<compile_context>
chip_gen: v6e
topology: v6e:2x2x1
jax: 0.10.0
libtpu: 0.0.40
codegen_flags: <defaults>
</compile_context>

<pallas_src>
import functools

import jax
import jax.numpy as jnp
from jax.experimental import pallas as pl
from jax.experimental.pallas import tpu as pltpu


SUBLANE = 8  # f32 sublane count


def _round_up(x, m):
    return ((x + m - 1) // m) * m


# ----------------------------- Pallas kernel ------------------------------ #

def _siren_fused_kernel(*refs, omega, num_layers):
    # refs = (x_ref, w0, b0, w1, b1, ..., w_{L-1}, b_{L-1}, o_ref)
    #   x_ref : (tile_m, in_dim)  VMEM row tile (unpadded feature dim)
    #   w_l   : (d_l, d_{l+1})    VMEM, full array (resident)
    #   b_l   : (1, d_{l+1})      VMEM
    #   o_ref : (tile_m, out_dim) VMEM output tile (narrow, masked store)
    x_ref = refs[0]
    o_ref = refs[-1]
    params = refs[1:-1]

    h = x_ref[...].astype(jnp.float32)
    for li in range(num_layers):
        w = params[2 * li][...]
        b = params[2 * li + 1][...]
        h = jnp.dot(h, w, preferred_element_type=jnp.float32) + b
        if li < num_layers - 1:          # SIREN layers: sine; final layer: none
            h = jnp.sin(omega * h)
    o_ref[...] = h.astype(o_ref.dtype)


# ------------------------------ forward pass ------------------------------- #

def siren_forward(x, siren_params, final_params, *, omega, tile_m=None):
    """Fused SIREN forward: one pallas_call, row-tiled, params resident in VMEM."""
    M, in_dim = x.shape

    # Flatten params to [w0, b0, w1, b1, ...] with biases as (1, dout).
    all_params = []
    for (w, b) in list(siren_params) + [final_params]:
        all_params.append(w.astype(jnp.float32))
        all_params.append(b.reshape(1, -1).astype(jnp.float32))
    num_layers = len(all_params) // 2
    out_dim = all_params[-2].shape[1]

    # Large tiles amortize per-step overhead; keep an even number of >=2 grid
    # steps so v7x's dual TensorCores split the work evenly.
    if tile_m is None:
        num_steps = max(2, 2 * pl.cdiv(M, 2 * 4096))
        tile_m = max(SUBLANE, _round_up(pl.cdiv(M, num_steps), SUBLANE))
    grid_m = pl.cdiv(M, tile_m)
    M_pad = grid_m * tile_m

    x32 = x.astype(jnp.float32)
    if M_pad != M:
        # Row padding only (feature dim stays unpadded); padded rows are
        # computed and then sliced off.
        x32 = jnp.pad(x32, ((0, M_pad - M), (0, 0)))

    kernel = functools.partial(_siren_fused_kernel, omega=omega,
                               num_layers=num_layers)

    in_specs = [pl.BlockSpec((tile_m, in_dim), lambda i: (i, 0))]  # x row tile
    for li in range(num_layers):
        w = all_params[2 * li]
        b = all_params[2 * li + 1]
        in_specs.append(pl.BlockSpec(w.shape, lambda i: (0, 0)))   # W_l (full)
        in_specs.append(pl.BlockSpec(b.shape, lambda i: (0, 0)))   # b_l (full)

    out_p = pl.pallas_call(
        kernel,
        out_shape=jax.ShapeDtypeStruct((M_pad, out_dim), jnp.float32),
        grid_spec=pltpu.PrefetchScalarGridSpec(
            num_scalar_prefetch=0,
            grid=(grid_m,),
            in_specs=in_specs,
            out_specs=pl.BlockSpec((tile_m, out_dim), lambda i: (i, 0)),
        ),
        compiler_params=pltpu.CompilerParams(
            dimension_semantics=("parallel",),
        ),
    )(x32, *all_params)

    return out_p if M_pad == M else out_p[:M]


def siren_forward_ref(x, siren_params, final_params, *, omega):
    h = x
    for (w, b) in siren_params:
        h = jnp.sin(omega * (h @ w + b))
    wf, bf = final_params
    return h @ wf + bf


# ------------------------- parameter initialization ------------------------ #

def init_siren_params(key, input_dim, output_dim, hidden_layers,
                      neurons_per_layer, omega):
    """Deterministic init mirroring the PyTorch module's init scheme.

    SIREN layers: uniform(-bound, bound) with bound = 1/in (first layer)
    or sqrt(6/in)/omega (hidden layers), for both weight and bias.
    Final nn.Linear: PyTorch default uniform(-1/sqrt(in), 1/sqrt(in)).
    Weights are stored as (in_features, out_features).
    """
    params = []
    dims_in = [input_dim] + [neurons_per_layer] * hidden_layers
    dims_out = [neurons_per_layer] * (hidden_layers + 1)
    for li, (din, dout) in enumerate(zip(dims_in, dims_out)):
        key, kw, kb = jax.random.split(key, 3)
        if li == 0:
            bound = 1.0 / din
        else:
            bound = float(jnp.sqrt(6.0 / din)) / omega
        w = jax.random.uniform(kw, (din, dout), jnp.float32, -bound, bound)
        b = jax.random.uniform(kb, (dout,), jnp.float32, -bound, bound)
        params.append((w, b))
    # final linear layer (PyTorch default init)
    key, kw, kb = jax.random.split(key, 3)
    bound = 1.0 / float(jnp.sqrt(float(neurons_per_layer)))
    wf = jax.random.uniform(kw, (neurons_per_layer, output_dim),
                            jnp.float32, -bound, bound)
    bf = jax.random.uniform(kb, (output_dim,), jnp.float32, -bound, bound)
    return params, (wf, bf)


# ---------------------------------- main ----------------------------------- #

if __name__ == "__main__":
    # Small, module-consistent shapes.
    batch = 256            # number of input points (coordinates)
    input_dim = 4
    output_dim = 3
    hidden_layers = 2
    neurons_per_layer = 32
    omega = 30.0

    key = jax.random.PRNGKey(0)
    key, kx = jax.random.split(key)
    x = jax.random.uniform(kx, (batch, input_dim), jnp.float32, -1.0, 1.0)

    siren_params, final_params = init_siren_params(
        key, input_dim, output_dim, hidden_layers, neurons_per_layer, omega)

    # jit the wrapper so any input prep fuses and dispatch overhead is paid once.
    fwd = jax.jit(functools.partial(siren_forward, omega=omega))

    out = fwd(x, siren_params, final_params)
    out = jax.block_until_ready(out)

    # Correctness check against a pure-JAX reference.
    ref = siren_forward_ref(x, siren_params, final_params, omega=omega)
    assert out.shape == (batch, output_dim)
    assert jnp.allclose(out, ref, atol=1e-4, rtol=1e-4), "mismatch vs reference"

    print("KERNEL_OK")
</pallas_src>

<mosaic_0001>
module attributes {stable_mosaic.version = 11 : i64} {
  func.func @_siren_fused_kernel(%arg0: i32, %arg1: memref<128x4xf32, #tpu.memory_space<vmem>>, %arg2: memref<4x32xf32, #tpu.memory_space<vmem>>, %arg3: memref<1x32xf32, #tpu.memory_space<vmem>>, %arg4: memref<32x32xf32, #tpu.memory_space<vmem>>, %arg5: memref<1x32xf32, #tpu.memory_space<vmem>>, %arg6: memref<32x32xf32, #tpu.memory_space<vmem>>, %arg7: memref<1x32xf32, #tpu.memory_space<vmem>>, %arg8: memref<32x3xf32, #tpu.memory_space<vmem>>, %arg9: memref<1x3xf32, #tpu.memory_space<vmem>>, %arg10: memref<128x3xf32, #tpu.memory_space<vmem>>) attributes {dimension_semantics = [#tpu.dimension_semantics<parallel>], iteration_bounds = array<i64: 2>, scalar_prefetch = 0 : i64, scratch_operands = 0 : i64, tpu.core_type = #tpu.core_type<tc>, window_params = [{transform_indices = @transform_0, window_bounds = array<i64: 128, 4>}, {pipeline_mode = #tpu.pipeline_mode<synchronous>, transform_indices = @transform_1, window_bounds = array<i64: 4, 32>}, {pipeline_mode = #tpu.pipeline_mode<synchronous>, transform_indices = @transform_2, window_bounds = array<i64: 1, 32>}, {pipeline_mode = #tpu.pipeline_mode<synchronous>, transform_indices = @transform_3, window_bounds = array<i64: 32, 32>}, {pipeline_mode = #tpu.pipeline_mode<synchronous>, transform_indices = @transform_4, window_bounds = array<i64: 1, 32>}, {pipeline_mode = #tpu.pipeline_mode<synchronous>, transform_indices = @transform_5, window_bounds = array<i64: 32, 32>}, {pipeline_mode = #tpu.pipeline_mode<synchronous>, transform_indices = @transform_6, window_bounds = array<i64: 1, 32>}, {pipeline_mode = #tpu.pipeline_mode<synchronous>, transform_indices = @transform_7, window_bounds = array<i64: 32, 3>}, {pipeline_mode = #tpu.pipeline_mode<synchronous>, transform_indices = @transform_8, window_bounds = array<i64: 1, 3>}, {transform_indices = @transform_9, window_bounds = array<i64: 128, 3>}]} {
    %c0 = arith.constant 0 : index
    %c0_0 = arith.constant 0 : index
    %0 = vector.load %arg1[%c0, %c0_0] : memref<128x4xf32, #tpu.memory_space<vmem>>, vector<128x4xf32>
    %c0_1 = arith.constant 0 : index
    %c0_2 = arith.constant 0 : index
    %1 = vector.load %arg2[%c0_1, %c0_2] : memref<4x32xf32, #tpu.memory_space<vmem>>, vector<4x32xf32>
    %c0_3 = arith.constant 0 : index
    %c0_4 = arith.constant 0 : index
    %2 = vector.load %arg3[%c0_3, %c0_4] : memref<1x32xf32, #tpu.memory_space<vmem>>, vector<1x32xf32>
    %cst = arith.constant dense<0.000000e+00> : vector<128x32xf32>
    %3 = tpu.matmul %0, %1, %cst {dimension_numbers = #tpu.dot_dimension_numbers<[1], [0], [0], [1], [0, 0, 1, 1], [], []>} : vector<128x4xf32>, vector<4x32xf32>, vector<128x32xf32> -> vector<128x32xf32>
    %4 = vector.broadcast %2 : vector<1x32xf32> to vector<128x32xf32>
    %5 = arith.addf %3, %4 : vector<128x32xf32>
    %cst_5 = arith.constant 3.000000e+01 : f32
    %6 = vector.broadcast %cst_5 : f32 to vector<128x32xf32>
    %7 = arith.mulf %6, %5 : vector<128x32xf32>
    %8 = math.sin %7 : vector<128x32xf32>
    %c0_6 = arith.constant 0 : index
    %c0_7 = arith.constant 0 : index
    %9 = vector.load %arg4[%c0_6, %c0_7] : memref<32x32xf32, #tpu.memory_space<vmem>>, vector<32x32xf32>
    %c0_8 = arith.constant 0 : index
    %c0_9 = arith.constant 0 : index
    %10 = vector.load %arg5[%c0_8, %c0_9] : memref<1x32xf32, #tpu.memory_space<vmem>>, vector<1x32xf32>
    %cst_10 = arith.constant dense<0.000000e+00> : vector<128x32xf32>
    %11 = tpu.matmul %8, %9, %cst_10 {dimension_numbers = #tpu.dot_dimension_numbers<[1], [0], [0], [1], [0, 0, 1, 1], [], []>} : vector<128x32xf32>, vector<32x32xf32>, vector<128x32xf32> -> vector<128x32xf32>
    %12 = vector.broadcast %10 : vector<1x32xf32> to vector<128x32xf32>
    %13 = arith.addf %11, %12 : vector<128x32xf32>
    %cst_11 = arith.constant 3.000000e+01 : f32
    %14 = vector.broadcast %cst_11 : f32 to vector<128x32xf32>
    %15 = arith.mulf %14, %13 : vector<128x32xf32>
    %16 = math.sin %15 : vector<128x32xf32>
    %c0_12 = arith.constant 0 : index
    %c0_13 = arith.constant 0 : index
    %17 = vector.load %arg6[%c0_12, %c0_13] : memref<32x32xf32, #tpu.memory_space<vmem>>, vector<32x32xf32>
    %c0_14 = arith.constant 0 : index
    %c0_15 = arith.constant 0 : index
    %18 = vector.load %arg7[%c0_14, %c0_15] : memref<1x32xf32, #tpu.memory_space<vmem>>, vector<1x32xf32>
    %cst_16 = arith.constant dense<0.000000e+00> : vector<128x32xf32>
    %19 = tpu.matmul %16, %17, %cst_16 {dimension_numbers = #tpu.dot_dimension_numbers<[1], [0], [0], [1], [0, 0, 1, 1], [], []>} : vector<128x32xf32>, vector<32x32xf32>, vector<128x32xf32> -> vector<128x32xf32>
    %20 = vector.broadcast %18 : vector<1x32xf32> to vector<128x32xf32>
    %21 = arith.addf %19, %20 : vector<128x32xf32>
    %cst_17 = arith.constant 3.000000e+01 : f32
    %22 = vector.broadcast %cst_17 : f32 to vector<128x32xf32>
    %23 = arith.mulf %22, %21 : vector<128x32xf32>
    %24 = math.sin %23 : vector<128x32xf32>
    %c0_18 = arith.constant 0 : index
    %c0_19 = arith.constant 0 : index
    %25 = vector.load %arg8[%c0_18, %c0_19] : memref<32x3xf32, #tpu.memory_space<vmem>>, vector<32x3xf32>
    %c0_20 = arith.constant 0 : index
    %c0_21 = arith.constant 0 : index
    %26 = vector.load %arg9[%c0_20, %c0_21] : memref<1x3xf32, #tpu.memory_space<vmem>>, vector<1x3xf32>
    %cst_22 = arith.constant dense<0.000000e+00> : vector<128x3xf32>
    %27 = tpu.matmul %24, %25, %cst_22 {dimension_numbers = #tpu.dot_dimension_numbers<[1], [0], [0], [1], [0, 0, 1, 1], [], []>} : vector<128x32xf32>, vector<32x3xf32>, vector<128x3xf32> -> vector<128x3xf32>
    %28 = vector.broadcast %26 : vector<1x3xf32> to vector<128x3xf32>
    %29 = arith.addf %27, %28 : vector<128x3xf32>
    %c0_23 = arith.constant 0 : index
    %c0_24 = arith.constant 0 : index
    %30 = vector.load %arg10[%c0_23, %c0_24] : memref<128x3xf32, #tpu.memory_space<vmem>>, vector<128x3xf32>
    tpu.vector_store %arg10[%c0_23, %c0_24], %29 {strides = array<i32>} : memref<128x3xf32, #tpu.memory_space<vmem>>, vector<128x3xf32>,
    return
  }
  func.func @transform_0(%arg0: i32) -> (i32, i32) {
    %c0_i32 = arith.constant 0 : i32
    %c0_i32_0 = arith.constant 0 : i32
    return %arg0, %c0_i32 : i32, i32
  }
  func.func @transform_1(%arg0: i32) -> (i32, i32) {
    %c0_i32 = arith.constant 0 : i32
    %c0_i32_0 = arith.constant 0 : i32
    %c0_i32_1 = arith.constant 0 : i32
    return %c0_i32, %c0_i32_0 : i32, i32
  }
  func.func @transform_2(%arg0: i32) -> (i32, i32) {
    %c0_i32 = arith.constant 0 : i32
    %c0_i32_0 = arith.constant 0 : i32
    %c0_i32_1 = arith.constant 0 : i32
    return %c0_i32, %c0_i32_0 : i32, i32
  }
  func.func @transform_3(%arg0: i32) -> (i32, i32) {
    %c0_i32 = arith.constant 0 : i32
    %c0_i32_0 = arith.constant 0 : i32
    %c0_i32_1 = arith.constant 0 : i32
    return %c0_i32, %c0_i32_0 : i32, i32
  }
  func.func @transform_4(%arg0: i32) -> (i32, i32) {
    %c0_i32 = arith.constant 0 : i32
    %c0_i32_0 = arith.constant 0 : i32
    %c0_i32_1 = arith.constant 0 : i32
    return %c0_i32, %c0_i32_0 : i32, i32
  }
  func.func @transform_5(%arg0: i32) -> (i32, i32) {
    %c0_i32 = arith.constant 0 : i32
    %c0_i32_0 = arith.constant 0 : i32
    %c0_i32_1 = arith.constant 0 : i32
    return %c0_i32, %c0_i32_0 : i32, i32
  }
  func.func @transform_6(%arg0: i32) -> (i32, i32) {
    %c0_i32 = arith.constant 0 : i32
    %c0_i32_0 = arith.constant 0 : i32
    %c0_i32_1 = arith.constant 0 : i32
    return %c0_i32, %c0_i32_0 : i32, i32
  }
  func.func @transform_7(%arg0: i32) -> (i32, i32) {
    %c0_i32 = arith.constant 0 : i32
    %c0_i32_0 = arith.constant 0 : i32
    %c0_i32_1 = arith.constant 0 : i32
    return %c0_i32, %c0_i32_0 : i32, i32
  }
  func.func @transform_8(%arg0: i32) -> (i32, i32) {
    %c0_i32 = arith.constant 0 : i32
    %c0_i32_0 = arith.constant 0 : i32
    %c0_i32_1 = arith.constant 0 : i32
    return %c0_i32, %c0_i32_0 : i32, i32
  }
  func.func @transform_9(%arg0: i32) -> (i32, i32) {
    %c0_i32 = arith.constant 0 : i32
    %c0_i32_0 = arith.constant 0 : i32
    return %arg0, %c0_i32 : i32, i32
  }
}

</mosaic_0001>

<bundles_post_ra>
// kernel: siren_forward.1
= control target key start
LH: loop header
LB: loop body
LE: loop exit
PB: predicated region body
PF: predicated region fallthrough
CT: control target
= control target key end

     0   :  { %s7220_s30 = smov 0   ;;  %s11814_s0 = inlined_call_operand.vmem [shape: f32[256,4], index: 0, kind: input, shape index: {}]   ;;  %s11815_s1 = inlined_call_operand.vmem [shape: f32[4,32], index: 1, kind: input, shape index: {}]   ;;  %s11816_s2 = inlined_call_operand.vmem [shape: f32[1,32], index: 2, kind: input, shape index: {}]   ;;  %s11817_s3 = inlined_call_operand.vmem [shape: f32[32,32], index: 3, kind: input, shape index: {}]   ;;  %s11818_s4 = inlined_call_operand.vmem [shape: f32[1,32], index: 4, kind: input, shape index: {}]   ;;  %s11819_s5 = inlined_call_operand.vmem [shape: f32[32,32], index: 5, kind: input, shape index: {}]   ;;  %s11820_s6 = inlined_call_operand.vmem [shape: f32[1,32], index: 6, kind: input, shape index: {}]   ;;  %s11821_s7 = inlined_call_operand.vmem [shape: f32[32,3], index: 7, kind: input, shape index: {}]   ;;  %s11822_s8 = inlined_call_operand.vmem [shape: f32[1,3], index: 8, kind: input, shape index: {}]   ;;  %s11823_s9 = inlined_call_operand.vmem [shape: f32[256,3], index: 9, kind: output, shape index: {}]  }
   0x1 LB: > { %s6284_s10 = sadd.s32 4294967295, %s7162_s30   ;;  %p6288_p0 = scmp.ge.s32.totalorder %s7162_s30, 1  ;;  %s7162_s30 = sphi %s7220_s30, %s19_s30  }
   0x2   : > { %p288_p1 = scmp.lt.s32.totalorder %s7162_s30, 3 }
   0x4   : > { %p289_p2 = pnand %p6288_p0, %p288_p1 }
   0x6   : > { %292 = sbr.rel (%p289_p2) target bundleno = 1940 (0x794), region = 56 }
   0xb   : > { %v352_v0 = vld [vmem:[%s11815_s1] sm:$0xf]  ;;  %vm409_vm0 = vcmask 1043456   ;;  %s6289_s13 = sshll.u32 %s6284_s10, 4  ;;  %vm360_vm1 = vcmask 31744  }
   0xc   : > { %6633 = vmatprep.subr.msk.mxu0 %vm409_vm0, %v352_v0  ;;  %p325_p3 = scmp.lt.s32.totalorder %s6289_s13, 31  ;;  %v7276_v17 = vld [vmem:[%s11816_s2] ss:$0 sm:$0xff]  ;;  %v11839_v51 = vmov 683565275  }
   0xd   : > { %6634 = vmatpush3.msk.msra.mxu0 %vm409_vm0, %v352_v0  ;;  %v11836_v53 = vmov 2475754826   ;;  %v11834_v57 = vmov 2131351028   ;;  %v11829_v60 = vmov 2102212464  }
   0xe   : > { %s12390_s13 = smov (!%p325_p3, %s6289_s13), 31  ;;  %v11847_v63 = vmov 920167782  }
   0xf   : > { %s6290_s14 = sshll.u32 %s12390_s13, 3 }
  0x10   : > { %s7239_s17 = scalar_lea.vmem %s11814_s0, %s6290_s14  ;;  %s11777_s22 = scalar_lea.vmem %s11823_s9, %s6290_s14 }
  0x11   : > { %v336_v1 = vld [vmem:[%s7239_s17] sm:$0xff]  ;;  %v337_v2 = vld [vmem:[%s7239_s17 + $0x8] sm:$0xff]  ;;  %v338_v3 = vld [vmem:[%s7239_s17 + $0x10] sm:$0xff] }
  0x12   : > { %6635 = vmatprep.mubr.msk.f32.mxu0 %vm360_vm1, %v336_v1  ;;  %v339_v4 = vld [vmem:[%s7239_s17 + $0x18] sm:$0xff]  ;;  %v340_v5 = vld [vmem:[%s7239_s17 + $0x20] sm:$0xff]  ;;  %v341_v6 = vld [vmem:[%s7239_s17 + $0x28] sm:$0xff] }
  0x13   : > { %6636 = vmatmul.mubr.msk.f32.vlgmr.msra.gmra.mxu0 %vm360_vm1, %v337_v2  ;;  %v342_v7 = vld [vmem:[%s7239_s17 + $0x30] sm:$0xff]  ;;  %v343_v8 = vld [vmem:[%s7239_s17 + $0x38] sm:$0xff]  ;;  %v344_v9 = vld [vmem:[%s7239_s17 + $0x40] sm:$0xff]  ;;  %v11831_v2 = vmov 1326507024  }
  0x14   : > { %6638 = vmatprep.mubr.msk.f32.mxu0 %vm360_vm1, %v338_v3  ;;  %v345_v10 = vld [vmem:[%s7239_s17 + $0x48] sm:$0xff]  ;;  %v346_v11 = vld [vmem:[%s7239_s17 + $0x50] sm:$0xff]  ;;  %v347_v12 = vld [vmem:[%s7239_s17 + $0x58] sm:$0xff] }
  0x15   : > { %v348_v13 = vld [vmem:[%s7239_s17 + $0x60] sm:$0xff]  ;;  %v349_v14 = vld [vmem:[%s7239_s17 + $0x68] sm:$0xff]  ;;  %v350_v15 = vld [vmem:[%s7239_s17 + $0x70] sm:$0xff] }
  0x16   : > { %v351_v16 = vld [vmem:[%s7239_s17 + $0x78] sm:$0xff] }
  0x17   : > { %6639 = vmatmul.mubr.msk.f32.gmra.mxu0 %vm360_vm1, %v339_v4 }
  0x18   : > { %6641 = vmatprep.mubr.msk.f32.mxu0 %vm360_vm1, %v340_v5 }
  0x1b   : > { %6642 = vmatmul.mubr.msk.f32.gmra.mxu0 %vm360_vm1, %v341_v6 }
  0x1c   : > { %6644 = vmatprep.mubr.msk.f32.mxu0 %vm360_vm1, %v342_v7 }
  0x1f   : > { %6645 = vmatmul.mubr.msk.f32.gmra.mxu0 %vm360_vm1, %v343_v8 }
  0x20   : > { %6647 = vmatprep.mubr.msk.f32.mxu0 %vm360_vm1, %v344_v9 }
  0x23   : > { %6648 = vmatmul.mubr.msk.f32.gmra.mxu0 %vm360_vm1, %v345_v10 }
  0x24   : > { %6650 = vmatprep.mubr.msk.f32.mxu0 %vm360_vm1, %v346_v11 }
  0x27   : > { %6651 = vmatmul.mubr.msk.f32.gmra.mxu0 %vm360_vm1, %v347_v12 }
  0x28   : > { %6653 = vmatprep.mubr.msk.f32.mxu0 %vm360_vm1, %v348_v13 }
  0x2b   : > { %6654 = vmatmul.mubr.msk.f32.gmra.mxu0 %vm360_vm1, %v349_v14 }
  0x2c   : > { %6656 = vmatprep.mubr.msk.f32.mxu0 %vm360_vm1, %v350_v15 }
  0x2f   : > { %6657 = vmatmul.mubr.msk.f32.gmra.mxu0 %vm360_vm1, %v351_v16 }
  0xd3   : > { %v6637_v18 = vpop.f32.mrf.mxu0 }
  0xd4   : > { %v485_v19 = vadd.f32 %v6637_v18, %v7276_v17 }
  0xd5   : > { %v479_v20 = vpop.f32.mrf.mxu0 }
  0xd6   : > { %v7279_v21 = vmul.f32 30.0, %v485_v19  ;;  %v480_v22 = vadd.f32 %v7276_v17, %v479_v20 }
  0xd7   : > { %v6640_v23 = vpop.f32.mrf.mxu0 }
  0xd8   : > { %11991 = vst [vmem:[#allocation2_spill] sm:$0xff] %v7279_v21  ;;  %v11828_v24 = vand.u32 2147483647, %v7279_v21  ;;  %v681_v25 = vand.u32 2139095040, %v7279_v21  ;;  %v495_v26 = vadd.f32 %v6640_v23, %v7276_v17  ;;  %v7286_v30 = vmul.f32 30.0, %v480_v22 }
  0xd9   : > { %v489_v27 = vpop.f32.mrf.mxu0 }
  0xda   : > { %v682_v28 = vshrl.u32 %v681_v25, 23  ;;  %v490_v29 = vadd.f32 %v7276_v17, %v489_v27  ;;  %v7288_v31 = vmul.f32 30.0, %v495_v26  ;;  %v685_v33 = vand.u32 8388607, %v11828_v24 }
  0xdb   : > { %v577_v37 = vand.u32 2139095040, %v7286_v30 }
  0xdc   : > { %11992 = vst [vmem:[#allocation3_spill] sm:$0xff] %v7288_v31  ;;  %v6315_v32 = vadd.s32 4294967169, %v682_v28  ;;  %v7292_v34 = vmul.f32 30.0, %v490_v29  ;;  %v889_v35 = vand.u32 2139095040, %v7288_v31  ;;  %v686_v39 = vor.u32 8388608, %v685_v33 }
  0xdd   : > { %v11826_v40 = vand.u32 2147483647, %v7288_v31  ;;  %v578_v45 = vshrl.u32 %v577_v37, 23 }
  0xde   : > { %11993 = vst [vmem:[#allocation4_spill] sm:$0xff] %v7292_v34  ;;  %v688_v36 = vadd.s32 1, %v6315_v32  ;;  %v890_v38 = vshrl.u32 %v889_v35, 23  ;;  %v785_v41 = vand.u32 2139095040, %v7292_v34  ;;  %v7298_v47 = vshll.u32 %v686_v39, 8  ;;  %v6643_v32 = vpop.f32.mrf.mxu0 }
  0xdf   : > { %v893_v48 = vand.u32 8388607, %v11826_v40  ;;  %v6311_v37 = vadd.s32 4294967169, %v578_v45 }
  0xe0   : > { %vm689_vm2 = vcmp.gt.s32.totalorder %v688_v36, 0  ;;  %v6323_v43 = vadd.s32 4294967169, %v890_v38  ;;  %v786_v49 = vshrl.u32 %v785_v41, 23  ;;  %v505_v41 = vadd.f32 %v6643_v32, %v7276_v17 }
  0xe1   : > { %v690_v42 = vsel %vm689_vm2, %v688_v36, 0  ;;  %v894_v25 = vor.u32 8388608, %v893_v48 }
  0xe2   : > { %v692_v44 = vand.u32 31, %v690_v42  ;;  %v691_v50 = vshrl.u32 %v690_v42, 5  ;;  %v896_v55 = vadd.s32 1, %v6323_v43  ;;  %v6319_v7 = vadd.s32 4294967169, %v786_v49 }
  0xe3   : > { %v7322_v39 = vshll.u32 %v894_v25, 8 }
  0xe4   : > { %v693_v46 = vsub.s32 32, %v692_v44  ;;  %v695_v52 = vshll.u32 %v11839_v51, %v692_v44  ;;  %v698_v54 = vshll.u32 %v11836_v53, %v692_v44  ;;  %v701_v59 = vshll.u32 %v11834_v57, %v692_v44 }
  0xe5   : > { %v704_v62 = vshll.u32 %v11829_v60, %v692_v44  ;;  %v707_v1 = vshll.u32 %v11847_v63, %v692_v44  ;;  %vm710_vm3 = vcmp.lt.s32.totalorder %v691_v50, 1  ;;  %vm713_vm4 = vcmp.lt.s32.totalorder %v691_v50, 4 }
  0xe6   : > { %v696_v56 = vshrl.u32 %v11836_v53, %v693_v46  ;;  %v699_v58 = vshrl.u32 %v11834_v57, %v693_v46  ;;  %v702_v61 = vshrl.u32 %v11829_v60, %v693_v46  ;;  %v705_v0 = vshrl.u32 %v11847_v63, %v693_v46 }
  0xe7   : > { %v708_v3 = vshrl.u32 %v11831_v2, %v693_v46  ;;  %v694_v10 = vshrl.u32 %v11839_v51, %v693_v46  ;;  %vm711_vm5 = vcmp.lt.s32.totalorder %v691_v50, 2  ;;  %vm712_vm6 = vcmp.lt.s32.totalorder %v691_v50, 3 }
  0xe8   : > { %v697_v4 = vor.u32 %v696_v56, %v695_v52  ;;  %v700_v5 = vor.u32 %v699_v58, %v698_v54  ;;  %v703_v6 = vor.u32 %v702_v61, %v701_v59  ;;  %v706_v8 = vor.u32 %v705_v0, %v704_v62 }
  0xe9   : > { %v709_v9 = vor.u32 %v708_v3, %v707_v1  ;;  %vm897_vm7 = vcmp.gt.s32.totalorder %v896_v55, 0  ;;  %v792_v36 = vadd.s32 1, %v6319_v7 }
  0xea   : > { %v715_v11 = vsel %vm713_vm4, %v703_v6, 2102212464  ;;  %v718_v12 = vsel %vm710_vm3, %v697_v4, %v700_v5  ;;  %v722_v13 = vsel %vm710_vm3, %v700_v5, %v703_v6  ;;  %v719_v14 = vsel %vm713_vm4, %v706_v8, 920167782 }
  0xeb   : > { %v723_v15 = vsel %vm713_vm4, %v709_v9, 1326507024  ;;  %v714_v16 = vsel %vm710_vm3, %v694_v10, %v697_v4  ;;  %v716_v18 = vsel %vm712_vm6, %v700_v5, %v715_v11  ;;  %v720_v19 = vsel %vm712_vm6, %v703_v6, %v719_v14 }
  0xec   : > { %v724_v20 = vsel %vm712_vm6, %v706_v8, %v723_v15  ;;  %v721_v22 = vsel %vm711_vm5, %v718_v12, %v720_v19  ;;  %v717_v33 = vsel %vm711_vm5, %v714_v16, %v716_v18  ;;  %v898_v35 = vsel %vm897_vm7, %v896_v55, 0 }
  0xed   : > { %v725_v23 = vsel %vm711_vm5, %v722_v13, %v724_v20  ;;  %v7318_v28 = vmul.u32.u64.low %v7298_v47, %v721_v22  ;;  %v7319_v29 = vmul.u32.u64.high %v7298_v47, %v721_v22, %v7318_v28  ;;  %v900_v38 = vand.u32 31, %v898_v35 }
  0xee   : > { %v7314_v26 = vmul.u32.u64.low %v7298_v47, %v725_v23  ;;  %v7315_v27 = vmul.u32.u64.high %v7298_v47, %v725_v23, %v7314_v26  ;;  %v733_v42 = vmul.u32 %v7298_v47, %v717_v33  ;;  %v899_v44 = vshrl.u32 %v898_v35, 5 }
  0xef   : > { %v736_v43 = vadd.s32 1, %v7319_v29  ;;  %v901_v46 = vsub.s32 32, %v900_v38  ;;  %v903_v48 = vshll.u32 %v11839_v51, %v900_v38  ;;  %v906_v49 = vshll.u32 %v11836_v53, %v900_v38 }
  0xf0   : > { %vm735_vm8 = vc.u32 %v7315_v27, %v7318_v28  ;;  %vm793_vm9 = vcmp.gt.s32.totalorder %v792_v36, 0  ;;  %v909_v50 = vshll.u32 %v11834_v57, %v900_v38  ;;  %v912_v52 = vshll.u32 %v11829_v60, %v900_v38 }
  0xf1   : > { %v737_v45 = vsel %vm735_vm8, %v736_v43, %v7319_v29  ;;  %v915_v47 = vshll.u32 %v11847_v63, %v900_v38  ;;  %v902_v55 = vshrl.u32 %v11839_v51, %v901_v46  ;;  %v904_v56 = vshrl.u32 %v11836_v53, %v901_v46 }
  0xf2   : > { %v738_v54 = vadd.s32 %v737_v45, %v733_v42  ;;  %v907_v58 = vshrl.u32 %v11834_v57, %v901_v46  ;;  %v910_v59 = vshrl.u32 %v11829_v60, %v901_v46  ;;  %v913_v61 = vshrl.u32 %v11847_v63, %v901_v46 }
  0xf3   : > { %v916_v62 = vshrl.u32 %v11831_v2, %v901_v46  ;;  %vm918_vm10 = vcmp.lt.s32.totalorder %v899_v44, 1  ;;  %v905_v1 = vor.u32 %v904_v56, %v903_v48  ;;  %vm919_vm11 = vcmp.lt.s32.totalorder %v899_v44, 2 }
  0xf4   : > { %v739_v0 = vadd.s32 536870912, %v738_v54  ;;  %v908_v3 = vor.u32 %v907_v58, %v906_v49  ;;  %v911_v4 = vor.u32 %v910_v59, %v909_v50  ;;  %v914_v5 = vor.u32 %v913_v61, %v912_v52 }
  0xf5   : > { %v917_v6 = vor.u32 %v916_v62, %v915_v47  ;;  %vm920_vm12 = vcmp.lt.s32.totalorder %v899_v44, 3  ;;  %vm921_vm13 = vcmp.lt.s32.totalorder %v899_v44, 4  ;;  %v922_v8 = vsel %vm918_vm10, %v902_v55, %v905_v1 }
  0xf6   : > { %v7341_v7 = vshrl.u32 %v739_v0, 30  ;;  %v926_v9 = vsel %vm918_vm10, %v905_v1, %v908_v3  ;;  %v923_v10 = vsel %vm921_vm13, %v911_v4, 2102212464  ;;  %v927_v11 = vsel %vm921_vm13, %v914_v5, 920167782 }
  0xf7   : > { %v930_v12 = vsel %vm918_vm10, %v908_v3, %v911_v4  ;;  %v931_v13 = vsel %vm921_vm13, %v917_v6, 1326507024  ;;  %v924_v15 = vsel %vm920_vm12, %v908_v3, %v923_v10  ;;  %v928_v16 = vsel %vm920_vm12, %v911_v4, %v927_v11 }
  0xf8   : > { %11994 = vst [vmem:[#allocation5_spill] sm:$0xff] %v7341_v7  ;;  %v741_v14 = vshll.u32 %v7341_v7, 30  ;;  %v932_v18 = vsel %vm920_vm12, %v914_v5, %v931_v13  ;;  %v929_v19 = vsel %vm919_vm11, %v926_v9, %v928_v16  ;;  %v11827_v22 = vand.u32 2147483647, %v7292_v34 }
  0xf9   : > { %v933_v20 = vsel %vm919_vm11, %v930_v12, %v932_v18  ;;  %v794_v23 = vsel %vm793_vm9, %v792_v36, 0  ;;  %v925_v32 = vsel %vm919_vm11, %v922_v8, %v924_v15  ;;  %v584_v42 = vadd.s32 1, %v6311_v37 }
  0xfa   : > { %v7348_v25 = vsub.s32 %v738_v54, %v741_v14  ;;  %v7351_v26 = vmul.u32.u64.low %v7322_v39, %v933_v20  ;;  %v7352_v29 = vmul.u32.u64.high %v7322_v39, %v933_v20, %v7351_v26  ;;  %v796_v38 = vand.u32 31, %v794_v23 }
  0xfb   : > { %v7356_v33 = vmul.u32.u64.low %v7322_v39, %v929_v19  ;;  %v7357_v35 = vmul.u32.u64.high %v7322_v39, %v929_v19, %v7356_v33  ;;  %v789_v36 = vand.u32 8388607, %v11827_v22  ;;  %v7363_v48 = vmul.f32 30.0, %v505_v41 }
  0xfc   : > { %v744_v43 = vsub.s32 0, %v7348_v25  ;;  %v797_v46 = vsub.s32 32, %v796_v38  ;;  %v941_v49 = vmul.u32 %v7322_v39, %v925_v32  ;;  %v795_v44 = vshrl.u32 %v794_v23, 5 }
  0xfd   : > { %vm943_vm14 = vc.u32 %v7352_v29, %v7356_v33  ;;  %v799_v45 = vshll.u32 %v11839_v51, %v796_v38  ;;  %v944_v50 = vadd.s32 1, %v7357_v35  ;;  %v802_v52 = vshll.u32 %v11836_v53, %v796_v38 }
  0xfe   : > { %v800_v37 = vshrl.u32 %v11836_v53, %v797_v46  ;;  %v803_v47 = vshrl.u32 %v11834_v57, %v797_v46  ;;  %v805_v54 = vshll.u32 %v11834_v57, %v796_v38  ;;  %v806_v41 = vshrl.u32 %v11829_v60, %v797_v46 }
  0xff   : > { %v808_v39 = vshll.u32 %v11829_v60, %v796_v38  ;;  %v809_v55 = vshrl.u32 %v11847_v63, %v797_v46  ;;  %v6316_v56 = vmin.u32 %v744_v43, %v7348_v25  ;;  %v945_v58 = vsel %vm943_vm14, %v944_v50, %v7357_v35 }
 0x100   : > { %v811_v59 = vshll.u32 %v11847_v63, %v796_v38  ;;  %v812_v61 = vshrl.u32 %v11831_v2, %v797_v46  ;;  %v946_v62 = vadd.s32 %v945_v58, %v941_v49  ;;  %v801_v0 = vor.u32 %v800_v37, %v799_v45  ;;  %v499_v58 = vpop.f32.mrf.mxu0 }
 0x101   : > { %v804_v1 = vor.u32 %v803_v47, %v802_v52  ;;  %v810_v3 = vor.u32 %v809_v55, %v808_v39  ;;  %v807_v4 = vor.u32 %v806_v41, %v805_v54  ;;  %v790_v8 = vor.u32 8388608, %v789_v36 }
 0x102   : > { %v813_v5 = vor.u32 %v812_v61, %v811_v59  ;;  %v947_v6 = vadd.s32 536870912, %v946_v62  ;;  %vm817_vm15 = vcmp.lt.s32.totalorder %v795_v44, 4  ;;  %v746_v9 = vclz %v6316_v56 }
 0x103   : > { %vm814_vm0 = vcmp.lt.s32.totalorder %v795_v44, 1  ;;  %v823_v10 = vsel %vm817_vm15, %v810_v3, 920167782  ;;  %v1097_v11 = vand.u32 2139095040, %v7363_v48  ;;  %vm585_vm1 = vcmp.gt.s32.totalorder %v584_v42, 0 }
 0x104   : > { %v7382_v12 = vshrl.u32 %v947_v6, 30  ;;  %vm816_vm2 = vcmp.lt.s32.totalorder %v795_v44, 3  ;;  %v822_v13 = vsel %vm814_vm0, %v801_v0, %v804_v1  ;;  %v819_v14 = vsel %vm817_vm15, %v807_v4, 2102212464 }
 0x105   : > { %v824_v15 = vsel %vm816_vm2, %v807_v4, %v823_v10  ;;  %v826_v16 = vsel %vm814_vm0, %v804_v1, %v807_v4  ;;  %v827_v18 = vsel %vm817_vm15, %v813_v5, 1326507024  ;;  %v798_v20 = vshrl.u32 %v11839_v51, %v797_v46 }
 0x106   : > { %11995 = vst [vmem:[#allocation6_spill] sm:$0xff] %v7382_v12  ;;  %v949_v19 = vshll.u32 %v7382_v12, 30  ;;  %vm815_vm3 = vcmp.lt.s32.totalorder %v795_v44, 2  ;;  %v830_v23 = vshll.u32 %v790_v8, 8  ;;  %v6317_v26 = vadd.s32 4294967294, %v746_v9  ;;  %v6646_v8 = vpop.f32.mrf.mxu0 }
 0x107   : > { %v825_v32 = vsel %vm815_vm3, %v822_v13, %v824_v15  ;;  %v828_v35 = vsel %vm816_vm2, %v810_v3, %v827_v18  ;;  %v1098_v38 = vshrl.u32 %v1097_v11, 23  ;;  %v818_v36 = vsel %vm814_vm0, %v798_v20, %v801_v0 }
 0x108   : > { %v7390_v43 = vsub.s32 %v946_v62, %v949_v19  ;;  %v820_v49 = vsel %vm816_vm2, %v804_v1, %v819_v14  ;;  %v829_v45 = vsel %vm815_vm3, %v826_v16, %v828_v35  ;;  %v586_v54 = vsel %vm585_vm1, %v584_v42, 0 }
 0x109   : > { %v7394_v50 = vmul.u32.u64.low %v830_v23, %v829_v45  ;;  %v7395_v37 = vmul.u32.u64.high %v830_v23, %v829_v45, %v7394_v50  ;;  %v7397_v52 = vmul.u32.u64.low %v830_v23, %v825_v32  ;;  %v7398_v47 = vmul.u32.u64.high %v830_v23, %v825_v32, %v7397_v52 }
 0x10a   : > { %v6331_v46 = vadd.s32 4294967169, %v1098_v38  ;;  %v821_v41 = vsel %vm815_vm3, %v818_v36, %v820_v49  ;;  %v11824_v39 = vand.u32 2147483647, %v7363_v48  ;;  %v952_v55 = vsub.s32 0, %v7390_v43 }
 0x10b   : > { %vm6318_vm4 = vcmp.lt.s32.totalorder %v6317_v26, 0  ;;  %vm839_vm5 = vc.u32 %v7395_v37, %v7397_v52  ;;  %v840_v44 = vadd.s32 1, %v7398_v47  ;;  %v7407_v59 = vand.u32 31, %v586_v54 }
 0x10c   : > { %v1104_v56 = vadd.s32 1, %v6331_v46  ;;  %v837_v61 = vmul.u32 %v830_v23, %v821_v41  ;;  %v1101_v42 = vand.u32 8388607, %v11824_v39  ;;  %v7412_v1 = vsel %vm6318_vm4, 0, %v6317_v26 }
 0x10d   : > { %v841_v62 = vsel %vm839_vm5, %v840_v44, %v7398_v47  ;;  %v6324_v3 = vmin.u32 %v952_v55, %v7390_v43  ;;  %v500_v5 = vadd.f32 %v7276_v17, %v499_v58  ;;  %v7416_v9 = vshrl.u32 %v586_v54, 5 }
 0x10e   : > { %vm1105_vm6 = vcmp.gt.s32.totalorder %v1104_v56, 0  ;;  %v842_v4 = vadd.s32 %v841_v62, %v837_v61  ;;  %v7419_v10 = vsub.s32 32, %v7407_v59  ;;  %v734_v13 = vadd.s32 %v7318_v28, %v7315_v27 }
 0x10f   : > { %v1106_v0 = vsel %vm1105_vm6, %v1104_v56, 0  ;;  %v754_v14 = vsub.s32 4294967266, %v7412_v1  ;;  %v1102_v15 = vor.u32 8388608, %v1101_v42  ;;  %v954_v18 = vclz %v6324_v3 }
 0x110   : > { %v1108_v6 = vand.u32 31, %v1106_v0  ;;  %v843_v11 = vadd.s32 536870912, %v842_v4  ;;  %v7426_v20 = vmul.f32 30.0, %v500_v5  ;;  %v515_v23 = vadd.f32 %v6646_v8, %v7276_v17 }
 0x111   : > { %v1107_v28 = vshrl.u32 %v1106_v0, 5  ;;  %v750_v54 = vsub.s32 32, %v7412_v1  ;;  %v755_v41 = vadd.s32 127, %v754_v14  ;;  %v1142_v62 = vshll.u32 %v1102_v15, 8 }
 0x112   : > { %v1109_v16 = vsub.s32 32, %v1108_v6  ;;  %v7424_v19 = vshrl.u32 %v843_v11, 30  ;;  %v1111_v26 = vshll.u32 %v11839_v51, %v1108_v6  ;;  %v1114_v35 = vshll.u32 %v11836_v53, %v1108_v6 }
 0x113   : > { %v1117_v36 = vshll.u32 %v11834_v57, %v1108_v6  ;;  %v1120_v47 = vshll.u32 %v11829_v60, %v1108_v6  ;;  %v1123_v58 = vshll.u32 %v11847_v63, %v1108_v6  ;;  %v6325_v42 = vadd.s32 4294967294, %v954_v18 }
 0x114   : > { %11996 = vst [vmem:[#allocation7_spill] sm:$0xff] %v7424_v19  ;;  %v1112_v32 = vshrl.u32 %v11836_v53, %v1109_v16  ;;  %v1115_v38 = vshrl.u32 %v11834_v57, %v1109_v16  ;;  %v845_v27 = vshll.u32 %v7424_v19, 30  ;;  %v1118_v49 = vshrl.u32 %v11829_v60, %v1109_v16 }
 0x115   : > { %v1121_v46 = vshrl.u32 %v11847_v63, %v1109_v16  ;;  %v1124_v61 = vshrl.u32 %v11831_v2, %v1109_v16  ;;  %vm1126_vm7 = vcmp.lt.s32.totalorder %v1107_v28, 1  ;;  %v7444_v3 = vmul.f32 30.0, %v515_v23 }
 0x116   : > { %v1113_v45 = vor.u32 %v1112_v32, %v1111_v26  ;;  %v1116_v50 = vor.u32 %v1115_v38, %v1114_v35  ;;  %v7439_v55 = vsub.s32 %v842_v4, %v845_v27  ;;  %v1119_v56 = vor.u32 %v1118_v49, %v1117_v36 }
 0x117   : > { %v1122_v44 = vor.u32 %v1121_v46, %v1120_v47  ;;  %11997 = vst [vmem:[#allocation8_spill] sm:$0xff] %v7444_v3  ;;  %v1125_v5 = vor.u32 %v1124_v61, %v1123_v58  ;;  %vm1129_vm8 = vcmp.lt.s32.totalorder %v1107_v28, 4  ;;  %v993_v4 = vand.u32 2139095040, %v7426_v20 }
 0x118   : > { %v848_v0 = vsub.s32 0, %v7439_v55  ;;  %v1134_v8 = vsel %vm1126_vm7, %v1113_v45, %v1116_v50  ;;  %v1110_v11 = vshrl.u32 %v11839_v51, %v1109_v16  ;;  %vm1128_vm9 = vcmp.lt.s32.totalorder %v1107_v28, 3 }
 0x119   : > { %v1131_v14 = vsel %vm1129_vm8, %v1119_v56, 2102212464  ;;  %v1135_v6 = vsel %vm1129_vm8, %v1122_v44, 920167782  ;;  %vm1127_vm10 = vcmp.lt.s32.totalorder %v1107_v28, 2  ;;  %v1138_v15 = vsel %vm1126_vm7, %v1116_v50, %v1119_v56 }
 0x11a   : > { %v1136_v26 = vsel %vm1128_vm9, %v1119_v56, %v1135_v6  ;;  %v1139_v18 = vsel %vm1129_vm8, %v1125_v5, 1326507024  ;;  %vm6326_vm11 = vcmp.lt.s32.totalorder %v6325_v42, 0  ;;  %v6320_v23 = vmin.u32 %v848_v0, %v7439_v55 }
 0x11b   : > { %v1130_v32 = vsel %vm1126_vm7, %v1110_v11, %v1113_v45  ;;  %v1137_v35 = vsel %vm1127_vm10, %v1134_v8, %v1136_v26  ;;  %v1132_v38 = vsel %vm1128_vm9, %v1116_v50, %v1131_v14  ;;  %v1140_v27 = vsel %vm1128_vm9, %v1122_v44, %v1139_v18 }
 0x11c   : > { %v7453_v36 = vmul.u32.u64.low %v1142_v62, %v1137_v35  ;;  %v7454_v49 = vmul.u32.u64.high %v1142_v62, %v1137_v35, %v7453_v36  ;;  %v751_v16 = vshll.u32 %v7348_v25, %v7412_v1  ;;  %v752_v47 = vshrl.u32 %v734_v13, %v750_v54 }
 0x11d   : > { %v1141_v46 = vsel %vm1127_vm10, %v1138_v15, %v1140_v27  ;;  %v994_v56 = vshrl.u32 %v993_v4, 23  ;;  %v756_v58 = vshll.u32 %v755_v41, 23  ;;  %v11825_v45 = vand.u32 2147483647, %v7426_v20 }
 0x11e   : > { %v7460_v61 = vmul.u32.u64.low %v1142_v62, %v1141_v46  ;;  %v7461_v0 = vmul.u32.u64.high %v1142_v62, %v1141_v46, %v7460_v61  ;;  %v7464_v5 = vsel %vm6326_vm11, 0, %v6325_v42  ;;  %v850_v50 = vclz %v6320_v23  ;;  %v509_v23 = vpop.f32.mrf.mxu0 }
 0x11f   : > { %v1133_v44 = vsel %vm1127_vm10, %v1130_v32, %v1132_v38  ;;  %v6327_v8 = vadd.s32 4294967169, %v994_v56  ;;  %v600_v11 = vshll.u32 %v11829_v60, %v7407_v59  ;;  %v601_v25 = vshrl.u32 %v11847_v63, %v7419_v10 }
 0x120   : > { %v1152_v1 = vadd.s32 1, %v7454_v49  ;;  %v1305_v13 = vand.u32 2139095040, %v7444_v3  ;;  %v7473_v54 = vor.u32 %v752_v47, %v751_v16  ;;  %v7477_v41 = vshll.u32 %v11847_v63, %v7407_v59 }
 0x121   : > { %v7481_v28 = vshrl.u32 %v11831_v2, %v7419_v10  ;;  %v1000_v42 = vadd.s32 1, %v6327_v8  ;;  %v7483_v4 = vor.u32 4788187, %v756_v58  ;;  %v958_v14 = vsub.s32 32, %v7464_v5 }
 0x122   : > { %v1149_v6 = vmul.u32 %v1142_v62, %v1133_v44  ;;  %vm1151_vm12 = vc.u32 %v7461_v0, %v7453_v36  ;;  %v6321_v26 = vadd.s32 4294967294, %v850_v50  ;;  %v997_v18 = vand.u32 8388607, %v11825_v45 }
 0x123   : > { %v1153_v15 = vsel %vm1151_vm12, %v1152_v1, %v7454_v49  ;;  %vm1001_vm13 = vcmp.gt.s32.totalorder %v1000_v42, 0  ;;  %v7491_v32 = vor.u32 %v601_v25, %v600_v11  ;;  %v1306_v27 = vshrl.u32 %v1305_v13, 23 }
 0x124   : > { %v1154_v35 = vadd.s32 %v1153_v15, %v1149_v6  ;;  %v1002_v38 = vsel %vm1001_vm13, %v1000_v42, 0  ;;  %v760_v16 = vcvt.s32.f32 %v7473_v54  ;;  %v942_v47 = vadd.s32 %v7356_v33, %v7352_v29 }
 0x125   : > { %v1004_v46 = vand.u32 31, %v1002_v38  ;;  %v758_v49 = vand.u32 2147483647, %v7483_v4  ;;  %v962_v56 = vsub.s32 4294967266, %v7464_v5  ;;  %v7501_v61 = vadd.f32 %v7276_v17, %v509_v23 }
 0x126   : > { %v1155_v58 = vadd.s32 536870912, %v1154_v35  ;;  %v7503_v50 = vshrl.u32 %v942_v47, %v958_v14  ;;  %vm6322_vm14 = vcmp.lt.s32.totalorder %v6321_v26, 0  ;;  %v998_v44 = vor.u32 8388608, %v997_v18 }
 0x127   : > { %v1005_v8 = vsub.s32 32, %v1004_v46  ;;  %v1003_v25 = vshrl.u32 %v1002_v38, 5  ;;  %v1007_v1 = vshll.u32 %v11839_v51, %v1004_v46  ;;  %v6339_v29 = vadd.s32 4294967169, %v1306_v27 }
 0x128   : > { %v7505_v11 = vshrl.u32 %v1155_v58, 30  ;;  %v1010_v13 = vshll.u32 %v11836_v53, %v1004_v46  ;;  %v1013_v4 = vshll.u32 %v11834_v57, %v1004_v46  ;;  %v1016_v15 = vshll.u32 %v11829_v60, %v1004_v46 }
 0x129   : > { %v1008_v33 = vshrl.u32 %v11836_v53, %v1005_v8  ;;  %v1011_v42 = vshrl.u32 %v11834_v57, %v1005_v8  ;;  %v1014_v6 = vshrl.u32 %v11829_v60, %v1005_v8  ;;  %v1017_v18 = vshrl.u32 %v11847_v63, %v1005_v8 }
 0x12a   : > { %11998 = vst [vmem:[#allocation9_spill] sm:$0xff] %v7505_v11  ;;  %v1157_v14 = vshll.u32 %v7505_v11, 30  ;;  %v1019_v27 = vshll.u32 %v11847_v63, %v1004_v46  ;;  %v1020_v47 = vshrl.u32 %v11831_v2, %v1005_v8  ;;  %v7519_v58 = vsel %vm6322_vm14, 0, %v6321_v26 }
 0x12b   : > { %v1009_v23 = vor.u32 %v1008_v33, %v1007_v1  ;;  %v1012_v38 = vor.u32 %v1011_v42, %v1010_v13  ;;  %v1015_v45 = vor.u32 %v1014_v6, %v1013_v4  ;;  %v1018_v40 = vor.u32 %v1017_v18, %v1016_v15 }
 0x12c   : > { %v7521_v39 = vsub.s32 %v1154_v35, %v1157_v14  ;;  %v1021_v22 = vor.u32 %v1020_v47, %v1019_v27  ;;  %vm1022_vm15 = vcmp.lt.s32.totalorder %v1003_v25, 1  ;;  %v1038_v24 = vshll.u32 %v998_v44, 8  ;;  %v6649_v27 = vpop.f32.mrf.mxu0 }
 0x12d   : > { %v1312_v62 = vadd.s32 1, %v6339_v29  ;;  %v1006_v60 = vshrl.u32 %v11839_v51, %v1005_v8  ;;  %vm1024_vm0 = vcmp.lt.s32.totalorder %v1003_v25, 3  ;;  %vm1025_vm1 = vcmp.lt.s32.totalorder %v1003_v25, 4 }
 0x12e   : > { %v1030_v1 = vsel %vm1022_vm15, %v1009_v23, %v1012_v38  ;;  %v1160_v46 = vsub.s32 0, %v7521_v39  ;;  %v1027_v33 = vsel %vm1025_vm1, %v1015_v45, 2102212464  ;;  %v1031_v13 = vsel %vm1025_vm1, %v1018_v40, 920167782 }
 0x12f   : > { %v1034_v42 = vsel %vm1022_vm15, %v1012_v38, %v1015_v45  ;;  %vm1023_vm2 = vcmp.lt.s32.totalorder %v1003_v25, 2  ;;  %v1026_v26 = vsel %vm1022_vm15, %v1006_v60, %v1009_v23  ;;  %v1032_v35 = vsel %vm1024_vm0, %v1015_v45, %v1031_v13 }
 0x130   : > { %v1035_v14 = vsel %vm1025_vm1, %v1021_v22, 1326507024  ;;  %v1028_v4 = vsel %vm1024_vm0, %v1012_v38, %v1027_v33  ;;  %v1033_v6 = vsel %vm1023_vm2, %v1030_v1, %v1032_v35  ;;  %vm1313_vm3 = vcmp.gt.s32.totalorder %v1312_v62, 0 }
 0x131   : > { %v1036_v15 = vsel %vm1024_vm0, %v1018_v40, %v1035_v14  ;;  %v7527_v8 = vmul.u32.u64.low %v1038_v24, %v1033_v6  ;;  %v7528_v29 = vmul.u32.u64.high %v1038_v24, %v1033_v6, %v7527_v8  ;;  %v11833_v18 = vand.u32 2147483647, %v7444_v3 }
 0x132   : > { %v1037_v44 = vsel %vm1023_vm2, %v1034_v42, %v1036_v15  ;;  %v6332_v47 = vmin.u32 %v1160_v46, %v7521_v39  ;;  %v1314_v22 = vsel %vm1313_vm3, %v1312_v62, 0  ;;  %v963_v45 = vadd.s32 127, %v962_v56 }
 0x133   : > { %v7533_v2 = vmul.u32.u64.low %v1038_v24, %v1037_v44  ;;  %v7534_v60 = vmul.u32.u64.high %v1038_v24, %v1037_v44, %v7533_v2  ;;  %v858_v23 = vsub.s32 4294967266, %v7519_v58  ;;  %v1029_v40 = vsel %vm1023_vm2, %v1026_v26, %v1028_v4 }
 0x134   : > { %v1316_v38 = vand.u32 31, %v1314_v22  ;;  %v7540_v1 = vmul.f32 %v760_v16, %v758_v49  ;;  %v959_v33 = vshll.u32 %v7390_v43, %v7464_v5  ;;  %v838_v46 = vadd.s32 %v7397_v52, %v7395_v37 }
 0x135   : > { %v7547_v13 = vadd.f32 %v6649_v27, %v7276_v17  ;;  %v1048_v2 = vadd.s32 1, %v7528_v29  ;;  %v1309_v62 = vand.u32 8388607, %v11833_v18  ;;  %v7553_v25 = vmul.f32 30.0, %v7501_v61 }
 0x136   : > { %v1317_v56 = vsub.s32 32, %v1316_v38  ;;  %v7556_v54 = vor.u32 %v7503_v50, %v959_v33  ;;  %v1162_v16 = vclz %v6332_v47  ;;  %v1045_v43 = vmul.u32 %v1038_v24, %v1029_v40 }
 0x137   : > { %vm1047_vm4 = vc.u32 %v7534_v60, %v7527_v8  ;;  %v964_v37 = vshll.u32 %v963_v45, 23  ;;  %v854_v52 = vsub.s32 32, %v7519_v58  ;;  %v859_v5 = vadd.s32 127, %v858_v23 }
 0x138   : > { %v1049_v49 = vsel %vm1047_vm4, %v1048_v2, %v7528_v29  ;;  %v1319_v26 = vshll.u32 %v11839_v51, %v1316_v38  ;;  %v1320_v61 = vshrl.u32 %v11836_v53, %v1317_v56  ;;  %v1323_v35 = vshrl.u32 %v11834_v57, %v1317_v56 }
 0x139   : > { %v1050_v42 = vadd.s32 %v1049_v49, %v1045_v43  ;;  %v1310_v50 = vor.u32 8388608, %v1309_v62  ;;  %v1322_v14 = vshll.u32 %v11836_v53, %v1316_v38  ;;  %v1325_v24 = vshll.u32 %v11834_v57, %v1316_v38 }
 0x13a   : > { %v11999_v4 = vmov 2102212464   ;;  %v6333_v15 = vadd.s32 4294967294, %v1162_v16  ;;  %v1315_v27 = vshrl.u32 %v1314_v22, 5  ;;  %v1321_v47 = vor.u32 %v1320_v61, %v1319_v26 }
 0x13b   : > { %v1326_v6 = vshrl.u32 %v11999_v4, %v1317_v56  ;;  %v1051_v44 = vadd.s32 536870912, %v1050_v42  ;;  %v1324_v45 = vor.u32 %v1323_v35, %v1322_v14  ;;  %v1328_v23 = vshll.u32 %v11999_v4, %v1316_v38 }
 0x13c   : > { %v1329_v40 = vshrl.u32 %v11847_v63, %v1317_v56  ;;  %v965_v33 = vor.u32 4788187, %v964_v37  ;;  %v1331_v62 = vshll.u32 %v11847_v63, %v1316_v38  ;;  %v12001_v43 = vmov 1326507024  }
 0x13d   : > { %v1327_v29 = vor.u32 %v1326_v6, %v1325_v24  ;;  %v7570_v2 = vshrl.u32 %v1051_v44, 30  ;;  %v1332_v49 = vshrl.u32 %v12001_v43, %v1317_v56  ;;  %v856_v18 = vshrl.u32 %v838_v46, %v854_v52 }
 0x13e   : > { %v860_v57 = vshll.u32 %v859_v5, 23  ;;  %v1330_v53 = vor.u32 %v1329_v40, %v1328_v23  ;;  %v1350_v16 = vshll.u32 %v1310_v50, 8  ;;  %vm6334_vm5 = vcmp.lt.s32.totalorder %v6333_v15, 0 }
 0x13f   : > { %12000 = vst [vmem:[#allocation10_spill] sm:$0xff] %v7570_v2  ;;  %v1333_v22 = vor.u32 %v1332_v49, %v1331_v62  ;;  %vm1334_vm6 = vcmp.lt.s32.totalorder %v1315_v27, 1  ;;  %vm1337_vm7 = vcmp.lt.s32.totalorder %v1315_v27, 4  ;;  %v1053_v26 = vshll.u32 %v7570_v2, 30 }
 0x140   : > { %v1339_v61 = vsel %vm1337_vm7, %v1327_v29, 2102212464  ;;  %v1342_v35 = vsel %vm1334_vm6, %v1321_v47, %v1324_v45  ;;  %v1201_v37 = vand.u32 2139095040, %v7553_v25  ;;  %v1318_v14 = vshrl.u32 %v11839_v51, %v1317_v56 }
 0x141   : > { %vm1336_vm8 = vcmp.lt.s32.totalorder %v1315_v27, 3  ;;  %v1343_v38 = vsel %vm1337_vm7, %v1330_v53, 920167782  ;;  %v1346_v24 = vsel %vm1334_vm6, %v1324_v45, %v1327_v29  ;;  %v1165_v6 = vsel %vm6334_vm5, 0, %v6333_v15 }
 0x142   : > { %vm1335_vm9 = vcmp.lt.s32.totalorder %v1315_v27, 2  ;;  %v1344_v46 = vsel %vm1336_vm8, %v1327_v29, %v1343_v38  ;;  %v1347_v52 = vsel %vm1337_vm7, %v1333_v22, 1326507024  ;;  %vm609_vm10 = vcmp.lt.s32.totalorder %v7416_v9, 4 }
 0x143   : > { %v1338_v5 = vsel %vm1334_vm6, %v1318_v14, %v1321_v47  ;;  %v1340_v50 = vsel %vm1336_vm8, %v1324_v45, %v1339_v61  ;;  %v1345_v44 = vsel %vm1335_vm9, %v1342_v35, %v1344_v46  ;;  %v1348_v23 = vsel %vm1336_vm8, %v1330_v53, %v1347_v52 }
 0x144   : > { %v7579_v40 = vsub.s32 %v1050_v42, %v1053_v26  ;;  %v1349_v62 = vsel %vm1335_vm9, %v1346_v24, %v1348_v23  ;;  %v7582_v49 = vmul.u32.u64.low %v1350_v16, %v1345_v44  ;;  %v7583_v56 = vmul.u32.u64.high %v1350_v16, %v1345_v44, %v7582_v49 }
 0x145   : > { %vm680_vm11 = vcmp.lt.s32.totalorder %v7279_v21, 0  ;;  %v7587_v15 = vmul.u32.u64.low %v1350_v16, %v1349_v62  ;;  %v7588_v29 = vmul.u32.u64.high %v1350_v16, %v1349_v62, %v7587_v15  ;;  %v1202_v22 = vshrl.u32 %v1201_v37, 23 }
 0x146   : > { %v7591_v47 = vmul.f32 30.0, %v7547_v13  ;;  %v966_v45 = vand.u32 2147483647, %v965_v33  ;;  %v968_v53 = vcvt.s32.f32 %v7556_v54  ;;  %v855_v42 = vshll.u32 %v7439_v55, %v7519_v58 }
 0x147   : > { %v1341_v26 = vsel %vm1335_vm9, %v1338_v5, %v1340_v50  ;;  %v861_v61 = vor.u32 4788187, %v860_v57  ;;  %v1150_v35 = vadd.s32 %v7453_v36, %v7461_v0  ;;  %v1166_v14 = vsub.s32 32, %v1165_v6 }
 0x148   : > { %12002 = vst [vmem:[#allocation11_spill] sm:$0xff] %v7591_v47  ;;  %v6335_v38 = vadd.s32 4294967169, %v1202_v22  ;;  %v857_v24 = vor.u32 %v856_v18, %v855_v42  ;;  %v1170_v46 = vsub.s32 4294967266, %v1165_v6  ;;  %v1056_v37 = vsub.s32 0, %v7579_v40 }
 0x149   : > { %v1360_v13 = vadd.s32 1, %v7583_v56  ;;  %v1357_v33 = vmul.u32 %v1350_v16, %v1341_v26  ;;  %vm1359_vm12 = vc.u32 %v7588_v29, %v7582_v49  ;;  %v1513_v55 = vand.u32 2139095040, %v7591_v47 }
 0x14a   : > { %v1208_v54 = vadd.s32 1, %v6335_v38  ;;  %v762_v57 = vxor.u32 2147483648, %v7540_v1  ;;  %v7605_v58 = vmul.f32 %v968_v53, %v966_v45  ;;  %v11838_v0 = vand.u32 2147483647, %v7553_v25 }
 0x14b   : > { %v1361_v36 = vsel %vm1359_vm12, %v1360_v13, %v7583_v56  ;;  %v862_v18 = vand.u32 2147483647, %v861_v61  ;;  %v1168_v27 = vshrl.u32 %v1150_v35, %v1166_v14  ;;  %v7612_v16 = vsel %vm609_vm10, %v7491_v32, 920167782 }
 0x14c   : > { %v1362_v52 = vadd.s32 %v1361_v36, %v1357_v33  ;;  %vm1209_vm13 = vcmp.gt.s32.totalorder %v1208_v54, 0  ;;  %v7614_v5 = vadd.s32 127, %v1170_v46  ;;  %v6328_v50 = vmin.u32 %v1056_v37, %v7579_v40 }
 0x14d   : > { %v1210_v44 = vsel %vm1209_vm13, %v1208_v54, 0  ;;  %v864_v23 = vcvt.s32.f32 %v857_v24  ;;  %v1167_v62 = vshll.u32 %v7521_v39, %v1165_v6  ;;  %v1514_v15 = vshrl.u32 %v1513_v55, 23 }
 0x14e   : > { %v1363_v56 = vadd.s32 536870912, %v1362_v52  ;;  %v7621_v22 = vsel %vm680_vm11, %v762_v57, %v7540_v1  ;;  %v12004_v45 = vor.u32 %v7481_v28, %v7477_v41  ;;  %v1212_v26 = vand.u32 31, %v1210_v44 }
 0x14f   : > { %12003 = vst [vmem:[#allocation12_spill] sm:$0xff] %v7621_v22  ;;  %v7631_v61 = vmul.f32 %v864_v23, %v862_v18  ;;  %v7633_v39 = vor.u32 %v1168_v27, %v1167_v62  ;;  %v1205_v1 = vand.u32 8388607, %v11838_v0  ;;  %v1172_v35 = vshll.u32 %v7614_v5, 23  ;;  %v519_v23 = vpop.f32.mrf.mxu0 }
 0x150   : > { %v7628_v53 = vsel %vm609_vm10, %v12004_v45, 1326507024  ;;  %v7635_v6 = vshrl.u32 %v1363_v56, 30  ;;  %v1058_v14 = vclz %v6328_v50  ;;  %v1213_v41 = vsub.s32 32, %v1212_v26 }
 0x151   : > { %v1215_v24 = vshll.u32 %v11839_v51, %v1212_v26  ;;  %v12006_v46 = vmov 2475754826   ;;  %v6347_v13 = vadd.s32 4294967169, %v1514_v15  ;;  %v12007_v54 = vmov 2131351028  }
 0x152   : > { %12005 = vst [vmem:[#allocation13_spill] sm:$0xff] %v7635_v6  ;;  %v1365_v38 = vshll.u32 %v7635_v6, 30  ;;  %v1218_v37 = vshll.u32 %v12006_v46, %v1212_v26  ;;  %v1216_v33 = vshrl.u32 %v12006_v46, %v1213_v41  ;;  %v1219_v55 = vshrl.u32 %v12007_v54, %v1213_v41 }
 0x153   : > { %v1221_v57 = vshll.u32 %v12007_v54, %v1212_v26  ;;  %v1222_v36 = vshrl.u32 %v11999_v4, %v1213_v41  ;;  %v1211_v27 = vshrl.u32 %v1210_v44, 5  ;;  %v1224_v5 = vshll.u32 %v11999_v4, %v1212_v26 }
 0x154   : > { %v7648_v18 = vsub.s32 %v1362_v52, %v1365_v38  ;;  %v1225_v50 = vshrl.u32 %v11847_v63, %v1213_v41  ;;  %v1206_v62 = vor.u32 8388608, %v1205_v1  ;;  %v1217_v56 = vor.u32 %v1216_v33, %v1215_v24 }
 0x155   : > { %v1220_v45 = vor.u32 %v1219_v55, %v1218_v37  ;;  %v1223_v15 = vor.u32 %v1222_v36, %v1221_v57  ;;  %v1227_v51 = vshll.u32 %v11847_v63, %v1212_v26  ;;  %v1228_v28 = vshrl.u32 %v12001_v43, %v1213_v41 }
 0x156   : > { %v1368_v0 = vsub.s32 0, %v7648_v18  ;;  %v1226_v42 = vor.u32 %v1225_v50, %v1224_v5  ;;  %v6329_v6 = vadd.s32 4294967294, %v1058_v14  ;;  %v12008_v52 = vand.u32 2147483647, %v7591_v47 }
 0x157   : > { %v1520_v38 = vadd.s32 1, %v6347_v13  ;;  %v520_v11 = vadd.f32 %v7276_v17, %v519_v23  ;;  %v1229_v1 = vor.u32 %v1228_v28, %v1227_v51  ;;  %vm1230_vm14 = vcmp.lt.s32.totalorder %v1211_v27, 1 }
 0x158   : > { %v1517_v44 = vand.u32 8388607, %v12008_v52  ;;  %v6340_v2 = vmin.u32 %v1368_v0, %v7648_v18  ;;  %vm1233_vm15 = vcmp.lt.s32.totalorder %v1211_v27, 4  ;;  %vm1232_vm0 = vcmp.lt.s32.totalorder %v1211_v27, 3 }
 0x159   : > { %v1235_v24 = vsel %vm1233_vm15, %v1223_v15, 2102212464  ;;  %v1238_v37 = vsel %vm1230_vm14, %v1217_v56, %v1220_v45  ;;  %v1239_v33 = vsel %vm1233_vm15, %v1226_v42, 920167782  ;;  %v12009_v55 = vmov 683565275  }
 0x15a   : > { %v1214_v26 = vshrl.u32 %v12009_v55, %v1213_v41  ;;  %vm1231_vm1 = vcmp.lt.s32.totalorder %v1211_v27, 2  ;;  %v1240_v57 = vsel %vm1232_vm0, %v1223_v15, %v1239_v33  ;;  %v1242_v14 = vsel %vm1230_vm14, %v1220_v45, %v1223_v15  ;;  %v6652_v41 = vpop.f32.mrf.mxu0 }
 0x15b   : > { %v1241_v36 = vsel %vm1231_vm1, %v1238_v37, %v1240_v57  ;;  %v1243_v5 = vsel %vm1233_vm15, %v1229_v1, 1326507024  ;;  %v1246_v13 = vshll.u32 %v1206_v62, 8  ;;  %vm1521_vm2 = vcmp.gt.s32.totalorder %v1520_v38, 0 }
 0x15c   : > { %v1370_v17 = vclz %v6340_v2  ;;  %v1234_v50 = vsel %vm1230_vm14, %v1214_v26, %v1217_v56  ;;  %v1236_v0 = vsel %vm1232_vm0, %v1220_v45, %v1235_v24  ;;  %v1244_v51 = vsel %vm1232_vm0, %v1226_v42, %v1243_v5  ;;  %v7681_v24 = vld [vmem:[%s11816_s2] ss:$0 sm:$0xff] }
 0x15d   : > { %v1245_v28 = vsel %vm1231_vm1, %v1242_v14, %v1244_v51  ;;  %v7662_v23 = vmul.u32.u64.low %v1246_v13, %v1241_v36  ;;  %v7663_v52 = vmul.u32.u64.high %v1246_v13, %v1241_v36, %v7662_v23  ;;  %v1522_v63 = vsel %vm1521_vm2, %v1520_v38, 0 }
 0x15e   : > { %vm6330_vm3 = vcmp.lt.s32.totalorder %v6329_v6, 0  ;;  %v7666_v33 = vmul.u32.u64.low %v1246_v13, %v1245_v28  ;;  %v7667_v15 = vmul.u32.u64.high %v1246_v13, %v1245_v28, %v7666_v33  ;;  %v1518_v37 = vor.u32 8388608, %v1517_v44 }
 0x15f   : > { %v7672_v2 = vadd.s32 %v7527_v8, %v7534_v60  ;;  %v1237_v42 = vsel %vm1231_vm1, %v1234_v50, %v1236_v0  ;;  %v1524_v56 = vand.u32 31, %v1522_v63  ;;  %v7675_v45 = vor.u32 4788187, %v1172_v35 }
 0x160   : > { %v6341_v38 = vadd.s32 4294967294, %v1370_v17  ;;  %v535_v44 = vadd.f32 %v7681_v24, %v6652_v41  ;;  %v7684_v26 = vsel %vm6330_vm3, 0, %v6329_v6  ;;  %v1256_v8 = vadd.s32 1, %v7663_v52 }
 0x161   : > { %v1525_v60 = vsub.s32 32, %v1524_v56  ;;  %v7687_v27 = vmul.f32 30.0, %v520_v11  ;;  %v1253_v57 = vmul.u32 %v1246_v13, %v1237_v42  ;;  %vm1255_vm4 = vc.u32 %v7667_v15, %v7662_v23 }
 0x162   : > { %v1527_v35 = vshll.u32 %v12009_v55, %v1524_v56  ;;  %v7692_v14 = vshll.u32 %v1518_v37, 8  ;;  %v1257_v36 = vsel %vm1255_vm4, %v1256_v8, %v7663_v52  ;;  %v1530_v6 = vshll.u32 %v12006_v46, %v1524_v56 }
 0x163   : > { %v1528_v5 = vshrl.u32 %v12006_v46, %v1525_v60  ;;  %v1531_v17 = vshrl.u32 %v12007_v54, %v1525_v60  ;;  %v1062_v50 = vsub.s32 32, %v7684_v26  ;;  %vm6342_vm5 = vcmp.lt.s32.totalorder %v6341_v38, 0 }
 0x164   : > { %v1258_v11 = vadd.s32 %v1257_v36, %v1253_v57  ;;  %v1523_v13 = vshrl.u32 %v1522_v63, 5  ;;  %v1533_v28 = vshll.u32 %v12007_v54, %v1524_v56  ;;  %v1534_v41 = vshrl.u32 %v11999_v4, %v1525_v60 }
 0x165   : > { %v1529_v0 = vor.u32 %v1528_v5, %v1527_v35  ;;  %v1532_v51 = vor.u32 %v1531_v17, %v1530_v6  ;;  %v1066_v33 = vsub.s32 4294967266, %v7684_v26  ;;  %v1536_v37 = vshll.u32 %v11999_v4, %v1524_v56 }
 0x166   : > { %v1259_v52 = vadd.s32 536870912, %v1258_v11  ;;  %v12010_v42 = vmov 920167782   ;;  %v7704_v1 = vsel %vm6342_vm5, 0, %v6341_v38  ;;  %v1535_v62 = vor.u32 %v1534_v41, %v1533_v28 }
 0x167   : > { %v1537_v8 = vshrl.u32 %v12010_v42, %v1525_v60  ;;  %v1539_v12 = vshll.u32 %v12010_v42, %v1524_v56  ;;  %v1540_v63 = vshrl.u32 %v12001_v43, %v1525_v60  ;;  %vm1542_vm6 = vcmp.lt.s32.totalorder %v1523_v13, 1 }
 0x168   : > { %v7708_v57 = vshrl.u32 %v1259_v52, 30  ;;  %v1409_v36 = vand.u32 2139095040, %v7687_v27  ;;  %v1526_v5 = vshrl.u32 %v12009_v55, %v1525_v60  ;;  %vm1545_vm7 = vcmp.lt.s32.totalorder %v1523_v13, 4 }
 0x169   : > { %v1538_v35 = vor.u32 %v1537_v8, %v1536_v37  ;;  %v1541_v6 = vor.u32 %v1540_v63, %v1539_v12  ;;  %v1550_v17 = vsel %vm1542_vm6, %v1529_v0, %v1532_v51  ;;  %vm1544_vm8 = vcmp.lt.s32.totalorder %v1523_v13, 3 }
 0x16a   : > { %12011 = vst [vmem:[#allocation14_spill] sm:$0xff] %v7708_v57  ;;  %v1261_v38 = vshll.u32 %v7708_v57, 30  ;;  %v1547_v28 = vsel %vm1545_vm7, %v1535_v62, 2102212464  ;;  %vm1543_vm9 = vcmp.lt.s32.totalorder %v1523_v13, 2  ;;  %v1554_v52 = vsel %vm1542_vm6, %v1532_v51, %v1535_v62 }
 0x16b   : > { %v1551_v41 = vsel %vm1545_vm7, %v1538_v35, 920167782  ;;  %v1555_v19 = vsel %vm1545_vm7, %v1541_v6, 1326507024  ;;  %v1378_v37 = vsub.s32 4294967266, %v7704_v1  ;;  %v1546_v60 = vsel %vm1542_vm6, %v1526_v5, %v1529_v0 }
 0x16c   : > { %v1552_v56 = vsel %vm1544_vm8, %v1535_v62, %v1551_v41  ;;  %v7716_v8 = vsub.s32 %v1258_v11, %v1261_v38  ;;  %vm888_vm12 = vcmp.lt.s32.totalorder %v7288_v31, 0  ;;  %v1548_v63 = vsel %vm1544_vm8, %v1532_v51, %v1547_v28 }
 0x16d   : > { %v1553_v12 = vsel %vm1543_vm9, %v1550_v17, %v1552_v56  ;;  %v1556_v57 = vsel %vm1544_vm8, %v1538_v35, %v1555_v19  ;;  %vm784_vm13 = vcmp.lt.s32.totalorder %v7292_v34, 0  ;;  %v1410_v6 = vshrl.u32 %v1409_v36, 23 }
 0x16e   : > { %v7722_v7 = vmul.u32.u64.low %v7692_v14, %v1553_v12  ;;  %v7723_v22 = vmul.u32.u64.high %v7692_v14, %v1553_v12, %v7722_v7  ;;  %v1264_v62 = vsub.s32 0, %v7716_v8  ;;  %v1557_v11 = vsel %vm1543_vm9, %v1554_v52, %v1556_v57 }
 0x16f   : > { %v7729_v38 = vmul.f32 30.0, %v535_v44  ;;  %v1064_v0 = vshrl.u32 %v7672_v2, %v1062_v50  ;;  %v1067_v5 = vadd.s32 127, %v1066_v33  ;;  %v1374_v35 = vsub.s32 32, %v7704_v1 }
 0x170   : > { %v7733_v51 = vmul.u32.u64.low %v7692_v14, %v1557_v11  ;;  %v7734_v19 = vmul.u32.u64.high %v7692_v14, %v1557_v11, %v7733_v51  ;;  %v6336_v17 = vmin.u32 %v1264_v62, %v7716_v8  ;;  %v1549_v28 = vsel %vm1543_vm9, %v1546_v60, %v1548_v63 }
 0x171   : > { %12012 = vst [vmem:[#allocation15_spill] sm:$0xff] %v7729_v38  ;;  %v6343_v41 = vadd.s32 4294967169, %v1410_v6  ;;  %v1063_v57 = vshll.u32 %v7579_v40, %v7684_v26  ;;  %v1379_v36 = vadd.s32 127, %v1378_v37  ;;  %v1568_v44 = vadd.s32 1, %v7723_v22 }
 0x172   : > { %v11857_v2 = vand.u32 2147483647, %v7687_v27  ;;  %v1174_v50 = vand.u32 2147483647, %v7675_v45  ;;  %v1358_v33 = vadd.s32 %v7582_v49, %v7588_v29  ;;  %v1721_v52 = vand.u32 2139095040, %v7729_v38 }
 0x173   : > { %v1416_v56 = vadd.s32 1, %v6343_v41  ;;  %v7747_v12 = vor.u32 %v1064_v0, %v1063_v57  ;;  %v1068_v13 = vshll.u32 %v1067_v5, 23  ;;  %v1565_v60 = vmul.u32 %v7692_v14, %v1549_v28 }
 0x174   : > { %vm1567_vm14 = vc.u32 %v7734_v19, %v7722_v7  ;;  %v1376_v40 = vshrl.u32 %v1358_v33, %v1374_v35  ;;  %v1266_v26 = vclz %v6336_v17  ;;  %v1380_v45 = vshll.u32 %v1379_v36, 23 }
 0x175   : > { %v1569_v37 = vsel %vm1567_vm14, %v1568_v44, %v7723_v22  ;;  %vm1417_vm15 = vcmp.gt.s32.totalorder %v1416_v56, 0  ;;  %v1413_v49 = vand.u32 8388607, %v11857_v2  ;;  %v12013_v62 = vxor.u32 2147483648, %v7605_v58 }
 0x176   : > { %v1570_v63 = vadd.s32 %v1569_v37, %v1565_v60  ;;  %v1418_v29 = vsel %vm1417_vm15, %v1416_v56, 0  ;;  %v1375_v11 = vshll.u32 %v7648_v18, %v7704_v1  ;;  %v1722_v0 = vshrl.u32 %v1721_v52, 23 }
 0x177   : > { %v7760_v14 = vsel %vm888_vm12, %v12013_v62, %v7605_v58  ;;  %v1420_v6 = vand.u32 31, %v1418_v29  ;;  %v12015_v22 = vxor.u32 2147483648, %v7631_v61  ;;  %v12017_v51 = vcvt.s32.f32 %v7633_v39 }
 0x178   : > { %12014 = vst [vmem:[#allocation16_spill] sm:$0xff] %v7760_v14  ;;  %v7775_v17 = vor.u32 4788187, %v1068_v13  ;;  %v1571_v58 = vadd.s32 536870912, %v1570_v63  ;;  %v7778_v41 = vor.u32 %v1376_v40, %v1375_v11  ;;  %v6337_v18 = vadd.s32 4294967294, %v1266_v26 }
 0x179   : > { %v7769_v5 = vsel %vm784_vm13, %v12015_v22, %v7631_v61  ;;  %v7773_v35 = vmul.f32 %v12017_v51, %v1174_v50  ;;  %v1421_v1 = vsub.s32 32, %v1420_v6  ;;  %v7780_v57 = vor.u32 4788187, %v1380_v45 }
 0x17a   : > { %12016 = vst [vmem:[#allocation17_spill] sm:$0xff] %v7769_v5  ;;  %v7782_v36 = vshrl.u32 %v1571_v58, 30  ;;  %v1414_v44 = vor.u32 8388608, %v1413_v49  ;;  %v1423_v39 = vshll.u32 %v12009_v55, %v1420_v6  ;;  %v1426_v33 = vshll.u32 %v12006_v46, %v1420_v6  ;;  %v529_v49 = vpop.f32.mrf.mxu0 }
 0x17b   : > { %v1424_v50 = vshrl.u32 %v12006_v46, %v1421_v1  ;;  %v6355_v56 = vadd.s32 4294967169, %v1722_v0  ;;  %v1427_v13 = vshrl.u32 %v12007_v54, %v1421_v1  ;;  %v1429_v60 = vshll.u32 %v12007_v54, %v1420_v6 }
 0x17c   : > { %12018 = vst [vmem:[#allocation18_spill] sm:$0xff] %v7782_v36  ;;  %v1573_v52 = vshll.u32 %v7782_v36, 30  ;;  %v1430_v40 = vshrl.u32 %v11999_v4, %v1421_v1  ;;  %vm6338_vm0 = vcmp.lt.s32.totalorder %v6337_v18, 0  ;;  %v1419_v26 = vshrl.u32 %v1418_v29, 5 }
 0x17d   : > { %v1432_v37 = vshll.u32 %v11999_v4, %v1420_v6  ;;  %v1433_v45 = vshrl.u32 %v12010_v42, %v1421_v1  ;;  %v1425_v11 = vor.u32 %v1424_v50, %v1423_v39  ;;  %v1428_v22 = vor.u32 %v1427_v13, %v1426_v33 }
 0x17e   : > { %v7794_v62 = vsub.s32 %v1570_v63, %v1573_v52  ;;  %v1431_v0 = vor.u32 %v1430_v40, %v1429_v60  ;;  %v1435_v58 = vshll.u32 %v12010_v42, %v1420_v6  ;;  %v1436_v2 = vshrl.u32 %v12001_v43, %v1421_v1 }
 0x17f   : > { %v1434_v51 = vor.u32 %v1433_v45, %v1432_v37  ;;  %v1454_v28 = vshll.u32 %v1414_v44, 8  ;;  %v7798_v61 = vsel %vm6338_vm0, 0, %v6337_v18  ;;  %v1728_v36 = vadd.s32 1, %v6355_v56 }
 0x180   : > { %v1576_v29 = vsub.s32 0, %v7794_v62  ;;  %v530_v14 = vadd.f32 %v7681_v24, %v529_v49  ;;  %v1422_v31 = vshrl.u32 %v12009_v55, %v1421_v1  ;;  %v1437_v63 = vor.u32 %v1436_v2, %v1435_v58 }
 0x181   : > { %vm1438_vm1 = vcmp.lt.s32.totalorder %v1419_v26, 1  ;;  %vm1441_vm2 = vcmp.lt.s32.totalorder %v1419_v26, 4  ;;  %vm1440_vm3 = vcmp.lt.s32.totalorder %v1419_v26, 3  ;;  %v1274_v6 = vsub.s32 4294967266, %v7798_v61 }
 0x182   : > { %v1443_v39 = vsel %vm1441_vm2, %v1431_v0, 2102212464  ;;  %v1446_v50 = vsel %vm1438_vm1, %v1425_v11, %v1428_v22  ;;  %v1447_v33 = vsel %vm1441_vm2, %v1434_v51, 920167782  ;;  %vm1439_vm4 = vcmp.lt.s32.totalorder %v1419_v26, 2 }
 0x183   : > { %v1448_v44 = vsel %vm1440_vm3, %v1431_v0, %v1447_v33  ;;  %v1450_v18 = vsel %vm1438_vm1, %v1428_v22, %v1431_v0  ;;  %v6348_v52 = vmin.u32 %v1576_v29, %v7794_v62  ;;  %v1442_v13 = vsel %vm1438_vm1, %v1422_v31, %v1425_v11 }
 0x184   : > { %v1449_v56 = vsel %vm1439_vm4, %v1446_v50, %v1448_v44  ;;  %v1451_v60 = vsel %vm1441_vm2, %v1437_v63, 1326507024  ;;  %v1444_v40 = vsel %vm1440_vm3, %v1428_v22, %v1443_v39  ;;  %v12019_v49 = vand.u32 2147483647, %v7729_v38  ;;  %v6655_v22 = vpop.f32.mrf.mxu0 }
 0x185   : > { %v1452_v1 = vsel %vm1440_vm3, %v1434_v51, %v1451_v60  ;;  %v7806_v2 = vmul.u32.u64.low %v1454_v28, %v1449_v56  ;;  %v7807_v37 = vmul.u32.u64.high %v1454_v28, %v1449_v56, %v7806_v2  ;;  %vm1729_vm5 = vcmp.gt.s32.totalorder %v1728_v36, 0 }
 0x186   : > { %v1453_v45 = vsel %vm1439_vm4, %v1450_v18, %v1452_v1  ;;  %v1725_v58 = vand.u32 8388607, %v12019_v49  ;;  %v7813_v33 = vmul.f32 30.0, %v530_v14  ;;  %v1270_v0 = vsub.s32 32, %v7798_v61 }
 0x187   : > { %v7816_v31 = vmul.u32.u64.low %v1454_v28, %v1453_v45  ;;  %v7817_v11 = vmul.u32.u64.high %v1454_v28, %v1453_v45, %v7816_v31  ;;  %v1730_v29 = vsel %vm1729_vm5, %v1728_v36, 0  ;;  %v1275_v51 = vadd.s32 127, %v1274_v6 }
 0x188   : > { %v1578_v63 = vclz %v6348_v52  ;;  %v1445_v39 = vsel %vm1439_vm4, %v1442_v13, %v1444_v40  ;;  %v1732_v50 = vand.u32 31, %v1730_v29  ;;  %v1254_v14 = vadd.s32 %v7662_v23, %v7667_v15 }
 0x189   : > { %v1464_v56 = vadd.s32 1, %v7807_v37  ;;  %v1726_v1 = vor.u32 8388608, %v1725_v58  ;;  %v7827_v36 = vadd.f32 %v7681_v24, %v6655_v22  ;;  %v1271_v26 = vshll.u32 %v7716_v8, %v7798_v61 }
 0x18a   : > { %v1733_v45 = vsub.s32 32, %v1732_v50  ;;  %v1461_v6 = vmul.u32 %v1454_v28, %v1445_v39  ;;  %vm1463_vm6 = vc.u32 %v7817_v11, %v7806_v2  ;;  %v1617_v52 = vand.u32 2139095040, %v7813_v33 }
 0x18b   : > { %v1272_v13 = vshrl.u32 %v1254_v14, %v1270_v0  ;;  %v1276_v23 = vshll.u32 %v1275_v51, 23  ;;  %v6349_v15 = vadd.s32 4294967294, %v1578_v63  ;;  %v1465_v40 = vsel %vm1463_vm6, %v1464_v56, %v7807_v37 }
 0x18c   : > { %v1466_v49 = vadd.s32 %v1465_v40, %v1461_v6  ;;  %v1731_v58 = vshrl.u32 %v1730_v29, 5  ;;  %v1736_v31 = vshrl.u32 %v12006_v46, %v1733_v45  ;;  %v1739_v22 = vshrl.u32 %v12007_v54, %v1733_v45 }
 0x18d   : > { %v1735_v18 = vshll.u32 %v12009_v55, %v1732_v50  ;;  %v1738_v8 = vshll.u32 %v12006_v46, %v1732_v50  ;;  %v1741_v28 = vshll.u32 %v12007_v54, %v1732_v50  ;;  %v1742_v61 = vshrl.u32 %v11999_v4, %v1733_v45 }
 0x18e   : > { %v1467_v39 = vadd.s32 536870912, %v1466_v49  ;;  %v1744_v0 = vshll.u32 %v11999_v4, %v1732_v50  ;;  %v1745_v51 = vshrl.u32 %v12010_v42, %v1733_v45  ;;  %v7843_v37 = vshll.u32 %v1726_v1, 8 }
 0x18f   : > { %v1273_v29 = vor.u32 %v1272_v13, %v1271_v26  ;;  %v1737_v63 = vor.u32 %v1736_v31, %v1735_v18  ;;  %v1740_v14 = vor.u32 %v1739_v22, %v1738_v8  ;;  %v1743_v56 = vor.u32 %v1742_v61, %v1741_v28 }
 0x190   : > { %v7845_v6 = vshrl.u32 %v1467_v39, 30  ;;  %v1746_v40 = vor.u32 %v1745_v51, %v1744_v0  ;;  %v1747_v60 = vshll.u32 %v12010_v42, %v1732_v50  ;;  %v1748_v44 = vshrl.u32 %v12001_v43, %v1733_v45 }
 0x191   : > { %v1277_v5 = vor.u32 4788187, %v1276_v23  ;;  %vm6350_vm7 = vcmp.lt.s32.totalorder %v6349_v15, 0  ;;  %vm1753_vm8 = vcmp.lt.s32.totalorder %v1731_v58, 4  ;;  %v1618_v34 = vshrl.u32 %v1617_v52, 23 }
 0x192   : > { %12020 = vst [vmem:[#allocation19_spill] sm:$0xff] %v7845_v6  ;;  %v1469_v38 = vshll.u32 %v7845_v6, 30  ;;  %v1749_v21 = vor.u32 %v1748_v44, %v1747_v60  ;;  %vm1750_vm9 = vcmp.lt.s32.totalorder %v1731_v58, 1  ;;  %v1755_v1 = vsel %vm1753_vm8, %v1743_v56, 2102212464 }
 0x193   : > { %v1734_v18 = vshrl.u32 %v12009_v55, %v1733_v45  ;;  %vm1752_vm14 = vcmp.lt.s32.totalorder %v1731_v58, 3  ;;  %v1758_v26 = vsel %vm1750_vm9, %v1737_v63, %v1740_v14  ;;  %v1759_v13 = vsel %vm1753_vm8, %v1746_v40, 920167782 }
 0x194   : > { %v7853_v31 = vsub.s32 %v1466_v49, %v1469_v38  ;;  %vm1751_vm15 = vcmp.lt.s32.totalorder %v1731_v58, 2  ;;  %v1760_v50 = vsel %vm1752_vm14, %v1743_v56, %v1759_v13  ;;  %v1762_v23 = vsel %vm1750_vm9, %v1740_v14, %v1743_v56 }
 0x195   : > { %vm1096_vm0 = vcmp.lt.s32.totalorder %v7363_v48, 0  ;;  %v1754_v52 = vsel %vm1750_vm9, %v1734_v18, %v1737_v63  ;;  %v1756_v22 = vsel %vm1752_vm14, %v1740_v14, %v1755_v1  ;;  %v1761_v44 = vsel %vm1751_vm15, %v1758_v26, %v1760_v50 }
 0x196   : > { %v1763_v60 = vsel %vm1753_vm8, %v1749_v21, 1326507024  ;;  %v1472_v8 = vsub.s32 0, %v7853_v31  ;;  %v7860_v28 = vmul.u32.u64.low %v7843_v37, %v1761_v44  ;;  %v7861_v61 = vmul.u32.u64.high %v7843_v37, %v1761_v44, %v7860_v28 }
 0x197   : > { %v1764_v45 = vsel %vm1752_vm14, %v1746_v40, %v1763_v60  ;;  %v1278_v38 = vand.u32 2147483647, %v1277_v5  ;;  %v11868_v39 = vand.u32 2147483647, %v7813_v33  ;;  %v6351_v0 = vadd.s32 4294967169, %v1618_v34 }
 0x198   : > { %v1765_v49 = vsel %vm1751_vm15, %v1762_v23, %v1764_v45  ;;  %v1280_v51 = vcvt.s32.f32 %v1273_v29  ;;  %v1581_v63 = vsel %vm6350_vm7, 0, %v6349_v15  ;;  %v6344_v56 = vmin.u32 %v1472_v8, %v7853_v31 }
 0x199   : > { %v7868_v14 = vmul.u32.u64.low %v7843_v37, %v1765_v49  ;;  %v7869_v21 = vmul.u32.u64.high %v7843_v37, %v1765_v49, %v7868_v14  ;;  %v1757_v40 = vsel %vm1751_vm15, %v1754_v52, %v1756_v22  ;;  %v1624_v1 = vadd.s32 1, %v6351_v0 }
 0x19a   : > { %v7874_v18 = vmul.f32 30.0, %v7827_v36  ;;  %v1178_v5 = vxor.u32 2147483648, %v7773_v35  ;;  %v12021_v26 = vand.u32 2147483647, %v7775_v17  ;;  %v12022_v34 = vcvt.s32.f32 %v7747_v12 }
 0x19b   : > { %v12023_v15 = vand.u32 2147483647, %v7780_v57  ;;  %v12024_v13 = vcvt.s32.f32 %v7778_v41  ;;  %v1776_v58 = vadd.s32 1, %v7861_v61  ;;  %v7890_v23 = vmul.f32 %v1280_v51, %v1278_v38  ;;  %v2241_v41 = vld [vmem:[%s11817_s3 + $0x18] sm:$0xff] }
 0x19c   : > { %v7881_v29 = vmul.f32 %v12022_v34, %v12021_v26  ;;  %v1582_v36 = vsub.s32 32, %v1581_v63  ;;  %v1621_v52 = vand.u32 8388607, %v11868_v39  ;;  %vm1625_vm1 = vcmp.gt.s32.totalorder %v1624_v1, 0  ;;  %6659 = vmatprep.subr.mxu1 %v2241_v41 }
 0x19d   : > { %v7887_v50 = vmul.f32 %v12024_v13, %v12023_v15  ;;  %v1586_v17 = vsub.s32 4294967266, %v1581_v63  ;;  %v1773_v12 = vmul.u32 %v7843_v37, %v1757_v40  ;;  %vm1775_vm2 = vc.u32 %v7869_v21, %v7860_v28  ;;  %6660 = vmatpush3.msra.mxu1 %v2241_v41 }
 0x19e   : > { %v1626_v57 = vsel %vm1625_vm1, %v1624_v1, 0  ;;  %v1474_v22 = vclz %v6344_v56  ;;  %v1777_v44 = vsel %vm1775_vm2, %v1776_v58, %v7861_v61  ;;  %v1929_v8 = vand.u32 2139095040, %v7874_v18  ;;  %v2240_v61 = vld [vmem:[%s11817_s3 + $0x10] sm:$0xff] }
 0x19f   : > { %v1628_v60 = vand.u32 31, %v1626_v57  ;;  %v7905_v45 = vsel %vm1096_vm0, %v1178_v5, %v7773_v35  ;;  %v1074_v37 = vxor.u32 2147483648, %v7881_v29  ;;  %v1566_v38 = vadd.s32 %v7722_v7, %v7734_v19  ;;  %6661 = vmatprep.subr.mxu1 %v2240_v61  ;;  %v2239_v7 = vld [vmem:[%s11817_s3 + $0x8] sm:$0xff] }
 0x1a0   : > { %v1778_v49 = vadd.s32 %v1777_v44, %v1773_v12  ;;  %v1583_v14 = vshll.u32 %v7794_v62, %v1581_v63  ;;  %v7916_v40 = vadd.s32 127, %v1586_v17  ;;  %v1622_v5 = vor.u32 8388608, %v1621_v52  ;;  %6662 = vmatpush3.msra.mxu1 %v2240_v61 }
 0x1a1   : > { %v1629_v56 = vsub.s32 32, %v1628_v60  ;;  %v1584_v35 = vshrl.u32 %v1566_v38, %v1582_v36  ;;  %v6345_v19 = vadd.s32 4294967294, %v1474_v22  ;;  %v1930_v15 = vshrl.u32 %v1929_v8, 23  ;;  %6663 = vmatprep.subr.mxu1 %v2239_v7  ;;  %v2238_v36 = vld [vmem:[%s11817_s3] sm:$0xff] }
 0x1a2   : > { %v1779_v1 = vadd.s32 536870912, %v1778_v49  ;;  %v1631_v63 = vshll.u32 %v12009_v55, %v1628_v60  ;;  %v1634_v13 = vshll.u32 %v12006_v46, %v1628_v60  ;;  %6664 = vmatpush3.msra.mxu1 %v2239_v7  ;;  %v1627_v52 = vshrl.u32 %v1626_v57, 5 }
 0x1a3   : > { %v1632_v26 = vshrl.u32 %v12006_v46, %v1629_v56  ;;  %v1635_v34 = vshrl.u32 %v12007_v54, %v1629_v56  ;;  %v1638_v58 = vshrl.u32 %v11999_v4, %v1629_v56  ;;  %v1637_v17 = vshll.u32 %v12007_v54, %v1628_v60  ;;  %6665 = vmatprep.subr.mxu1 %v2238_v36 }
 0x1a4   : > { %v7923_v62 = vshrl.u32 %v1779_v1, 30  ;;  %v1640_v12 = vshll.u32 %v11999_v4, %v1628_v60  ;;  %v1641_v41 = vshrl.u32 %v12010_v42, %v1629_v56  ;;  %v7934_v22 = vor.u32 %v1584_v35, %v1583_v14  ;;  %6666 = vmatpush3.msra.mxu1 %v2238_v36 }
 0x1a5   : > { %v1633_v8 = vor.u32 %v1632_v26, %v1631_v63  ;;  %v1636_v38 = vor.u32 %v1635_v34, %v1634_v13  ;;  %vm992_vm3 = vcmp.lt.s32.totalorder %v7426_v20, 0  ;;  %vm1304_vm4 = vcmp.lt.s32.totalorder %v7444_v3, 0 }
 0x1a6   : > { %12025 = vst [vmem:[#allocation20_spill] sm:$0xff] %v7923_v62  ;;  %v1781_v44 = vshll.u32 %v7923_v62, 30  ;;  %v1639_v61 = vor.u32 %v1638_v58, %v1637_v17  ;;  %v1642_v57 = vor.u32 %v1641_v41, %v1640_v12  ;;  %v1643_v1 = vshll.u32 %v12010_v42, %v1628_v60 }
 0x1a7   : > { %v1644_v7 = vshrl.u32 %v12001_v43, %v1629_v56  ;;  %v1588_v39 = vshll.u32 %v7916_v40, 23  ;;  %v1662_v14 = vshll.u32 %v1622_v5, 8  ;;  %vm1200_vm5 = vcmp.lt.s32.totalorder %v7553_v25, 0 }
 0x1a8   : > { %v7942_v51 = vsub.s32 %v1778_v49, %v1781_v44  ;;  %vm6346_vm6 = vcmp.lt.s32.totalorder %v6345_v19, 0  ;;  %vm1646_vm7 = vcmp.lt.s32.totalorder %v1627_v52, 1  ;;  %v6363_v34 = vadd.s32 4294967169, %v1930_v15 }
 0x1a9   : > { %v1645_v26 = vor.u32 %v1644_v7, %v1643_v1  ;;  %vm1648_vm8 = vcmp.lt.s32.totalorder %v1627_v52, 3  ;;  %vm1649_vm9 = vcmp.lt.s32.totalorder %v1627_v52, 4  ;;  %v1654_v60 = vsel %vm1646_vm7, %v1633_v8, %v1636_v38  ;;  %v539_v1 = vpop.f32.mrf.mxu0 }
 0x1aa   : > { %v1784_v63 = vsub.s32 0, %v7942_v51  ;;  %v1651_v13 = vsel %vm1649_vm9, %v1639_v61, 2102212464  ;;  %v1655_v58 = vsel %vm1649_vm9, %v1642_v57, 920167782  ;;  %v1658_v49 = vsel %vm1646_vm7, %v1636_v38, %v1639_v61 }
 0x1ab   : > { %v1659_v40 = vsel %vm1649_vm9, %v1645_v26, 1326507024  ;;  %v1630_v36 = vshrl.u32 %v12009_v55, %v1629_v56  ;;  %vm1647_vm14 = vcmp.lt.s32.totalorder %v1627_v52, 2  ;;  %v1656_v17 = vsel %vm1648_vm8, %v1639_v61, %v1655_v58 }
 0x1ac   : > { %v6356_v5 = vmin.u32 %v1784_v63, %v7942_v51  ;;  %v7953_v15 = vsel %vm6346_vm6, 0, %v6345_v19  ;;  %v1657_v12 = vsel %vm1647_vm14, %v1654_v60, %v1656_v17  ;;  %v1660_v41 = vsel %vm1648_vm8, %v1642_v57, %v1659_v40 }
 0x1ad   : > { %v1936_v44 = vadd.s32 1, %v6363_v34  ;;  %v1650_v35 = vsel %vm1646_vm7, %v1630_v36, %v1633_v8  ;;  %v1652_v26 = vsel %vm1648_vm8, %v1636_v38, %v1651_v13  ;;  %v1661_v63 = vsel %vm1647_vm14, %v1658_v49, %v1660_v41 }
 0x1ae   : > { %v1786_v7 = vclz %v6356_v5  ;;  %v7960_v56 = vmul.u32.u64.low %v1662_v14, %v1661_v63  ;;  %v7961_v0 = vmul.u32.u64.high %v1662_v14, %v1661_v63, %v7960_v56  ;;  %v7972_v19 = vsel %vm992_vm3, %v1074_v37, %v7881_v29  ;;  %v6658_v29 = vpop.f32.mrf.mxu0 }
 0x1af   : > { %v7963_v61 = vmul.u32.u64.low %v1662_v14, %v1657_v12  ;;  %v7964_v58 = vmul.u32.u64.high %v1662_v14, %v1657_v12, %v7963_v61  ;;  %v12026_v8 = vxor.u32 2147483648, %v7887_v50  ;;  %v12028_v57 = vand.u32 2147483647, %v7874_v18 }
 0x1b0   : > { %vm1937_vm15 = vcmp.gt.s32.totalorder %v1936_v44, 0  ;;  %v1482_v60 = vsub.s32 4294967266, %v7953_v15  ;;  %v1653_v13 = vsel %vm1647_vm14, %v1650_v35, %v1652_v26  ;;  %v540_v40 = vadd.f32 %v7681_v24, %v539_v1 }
 0x1b1   : > { %v7979_v38 = vsel %vm1304_vm4, %v12026_v8, %v7887_v50  ;;  %v1933_v34 = vand.u32 8388607, %v12028_v57  ;;  %v1938_v49 = vsel %vm1937_vm15, %v1936_v44, 0  ;;  %v12029_v37 = vxor.u32 2147483648, %v7890_v23 }
 0x1b2   : > { %12027 = vst [vmem:[#allocation21_spill] sm:$0xff] %v7979_v38  ;;  %v7995_v50 = vadd.s32 %v7806_v2, %v7817_v11  ;;  %v6357_v36 = vadd.s32 4294967294, %v1786_v7  ;;  %v1940_v17 = vand.u32 31, %v1938_v49  ;;  %v7997_v12 = vor.u32 4788187, %v1588_v39 }
 0x1b3   : > { %v7991_v5 = vsel %vm1200_vm5, %v12029_v37, %v7890_v23  ;;  %vm1671_vm1 = vc.u32 %v7961_v0, %v7963_v61  ;;  %v1672_v35 = vadd.s32 1, %v7964_v58  ;;  %v1669_v41 = vmul.u32 %v1662_v14, %v1653_v13 }
 0x1b4   : > { %12030 = vst [vmem:[#allocation22_spill] sm:$0xff] %v7991_v5  ;;  %v1934_v44 = vor.u32 8388608, %v1933_v34  ;;  %v1941_v1 = vsub.s32 32, %v1940_v17  ;;  %v555_v23 = vadd.f32 %v7681_v24, %v6658_v29  ;;  %v1478_v26 = vsub.s32 32, %v7953_v15 }
 0x1b5   : > { %v8005_v2 = vadd.s32 127, %v1482_v60  ;;  %v1673_v11 = vsel %vm1671_vm1, %v1672_v35, %v7964_v58  ;;  %v8008_v39 = vmul.f32 30.0, %v540_v40  ;;  %vm6358_vm2 = vcmp.lt.s32.totalorder %v6357_v36, 0 }
 0x1b6   : > { %v1674_v7 = vadd.s32 %v1673_v11, %v1669_v41  ;;  %v1943_v63 = vshll.u32 %v12009_v55, %v1940_v17  ;;  %v1946_v56 = vshll.u32 %v12006_v46, %v1940_v17  ;;  %v1944_v14 = vshrl.u32 %v12006_v46, %v1941_v1 }
 0x1b7   : > { %v1947_v8 = vshrl.u32 %v12007_v54, %v1941_v1  ;;  %v1949_v57 = vshll.u32 %v12007_v54, %v1940_v17  ;;  %v1950_v34 = vshrl.u32 %v11999_v4, %v1941_v1  ;;  %v1939_v13 = vshrl.u32 %v1938_v49, 5 }
 0x1b8   : > { %v1675_v60 = vadd.s32 536870912, %v1674_v7  ;;  %v1952_v58 = vshll.u32 %v11999_v4, %v1940_v17  ;;  %v1953_v40 = vshrl.u32 %v12010_v42, %v1941_v1  ;;  %v1484_v29 = vshll.u32 %v8005_v2, 23 }
 0x1b9   : > { %v1945_v37 = vor.u32 %v1944_v14, %v1943_v63  ;;  %v1948_v35 = vor.u32 %v1947_v8, %v1946_v56  ;;  %v1951_v41 = vor.u32 %v1950_v34, %v1949_v57  ;;  %v1974_v62 = vshll.u32 %v1934_v44, 8 }
 0x1ba   : > { %v8019_v11 = vshrl.u32 %v1675_v60, 30  ;;  %v1954_v52 = vor.u32 %v1953_v40, %v1952_v58  ;;  %v8023_v38 = vsel %vm6358_vm2, 0, %v6357_v36  ;;  %v1955_v49 = vshll.u32 %v12010_v42, %v1940_v17 }
 0x1bb   : > { %v1956_v3 = vshrl.u32 %v12001_v43, %v1941_v1  ;;  %v1825_v5 = vand.u32 2139095040, %v8008_v39  ;;  %vm1958_vm6 = vcmp.lt.s32.totalorder %v1939_v13, 1  ;;  %vm1960_vm7 = vcmp.lt.s32.totalorder %v1939_v13, 3 }
 0x1bc   : > { %12031 = vst [vmem:[#allocation23_spill] sm:$0xff] %v8019_v11  ;;  %v1677_v2 = vshll.u32 %v8019_v11, 30  ;;  %vm1961_vm8 = vcmp.lt.s32.totalorder %v1939_v13, 4  ;;  %v1966_v44 = vsel %vm1958_vm6, %v1945_v37, %v1948_v35  ;;  %v1942_v36 = vshrl.u32 %v12009_v55, %v1941_v1 }
 0x1bd   : > { %v1957_v63 = vor.u32 %v1956_v3, %v1955_v49  ;;  %v1963_v56 = vsel %vm1961_vm8, %v1951_v41, 2102212464  ;;  %v1967_v14 = vsel %vm1961_vm8, %v1954_v52, 920167782  ;;  %vm1959_vm9 = vcmp.lt.s32.totalorder %v1939_v13, 2 }
 0x1be   : > { %v8030_v8 = vsub.s32 %v1674_v7, %v1677_v2  ;;  %v1968_v17 = vsel %vm1960_vm7, %v1951_v41, %v1967_v14  ;;  %v1794_v57 = vsub.s32 4294967266, %v8023_v38  ;;  %v1970_v60 = vsel %vm1958_vm6, %v1948_v35, %v1951_v41 }
 0x1bf   : > { %v1969_v34 = vsel %vm1959_vm9, %v1966_v44, %v1968_v17  ;;  %v1971_v58 = vsel %vm1961_vm8, %v1957_v63, 1326507024  ;;  %v1962_v40 = vsel %vm1958_vm6, %v1942_v36, %v1945_v37  ;;  %v1964_v49 = vsel %vm1960_vm7, %v1948_v35, %v1963_v56 }
 0x1c0   : > { %v1680_v3 = vsub.s32 0, %v8030_v8  ;;  %v1972_v7 = vsel %vm1960_vm7, %v1954_v52, %v1971_v58  ;;  %v8042_v2 = vmul.u32.u64.low %v1974_v62, %v1969_v34  ;;  %v8043_v6 = vmul.u32.u64.high %v1974_v62, %v1969_v34, %v8042_v2 }
 0x1c1   : > { %v1973_v1 = vsel %vm1959_vm9, %v1970_v60, %v1972_v7  ;;  %v1826_v14 = vshrl.u32 %v1825_v5, 23  ;;  %v1790_v44 = vsub.s32 32, %v8023_v38  ;;  %v1795_v11 = vadd.s32 127, %v1794_v57 }
 0x1c2   : > { %v6352_v41 = vmin.u32 %v1680_v3, %v8030_v8  ;;  %v8048_v63 = vmul.u32.u64.low %v1974_v62, %v1973_v1  ;;  %v8049_v17 = vmul.u32.u64.high %v1974_v62, %v1973_v1, %v8048_v63  ;;  %v1965_v37 = vsel %vm1959_vm9, %v1962_v40, %v1964_v49 }
 0x1c3   : > { %v6359_v35 = vadd.s32 4294967169, %v1826_v14  ;;  %v8052_v56 = vmul.f32 30.0, %v555_v23  ;;  %v1590_v52 = vand.u32 2147483647, %v7997_v12  ;;  %v1480_v36 = vshrl.u32 %v7995_v50, %v1478_v26  ;;  %v549_v12 = vpop.f32.mrf.mxu0 }
 0x1c4   : > { %v1774_v5 = vadd.s32 %v7860_v28, %v7869_v21  ;;  %v1682_v34 = vclz %v6352_v41  ;;  %v8058_v60 = vor.u32 4788187, %v1484_v29  ;;  %v1984_v58 = vadd.s32 1, %v8043_v6 }
 0x1c5   : > { %12032 = vst [vmem:[#allocation24_spill] sm:$0xff] %v8052_v56  ;;  %v12033_v3 = vand.u32 2147483647, %v8008_v39  ;;  %v1832_v13 = vadd.s32 1, %v6359_v35  ;;  %v1981_v23 = vmul.u32 %v1974_v62, %v1965_v37  ;;  %vm1983_vm14 = vc.u32 %v8049_v17, %v8042_v2 }
 0x1c6   : > { %v1792_v40 = vshrl.u32 %v1774_v5, %v1790_v44  ;;  %v6353_v49 = vadd.s32 4294967294, %v1682_v34  ;;  %v1796_v50 = vshll.u32 %v1795_v11, 23  ;;  %v1985_v26 = vsel %vm1983_vm14, %v1984_v58, %v8043_v6 }
 0x1c7   : > { %v1829_v57 = vand.u32 8388607, %v12033_v3  ;;  %vm1833_vm15 = vcmp.gt.s32.totalorder %v1832_v13, 0  ;;  %v2137_v28 = vand.u32 2139095040, %v8052_v56  ;;  %v1479_v21 = vshll.u32 %v7853_v31, %v7953_v15 }
 0x1c8   : > { %v1791_v29 = vshll.u32 %v7942_v51, %v8023_v38  ;;  %v1986_v7 = vadd.s32 %v1985_v26, %v1981_v23  ;;  %v1834_v1 = vsel %vm1833_vm15, %v1832_v13, 0  ;;  %v12034_v62 = vcvt.s32.f32 %v7934_v22 }
 0x1c9   : > { %vm6354_vm1 = vcmp.lt.s32.totalorder %v6353_v49, 0  ;;  %v1836_v44 = vand.u32 31, %v1834_v1  ;;  %v550_v11 = vadd.f32 %v7681_v24, %v549_v12  ;;  %v8076_v6 = vor.u32 %v1480_v36, %v1479_v21 }
 0x1ca   : > { %v8073_v14 = vmul.f32 %v12034_v62, %v1590_v52  ;;  %v8079_v63 = vor.u32 %v1792_v40, %v1791_v29  ;;  %v1987_v31 = vadd.s32 536870912, %v1986_v7  ;;  %v8081_v15 = vor.u32 4788187, %v1796_v50 }
 0x1cb   : > { %v1830_v51 = vor.u32 8388608, %v1829_v57  ;;  %v1837_v38 = vsub.s32 32, %v1836_v44  ;;  %v2138_v37 = vshrl.u32 %v2137_v28, 23  ;;  %v8083_v35 = vsel %vm6354_vm1, 0, %v6353_v49 }
 0x1cc   : > { %v8085_v22 = vshrl.u32 %v1987_v31, 30  ;;  %v1839_v52 = vshll.u32 %v12009_v55, %v1836_v44  ;;  %v1842_v24 = vshll.u32 %v12006_v46, %v1836_v44  ;;  %v1845_v34 = vshll.u32 %v12007_v54, %v1836_v44 }
 0x1cd   : > { %v1840_v36 = vshrl.u32 %v12006_v46, %v1837_v38  ;;  %v1843_v5 = vshrl.u32 %v12007_v54, %v1837_v38  ;;  %v1846_v58 = vshrl.u32 %v11999_v4, %v1837_v38  ;;  %v1835_v57 = vshrl.u32 %v1834_v1, 5 }
 0x1ce   : > { %12035 = vst [vmem:[#allocation25_spill] sm:$0xff] %v8085_v22  ;;  %v1989_v3 = vshll.u32 %v8085_v22, 30  ;;  %v1848_v13 = vshll.u32 %v11999_v4, %v1836_v44  ;;  %v1849_v40 = vshrl.u32 %v12010_v42, %v1837_v38  ;;  %v1798_v49 = vand.u32 2147483647, %v8081_v15 }
 0x1cf   : > { %v1841_v23 = vor.u32 %v1840_v36, %v1839_v52  ;;  %v1844_v12 = vor.u32 %v1843_v5, %v1842_v24  ;;  %v1847_v50 = vor.u32 %v1846_v58, %v1845_v34  ;;  %v1870_v21 = vshll.u32 %v1830_v51, 8 }
 0x1d0   : > { %v8097_v26 = vsub.s32 %v1986_v7, %v1989_v3  ;;  %v1850_v28 = vor.u32 %v1849_v40, %v1848_v13  ;;  %v11879_v29 = vand.u32 2147483647, %v8052_v56  ;;  %v1690_v62 = vsub.s32 4294967266, %v8083_v35 }
 0x1d1   : > { %v1851_v31 = vshll.u32 %v12010_v42, %v1836_v44  ;;  %v1852_v1 = vshrl.u32 %v12001_v43, %v1837_v38  ;;  %v6371_v41 = vadd.s32 4294967169, %v2138_v37  ;;  %vm1854_vm2 = vcmp.lt.s32.totalorder %v1835_v57, 1 }
 0x1d2   : > { %v1992_v22 = vsub.s32 0, %v8097_v26  ;;  %vm1856_vm6 = vcmp.lt.s32.totalorder %v1835_v57, 3  ;;  %vm1857_vm7 = vcmp.lt.s32.totalorder %v1835_v57, 4  ;;  %v1862_v7 = vsel %vm1854_vm2, %v1841_v23, %v1844_v12 }
 0x1d3   : > { %v1853_v15 = vor.u32 %v1852_v1, %v1851_v31  ;;  %v1859_v52 = vsel %vm1857_vm7, %v1847_v50, 2102212464  ;;  %v1863_v24 = vsel %vm1857_vm7, %v1850_v28, 920167782  ;;  %v1838_v51 = vshrl.u32 %v12009_v55, %v1837_v38 }
 0x1d4   : > { %vm1855_vm8 = vcmp.lt.s32.totalorder %v1835_v57, 2  ;;  %v1864_v36 = vsel %vm1856_vm6, %v1847_v50, %v1863_v24  ;;  %v2141_v44 = vand.u32 8388607, %v11879_v29  ;;  %v6364_v37 = vmin.u32 %v1992_v22, %v8097_v26 }
 0x1d5   : > { %v1865_v5 = vsel %vm1855_vm8, %v1862_v7, %v1864_v36  ;;  %v1866_v34 = vsel %vm1854_vm2, %v1844_v12, %v1847_v50  ;;  %v1867_v58 = vsel %vm1857_vm7, %v1853_v15, 1326507024  ;;  %v1691_v3 = vadd.s32 127, %v1690_v62 }
 0x1d6   : > { %v1858_v13 = vsel %vm1854_vm2, %v1838_v51, %v1841_v23  ;;  %v1860_v40 = vsel %vm1856_vm6, %v1844_v12, %v1859_v52  ;;  %v1868_v38 = vsel %vm1856_vm6, %v1850_v28, %v1867_v58  ;;  %v2144_v29 = vadd.s32 1, %v6371_v41 }
 0x1d7   : > { %v1869_v31 = vsel %vm1855_vm8, %v1866_v34, %v1868_v38  ;;  %v8116_v1 = vmul.u32.u64.low %v1870_v21, %v1865_v5  ;;  %v8117_v24 = vmul.u32.u64.high %v1870_v21, %v1865_v5, %v8116_v1  ;;  %v2142_v7 = vor.u32 8388608, %v2141_v44 }
 0x1d8   : > { %v8120_v22 = vmul.u32.u64.low %v1870_v21, %v1869_v31  ;;  %v8121_v56 = vmul.u32.u64.high %v1870_v21, %v1869_v31, %v8120_v22  ;;  %v8123_v50 = vmul.f32 30.0, %v550_v11  ;;  %v1488_v62 = vcvt.s32.f32 %v8076_v6 }
 0x1d9   : > { %v1800_v23 = vcvt.s32.f32 %v8079_v63  ;;  %v1994_v12 = vclz %v6364_v37  ;;  %vm2145_vm9 = vcmp.gt.s32.totalorder %v2144_v29, 0  ;;  %v1686_v28 = vsub.s32 32, %v8083_v35 }
 0x1da   : > { %12036 = vst [vmem:[#allocation26_spill] sm:$0xff] %v8123_v50  ;;  %v1692_v15 = vshll.u32 %v1691_v3, 23  ;;  %v1861_v52 = vsel %vm1855_vm8, %v1858_v13, %v1860_v40  ;;  %v2146_v51 = vsel %vm2145_vm9, %v2144_v29, 0  ;;  %v1594_v41 = vxor.u32 2147483648, %v8073_v14 }
 0x1db   : > { %v12037_v36 = vand.u32 2147483647, %v8058_v60  ;;  %v1880_v11 = vadd.s32 1, %v8117_v24  ;;  %v2148_v44 = vand.u32 31, %v2146_v51  ;;  %v8135_v6 = vmul.f32 %v1800_v23, %v1798_v49 }
 0x1dc   : > { %v1670_v63 = vadd.s32 %v7963_v61, %v7961_v0  ;;  %v8139_v37 = vshll.u32 %v2142_v7, 8  ;;  %v11882_v57 = vand.u32 2147483647, %v8123_v50  ;;  %v6365_v34 = vadd.s32 4294967294, %v1994_v12 }
 0x1dd   : > { %v8132_v5 = vmul.f32 %v1488_v62, %v12037_v36  ;;  %v1877_v29 = vmul.u32 %v1870_v21, %v1861_v52  ;;  %vm1879_vm14 = vc.u32 %v8121_v56, %v8116_v1  ;;  %v2149_v60 = vsub.s32 32, %v2148_v44 }
 0x1de   : > { %v1687_v58 = vshll.u32 %v8030_v8, %v8083_v35  ;;  %v1688_v3 = vshrl.u32 %v1670_v63, %v1686_v28  ;;  %v1693_v13 = vor.u32 4788187, %v1692_v15  ;;  %v1881_v49 = vsel %vm1879_vm14, %v1880_v11, %v8117_v24 }
 0x1df   : > { %v1882_v40 = vadd.s32 %v1881_v49, %v1877_v29  ;;  %v2147_v38 = vshrl.u32 %v2146_v51, 5  ;;  %v2152_v0 = vshrl.u32 %v12006_v46, %v2149_v60  ;;  %v2155_v61 = vshrl.u32 %v12007_v54, %v2149_v60 }
 0x1e0   : > { %v2151_v31 = vshll.u32 %v12009_v55, %v2148_v44  ;;  %v2154_v21 = vshll.u32 %v12006_v46, %v2148_v44  ;;  %v2157_v22 = vshll.u32 %v12007_v54, %v2148_v44  ;;  %v2158_v7 = vshrl.u32 %v11999_v4, %v2149_v60 }
 0x1e1   : > { %vm6366_vm15 = vcmp.lt.s32.totalorder %v6365_v34, 0  ;;  %v1883_v8 = vadd.s32 536870912, %v1882_v40  ;;  %v2160_v35 = vshll.u32 %v11999_v4, %v2148_v44  ;;  %v2161_v24 = vshrl.u32 %v12010_v42, %v2149_v60 }
 0x1e2   : > { %v1689_v62 = vor.u32 %v1688_v3, %v1687_v58  ;;  %v2153_v23 = vor.u32 %v2152_v0, %v2151_v31  ;;  %v2156_v12 = vor.u32 %v2155_v61, %v2154_v21  ;;  %v2159_v28 = vor.u32 %v2158_v7, %v2157_v22 }
 0x1e3   : > { %vm1512_vm1 = vcmp.lt.s32.totalorder %v7591_v47, 0  ;;  %v8156_v15 = vshrl.u32 %v1883_v8, 30  ;;  %v2162_v52 = vor.u32 %v2161_v24, %v2160_v35  ;;  %v2163_v51 = vshll.u32 %v12010_v42, %v2148_v44 }
 0x1e4   : > { %v2164_v36 = vshrl.u32 %v12001_v43, %v2149_v60  ;;  %v1694_v11 = vand.u32 2147483647, %v1693_v13  ;;  %v8160_v63 = vsel %vm6366_vm15, 0, %v6365_v34  ;;  %vm2169_vm2 = vcmp.lt.s32.totalorder %v2147_v38, 4 }
 0x1e5   : > { %12038 = vst [vmem:[#allocation27_spill] sm:$0xff] %v8156_v15  ;;  %v2033_v29 = vand.u32 2139095040, %v8123_v50  ;;  %v1885_v58 = vshll.u32 %v8156_v15, 30  ;;  %vm2166_vm6 = vcmp.lt.s32.totalorder %v2147_v38, 1  ;;  %v2171_v49 = vsel %vm2169_vm2, %v2159_v28, 2102212464 }
 0x1e6   : > { %v2165_v3 = vor.u32 %v2164_v36, %v2163_v51  ;;  %v2150_v0 = vshrl.u32 %v12009_v55, %v2149_v60  ;;  %vm2168_vm7 = vcmp.lt.s32.totalorder %v2147_v38, 3  ;;  %v2174_v61 = vsel %vm2166_vm6, %v2153_v23, %v2156_v12 }
 0x1e7   : > { %v2175_v44 = vsel %vm2169_vm2, %v2162_v52, 920167782  ;;  %v8167_v31 = vsub.s32 %v1882_v40, %v1885_v58  ;;  %vm2167_vm8 = vcmp.lt.s32.totalorder %v2147_v38, 2  ;;  %v2178_v13 = vsel %vm2166_vm6, %v2156_v12, %v2159_v28 }
 0x1e8   : > { %v2176_v34 = vsel %vm2168_vm7, %v2159_v28, %v2175_v44  ;;  %v2170_v21 = vsel %vm2166_vm6, %v2150_v0, %v2153_v23  ;;  %v2172_v22 = vsel %vm2168_vm7, %v2156_v12, %v2171_v49  ;;  %v2179_v8 = vsel %vm2169_vm2, %v2165_v3, 1326507024 }
 0x1e9   : > { %v2177_v7 = vsel %vm2167_vm8, %v2174_v61, %v2176_v34  ;;  %v1888_v35 = vsub.s32 0, %v8167_v31  ;;  %v2180_v24 = vsel %vm2168_vm7, %v2162_v52, %v2179_v8  ;;  %v1696_v36 = vcvt.s32.f32 %v1689_v62 }
 0x1ea   : > { %v8173_v60 = vmul.u32.u64.low %v8139_v37, %v2177_v7  ;;  %v8174_v51 = vmul.u32.u64.high %v8139_v37, %v2177_v7, %v8173_v60  ;;  %v2002_v40 = vsub.s32 4294967266, %v8160_v63  ;;  %v2181_v58 = vsel %vm2167_vm8, %v2178_v13, %v2180_v24 }
 0x1eb   : > { %v2034_v28 = vshrl.u32 %v2033_v29, 23  ;;  %v6360_v23 = vmin.u32 %v1888_v35, %v8167_v31  ;;  %v8181_v12 = vmul.u32.u64.low %v8139_v37, %v2181_v58  ;;  %v8182_v49 = vmul.u32.u64.high %v8139_v37, %v2181_v58, %v8181_v12 }
 0x1ec   : > { %v2037_v52 = vand.u32 8388607, %v11882_v57  ;;  %v8191_v62 = vsel %vm1512_vm1, %v1594_v41, %v8073_v14  ;;  %v8193_v3 = vmul.f32 %v1696_v36, %v1694_v11  ;;  %v2173_v29 = vsel %vm2167_vm8, %v2170_v21, %v2172_v22 }
 0x1ed   : > { %12039 = vst [vmem:[#allocation28_spill] sm:$0xff] %v8191_v62  ;;  %v6367_v0 = vadd.s32 4294967169, %v2034_v28  ;;  %v1890_v34 = vclz %v6360_v23  ;;  %v2192_v13 = vadd.s32 1, %v8174_v51  ;;  %v1998_v7 = vsub.s32 32, %v8160_v63 }
 0x1ee   : > { %v8200_v8 = vadd.s32 127, %v2002_v40  ;;  %v11883_v14 = vand.u32 2147483647, %v7286_v30  ;;  %v1982_v41 = vadd.s32 %v8042_v2, %v8049_v17  ;;  %v2189_v38 = vmul.u32 %v8139_v37, %v2173_v29 }
 0x1ef   : > { %v2040_v35 = vadd.s32 1, %v6367_v0  ;;  %vm2191_vm9 = vc.u32 %v8182_v49, %v8173_v60  ;;  %v2038_v11 = vor.u32 8388608, %v2037_v52  ;;  %v8214_v36 = vadd.s32 %v8116_v1, %v8121_v56 }
 0x1f0   : > { %v2193_v24 = vsel %vm2191_vm9, %v2192_v13, %v8174_v51  ;;  %v6361_v40 = vadd.s32 4294967294, %v1890_v34  ;;  %v8216_v37 = vshrl.u32 %v1982_v41, %v1998_v7  ;;  %v2004_v58 = vshll.u32 %v8200_v8, 23 }
 0x1f1   : > { %vm2041_vm14 = vcmp.gt.s32.totalorder %v2040_v35, 0  ;;  %v2194_v2 = vadd.s32 %v2193_v24, %v2189_v38  ;;  %v8221_v23 = vand.u32 8388607, %v11883_v14  ;;  %v8223_v52 = vshll.u32 %v2038_v11, 8 }
 0x1f2   : > { %v2042_v17 = vsel %vm2041_vm14, %v2040_v35, 0  ;;  %v591_v51 = vshll.u32 %v12009_v55, %v7407_v59  ;;  %v592_v56 = vshrl.u32 %v12006_v46, %v7419_v10  ;;  %v594_v29 = vshll.u32 %v12006_v46, %v7407_v59 }
 0x1f3   : > { %v2044_v28 = vand.u32 31, %v2042_v17  ;;  %v2195_v12 = vadd.s32 536870912, %v2194_v2  ;;  %v595_v0 = vshrl.u32 %v12007_v54, %v7419_v10  ;;  %v598_v34 = vshrl.u32 %v11999_v4, %v7419_v10 }
 0x1f4   : > { %vm6362_vm15 = vcmp.lt.s32.totalorder %v6361_v40, 0  ;;  %v2043_v57 = vshrl.u32 %v2042_v17, 5  ;;  %v597_v22 = vshll.u32 %v12007_v54, %v7407_v59  ;;  %v593_v62 = vor.u32 %v592_v56, %v591_v51 }
 0x1f5   : > { %v2045_v1 = vsub.s32 32, %v2044_v28  ;;  %v8235_v13 = vshrl.u32 %v2195_v12, 30  ;;  %v2047_v7 = vshll.u32 %v12009_v55, %v2044_v28  ;;  %v2050_v8 = vshll.u32 %v12006_v46, %v2044_v28 }
 0x1f6   : > { %v2053_v38 = vshll.u32 %v12007_v54, %v2044_v28  ;;  %v2056_v14 = vshll.u32 %v11999_v4, %v2044_v28  ;;  %v596_v47 = vor.u32 %v595_v0, %v594_v29  ;;  %v8251_v50 = vsel %vm6362_vm15, 0, %v6361_v40 }
 0x1f7   : > { %12040 = vst [vmem:[#allocation29_spill] sm:$0xff] %v8235_v13  ;;  %v2048_v35 = vshrl.u32 %v12006_v46, %v2045_v1  ;;  %v2051_v41 = vshrl.u32 %v12007_v54, %v2045_v1  ;;  %v2054_v11 = vshrl.u32 %v11999_v4, %v2045_v1  ;;  %v2197_v24 = vshll.u32 %v8235_v13, 30 }
 0x1f8   : > { %v2057_v12 = vshrl.u32 %v12010_v42, %v2045_v1  ;;  %v2059_v17 = vshll.u32 %v12010_v42, %v2044_v28  ;;  %v2060_v4 = vshrl.u32 %v12001_v43, %v2045_v1  ;;  %v599_v13 = vor.u32 %v598_v34, %v597_v22 }
 0x1f9   : > { %v2049_v21 = vor.u32 %v2048_v35, %v2047_v7  ;;  %v2052_v44 = vor.u32 %v2051_v41, %v2050_v8  ;;  %v2055_v61 = vor.u32 %v2054_v11, %v2053_v38  ;;  %v8248_v46 = vsub.s32 %v2194_v2, %v2197_v24 }
 0x1fa   : > { %v2058_v15 = vor.u32 %v2057_v12, %v2056_v14  ;;  %vm2062_vm2 = vcmp.lt.s32.totalorder %v2043_v57, 1  ;;  %vm2064_vm6 = vcmp.lt.s32.totalorder %v2043_v57, 3  ;;  %vm2065_vm7 = vcmp.lt.s32.totalorder %v2043_v57, 4 }
 0x1fb   : > { %v2200_v7 = vsub.s32 0, %v8248_v46  ;;  %v2061_v8 = vor.u32 %v2060_v4, %v2059_v17  ;;  %v2067_v59 = vsel %vm2065_vm7, %v2055_v61, 2102212464  ;;  %v2070_v2 = vsel %vm2062_vm2, %v2049_v21, %v2052_v44 }
 0x1fc   : > { %v2071_v14 = vsel %vm2065_vm7, %v2058_v15, 920167782  ;;  %v2046_v40 = vshrl.u32 %v12009_v55, %v2045_v1  ;;  %vm2063_vm8 = vcmp.lt.s32.totalorder %v2043_v57, 2  ;;  %v1898_v56 = vsub.s32 4294967266, %v8251_v50 }
 0x1fd   : > { %v6372_v51 = vmin.u32 %v2200_v7, %v8248_v46  ;;  %v2072_v28 = vsel %vm2064_vm6, %v2055_v61, %v2071_v14  ;;  %v2074_v29 = vsel %vm2062_vm2, %v2052_v44, %v2055_v61  ;;  %v2075_v0 = vsel %vm2065_vm7, %v2061_v8, 1326507024 }
 0x1fe   : > { %v2073_v22 = vsel %vm2063_vm8, %v2070_v2, %v2072_v28  ;;  %v2066_v4 = vsel %vm2062_vm2, %v2046_v40, %v2049_v21  ;;  %v2068_v35 = vsel %vm2064_vm6, %v2052_v44, %v2067_v59  ;;  %v2076_v41 = vsel %vm2064_vm6, %v2058_v15, %v2075_v0 }
 0x1ff   : > { %v2202_v34 = vclz %v6372_v51  ;;  %v8266_v38 = vor.u32 4788187, %v2004_v58  ;;  %v2077_v1 = vsel %vm2063_vm8, %v2074_v29, %v2076_v41  ;;  %v590_v21 = vshrl.u32 %v12009_v55, %v7419_v10 }
 0x200   : > { %v8270_v11 = vmul.u32.u64.low %v8223_v52, %v2073_v22  ;;  %v8271_v24 = vmul.u32.u64.high %v8223_v52, %v2073_v22, %v8270_v11  ;;  %v8275_v61 = vmul.u32.u64.low %v8223_v52, %v2077_v1  ;;  %v8276_v17 = vmul.u32.u64.high %v8223_v52, %v2077_v1, %v8275_v61 }
 0x201   : > { %v6373_v12 = vadd.s32 4294967294, %v2202_v34  ;;  %v2069_v44 = vsel %vm2063_vm8, %v2066_v4, %v2068_v35  ;;  %v582_v15 = vor.u32 8388608, %v8221_v23  ;;  %vm606_vm9 = vcmp.lt.s32.totalorder %v7416_v9, 1 }
 0x202   : > { %vm608_vm14 = vcmp.lt.s32.totalorder %v7416_v9, 3  ;;  %v1899_v58 = vadd.s32 127, %v1898_v56  ;;  %v614_v7 = vsel %vm606_vm9, %v593_v62, %v596_v47  ;;  %v1894_v59 = vsub.s32 32, %v8251_v50 }
 0x203   : > { %vm6374_vm15 = vcmp.lt.s32.totalorder %v6373_v12, 0  ;;  %v616_v8 = vsel %vm608_vm14, %v599_v13, %v7612_v16  ;;  %v2088_v57 = vadd.s32 1, %v8271_v24  ;;  %v618_v23 = vsel %vm606_vm9, %v596_v47, %v599_v13 }
 0x204   : > { %v2205_v10 = vsel %vm6374_vm15, 0, %v6373_v12  ;;  %v2085_v14 = vmul.u32 %v8223_v52, %v2069_v44  ;;  %vm607_vm2 = vcmp.lt.s32.totalorder %v7416_v9, 2  ;;  %v611_v51 = vsel %vm609_vm10, %v599_v13, 2102212464  ;;  %v12042_v44 = vld [vmem:[#allocation2_spill] sm:$0xff]  ;;  %v12047_v9 = vld [vmem:[#allocation12_spill] sm:$0xff] }
 0x205   : > { %v2210_v2 = vsub.s32 4294967266, %v2205_v10  ;;  %vm2087_vm6 = vc.u32 %v8276_v17, %v8270_v11  ;;  %v617_v16 = vsel %vm607_vm2, %v614_v7, %v616_v8  ;;  %v620_v40 = vsel %vm608_vm14, %v7491_v32, %v7628_v53  ;;  %v12048_v8 = vld [vmem:[#allocation5_spill] sm:$0xff] }
 0x206   : > { %v622_v28 = vshll.u32 %v582_v15, 8  ;;  %v1900_v56 = vshll.u32 %v1899_v58, 23  ;;  %v2089_v52 = vsel %vm2087_vm6, %v2088_v57, %v8271_v24  ;;  %v610_v22 = vsel %vm606_vm9, %v590_v21, %v593_v62 }
 0x207   : > { %v621_v13 = vsel %vm607_vm2, %v618_v23, %v620_v40  ;;  %v2090_v29 = vadd.s32 %v2089_v52, %v2085_v14  ;;  %v612_v0 = vsel %vm608_vm14, %v596_v47, %v611_v51  ;;  %v1896_v35 = vshrl.u32 %v8214_v36, %v1894_v59 }
 0x208   : > { %v8312_v34 = vmul.u32.u64.low %v622_v28, %v621_v13  ;;  %v8313_v4 = vmul.u32.u64.high %v622_v28, %v621_v13, %v8312_v34  ;;  %v2211_v32 = vadd.s32 127, %v2210_v2  ;;  %vm1408_vm10 = vcmp.lt.s32.totalorder %v7687_v27, 0 }
 0x209   : > { %v8316_v53 = vmul.u32.u64.low %v622_v28, %v617_v16  ;;  %v8317_v41 = vmul.u32.u64.high %v622_v28, %v617_v16, %v8316_v53  ;;  %v12041_v62 = vshll.u32 %v8097_v26, %v8160_v63  ;;  %v2006_v24 = vand.u32 2147483647, %v8266_v38  ;;  %v12046_v26 = vld [vmem:[#allocation15_spill] sm:$0xff] }
 0x20a   : > { %v2206_v47 = vsub.s32 32, %v2205_v10  ;;  %v2091_v12 = vadd.s32 536870912, %v2090_v29  ;;  %v1895_v61 = vshll.u32 %v8167_v31, %v8251_v50  ;;  %v1901_v36 = vor.u32 4788187, %v1900_v56  ;;  %v12049_v56 = vld [vmem:[#allocation7_spill] sm:$0xff] }
 0x20b   : > { %v2001_v1 = vor.u32 %v8216_v37, %v12041_v62  ;;  %v613_v21 = vsel %vm607_vm2, %v610_v22, %v612_v0  ;;  %v12043_v15 = vand.u32 2147483647, %v12042_v44  ;;  %vm11896_vm8 = vcmp.lt.s32.totalorder %v12046_v26, 0 }
 0x20c   : > { %vm1616_vm9 = vcmp.lt.s32.totalorder %v7813_v33, 0  ;;  %v2190_v63 = vadd.s32 %v8173_v60, %v8182_v49  ;;  %v8340_v37 = vshrl.u32 %v2091_v12, 30  ;;  %vm631_vm14 = vc.u32 %v8313_v4, %v8316_v53 }
 0x20d   : > { %vm8332_vm7 = vcmp.le.f32.partialorder %v12043_v15, 0.7853982  ;;  %v1897_v31 = vor.u32 %v1896_v35, %v1895_v61  ;;  %v2212_v38 = vshll.u32 %v2211_v32, 23  ;;  %v632_v7 = vadd.s32 1, %v8317_v41  ;;  %v12050_v35 = vld [vmem:[#allocation4_spill] sm:$0xff] }
 0x20e   : > { %v766_v50 = vsel %vm8332_vm7, %v12042_v44, %v12047_v9  ;;  %v764_v59 = vsub.s32 4, %v12048_v8  ;;  %v2008_v57 = vcvt.s32.f32 %v2001_v1  ;;  %v2208_v23 = vshrl.u32 %v2190_v63, %v2206_v47 }
 0x20f   : > { %v2093_v60 = vshll.u32 %v8340_v37, 30  ;;  %v629_v49 = vmul.u32 %v622_v28, %v613_v21  ;;  %v1902_v2 = vand.u32 2147483647, %v1901_v36  ;;  %v2207_v14 = vshll.u32 %v8248_v46, %v2205_v10 }
 0x210   : > { %v633_v51 = vsel %vm631_vm14, %v632_v7, %v8317_v41  ;;  %6961 = vcosq.f32 %v766_v50  ;;  %v868_v52 = vsub.s32 4, %v12049_v56  ;;  %vm11894_vm15 = vcmp.lt.s32.totalorder %v7874_v18, 0 }
 0x211   : > { %v8353_v16 = vsub.s32 %v2090_v29, %v2093_v60  ;;  %v634_v40 = vadd.s32 %v633_v51, %v629_v49  ;;  %6963 = vsinq.f32 %v766_v50  ;;  %v2009_v22 = vmul.f32 %v2008_v57, %v2006_v24  ;;  %v12055_v24 = vld [vmem:[#allocation17_spill] sm:$0xff] }
 0x212   : > { %v1904_v13 = vcvt.s32.f32 %v1897_v31  ;;  %v2213_v0 = vor.u32 4788187, %v2212_v38  ;;  %v765_v28 = vsel %vm680_vm11, %v764_v59, %v12048_v8  ;;  %v2209_v34 = vor.u32 %v2208_v23, %v2207_v14 }
 0x213   : > { %v2096_v46 = vsub.s32 0, %v8353_v16  ;;  %v635_v10 = vadd.s32 536870912, %v634_v40  ;;  %v12051_v29 = vand.u32 2147483647, %v12050_v35  ;;  %v12054_v41 = vxor.u32 2147483648, %v8132_v5 }
 0x214   : > { %vm11895_vm6 = vcmp.lt.s32.totalorder %v8008_v39, 0  ;;  %v1905_v1 = vmul.f32 %v1904_v13, %v1902_v2  ;;  %v767_v36 = vsel %vm8332_vm7, 0, %v765_v28  ;;  %v869_v21 = vsel %vm784_vm13, %v868_v52, %v12049_v56  ;;  %v12062_v2 = vld [vmem:[#allocation16_spill] sm:$0xff]  ;;  %v12066_v13 = vld [vmem:[#allocation6_spill] sm:$0xff]  ;;  %v12087_v52 = vld [vmem:[#allocation19_spill] sm:$0xff] }
 0x215   : > { %vm8363_vm2 = vcmp.le.f32.partialorder %v12051_v29, 0.7853982  ;;  %v8372_v62 = vsel %vm1408_vm10, %v12054_v41, %v8132_v5  ;;  %v6368_v12 = vmin.u32 %v2096_v46, %v8353_v16  ;;  %v636_v61 = vshrl.u32 %v635_v10, 30 }
 0x216   : > { %v870_v47 = vsel %vm8363_vm2, %v12050_v35, %v12055_v24  ;;  %v12056_v5 = vxor.u32 2147483648, %v8135_v6  ;;  %v12057_v63 = vxor.u32 2147483648, %v8193_v3  ;;  %v2010_v58 = vxor.u32 2147483648, %v2009_v22 }
 0x217   : > { %v2214_v50 = vand.u32 2147483647, %v2213_v0  ;;  %v2216_v31 = vcvt.s32.f32 %v2209_v34  ;;  %v2098_v38 = vclz %v6368_v12  ;;  %v637_v7 = vshll.u32 %v636_v61, 30 }
 0x218   : > { %v8390_v15 = vsel %vm11896_vm8, %v12056_v5, %v8135_v6  ;;  %v8397_v9 = vsel %vm1616_vm9, %v12057_v63, %v8193_v3  ;;  %6965 = vcosq.f32 %v870_v47  ;;  %v771_v8 = vadd.s32 3, %v767_v36  ;;  %v12058_v6 = vld [vmem:[#allocation3_spill] sm:$0xff]  ;;  %v12067_v63 = vld [vmem:[#allocation10_spill] sm:$0xff] }
 0x219   : > { %v871_v59 = vsel %vm8363_vm2, 0, %v869_v21  ;;  %6967 = vsinq.f32 %v870_v47  ;;  %v12059_v57 = vand.u32 2147483647, %v12058_v6  ;;  %v1906_v60 = vxor.u32 2147483648, %v1905_v1 }
 0x21a   : > { %v6369_v3 = vadd.s32 4294967294, %v2098_v38  ;;  %v8407_v49 = vsub.s32 %v634_v40, %v637_v7  ;;  %v8413_v51 = vmul.f32 %v2216_v31, %v2214_v50  ;;  %v12063_v56 = vand.u32 2147483647, %v7286_v30 }
 0x21b   : > { %vm8403_vm11 = vcmp.le.f32.partialorder %v12059_v57, 0.7853982  ;;  %vm576_vm7 = vcmp.lt.s32.totalorder %v7286_v30, 0  ;;  %v972_v0 = vsub.s32 4, %v12066_v13  ;;  %v8425_v40 = vsel %vm11894_vm15, %v2010_v58, %v2009_v22 }
 0x21c   : > { %v974_v14 = vsel %vm8403_vm11, %v12058_v6, %v12062_v2  ;;  %vm8417_vm13 = vcmp.le.f32.partialorder %v12063_v56, 0.7853982  ;;  %vm6370_vm14 = vcmp.lt.s32.totalorder %v6369_v3, 0  ;;  %v640_v28 = vsub.s32 0, %v8407_v49 }
 0x21d   : > { %v875_v34 = vadd.s32 3, %v871_v59  ;;  %v2101_v46 = vsel %vm6370_vm14, 0, %v6369_v3  ;;  %v660_v10 = vsub.s32 4, %v636_v61  ;;  %v772_v29 = vand.u32 3, %v771_v8  ;;  %v6962_v32 = vpop.eup %6961 }
 0x21e   : > { %6969 = vcosq.f32 %v974_v14  ;;  %v8430_v41 = vsel %vm11895_vm6, %v1906_v60, %v1905_v1  ;;  %v2086_v24 = vadd.s32 %v8270_v11, %v8276_v17  ;;  %v2106_v47 = vsub.s32 4294967266, %v2101_v46  ;;  %v6964_v12 = vpop.eup %6963 }
 0x21f   : > { %v6312_v22 = vmin.u32 %v640_v28, %v8407_v49  ;;  %v2218_v36 = vxor.u32 2147483648, %v8413_v51  ;;  %v630_v21 = vadd.s32 %v8316_v53, %v8313_v4  ;;  %v973_v5 = vsel %vm888_vm12, %v972_v0, %v12066_v13 }
 0x220   : > { %v1076_v58 = vsub.s32 4, %v12067_v63  ;;  %v2107_v1 = vadd.s32 127, %v2106_v47  ;;  %v8442_v31 = vand.u32 3, %v875_v34  ;;  %6971 = vsinq.f32 %v974_v14 }
 0x221   : > { %v642_v50 = vclz %v6312_v22  ;;  %v2102_v11 = vsub.s32 32, %v2101_v46  ;;  %v661_v17 = vsel %vm576_vm7, %v660_v10, %v636_v61  ;;  %vm773_vm2 = vcmp.lt.s32.totalorder %v772_v29, 2 }
 0x222   : > { %v778_v38 = vxor.u32 2147483648, %v6962_v32  ;;  %v775_v8 = vxor.u32 2147483648, %v6964_v12  ;;  %v975_v4 = vsel %vm8403_vm11, 0, %v973_v5  ;;  %v12068_v53 = vand.u32 2147483647, %v7426_v20 }
 0x223   : > { %v6313_v7 = vadd.s32 4294967294, %v642_v50  ;;  %v2108_v57 = vshll.u32 %v2107_v1, 23  ;;  %vm770_vm14 = vweird.f32 %v12042_v44  ;;  %vm774_vm15 = vcmp.eq.s32.totalorder %v772_v29, 0 }
 0x224   : > { %vm8450_vm12 = vcmp.le.f32.partialorder %v12068_v53, 0.7853982  ;;  %vm777_vm6 = vcmp.eq.s32.totalorder %v772_v29, 2  ;;  %v663_v23 = vsel %vm8417_vm13, 0, %v661_v17  ;;  %vm878_vm11 = vcmp.eq.s32.totalorder %v8442_v31, 0 }
 0x225   : > { %v1078_v61 = vsel %vm8450_vm12, %v7426_v20, %v7972_v19  ;;  %vm6314_vm8 = vcmp.lt.s32.totalorder %v6313_v7, 0  ;;  %v1077_v60 = vsel %vm992_vm3, %v1076_v58, %v12067_v63  ;;  %v6966_v3 = vpop.eup %6965  ;;  %v2104_v2 = vshrl.u32 %v2086_v24, %v2102_v11 }
 0x226   : > { %v645_v14 = vsel %vm6314_vm8, 0, %v6313_v7  ;;  %v779_v56 = vsel %vm777_vm6, %v778_v38, %v6964_v12  ;;  %v979_v13 = vadd.s32 3, %v975_v4  ;;  %v6968_v0 = vpop.eup %6967  ;;  %v776_v10 = vsel %vm774_vm15, %v6962_v32, %v775_v8 }
 0x227   : > { %v646_v28 = vsub.s32 32, %v645_v14  ;;  %v650_v34 = vsub.s32 4294967266, %v645_v14  ;;  %6973 = vcosq.f32 %v1078_v61  ;;  %v2103_v19 = vshll.u32 %v8353_v16, %v2101_v46 }
 0x228   : > { %v2109_v47 = vor.u32 4788187, %v2108_v57  ;;  %v667_v22 = vadd.s32 3, %v663_v23  ;;  %6975 = vsinq.f32 %v1078_v61  ;;  %v647_v5 = vshll.u32 %v8407_v49, %v645_v14  ;;  %v12074_v49 = vld [vmem:[#allocation9_spill] sm:$0xff] }
 0x229   : > { %v648_v1 = vshrl.u32 %v630_v21, %v646_v28  ;;  %v651_v50 = vadd.s32 127, %v650_v34  ;;  %v882_v63 = vxor.u32 2147483648, %v6966_v3  ;;  %v2105_v58 = vor.u32 %v2104_v2, %v2103_v19 }
 0x22a   : > { %v780_v24 = vsel %vm773_vm2, %v776_v10, %v779_v56  ;;  %v879_v12 = vxor.u32 2147483648, %v6968_v0  ;;  %v8468_v11 = vand.u32 3, %v979_v13  ;;  %vm877_vm3 = vcmp.lt.s32.totalorder %v8442_v31, 2 }
 0x22b   : > { %v6970_v17 = vpop.eup %6969  ;;  %v649_v38 = vor.u32 %v648_v1, %v647_v5  ;;  %v652_v32 = vshll.u32 %v651_v50, 23  ;;  %v12071_v16 = vand.u32 2147483647, %v7363_v48  ;;  %v1180_v21 = vsub.s32 4, %v12074_v49  ;;  %v12080_v5 = vld [vmem:[#allocation26_spill] sm:$0xff]  ;;  %v12081_v50 = vld [vmem:[#allocation8_spill] sm:$0xff] }
 0x22c   : > { %v2110_v7 = vand.u32 2147483647, %v2109_v47  ;;  %vm881_vm15 = vcmp.eq.s32.totalorder %v8442_v31, 2  ;;  %v1079_v29 = vsel %vm8450_vm12, 0, %v1077_v60  ;;  %v8485_v53 = vand.u32 3, %v667_v22  ;;  %v12079_v47 = vld [vmem:[#allocation22_spill] sm:$0xff] }
 0x22d   : > { %vm8473_vm8 = vcmp.le.f32.partialorder %v12071_v16, 0.7853982  ;;  %v653_v4 = vor.u32 4788187, %v652_v32  ;;  %v8489_v57 = vsel %vm770_vm14, nan, %v780_v24  ;;  %v883_v61 = vsel %vm881_vm15, %v882_v63, %v6968_v0  ;;  %v6972_v23 = vpop.eup %6971  ;;  %v12085_v24 = vld [vmem:[#allocation13_spill] sm:$0xff] }
 0x22e   : > { %v1182_v8 = vsel %vm8473_vm8, %v7363_v48, %v7905_v45  ;;  %v2112_v2 = vcvt.s32.f32 %v2105_v58  ;;  %v880_v14 = vsel %vm878_vm11, %v6966_v3, %v879_v12  ;;  %vm985_vm6 = vcmp.eq.s32.totalorder %v8468_v11, 2  ;;  %v12078_v3 = vld [vmem:[#allocation14_spill] sm:$0xff]  ;;  %v12086_v16 = vld [vmem:[#allocation21_spill] sm:$0xff] }
 0x22f   : > { %v986_v59 = vxor.u32 2147483648, %v6970_v17  ;;  %v654_v60 = vand.u32 2147483647, %v653_v4  ;;  %v656_v56 = vcvt.s32.f32 %v649_v38  ;;  %vm874_vm2 = vweird.f32 %v12050_v35 }
 0x230   : > { %v1181_v45 = vsel %vm1096_vm0, %v1180_v21, %v12074_v49  ;;  %6977 = vcosq.f32 %v1182_v8  ;;  %v2113_v44 = vmul.f32 %v2112_v2, %v2110_v7  ;;  %v12075_v13 = vand.u32 2147483647, %v7553_v25 }
 0x231   : > { %6979 = vsinq.f32 %v1182_v8  ;;  %v1284_v28 = vsub.s32 4, %v12078_v3  ;;  %v657_v34 = vmul.f32 %v656_v56, %v654_v60  ;;  %v983_v10 = vxor.u32 2147483648, %v6972_v23 }
 0x232   : > { %vm8500_vm12 = vcmp.le.f32.partialorder %v12075_v13, 0.7853982  ;;  %v1083_v19 = vadd.s32 3, %v1079_v29  ;;  %vm11897_vm0 = vcmp.lt.s32.totalorder %v12080_v5, 0  ;;  %v1183_v1 = vsel %vm8473_vm8, 0, %v1181_v45 }
 0x233   : > { %v1286_v22 = vsel %vm8500_vm12, %v7553_v25, %v12079_v47  ;;  %v12082_v63 = vand.u32 2147483647, %v12081_v50  ;;  %v1388_v12 = vsub.s32 4, %v12085_v24  ;;  %v658_v38 = vxor.u32 2147483648, %v657_v34 }
 0x234   : > { %6981 = vcosq.f32 %v1286_v22  ;;  %vm978_vm11 = vweird.f32 %v12058_v6  ;;  %v1285_v32 = vsel %vm1200_vm5, %v1284_v28, %v12078_v3  ;;  %v6974_v49 = vpop.eup %6973  ;;  %v2114_v21 = vxor.u32 2147483648, %v2113_v44 }
 0x235   : > { %vm8514_vm14 = vcmp.le.f32.partialorder %v12082_v63, 0.7853982  ;;  %6983 = vsinq.f32 %v1286_v22  ;;  %v884_v7 = vsel %vm877_vm3, %v880_v14, %v883_v61  ;;  %vm982_vm8 = vcmp.eq.s32.totalorder %v8468_v11, 0  ;;  %v6976_v8 = vpop.eup %6975 }
 0x236   : > { %v1390_v46 = vsel %vm8514_vm14, %v12081_v50, %v12086_v16  ;;  %v987_v29 = vsel %vm985_vm6, %v986_v59, %v6972_v23  ;;  %v659_v4 = vsel %vm576_vm7, %v658_v38, %v657_v34  ;;  %v984_v2 = vsel %vm982_vm8, %v6970_v17, %v983_v10 }
 0x237   : > { %v1084_v60 = vand.u32 3, %v1083_v19  ;;  %v1389_v56 = vsel %vm1304_vm4, %v1388_v12, %v12085_v24  ;;  %v662_v31 = vsel %vm8417_vm13, %v7286_v30, %v659_v4  ;;  %v1187_v61 = vadd.s32 3, %v1183_v1  ;;  %v12091_v12 = vld [vmem:[#allocation11_spill] sm:$0xff] }
 0x238   : > { %v1287_v14 = vsel %vm8500_vm12, 0, %v1285_v32  ;;  %6985 = vcosq.f32 %v1390_v46  ;;  %v1087_v23 = vxor.u32 2147483648, %v6976_v8  ;;  %v1090_v59 = vxor.u32 2147483648, %v6974_v49 }
 0x239   : > { %6987 = vcosq.f32 %v662_v31  ;;  %v1391_v17 = vsel %vm8514_vm14, 0, %v1389_v56  ;;  %v8546_v45 = vsel %vm874_vm2, nan, %v884_v7  ;;  %vm981_vm4 = vcmp.lt.s32.totalorder %v8468_v11, 2 }
 0x23a   : > { %6989 = vsinq.f32 %v662_v31  ;;  %v1492_v13 = vsub.s32 4, %v12087_v52  ;;  %v988_v3 = vsel %vm981_vm4, %v984_v2, %v987_v29  ;;  %vm1082_vm5 = vweird.f32 %v7426_v20  ;;  %v12100_v20 = vld [vmem:[#allocation23_spill] sm:$0xff] }
 0x23b   : > { %vm1086_vm13 = vcmp.eq.s32.totalorder %v1084_v60, 0  ;;  %vm1089_vm7 = vcmp.eq.s32.totalorder %v1084_v60, 2  ;;  %v1291_v0 = vadd.s32 3, %v1287_v14  ;;  %v8551_v28 = vand.u32 3, %v1187_v61 }
 0x23c   : > { %6991 = vsinq.f32 %v1390_v46  ;;  %v1395_v34 = vadd.s32 3, %v1391_v17  ;;  %v12088_v10 = vand.u32 2147483647, %v7687_v27  ;;  %v8561_v11 = vsel %vm11897_vm0, %v2114_v21, %v2113_v44 }
 0x23d   : > { %v1088_v19 = vsel %vm1086_vm13, %v6974_v49, %v1087_v23  ;;  %v1091_v47 = vsel %vm1089_vm7, %v1090_v59, %v6976_v8  ;;  %v6978_v1 = vpop.eup %6977  ;;  %v8569_v63 = vsel %vm978_vm11, nan, %v988_v3  ;;  %vm1085_vm15 = vcmp.lt.s32.totalorder %v1084_v60, 2  ;;  %v12096_v49 = vld [vmem:[#allocation28_spill] sm:$0xff] }
 0x23e   : > { %vm8555_vm3 = vcmp.le.f32.partialorder %v12088_v10, 0.7853982  ;;  %v1493_v58 = vsel %vm1408_vm10, %v1492_v13, %v12087_v52  ;;  %v6980_v44 = vpop.eup %6979  ;;  %v8574_v24 = vand.u32 3, %v1291_v0  ;;  %v12092_v38 = vand.u32 2147483647, %v12091_v12 }
 0x23f   : > { %v1494_v22 = vsel %vm8555_vm3, %v7687_v27, %v8372_v62  ;;  %v12095_v62 = vld [vmem:[#allocation18_spill] sm:$0xff]  ;;  %vm673_vm2 = vcmp.eq.s32.totalorder %v8485_v53, 2  ;;  %v1092_v16 = vsel %vm1085_vm15, %v1088_v19, %v1091_v47  ;;  %vm1189_vm12 = vcmp.lt.s32.totalorder %v8551_v28, 2 }
 0x240   : > { %6993 = vcosq.f32 %v1494_v22  ;;  %vm8578_vm6 = vcmp.le.f32.partialorder %v12092_v38, 0.7853982  ;;  %v1596_v6 = vsub.s32 4, %v12095_v62  ;;  %vm1190_vm10 = vcmp.eq.s32.totalorder %v8551_v28, 0 }
 0x241   : > { %6995 = vsinq.f32 %v1494_v22  ;;  %v8586_v46 = vand.u32 3, %v1395_v34  ;;  %v1598_v21 = vsel %vm8578_vm6, %v12091_v12, %v12096_v49  ;;  %v6982_v7 = vpop.eup %6981  ;;  %vm670_vm14 = vcmp.eq.s32.totalorder %v8485_v53, 0  ;;  %v12101_v49 = vld [vmem:[#allocation20_spill] sm:$0xff] }
 0x242   : > { %v1194_v29 = vxor.u32 2147483648, %v6978_v1  ;;  %v1495_v8 = vsel %vm8555_vm3, 0, %v1493_v58  ;;  %v1597_v4 = vsel %vm1512_vm1, %v1596_v6, %v12095_v62  ;;  %6997 = vcosq.f32 %v1598_v21  ;;  %v6984_v2 = vpop.eup %6983 }
 0x243   : > { %vm669_vm11 = vcmp.lt.s32.totalorder %v8485_v53, 2  ;;  %v1191_v60 = vxor.u32 2147483648, %v6980_v44  ;;  %vm1193_vm4 = vcmp.eq.s32.totalorder %v8551_v28, 2  ;;  %v1298_v56 = vxor.u32 2147483648, %v6982_v7 }
 0x244   : > { %6999 = vsinq.f32 %v1598_v21  ;;  %vm666_vm13 = vweird.f32 %v7286_v30  ;;  %vm1293_vm7 = vcmp.lt.s32.totalorder %v8574_v24, 2  ;;  %vm1294_vm3 = vcmp.eq.s32.totalorder %v8574_v24, 0 }
 0x245   : > { %v1295_v31 = vxor.u32 2147483648, %v6984_v2  ;;  %v1599_v61 = vsel %vm8578_vm6, 0, %v1597_v4  ;;  %v8607_v14 = vsel %vm1082_vm5, nan, %v1092_v16  ;;  %vm1297_vm1 = vcmp.eq.s32.totalorder %v8574_v24, 2  ;;  %v6986_v52 = vpop.eup %6985 }
 0x246   : > { %v1499_v23 = vadd.s32 3, %v1495_v8  ;;  %v12097_v59 = vand.u32 2147483647, %v7813_v33  ;;  %vm1186_vm0 = vweird.f32 %v7363_v48  ;;  %v1195_v13 = vsel %vm1193_vm4, %v1194_v29, %v6980_v44  ;;  %v6988_v34 = vpop.eup %6987 }
 0x247   : > { %vm1290_vm8 = vweird.f32 %v7553_v25  ;;  %vm1398_vm6 = vcmp.eq.s32.totalorder %v8586_v46, 0  ;;  %v1700_v3 = vsub.s32 4, %v12100_v20  ;;  %v1192_v10 = vsel %vm1190_vm10, %v6978_v1, %v1191_v60  ;;  %v6990_v47 = vpop.eup %6989 }
 0x248   : > { %vm8612_vm15 = vcmp.le.f32.partialorder %v12097_v59, 0.7853982  ;;  %v1299_v35 = vsel %vm1297_vm1, %v1298_v56, %v6984_v2  ;;  %vm1397_vm5 = vcmp.lt.s32.totalorder %v8586_v46, 2  ;;  %v1603_v19 = vadd.s32 3, %v1599_v61 }
 0x249   : > { %v1702_v0 = vsel %vm8612_vm15, %v7813_v33, %v8397_v9  ;;  %v674_v22 = vxor.u32 2147483648, %v6988_v34  ;;  %v1296_v58 = vsel %vm1294_vm3, %v6982_v7, %v1295_v31  ;;  %v1701_v44 = vsel %vm1616_vm9, %v1700_v3, %v12100_v20  ;;  %v6992_v32 = vpop.eup %6991 }
 0x24a   : > { %7001 = vcosq.f32 %v1702_v0  ;;  %v671_v9 = vxor.u32 2147483648, %v6990_v47  ;;  %vm1401_vm4 = vcmp.eq.s32.totalorder %v8586_v46, 2  ;;  %v1402_v38 = vxor.u32 2147483648, %v6986_v52 }
 0x24b   : > { %7003 = vsinq.f32 %v1702_v0  ;;  %v1500_v1 = vand.u32 3, %v1499_v23  ;;  %v675_v62 = vsel %vm673_vm2, %v674_v22, %v6990_v47  ;;  %v1196_v6 = vsel %vm1189_vm12, %v1192_v10, %v1195_v13  ;;  %v12113_v47 = vld [vmem:[#allocation27_spill] sm:$0xff] }
 0x24c   : > { %vm1394_vm10 = vweird.f32 %v12081_v50  ;;  %v1703_v16 = vsel %vm8612_vm15, 0, %v1701_v44  ;;  %v1804_v21 = vsub.s32 4, %v12101_v49  ;;  %v672_v7 = vsel %vm670_vm14, %v6988_v34, %v671_v9 }
 0x24d   : > { %v1300_v29 = vsel %vm1293_vm7, %v1296_v58, %v1299_v35  ;;  %v1399_v8 = vxor.u32 2147483648, %v6992_v32  ;;  %v12102_v4 = vand.u32 2147483647, %v12046_v26  ;;  %v6994_v28 = vpop.eup %6993  ;;  %v676_v60 = vsel %vm669_vm11, %v672_v7, %v675_v62 }
 0x24e   : > { %v8653_v56 = vand.u32 3, %v1603_v19  ;;  %v1707_v31 = vadd.s32 3, %v1703_v16  ;;  %v6996_v61 = vpop.eup %6995  ;;  %v677_v23 = vsel %vm666_vm13, nan, %v676_v60  ;;  %v1403_v17 = vsel %vm1401_vm4, %v1402_v38, %v6992_v32  ;;  %v12112_v19 = vld [vmem:[#allocation24_spill] sm:$0xff] }
 0x24f   : > { %vm8647_vm9 = vcmp.le.f32.partialorder %v12102_v4, 0.7853982  ;;  %v1400_v59 = vsel %vm1398_vm6, %v6986_v52, %v1399_v8  ;;  %v1506_v53 = vxor.u32 2147483648, %v6994_v28  ;;  %vm12105_vm2 = vcmask 261120  }
 0x250   : > { %v1806_v24 = vsel %vm8647_vm9, %v12046_v26, %v8390_v15  ;;  %6667 = vmatprep.mubr.msk.f32.mxu1 %vm12105_vm2, %v677_v23  ;;  %vm1501_vm12 = vcmp.lt.s32.totalorder %v1500_v1, 2  ;;  %v1503_v13 = vxor.u32 2147483648, %v6996_v61  ;;  %vm12106_vm14 = vcmp.lt.s32.totalorder %v12046_v26, 0  ;;  %v6998_v15 = vpop.eup %6997  ;;  %vm12107_vm11 = vmmov %vm12105_vm2 }
 0x251   : > { %v1805_v20 = vsel %vm12106_vm14, %v1804_v21, %v12101_v49  ;;  %7005 = vcosq.f32 %v1806_v24  ;;  %6668 = vmatmul.mubr.msk.f32.vlgmr.msra.gmra.mxu1 %vm12107_vm11, %v8489_v57  ;;  %v1197_v30 = vsel %vm1186_vm0, nan, %v1196_v6  ;;  %v1301_v52 = vsel %vm1290_vm8, nan, %v1300_v29  ;;  %v7000_v3 = vpop.eup %6999  ;;  %vm12108_vm1 = vmmov %vm12105_vm2 }
 0x252   : > { %vm1498_vm13 = vweird.f32 %v7687_v27  ;;  %vm1502_vm7 = vcmp.eq.s32.totalorder %v1500_v1, 0  ;;  %vm1505_vm3 = vcmp.eq.s32.totalorder %v1500_v1, 2  ;;  %6670 = vmatprep.mubr.msk.f32.mxu1 %vm12108_vm1, %v8546_v45  ;;  %v1404_v0 = vsel %vm1397_vm5, %v1400_v59, %v1403_v17  ;;  %vm12114_vm6 = vmmov %vm12108_vm1 }
 0x253   : > { %vm1605_vm15 = vcmp.lt.s32.totalorder %v8653_v56, 2  ;;  %v1708_v57 = vand.u32 3, %v1707_v31  ;;  %7007 = vsinq.f32 %v1806_v24  ;;  %v1507_v48 = vsel %vm1505_vm3, %v1506_v53, %v6996_v61 }
 0x254   : > { %v1610_v34 = vxor.u32 2147483648, %v6998_v15  ;;  %v1807_v25 = vsel %vm8647_vm9, 0, %v1805_v20  ;;  %v12109_v10 = vand.u32 2147483647, %v8008_v39  ;;  %vm2136_vm8 = vcmp.lt.s32.totalorder %v12112_v19, 0  ;;  %vm12115_vm9 = vmmov %vm12108_vm1 }
 0x255   : > { %v1504_v45 = vsel %vm1502_vm7, %v6994_v28, %v1503_v13  ;;  %v1607_v46 = vxor.u32 2147483648, %v7000_v3  ;;  %v1908_v22 = vsub.s32 4, %v12113_v47  ;;  %6671 = vmatmul.mubr.msk.f32.gmra.mxu1 %vm12114_vm6, %v8569_v63  ;;  %v1405_v44 = vsel %vm1394_vm10, nan, %v1404_v0  ;;  %vm12121_vm7 = vmmov %vm12108_vm1 }
 0x256   : > { %vm8685_vm0 = vcmp.le.f32.partialorder %v12109_v10, 0.7853982  ;;  %vm1606_vm5 = vcmp.eq.s32.totalorder %v8653_v56, 0  ;;  %vm1609_vm4 = vcmp.eq.s32.totalorder %v8653_v56, 2  ;;  %6673 = vmatprep.mubr.msk.f32.mxu1 %vm12115_vm9, %v8607_v14  ;;  %vm1709_vm2 = vcmp.lt.s32.totalorder %v1708_v57, 2  ;;  %v12120_v14 = vld [vmem:[#allocation25_spill] sm:$0xff] }
 0x257   : > { %v1910_v58 = vsel %vm8685_vm0, %v8008_v39, %v8430_v41  ;;  %v7002_v9 = vpop.eup %7001  ;;  %v1811_v38 = vadd.s32 3, %v1807_v25  ;;  %vm12116_vm14 = vcmp.lt.s32.totalorder %v8008_v39, 0  ;;  %v1508_v50 = vsel %vm1501_vm12, %v1504_v45, %v1507_v48  ;;  %vm12122_vm12 = vmmov %vm12108_vm1 }
 0x258   : > { %7009 = vcosq.f32 %v1910_v58  ;;  %v1909_v41 = vsel %vm12116_vm14, %v1908_v22, %v12113_v47  ;;  %v7004_v63 = vpop.eup %7003  ;;  %v1611_v32 = vsel %vm1609_vm4, %v1610_v34, %v7000_v3  ;;  %vm1713_vm10 = vcmp.eq.s32.totalorder %v1708_v57, 2 }
 0x259   : > { %7011 = vsinq.f32 %v1910_v58  ;;  %v1714_v62 = vxor.u32 2147483648, %v7002_v9  ;;  %v1608_v6 = vsel %vm1606_vm5, %v6998_v15, %v1607_v46  ;;  %v1711_v16 = vxor.u32 2147483648, %v7004_v63  ;;  %6674 = vmatmul.mubr.msk.f32.gmra.mxu1 %vm12121_vm7, %v1197_v30  ;;  %vm12128_vm5 = vmmov %vm12121_vm7  ;;  %v12130_v15 = vld [vmem:[#allocation29_spill] sm:$0xff] }
 0x25a   : > { %v12117_v49 = vand.u32 2147483647, %v7874_v18  ;;  %v2012_v7 = vsub.s32 4, %v12120_v14  ;;  %vm1710_vm3 = vcmp.eq.s32.totalorder %v1708_v57, 0  ;;  %v1911_v1 = vsel %vm8685_vm0, 0, %v1909_v41  ;;  %6676 = vmatprep.mubr.msk.f32.mxu1 %vm12122_vm12, %v1301_v52  ;;  %vm12134_vm14 = vmmov %vm12128_vm5 }
 0x25b   : > { %v1715_v29 = vsel %vm1713_vm10, %v1714_v62, %v7004_v63  ;;  %v1509_v4 = vsel %vm1498_vm13, nan, %v1508_v50  ;;  %v1712_v2 = vsel %vm1710_vm3, %v7002_v9, %v1711_v16  ;;  %v1812_v28 = vand.u32 3, %v1811_v38  ;;  %vm12127_vm13 = vmmov %vm12114_vm6 }
 0x25c   : > { %vm8709_vm11 = vcmp.le.f32.partialorder %v12117_v49, 0.7853982  ;;  %v1612_v60 = vsel %vm1605_vm15, %v1608_v6, %v1611_v32  ;;  %vm12123_vm1 = vcmp.lt.s32.totalorder %v7874_v18, 0  ;;  %v12124_v24 = vand.u32 2147483647, %v12080_v5 }
 0x25d   : > { %v2014_v8 = vsel %vm8709_vm11, %v7874_v18, %v8425_v40  ;;  %v2013_v31 = vsel %vm12123_vm1, %v2012_v7, %v12120_v14  ;;  %v1716_v27 = vsel %vm1709_vm2, %v1712_v2, %v1715_v29  ;;  %v1915_v61 = vadd.s32 3, %v1911_v1  ;;  %6677 = vmatmul.mubr.msk.f32.gmra.mxu1 %vm12127_vm13, %v1405_v44  ;;  %vm12136_vm1 = vmmov %vm12128_vm5 }
 0x25e   : > { %7013 = vcosq.f32 %v2014_v8  ;;  %vm8731_vm0 = vcmp.le.f32.partialorder %v12124_v24, 0.7853982  ;;  %v2116_v23 = vsub.s32 4, %v8340_v37  ;;  %v7006_v59 = vpop.eup %7005  ;;  %v2219_v17 = vsel %vm2136_vm8, %v2218_v36, %v8413_v51  ;;  %6679 = vmatprep.mubr.msk.f32.mxu1 %vm12128_vm5, %v1509_v4 }
 0x25f   : > { %7015 = vsinq.f32 %v2014_v8  ;;  %v2118_v56 = vsel %vm8731_vm0, %v12080_v5, %v8561_v11  ;;  %vm1602_vm15 = vweird.f32 %v12091_v12  ;;  %vm1706_vm6 = vweird.f32 %v7813_v33 }
 0x260   : > { %7017 = vcosq.f32 %v2118_v56  ;;  %v1818_v53 = vxor.u32 2147483648, %v7006_v59  ;;  %v2015_v11 = vsel %vm8709_vm11, 0, %v2013_v31  ;;  %vm12129_vm4 = vcmp.lt.s32.totalorder %v12080_v5, 0  ;;  %v7008_v20 = vpop.eup %7007  ;;  %vm12135_vm11 = vmmov %vm12128_vm5 }
 0x261   : > { %v2117_v13 = vsel %vm12129_vm4, %v2116_v23, %v8340_v37  ;;  %7019 = vsinq.f32 %v2118_v56  ;;  %v1613_v51 = vsel %vm1602_vm15, nan, %v1612_v60  ;;  %v1717_v36 = vsel %vm1706_vm6, nan, %v1716_v27 }
 0x262   : > { %vm1817_vm9 = vcmp.eq.s32.totalorder %v1812_v28, 2  ;;  %v2220_v12 = vsub.s32 4, %v12130_v15  ;;  %v1815_v30 = vxor.u32 2147483648, %v7008_v20  ;;  %v1916_v52 = vand.u32 3, %v1915_v61  ;;  %6680 = vmatmul.mubr.msk.f32.gmra.mxu1 %vm12134_vm14, %v1613_v51 }
 0x263   : > { %v1819_v33 = vsel %vm1817_vm9, %v1818_v53, %v7008_v20  ;;  %v12131_v3 = vand.u32 2147483647, %v12112_v19  ;;  %vm1814_vm10 = vcmp.eq.s32.totalorder %v1812_v28, 0  ;;  %v2019_v37 = vadd.s32 3, %v2015_v11  ;;  %6682 = vmatprep.mubr.msk.f32.mxu1 %vm12135_vm11, %v1717_v36 }
 0x264   : > { %v2119_v57 = vsel %vm8731_vm0, 0, %v2117_v13  ;;  %vm1810_vm7 = vweird.f32 %v12046_v26  ;;  %vm1813_vm3 = vcmp.lt.s32.totalorder %v1812_v28, 2  ;;  %v1816_v25 = vsel %vm1814_vm10, %v7006_v59, %v1815_v30  ;;  %vm12138_vm10 = vmmov %vm12136_vm1 }
 0x265   : > { %vm8758_vm2 = vcmp.le.f32.partialorder %v12131_v3, 0.7853982  ;;  %v7010_v34 = vpop.eup %7009  ;;  %v1820_v35 = vsel %vm1813_vm3, %v1816_v25, %v1819_v33  ;;  %v2221_v46 = vsel %vm2136_vm8, %v2220_v12, %v12130_v15  ;;  %vm1921_vm12 = vcmp.eq.s32.totalorder %v1916_v52, 2  ;;  %vm12137_vm8 = vmmov %vm12136_vm1 }
 0x266   : > { %v2222_v48 = vsel %vm8758_vm2, %v12112_v19, %v2219_v17  ;;  %v7012_v10 = vpop.eup %7011  ;;  %v1922_v45 = vxor.u32 2147483648, %v7010_v34  ;;  %v1821_v47 = vsel %vm1810_vm7, nan, %v1820_v35  ;;  %v2123_v58 = vadd.s32 3, %v2119_v57  ;;  %vm12139_vm3 = vmmov %vm12136_vm1 }
 0x267   : > { %7021 = vcosq.f32 %v2222_v48  ;;  %v1919_v22 = vxor.u32 2147483648, %v7012_v10  ;;  %6683 = vmatmul.mubr.msk.f32.gmra.mxu1 %vm12136_vm1, %v1821_v47  ;;  %vm1918_vm0 = vcmp.eq.s32.totalorder %v1916_v52, 0  ;;  %v2020_v26 = vand.u32 3, %v2019_v37 }
 0x268   : > { %7023 = vsinq.f32 %v2222_v48  ;;  %v1923_v44 = vsel %vm1921_vm12, %v1922_v45, %v7012_v10  ;;  %vm1917_vm13 = vcmp.lt.s32.totalorder %v1916_v52, 2  ;;  %v2223_v38 = vsel %vm8758_vm2, 0, %v2221_v46 }
 0x269   : > { %v1920_v9 = vsel %vm1918_vm0, %v7010_v34, %v1919_v22  ;;  %vm1914_vm15 = vweird.f32 %v8008_v39  ;;  %v2124_v6 = vand.u32 3, %v2123_v58  ;;  %vm2025_vm6 = vcmp.eq.s32.totalorder %v2020_v26, 2 }
 0x26a   : > { %v1924_v63 = vsel %vm1917_vm13, %v1920_v9, %v1923_v44  ;;  %v2227_v49 = vadd.s32 3, %v2223_v38  ;;  %vm2022_vm5 = vcmp.eq.s32.totalorder %v2020_v26, 0  ;;  %vm2021_vm4 = vcmp.lt.s32.totalorder %v2020_v26, 2 }
 0x26b   : > { %v7014_v41 = vpop.eup %7013  ;;  %v1925_v32 = vsel %vm1914_vm15, nan, %v1924_v63  ;;  %vm2018_vm9 = vweird.f32 %v7874_v18  ;;  %vm2129_vm2 = vcmp.eq.s32.totalorder %v2124_v6, 2  ;;  %vm2126_vm14 = vcmp.eq.s32.totalorder %v2124_v6, 0  ;;  %vm12140_vm15 = vmmov %vm12139_vm3 }
 0x26c   : > { %v7016_v50 = vpop.eup %7015  ;;  %v2026_v62 = vxor.u32 2147483648, %v7014_v41  ;;  %6685 = vmatprep.mubr.msk.f32.mxu1 %vm12137_vm8, %v1925_v32  ;;  %v2228_v28 = vand.u32 3, %v2227_v49  ;;  %vm2125_vm11 = vcmp.lt.s32.totalorder %v2124_v6, 2  ;;  %vm2122_vm7 = vweird.f32 %v12080_v5  ;;  %v8787_v5 = vld [vmem:[%s11818_s4] ss:$0 sm:$0xff] }
 0x26d   : > { %v2023_v16 = vxor.u32 2147483648, %v7016_v50  ;;  %v7018_v21 = vpop.eup %7017  ;;  %vm2226_vm13 = vweird.f32 %v12112_v19 }
 0x26e   : > { %v2027_v14 = vsel %vm2025_vm6, %v2026_v62, %v7016_v50  ;;  %v7020_v7 = vpop.eup %7019  ;;  %v2130_v1 = vxor.u32 2147483648, %v7018_v21  ;;  %vm2233_vm12 = vcmp.eq.s32.totalorder %v2228_v28, 2  ;;  %vm2230_vm1 = vcmp.eq.s32.totalorder %v2228_v28, 0 }
 0x26f   : > { %v2024_v29 = vsel %vm2022_vm5, %v7014_v41, %v2023_v16  ;;  %v2127_v8 = vxor.u32 2147483648, %v7020_v7  ;;  %vm2229_vm0 = vcmp.lt.s32.totalorder %v2228_v28, 2  ;;  %v12143_v16 = vmov 2475754826  }
 0x270   : > { %v2028_v39 = vsel %vm2021_vm4, %v2024_v29, %v2027_v14  ;;  %v2131_v2 = vsel %vm2129_vm2, %v2130_v1, %v7020_v7  ;;  %v12144_v14 = vmov 2102212464  }
 0x271   : > { %v2029_v4 = vsel %vm2018_vm9, nan, %v2028_v39  ;;  %v2128_v60 = vsel %vm2126_vm14, %v7018_v21, %v2127_v8 }
 0x272   : > { %6686 = vmatmul.mubr.msk.f32.gmra.mxu1 %vm12138_vm10, %v2029_v4  ;;  %v2132_v24 = vsel %vm2125_vm11, %v2128_v60, %v2131_v2 }
 0x273   : > { %v2133_v27 = vsel %vm2122_vm7, nan, %v2132_v24 }
 0x274   : > { %v7022_v31 = vpop.eup %7021  ;;  %6688 = vmatprep.mubr.msk.f32.mxu1 %vm12139_vm3, %v2133_v27 }
 0x275   : > { %v7024_v40 = vpop.eup %7023  ;;  %v2234_v61 = vxor.u32 2147483648, %v7022_v31 }
 0x276   : > { %v2231_v18 = vxor.u32 2147483648, %v7024_v40 }
 0x277   : > { %v2235_v23 = vsel %vm2233_vm12, %v2234_v61, %v7024_v40 }
 0x278   : > { %v2232_v56 = vsel %vm2230_vm1, %v7022_v31, %v2231_v18 }
 0x279   : > { %v2236_v59 = vsel %vm2229_vm0, %v2232_v56, %v2235_v23 }
 0x27a   : > { %v2237_v17 = vsel %vm2226_vm13, nan, %v2236_v59 }
 0x27b   : > { %6689 = vmatmul.mubr.msk.f32.gmra.mxu1 %vm12140_vm15, %v2237_v17 }
 0x311   : > { %v6669_v53 = vpop.f32.mrf.mxu1 }
 0x312   : > { %v2370_v11 = vadd.f32 %v6669_v53, %v8787_v5 }
 0x313   : > { %v2364_v13 = vpop.f32.mrf.mxu1 }
 0x314   : > { %v8790_v20 = vmul.f32 30.0, %v2370_v11  ;;  %v2365_v51 = vadd.f32 %v8787_v5, %v2364_v13 }
 0x315   : > { %v6672_v36 = vpop.f32.mrf.mxu1 }
 0x316   : > { %12141 = vst [vmem:[#allocation2_spill] sm:$0xff] %v8790_v20  ;;  %v2563_v19 = vand.u32 2147483647, %v8790_v20  ;;  %v2566_v15 = vand.u32 2139095040, %v8790_v20  ;;  %v8795_v12 = vmul.f32 30.0, %v2365_v51  ;;  %v2380_v30 = vadd.f32 %v6672_v36, %v8787_v5 }
 0x317   : > { %v2374_v57 = vpop.f32.mrf.mxu1 }
 0x318   : > { %v2567_v33 = vshrl.u32 %v2566_v15, 23  ;;  %v2570_v52 = vand.u32 8388607, %v2563_v19  ;;  %v11904_v3 = vand.u32 2147483647, %v8795_v12  ;;  %v2462_v0 = vand.u32 2139095040, %v8795_v12 }
 0x319   : > { %v8802_v37 = vmul.f32 30.0, %v2380_v30  ;;  %v2375_v35 = vadd.f32 %v8787_v5, %v2374_v57 }
 0x31a   : > { %v6396_v48 = vadd.s32 4294967169, %v2567_v33  ;;  %v2463_v34 = vshrl.u32 %v2462_v0, 23  ;;  %v2466_v25 = vand.u32 8388607, %v11904_v3  ;;  %v2571_v45 = vor.u32 8388608, %v2570_v52 }
 0x31b   : > { %12142 = vst [vmem:[#allocation15_spill] sm:$0xff] %v8802_v37  ;;  %v2774_v22 = vand.u32 2139095040, %v8802_v37  ;;  %v11901_v38 = vand.u32 2147483647, %v8802_v37  ;;  %v8813_v32 = vmul.f32 30.0, %v2375_v35 }
 0x31c   : > { %v2573_v10 = vadd.s32 1, %v6396_v48  ;;  %v6392_v46 = vadd.s32 4294967169, %v2463_v34  ;;  %v2467_v47 = vor.u32 8388608, %v2466_v25  ;;  %v8809_v41 = vshll.u32 %v2571_v45, 8 }
 0x31d   : > { %v2775_v50 = vshrl.u32 %v2774_v22, 23 }
 0x31e   : > { %vm2574_vm8 = vcmp.gt.s32.totalorder %v2573_v10, 0  ;;  %v2469_v44 = vadd.s32 1, %v6392_v46  ;;  %v8811_v63 = vshll.u32 %v2467_v47, 8 }
 0x31f   : > { %v2575_v58 = vsel %vm2574_vm8, %v2573_v10, 0  ;;  %v6404_v33 = vadd.s32 4294967169, %v2775_v50 }
 0x320   : > { %v2576_v26 = vshrl.u32 %v2575_v58, 5  ;;  %v2577_v9 = vand.u32 31, %v2575_v58  ;;  %vm2470_vm6 = vcmp.gt.s32.totalorder %v2469_v44, 0 }
 0x321   : > { %v2471_v40 = vsel %vm2470_vm6, %v2469_v44, 0 }
 0x322   : > { %v2578_v62 = vsub.s32 32, %v2577_v9  ;;  %v2580_v6 = vshll.u32 %v12009_v55, %v2577_v9  ;;  %v2583_v49 = vshll.u32 %v12143_v16, %v2577_v9  ;;  %v2586_v21 = vshll.u32 %v12007_v54, %v2577_v9 }
 0x323   : > { %v2589_v7 = vshll.u32 %v12144_v14, %v2577_v9  ;;  %v2592_v29 = vshll.u32 %v12010_v42, %v2577_v9  ;;  %vm2595_vm5 = vcmp.lt.s32.totalorder %v2576_v26, 1  ;;  %vm2596_vm4 = vcmp.lt.s32.totalorder %v2576_v26, 2 }
 0x324   : > { %v2581_v1 = vshrl.u32 %v12143_v16, %v2578_v62  ;;  %v2584_v39 = vshrl.u32 %v12007_v54, %v2578_v62  ;;  %v2587_v8 = vshrl.u32 %v12144_v14, %v2578_v62  ;;  %v2579_v4 = vshrl.u32 %v12009_v55, %v2578_v62 }
 0x325   : > { %v2590_v2 = vshrl.u32 %v12010_v42, %v2578_v62  ;;  %v2593_v28 = vshrl.u32 %v12001_v43, %v2578_v62  ;;  %vm2597_vm9 = vcmp.lt.s32.totalorder %v2576_v26, 3  ;;  %vm2598_vm2 = vcmp.lt.s32.totalorder %v2576_v26, 4 }
 0x326   : > { %v2582_v60 = vor.u32 %v2581_v1, %v2580_v6  ;;  %v2585_v31 = vor.u32 %v2584_v39, %v2583_v49  ;;  %v2588_v24 = vor.u32 %v2587_v8, %v2586_v21  ;;  %v2473_v18 = vand.u32 31, %v2471_v40 }
 0x327   : > { %v2591_v27 = vor.u32 %v2590_v2, %v2589_v7  ;;  %v2594_v61 = vor.u32 %v2593_v28, %v2592_v29  ;;  %v2472_v57 = vshrl.u32 %v2471_v40, 5 }
 0x328   : > { %v2599_v23 = vsel %vm2595_vm5, %v2579_v4, %v2582_v60  ;;  %v2600_v56 = vsel %vm2598_vm2, %v2588_v24, 2102212464  ;;  %v2603_v59 = vsel %vm2595_vm5, %v2582_v60, %v2585_v31  ;;  %v2607_v17 = vsel %vm2595_vm5, %v2585_v31, %v2588_v24 }
 0x329   : > { %v2601_v53 = vsel %vm2597_vm9, %v2585_v31, %v2600_v56  ;;  %v2604_v11 = vsel %vm2598_vm2, %v2591_v27, 920167782  ;;  %v2608_v13 = vsel %vm2598_vm2, %v2594_v61, 1326507024  ;;  %v2474_v51 = vsub.s32 32, %v2473_v18 }
 0x32a   : > { %v2602_v36 = vsel %vm2596_vm4, %v2599_v23, %v2601_v53  ;;  %v2605_v15 = vsel %vm2597_vm9, %v2588_v24, %v2604_v11  ;;  %v2609_v30 = vsel %vm2597_vm9, %v2591_v27, %v2608_v13  ;;  %v2476_v48 = vshll.u32 %v12009_v55, %v2473_v18 }
 0x32b   : > { %v2606_v52 = vsel %vm2596_vm4, %v2603_v59, %v2605_v15  ;;  %v2610_v0 = vsel %vm2596_vm4, %v2607_v17, %v2609_v30  ;;  %v2618_v45 = vmul.u32 %v8809_v41, %v2602_v36  ;;  %v2477_v46 = vshrl.u32 %v12143_v16, %v2474_v51  ;;  %v6675_v15 = vpop.f32.mrf.mxu1 }
 0x32c   : > { %v8838_v34 = vmul.u32.u64.low %v8809_v41, %v2610_v0  ;;  %v8839_v25 = vmul.u32.u64.high %v8809_v41, %v2610_v0, %v8838_v34  ;;  %v8842_v10 = vmul.u32.u64.low %v8809_v41, %v2606_v52  ;;  %v8843_v35 = vmul.u32.u64.high %v8809_v41, %v2606_v52, %v8842_v10 }
 0x32d   : > { %v2479_v47 = vshll.u32 %v12143_v16, %v2473_v18  ;;  %v2480_v22 = vshrl.u32 %v12007_v54, %v2474_v51  ;;  %v2482_v58 = vshll.u32 %v12007_v54, %v2473_v18  ;;  %v2483_v44 = vshrl.u32 %v12144_v14, %v2474_v51 }
 0x32e   : > { %v2485_v26 = vshll.u32 %v12144_v14, %v2473_v18  ;;  %v2486_v9 = vshrl.u32 %v12010_v42, %v2474_v51  ;;  %v2478_v50 = vor.u32 %v2477_v46, %v2476_v48  ;;  %v2488_v6 = vshll.u32 %v12010_v42, %v2473_v18 }
 0x32f   : > { %v2481_v62 = vor.u32 %v2480_v22, %v2479_v47  ;;  %v2489_v41 = vshrl.u32 %v12001_v43, %v2474_v51  ;;  %vm2620_vm14 = vc.u32 %v8839_v25, %v8842_v10  ;;  %v2621_v49 = vadd.s32 1, %v8843_v35 }
 0x330   : > { %v2475_v21 = vshrl.u32 %v12009_v55, %v2474_v51  ;;  %v2484_v7 = vor.u32 %v2483_v44, %v2482_v58  ;;  %v2487_v29 = vor.u32 %v2486_v9, %v2485_v26  ;;  %vm2491_vm10 = vcmp.lt.s32.totalorder %v2472_v57, 1 }
 0x331   : > { %v2490_v1 = vor.u32 %v2489_v41, %v2488_v6  ;;  %vm2492_vm11 = vcmp.lt.s32.totalorder %v2472_v57, 2  ;;  %v2622_v39 = vsel %vm2620_vm14, %v2621_v49, %v8843_v35  ;;  %vm2493_vm7 = vcmp.lt.s32.totalorder %v2472_v57, 3 }
 0x332   : > { %vm2494_vm3 = vcmp.lt.s32.totalorder %v2472_v57, 4  ;;  %v2499_v8 = vsel %vm2491_vm10, %v2478_v50, %v2481_v62  ;;  %v2623_v4 = vadd.s32 %v2622_v39, %v2618_v45  ;;  %v2503_v60 = vsel %vm2491_vm10, %v2481_v62, %v2484_v7 }
 0x333   : > { %v2496_v2 = vsel %vm2494_vm3, %v2484_v7, 2102212464  ;;  %v2500_v28 = vsel %vm2494_vm3, %v2487_v29, 920167782  ;;  %v2495_v31 = vsel %vm2491_vm10, %v2475_v21, %v2478_v50  ;;  %v2504_v40 = vsel %vm2494_vm3, %v2490_v1, 1326507024 }
 0x334   : > { %v2501_v24 = vsel %vm2493_vm7, %v2484_v7, %v2500_v28  ;;  %v2781_v27 = vadd.s32 1, %v6404_v33  ;;  %v2624_v61 = vadd.s32 536870912, %v2623_v4  ;;  %v2497_v18 = vsel %vm2493_vm7, %v2481_v62, %v2496_v2 }
 0x335   : > { %v2502_v23 = vsel %vm2492_vm11, %v2499_v8, %v2501_v24  ;;  %v2505_v56 = vsel %vm2493_vm7, %v2487_v29, %v2504_v40  ;;  %v2778_v11 = vand.u32 8388607, %v11901_v38  ;;  %v2498_v30 = vsel %vm2492_vm11, %v2495_v31, %v2497_v18 }
 0x336   : > { %v2506_v59 = vsel %vm2492_vm11, %v2503_v60, %v2505_v56  ;;  %v8864_v17 = vmul.u32.u64.low %v8811_v63, %v2502_v23  ;;  %v8865_v53 = vmul.u32.u64.high %v8811_v63, %v2502_v23, %v8864_v17  ;;  %v8870_v13 = vshrl.u32 %v2624_v61, 30 }
 0x337   : > { %v8873_v51 = vmul.u32.u64.low %v8811_v63, %v2506_v59  ;;  %v8874_v36 = vmul.u32.u64.high %v8811_v63, %v2506_v59, %v8873_v51  ;;  %vm2782_vm12 = vcmp.gt.s32.totalorder %v2781_v27, 0  ;;  %v2670_v52 = vand.u32 2139095040, %v8813_v32 }
 0x338   : > { %v2783_v33 = vsel %vm2782_vm12, %v2781_v27, 0  ;;  %v2626_v0 = vshll.u32 %v8870_v13, 30  ;;  %v2517_v34 = vadd.s32 1, %v8865_v53  ;;  %v8881_v35 = vadd.f32 %v6675_v15, %v8787_v5 }
 0x339   : > { %v2785_v48 = vand.u32 31, %v2783_v33  ;;  %v2514_v46 = vmul.u32 %v8811_v63, %v2498_v30  ;;  %vm2516_vm1 = vc.u32 %v8874_v36, %v8864_v17  ;;  %v2779_v57 = vor.u32 8388608, %v2778_v11 }
 0x33a   : > { %v8883_v45 = vsub.s32 %v2623_v4, %v2626_v0  ;;  %v2518_v47 = vsel %vm2516_vm1, %v2517_v34, %v8865_v53  ;;  %v2784_v22 = vshrl.u32 %v2783_v33, 5  ;;  %v2671_v44 = vshrl.u32 %v2670_v52, 23 }
 0x33b   : > { %v2786_v58 = vsub.s32 32, %v2785_v48  ;;  %v2519_v9 = vadd.s32 %v2518_v47, %v2514_v46  ;;  %v2788_v50 = vshll.u32 %v12009_v55, %v2785_v48  ;;  %v2791_v62 = vshll.u32 %v12143_v16, %v2785_v48 }
 0x33c   : > { %v2629_v26 = vsub.s32 0, %v8883_v45  ;;  %v2794_v41 = vshll.u32 %v12007_v54, %v2785_v48  ;;  %v2797_v29 = vshll.u32 %v12144_v14, %v2785_v48  ;;  %v2800_v2 = vshll.u32 %v12010_v42, %v2785_v48 }
 0x33d   : > { %v2789_v6 = vshrl.u32 %v12143_v16, %v2786_v58  ;;  %v2792_v63 = vshrl.u32 %v12007_v54, %v2786_v58  ;;  %v2795_v49 = vshrl.u32 %v12144_v14, %v2786_v58  ;;  %v2520_v7 = vadd.s32 536870912, %v2519_v9 }
 0x33e   : > { %v6397_v21 = vmin.u32 %v2629_v26, %v8883_v45  ;;  %v2798_v1 = vshrl.u32 %v12010_v42, %v2786_v58  ;;  %v2801_v24 = vshrl.u32 %v12001_v43, %v2786_v58  ;;  %v2787_v40 = vshrl.u32 %v12009_v55, %v2786_v58 }
 0x33f   : > { %v2790_v39 = vor.u32 %v2789_v6, %v2788_v50  ;;  %v2793_v8 = vor.u32 %v2792_v63, %v2791_v62  ;;  %v2796_v4 = vor.u32 %v2795_v49, %v2794_v41  ;;  %v8900_v60 = vshrl.u32 %v2520_v7, 30 }
 0x340   : > { %v2631_v28 = vclz %v6397_v21  ;;  %v2799_v31 = vor.u32 %v2798_v1, %v2797_v29  ;;  %vm2803_vm0 = vcmp.lt.s32.totalorder %v2784_v22, 1  ;;  %v2819_v27 = vshll.u32 %v2779_v57, 8 }
 0x341   : > { %v6400_v61 = vadd.s32 4294967169, %v2671_v44  ;;  %v2522_v23 = vshll.u32 %v8900_v60, 30  ;;  %v2802_v56 = vor.u32 %v2801_v24, %v2800_v2  ;;  %vm2806_vm13 = vcmp.lt.s32.totalorder %v2784_v22, 4 }
 0x342   : > { %v6398_v18 = vadd.s32 4294967294, %v2631_v28  ;;  %vm2804_vm15 = vcmp.lt.s32.totalorder %v2784_v22, 2  ;;  %vm2805_vm8 = vcmp.lt.s32.totalorder %v2784_v22, 3  ;;  %v2811_v59 = vsel %vm2803_vm0, %v2790_v39, %v2793_v8 }
 0x343   : > { %v2812_v53 = vsel %vm2806_vm13, %v2799_v31, 920167782  ;;  %v8906_v11 = vsub.s32 %v2519_v9, %v2522_v23  ;;  %v2808_v51 = vsel %vm2806_vm13, %v2796_v4, 2102212464  ;;  %v2815_v52 = vsel %vm2803_vm0, %v2793_v8, %v2796_v4 }
 0x344   : > { %vm6399_vm6 = vcmp.lt.s32.totalorder %v6398_v18, 0  ;;  %v2813_v15 = vsel %vm2805_vm8, %v2796_v4, %v2812_v53  ;;  %v2816_v0 = vsel %vm2806_vm13, %v2802_v56, 1326507024  ;;  %v2807_v46 = vsel %vm2803_vm0, %v2787_v40, %v2790_v39 }
 0x345   : > { %v2634_v30 = vsel %vm6399_vm6, 0, %v6398_v18  ;;  %v2814_v33 = vsel %vm2804_vm15, %v2811_v59, %v2813_v15  ;;  %v2525_v34 = vsub.s32 0, %v8906_v11  ;;  %v11902_v57 = vand.u32 2147483647, %v8813_v32 }
 0x346   : > { %v2639_v48 = vsub.s32 4294967266, %v2634_v30  ;;  %v2809_v47 = vsel %vm2805_vm8, %v2793_v8, %v2808_v51  ;;  %v2817_v58 = vsel %vm2805_vm8, %v2799_v31, %v2816_v0  ;;  %v2635_v9 = vsub.s32 32, %v2634_v30 }
 0x347   : > { %v8916_v44 = vmul.u32.u64.low %v2819_v27, %v2814_v33  ;;  %v8917_v26 = vmul.u32.u64.high %v2819_v27, %v2814_v33, %v8916_v44  ;;  %v6393_v62 = vmin.u32 %v2525_v34, %v8906_v11  ;;  %v2818_v6 = vsel %vm2804_vm15, %v2815_v52, %v2817_v58 }
 0x348   : > { %v2640_v50 = vadd.s32 127, %v2639_v48  ;;  %v8922_v63 = vmul.u32.u64.low %v2819_v27, %v2818_v6  ;;  %v8923_v41 = vmul.u32.u64.high %v2819_v27, %v2818_v6, %v8922_v63  ;;  %v2677_v49 = vadd.s32 1, %v6400_v61 }
 0x349   : > { %v2619_v21 = vadd.s32 %v8842_v10, %v8839_v25  ;;  %v2527_v7 = vclz %v6393_v62  ;;  %v2810_v29 = vsel %vm2804_vm15, %v2807_v46, %v2809_v47  ;;  %v2674_v1 = vand.u32 8388607, %v11902_v57 }
 0x34a   : > { %v2829_v39 = vadd.s32 1, %v8917_v26  ;;  %vm2678_vm5 = vcmp.gt.s32.totalorder %v2677_v49, 0  ;;  %v8932_v8 = vmul.f32 30.0, %v8881_v35  ;;  %v2641_v2 = vshll.u32 %v2640_v50, 23 }
 0x34b   : > { %v2637_v4 = vshrl.u32 %v2619_v21, %v2635_v9  ;;  %v2679_v28 = vsel %vm2678_vm5, %v2677_v49, 0  ;;  %v2826_v31 = vmul.u32 %v2819_v27, %v2810_v29  ;;  %vm2828_vm4 = vc.u32 %v8923_v41, %v8916_v44 }
 0x34c   : > { %12145 = vst [vmem:[#allocation12_spill] sm:$0xff] %v8932_v8  ;;  %v2681_v25 = vand.u32 31, %v2679_v28  ;;  %v2636_v10 = vshll.u32 %v8883_v45, %v2634_v30  ;;  %v6394_v22 = vadd.s32 4294967294, %v2527_v7  ;;  %v2830_v24 = vsel %vm2828_vm4, %v2829_v39, %v8917_v26 }
 0x34d   : > { %v2675_v40 = vor.u32 8388608, %v2674_v1  ;;  %v2831_v61 = vadd.s32 %v2830_v24, %v2826_v31  ;;  %v11899_v23 = vand.u32 2147483647, %v8932_v8  ;;  %v2982_v35 = vand.u32 2139095040, %v8932_v8 }
 0x34e   : > { %v2682_v18 = vsub.s32 32, %v2681_v25  ;;  %v2638_v56 = vor.u32 %v2637_v4, %v2636_v10  ;;  %v2642_v59 = vor.u32 4788187, %v2641_v2  ;;  %v2649_v27 = vsub.s32 4, %v8870_v13 }
 0x34f   : > { %v2832_v53 = vadd.s32 536870912, %v2831_v61  ;;  %vm6395_vm9 = vcmp.lt.s32.totalorder %v6394_v22, 0  ;;  %v8943_v15 = vshll.u32 %v2675_v40, 8  ;;  %v2983_v52 = vshrl.u32 %v2982_v35, 23 }
 0x350   : > { %v2685_v51 = vshrl.u32 %v12143_v16, %v2682_v18  ;;  %v2688_v45 = vshrl.u32 %v12007_v54, %v2682_v18  ;;  %v2691_v33 = vshrl.u32 %v12144_v14, %v2682_v18  ;;  %v8950_v0 = vand.u32 8388607, %v11899_v23 }
 0x351   : > { %v8945_v30 = vshrl.u32 %v2832_v53, 30  ;;  %v2643_v48 = vand.u32 2147483647, %v2642_v59  ;;  %v2645_v34 = vcvt.s32.f32 %v2638_v56  ;;  %v2684_v46 = vshll.u32 %v12009_v55, %v2681_v25 }
 0x352   : > { %v2687_v47 = vshll.u32 %v12143_v16, %v2681_v25  ;;  %v8954_v58 = vsel %vm6395_vm9, 0, %v6394_v22  ;;  %v2680_v9 = vshrl.u32 %v2679_v28, 5  ;;  %v2690_v50 = vshll.u32 %v12007_v54, %v2681_v25 }
 0x353   : > { %12146 = vst [vmem:[#allocation5_spill] sm:$0xff] %v8945_v30  ;;  %v2834_v26 = vshll.u32 %v8945_v30, 30  ;;  %v2686_v62 = vor.u32 %v2685_v51, %v2684_v46  ;;  %v2693_v63 = vshll.u32 %v12144_v14, %v2681_v25  ;;  %v2694_v49 = vshrl.u32 %v12010_v42, %v2682_v18 }
 0x354   : > { %v2689_v6 = vor.u32 %v2688_v45, %v2687_v47  ;;  %v2692_v7 = vor.u32 %v2691_v33, %v2690_v50  ;;  %v2696_v29 = vshll.u32 %v12010_v42, %v2681_v25  ;;  %v2697_v1 = vshrl.u32 %v12001_v43, %v2682_v18 }
 0x355   : > { %v8960_v21 = vsub.s32 %v2831_v61, %v2834_v26  ;;  %v2646_v39 = vmul.f32 %v2645_v34, %v2643_v48  ;;  %v2535_v4 = vsub.s32 4294967266, %v8954_v58  ;;  %v2695_v2 = vor.u32 %v2694_v49, %v2693_v63 }
 0x356   : > { %v6412_v28 = vadd.s32 4294967169, %v2983_v52  ;;  %v2531_v31 = vsub.s32 32, %v8954_v58  ;;  %v2698_v22 = vor.u32 %v2697_v1, %v2696_v29  ;;  %vm2699_vm2 = vcmp.lt.s32.totalorder %v2680_v9, 1 }
 0x357   : > { %v2837_v10 = vsub.s32 0, %v8960_v21  ;;  %v2683_v24 = vshrl.u32 %v12009_v55, %v2682_v18  ;;  %vm2701_vm14 = vcmp.lt.s32.totalorder %v2680_v9, 3  ;;  %vm2702_vm10 = vcmp.lt.s32.totalorder %v2680_v9, 4 }
 0x358   : > { %v2707_v40 = vsel %vm2699_vm2, %v2686_v62, %v2689_v6  ;;  %v2704_v61 = vsel %vm2702_vm10, %v2692_v7, 2102212464  ;;  %v2708_v35 = vsel %vm2702_vm10, %v2695_v2, 920167782  ;;  %v2711_v56 = vsel %vm2699_vm2, %v2689_v6, %v2692_v7 }
 0x359   : > { %v6405_v25 = vmin.u32 %v2837_v10, %v8960_v21  ;;  %v2536_v59 = vadd.s32 127, %v2535_v4  ;;  %vm2700_vm11 = vcmp.lt.s32.totalorder %v2680_v9, 2  ;;  %v2709_v53 = vsel %vm2701_vm14, %v2692_v7, %v2708_v35 }
 0x35a   : > { %v2712_v51 = vsel %vm2702_vm10, %v2698_v22, 1326507024  ;;  %v2703_v33 = vsel %vm2699_vm2, %v2683_v24, %v2686_v62  ;;  %v2710_v52 = vsel %vm2700_vm11, %v2707_v40, %v2709_v53  ;;  %v2705_v34 = vsel %vm2701_vm14, %v2689_v6, %v2704_v61  ;;  %v2384_v62 = vpop.f32.mrf.mxu1 }
 0x35b   : > { %v2839_v45 = vclz %v6405_v25  ;;  %v2713_v48 = vsel %vm2701_vm14, %v2695_v2, %v2712_v51  ;;  %v8972_v46 = vmul.u32.u64.low %v8943_v15, %v2710_v52  ;;  %v8973_v47 = vmul.u32.u64.high %v8943_v15, %v2710_v52, %v8972_v46 }
 0x35c   : > { %v2714_v18 = vsel %vm2700_vm11, %v2711_v56, %v2713_v48  ;;  %v2515_v26 = vadd.s32 %v8864_v17, %v8874_v36  ;;  %v2989_v49 = vadd.s32 1, %v6412_v28  ;;  %vm2565_vm7 = vcmp.lt.s32.totalorder %v8790_v20, 0  ;;  %v6678_v22 = vpop.f32.mrf.mxu1 }
 0x35d   : > { %v8979_v50 = vmul.u32.u64.low %v8943_v15, %v2714_v18  ;;  %v8980_v63 = vmul.u32.u64.high %v8943_v15, %v2714_v18, %v8979_v50  ;;  %v2647_v7 = vxor.u32 2147483648, %v2646_v39  ;;  %v6406_v6 = vadd.s32 4294967294, %v2839_v45 }
 0x35e   : > { %v2533_v29 = vshrl.u32 %v2515_v26, %v2531_v31  ;;  %v2537_v1 = vshll.u32 %v2536_v59, 23  ;;  %v2706_v4 = vsel %vm2700_vm11, %v2703_v33, %v2705_v34  ;;  %vm2990_vm3 = vcmp.gt.s32.totalorder %v2989_v49, 0 }
 0x35f   : > { %v2725_v2 = vadd.s32 1, %v8973_v47  ;;  %v2987_v10 = vor.u32 8388608, %v8950_v0  ;;  %v2991_v17 = vsel %vm2990_vm3, %v2989_v49, 0  ;;  %v2385_v36 = vadd.f32 %v8787_v5, %v2384_v62 }
 0x360   : > { %v8992_v28 = vsel %vm2565_vm7, %v2649_v27, %v8870_v13  ;;  %v2532_v31 = vshll.u32 %v8906_v11, %v8954_v58  ;;  %vm6407_vm12 = vcmp.lt.s32.totalorder %v6406_v6, 0  ;;  %v2722_v9 = vmul.u32 %v8943_v15, %v2706_v4 }
 0x361   : > { %vm2724_vm1 = vc.u32 %v8980_v63, %v8972_v46  ;;  %v2993_v0 = vand.u32 31, %v2991_v17  ;;  %v9001_v24 = vsel %vm2565_vm7, %v2647_v7, %v2646_v39  ;;  %v9005_v25 = vor.u32 4788187, %v2537_v1 }
 0x362   : > { %v9003_v40 = vor.u32 %v2533_v29, %v2532_v31  ;;  %v2726_v13 = vsel %vm2724_vm1, %v2725_v2, %v8973_v47  ;;  %v9008_v58 = vshll.u32 %v2987_v10, 8  ;;  %v9010_v15 = vmul.f32 30.0, %v2385_v36 }
 0x363   : > { %v2727_v27 = vadd.s32 %v2726_v13, %v2722_v9  ;;  %v2994_v11 = vsub.s32 32, %v2993_v0  ;;  %v9012_v61 = vsel %vm6407_vm12, 0, %v6406_v6  ;;  %v2992_v35 = vshrl.u32 %v2991_v17, 5 }
 0x364   : > { %v2996_v56 = vshll.u32 %v12009_v55, %v2993_v0  ;;  %v2400_v39 = vadd.f32 %v6678_v22, %v8787_v5  ;;  %v2999_v51 = vshll.u32 %v12143_v16, %v2993_v0  ;;  %v3002_v33 = vshll.u32 %v12007_v54, %v2993_v0 }
 0x365   : > { %v2728_v59 = vadd.s32 536870912, %v2727_v27  ;;  %v2997_v53 = vshrl.u32 %v12143_v16, %v2994_v11  ;;  %v3000_v45 = vshrl.u32 %v12007_v54, %v2994_v11  ;;  %v3003_v52 = vshrl.u32 %v12144_v14, %v2994_v11 }
 0x366   : > { %v3005_v48 = vshll.u32 %v12144_v14, %v2993_v0  ;;  %v3006_v34 = vshrl.u32 %v12010_v42, %v2994_v11  ;;  %v2847_v18 = vsub.s32 4294967266, %v9012_v61  ;;  %v3008_v7 = vshll.u32 %v12010_v42, %v2993_v0 }
 0x367   : > { %v9024_v47 = vshrl.u32 %v2728_v59, 30  ;;  %v2998_v26 = vor.u32 %v2997_v53, %v2996_v56  ;;  %v3001_v50 = vor.u32 %v3000_v45, %v2999_v51  ;;  %v3004_v49 = vor.u32 %v3003_v52, %v3002_v33 }
 0x368   : > { %v3007_v62 = vor.u32 %v3006_v34, %v3005_v48  ;;  %v3009_v6 = vshrl.u32 %v12001_v43, %v2994_v11  ;;  %v2995_v1 = vshrl.u32 %v12009_v55, %v2994_v11  ;;  %v11900_v4 = vand.u32 2147483647, %v9010_v15 }
 0x369   : > { %v2730_v29 = vshll.u32 %v9024_v47, 30  ;;  %v2878_v2 = vand.u32 2139095040, %v9010_v15  ;;  %vm9034_vm0 = vcmp.le.f32.partialorder %v2563_v19, 0.7853982  ;;  %vm3011_vm13 = vcmp.lt.s32.totalorder %v2992_v35, 1 }
 0x36a   : > { %v3010_v17 = vor.u32 %v3009_v6, %v3008_v7  ;;  %vm3013_vm15 = vcmp.lt.s32.totalorder %v2992_v35, 3  ;;  %vm3014_vm8 = vcmp.lt.s32.totalorder %v2992_v35, 4  ;;  %v3019_v9 = vsel %vm3011_vm13, %v2998_v26, %v3001_v50 }
 0x36b   : > { %v9038_v36 = vsub.s32 %v2727_v27, %v2730_v29  ;;  %v3016_v31 = vsel %vm3014_vm8, %v3004_v49, 2102212464  ;;  %v3020_v0 = vsel %vm3014_vm8, %v3007_v62, 920167782  ;;  %v2848_v22 = vadd.s32 127, %v2847_v18 }
 0x36c   : > { %vm3012_vm6 = vcmp.lt.s32.totalorder %v2992_v35, 2  ;;  %v3021_v13 = vsel %vm3013_vm15, %v3004_v49, %v3020_v0  ;;  %v3023_v11 = vsel %vm3011_vm13, %v3001_v50, %v3004_v49  ;;  %v3015_v59 = vsel %vm3011_vm13, %v2995_v1, %v2998_v26 }
 0x36d   : > { %v2733_v56 = vsub.s32 0, %v9038_v36  ;;  %v3022_v19 = vsel %vm3012_vm6, %v3019_v9, %v3021_v13  ;;  %v3024_v53 = vsel %vm3014_vm8, %v3010_v17, 1326507024  ;;  %v3017_v51 = vsel %vm3013_vm15, %v3001_v50, %v3016_v31  ;;  %v2394_v17 = vpop.f32.mrf.mxu1 }
 0x36e   : > { %v3025_v45 = vsel %vm3013_vm15, %v3007_v62, %v3024_v53  ;;  %v9043_v33 = vmul.u32.u64.low %v9008_v58, %v3022_v19  ;;  %v9044_v52 = vmul.u32.u64.high %v9008_v58, %v3022_v19, %v9043_v33  ;;  %v2539_v27 = vand.u32 2147483647, %v9005_v25 }
 0x36f   : > { %v6401_v48 = vmin.u32 %v2733_v56, %v9038_v36  ;;  %v3026_v34 = vsel %vm3012_vm6, %v3023_v11, %v3025_v45  ;;  %v2879_v18 = vshrl.u32 %v2878_v2, 23  ;;  %v2541_v49 = vcvt.s32.f32 %v9003_v40  ;;  %v6681_v53 = vpop.f32.mrf.mxu1 }
 0x370   : > { %v2843_v26 = vsub.s32 32, %v9012_v61  ;;  %v9053_v7 = vmul.u32.u64.low %v9008_v58, %v3026_v34  ;;  %v9054_v50 = vmul.u32.u64.high %v9008_v58, %v3026_v34, %v9053_v7  ;;  %v2849_v62 = vshll.u32 %v2848_v22, 23 }
 0x371   : > { %v2735_v6 = vclz %v6401_v48  ;;  %v3018_v29 = vsel %vm3012_vm6, %v3015_v59, %v3017_v51  ;;  %v6408_v1 = vadd.s32 4294967169, %v2879_v18  ;;  %v2827_v25 = vadd.s32 %v8916_v44, %v8923_v41 }
 0x372   : > { %v3037_v31 = vadd.s32 1, %v9044_v52  ;;  %v2882_v40 = vand.u32 8388607, %v11900_v4  ;;  %v9062_v2 = vmul.f32 30.0, %v2400_v39  ;;  %v9068_v9 = vsel %vm9034_vm0, %v8790_v20, %v9001_v24 }
 0x373   : > { %v9070_v35 = vmul.f32 %v2541_v49, %v2539_v27  ;;  %v6402_v0 = vadd.s32 4294967294, %v2735_v6  ;;  %v2885_v22 = vadd.s32 1, %v6408_v1  ;;  %v2845_v13 = vshrl.u32 %v2827_v25, %v2843_v26 }
 0x374   : > { %12149 = vst [vmem:[#allocation7_spill] sm:$0xff] %v9062_v2  ;;  %v3034_v44 = vmul.u32 %v9008_v58, %v3018_v29  ;;  %vm3036_vm5 = vc.u32 %v9054_v50, %v9043_v33  ;;  %v2395_v41 = vadd.f32 %v8787_v5, %v2394_v17  ;;  %v9076_v39 = vor.u32 4788187, %v2849_v62 }
 0x375   : > { %vm6403_vm4 = vcmp.lt.s32.totalorder %v6402_v0, 0  ;;  %v3038_v11 = vsel %vm3036_vm5, %v3037_v31, %v9044_v52  ;;  %vm2886_vm9 = vcmp.gt.s32.totalorder %v2885_v22, 0  ;;  %v2883_v56 = vor.u32 8388608, %v2882_v40 }
 0x376   : > { %v3039_v24 = vadd.s32 %v3038_v11, %v3034_v44  ;;  %v2887_v59 = vsel %vm2886_vm9, %v2885_v22, 0  ;;  %v11898_v19 = vand.u32 2147483647, %v9062_v2  ;;  %7025 = vcosq.f32 %v9068_v9 }
 0x377   : > { %v2844_v51 = vshll.u32 %v8960_v21, %v9012_v61  ;;  %v3190_v45 = vand.u32 2139095040, %v9062_v2  ;;  %v2543_v52 = vxor.u32 2147483648, %v9070_v35  ;;  %v9088_v27 = vsel %vm6403_vm4, 0, %v6402_v0 }
 0x378   : > { %v3040_v48 = vadd.s32 536870912, %v3039_v24  ;;  %v2889_v34 = vand.u32 31, %v2887_v59  ;;  %v2851_v49 = vand.u32 2147483647, %v9076_v39  ;;  %v9093_v26 = vmul.f32 30.0, %v2395_v41 }
 0x379   : > { %v9090_v18 = vor.u32 %v2845_v13, %v2844_v51  ;;  %v9096_v7 = vadd.f32 %v6681_v53, %v8787_v5  ;;  %v9100_v61 = vshll.u32 %v2883_v56, 8  ;;  %v9104_v6 = vand.u32 8388607, %v11898_v19 }
 0x37a   : > { %v9098_v62 = vshrl.u32 %v3040_v48, 30  ;;  %v2890_v21 = vsub.s32 32, %v2889_v34  ;;  %v2739_v29 = vsub.s32 32, %v9088_v27  ;;  %v2888_v1 = vshrl.u32 %v2887_v59, 5 }
 0x37b   : > { %v2892_v17 = vshll.u32 %v12009_v55, %v2889_v34  ;;  %v3191_v25 = vshrl.u32 %v3190_v45, 23  ;;  %v2895_v40 = vshll.u32 %v12143_v16, %v2889_v34  ;;  %v2898_v22 = vshll.u32 %v12007_v54, %v2889_v34 }
 0x37c   : > { %12150 = vst [vmem:[#allocation4_spill] sm:$0xff] %v9098_v62  ;;  %v3042_v31 = vshll.u32 %v9098_v62, 30  ;;  %v2893_v5 = vshrl.u32 %v12143_v16, %v2890_v21  ;;  %v2896_v0 = vshrl.u32 %v12007_v54, %v2890_v21  ;;  %v2899_v13 = vshrl.u32 %v12144_v14, %v2890_v21 }
 0x37d   : > { %v2901_v44 = vshll.u32 %v12144_v14, %v2889_v34  ;;  %v2902_v41 = vshrl.u32 %v12010_v42, %v2890_v21  ;;  %vm2461_vm2 = vcmp.lt.s32.totalorder %v8795_v12, 0  ;;  %v2743_v11 = vsub.s32 4294967266, %v9088_v27 }
 0x37e   : > { %v9118_v56 = vsub.s32 %v3039_v24, %v3042_v31  ;;  %v2894_v59 = vor.u32 %v2893_v5, %v2892_v17  ;;  %v2897_v53 = vor.u32 %v2896_v0, %v2895_v40  ;;  %v2900_v51 = vor.u32 %v2899_v13, %v2898_v22 }
 0x37f   : > { %v2903_v45 = vor.u32 %v2902_v41, %v2901_v44  ;;  %v2904_v48 = vshll.u32 %v12010_v42, %v2889_v34  ;;  %v2905_v19 = vshrl.u32 %v12001_v43, %v2890_v21  ;;  %v2891_v4 = vshrl.u32 %v12009_v55, %v2890_v21 }
 0x380   : > { %v3045_v23 = vsub.s32 0, %v9118_v56  ;;  %vm2907_vm14 = vcmp.lt.s32.totalorder %v2888_v1, 1  ;;  %v6420_v38 = vadd.s32 4294967169, %v3191_v25  ;;  %vm2909_vm10 = vcmp.lt.s32.totalorder %v2888_v1, 3 }
 0x381   : > { %v2906_v57 = vor.u32 %v2905_v19, %v2904_v48  ;;  %vm2910_vm11 = vcmp.lt.s32.totalorder %v2888_v1, 4  ;;  %v2915_v24 = vsel %vm2907_vm14, %v2894_v59, %v2897_v53  ;;  %v2919_v40 = vsel %vm2907_vm14, %v2897_v53, %v2900_v51 }
 0x382   : > { %v6413_v17 = vmin.u32 %v3045_v23, %v9118_v56  ;;  %v2912_v31 = vsel %vm2910_vm11, %v2900_v51, 2102212464  ;;  %v2916_v5 = vsel %vm2910_vm11, %v2903_v45, 920167782  ;;  %v2744_v34 = vadd.s32 127, %v2743_v11 }
 0x383   : > { %vm2908_vm7 = vcmp.lt.s32.totalorder %v2888_v1, 2  ;;  %v2917_v0 = vsel %vm2909_vm10, %v2900_v51, %v2916_v5  ;;  %v2920_v22 = vsel %vm2910_vm11, %v2906_v57, 1326507024  ;;  %v9128_v13 = vpop.eup %7025  ;;  %v2911_v19 = vsel %vm2907_vm14, %v2891_v4, %v2894_v59 }
 0x384   : > { %v3047_v21 = vclz %v6413_v17  ;;  %v2918_v25 = vsel %vm2908_vm7, %v2915_v24, %v2917_v0  ;;  %v2921_v44 = vsel %vm2909_vm10, %v2903_v45, %v2920_v22  ;;  %v2913_v23 = vsel %vm2909_vm10, %v2897_v53, %v2912_v31 }
 0x385   : > { %v2922_v41 = vsel %vm2908_vm7, %v2919_v40, %v2921_v44  ;;  %v9136_v48 = vmul.u32.u64.low %v9100_v61, %v2918_v25  ;;  %v9137_v11 = vmul.u32.u64.high %v9100_v61, %v2918_v25, %v9136_v48  ;;  %v3197_v17 = vadd.s32 1, %v6420_v38 }
 0x386   : > { %v6414_v51 = vadd.s32 4294967294, %v3047_v21  ;;  %v9141_v57 = vmul.u32.u64.low %v9100_v61, %v2922_v41  ;;  %v9142_v5 = vmul.u32.u64.high %v9100_v61, %v2922_v41, %v9141_v57  ;;  %7027 = vsinq.f32 %v9068_v9 }
 0x387   : > { %v9148_v4 = vsel %vm2461_vm2, %v2543_v52, %v9070_v35  ;;  %v2853_v59 = vcvt.s32.f32 %v9090_v18  ;;  %v2723_v53 = vadd.s32 %v8972_v46, %v8980_v63  ;;  %v2914_v45 = vsel %vm2908_vm7, %v2911_v19, %v2913_v23 }
 0x388   : > { %vm6415_vm3 = vcmp.lt.s32.totalorder %v6414_v51, 0  ;;  %v3195_v24 = vor.u32 8388608, %v9104_v6  ;;  %vm3198_vm12 = vcmp.gt.s32.totalorder %v3197_v17, 0  ;;  %v2745_v38 = vshll.u32 %v2744_v34, 23 }
 0x389   : > { %v2741_v31 = vshrl.u32 %v2723_v53, %v2739_v29  ;;  %v2933_v9 = vadd.s32 1, %v9137_v11  ;;  %v3199_v40 = vsel %vm3198_vm12, %v3197_v17, 0  ;;  %v9158_v35 = vmul.f32 %v2853_v59, %v2851_v49 }
 0x38a   : > { %v2740_v52 = vshll.u32 %v9038_v36, %v9088_v27  ;;  %v3086_v46 = vand.u32 2139095040, %v9093_v26  ;;  %v9164_v63 = vmul.f32 30.0, %v9096_v7  ;;  %v9166_v18 = vsel %vm6415_vm3, 0, %v6414_v51 }
 0x38b   : > { %v2930_v6 = vmul.u32 %v9100_v61, %v2914_v45  ;;  %vm2932_vm1 = vc.u32 %v9142_v5, %v9136_v48  ;;  %v3201_v29 = vand.u32 31, %v3199_v40  ;;  %v3035_v39 = vadd.s32 %v9043_v33, %v9054_v50 }
 0x38c   : > { %12151 = vst [vmem:[#allocation17_spill] sm:$0xff] %v9164_v63  ;;  %v2934_v49 = vsel %vm2932_vm1, %v2933_v9, %v9137_v11  ;;  %v9174_v1 = vshll.u32 %v3195_v24, 8  ;;  %v11903_v36 = vand.u32 2147483647, %v9093_v26  ;;  %v9177_v27 = vor.u32 %v2741_v31, %v2740_v52 }
 0x38d   : > { %v9179_v7 = vor.u32 4788187, %v2745_v38  ;;  %v2935_v34 = vadd.s32 %v2934_v49, %v2930_v6  ;;  %v3202_v0 = vsub.s32 32, %v3201_v29  ;;  %v3051_v61 = vsub.s32 32, %v9166_v18 }
 0x38e   : > { %v3200_v22 = vshrl.u32 %v3199_v40, 5  ;;  %v3204_v21 = vshll.u32 %v12009_v55, %v3201_v29  ;;  %v3087_v19 = vshrl.u32 %v3086_v46, 23  ;;  %v3207_v50 = vshll.u32 %v12143_v16, %v3201_v29 }
 0x38f   : > { %v2936_v25 = vadd.s32 536870912, %v2935_v34  ;;  %v3205_v33 = vshrl.u32 %v12143_v16, %v3202_v0  ;;  %v3208_v44 = vshrl.u32 %v12007_v54, %v3202_v0  ;;  %v3210_v23 = vshll.u32 %v12007_v54, %v3201_v29 }
 0x390   : > { %v3211_v41 = vshrl.u32 %v12144_v14, %v3202_v0  ;;  %v3213_v11 = vshll.u32 %v12144_v14, %v3201_v29  ;;  %v3214_v51 = vshrl.u32 %v12010_v42, %v3202_v0  ;;  %v3055_v57 = vsub.s32 4294967266, %v9166_v18 }
 0x391   : > { %v9191_v17 = vshrl.u32 %v2936_v25, 30  ;;  %v3206_v59 = vor.u32 %v3205_v33, %v3204_v21  ;;  %v3209_v53 = vor.u32 %v3208_v44, %v3207_v50  ;;  %v3216_v31 = vshll.u32 %v12010_v42, %v3201_v29 }
 0x392   : > { %v3212_v45 = vor.u32 %v3211_v41, %v3210_v23  ;;  %v3215_v24 = vor.u32 %v3214_v51, %v3213_v11  ;;  %v3217_v38 = vshrl.u32 %v12001_v43, %v3202_v0  ;;  %v3053_v9 = vshrl.u32 %v3035_v39, %v3051_v61 }
 0x393   : > { %12152 = vst [vmem:[#allocation3_spill] sm:$0xff] %v9191_v17  ;;  %v2938_v40 = vshll.u32 %v9191_v17, 30  ;;  %v3203_v52 = vshrl.u32 %v12009_v55, %v3202_v0  ;;  %v6416_v46 = vadd.s32 4294967169, %v3087_v19  ;;  %v9197_v6 = vpop.eup %7027  ;;  %vm3219_vm13 = vcmp.lt.s32.totalorder %v3200_v22, 1 }
 0x394   : > { %v3218_v49 = vor.u32 %v3217_v38, %v3216_v31  ;;  %vm3221_vm15 = vcmp.lt.s32.totalorder %v3200_v22, 3  ;;  %vm3222_vm8 = vcmp.lt.s32.totalorder %v3200_v22, 4  ;;  %v3227_v33 = vsel %vm3219_vm13, %v3206_v59, %v3209_v53 }
 0x395   : > { %v9199_v21 = vsub.s32 %v2935_v34, %v2938_v40  ;;  %v3224_v25 = vsel %vm3222_vm8, %v3212_v45, 2102212464  ;;  %v3228_v50 = vsel %vm3222_vm8, %v3215_v24, 920167782  ;;  %v3056_v29 = vadd.s32 127, %v3055_v57 }
 0x396   : > { %vm3220_vm6 = vcmp.lt.s32.totalorder %v3200_v22, 2  ;;  %v3229_v44 = vsel %vm3221_vm15, %v3212_v45, %v3228_v50  ;;  %v3231_v39 = vsel %vm3219_vm13, %v3209_v53, %v3212_v45  ;;  %v3223_v23 = vsel %vm3219_vm13, %v3203_v52, %v3206_v59 }
 0x397   : > { %v2941_v61 = vsub.s32 0, %v9199_v21  ;;  %v3230_v0 = vsel %vm3220_vm6, %v3227_v33, %v3229_v44  ;;  %v3232_v19 = vsel %vm3222_vm8, %v3218_v49, 1326507024  ;;  %v3225_v41 = vsel %vm3221_vm15, %v3209_v53, %v3224_v25  ;;  %v2404_v33 = vpop.f32.mrf.mxu1 }
 0x398   : > { %v3233_v11 = vsel %vm3221_vm15, %v3215_v24, %v3232_v19  ;;  %v9204_v51 = vmul.u32.u64.low %v9174_v1, %v3230_v0  ;;  %v9205_v31 = vmul.u32.u64.high %v9174_v1, %v3230_v0, %v9204_v51  ;;  %v3093_v38 = vadd.s32 1, %v6416_v46 }
 0x399   : > { %v6409_v34 = vmin.u32 %v2941_v61, %v9199_v21  ;;  %v3234_v57 = vsel %vm3220_vm6, %v3231_v39, %v3233_v11  ;;  %v3398_v45 = vand.u32 2139095040, %v9164_v63  ;;  %v2747_v40 = vand.u32 2147483647, %v9179_v7 }
 0x39a   : > { %v3052_v59 = vshll.u32 %v9118_v56, %v9166_v18  ;;  %v9215_v53 = vmul.u32.u64.low %v9174_v1, %v3234_v57  ;;  %v9216_v24 = vmul.u32.u64.high %v9174_v1, %v3234_v57, %v9215_v53  ;;  %v3226_v49 = vsel %vm3220_vm6, %v3223_v23, %v3225_v41 }
 0x39b   : > { %v2943_v52 = vclz %v6409_v34  ;;  %v3090_v25 = vand.u32 8388607, %v11903_v36  ;;  %vm3094_vm5 = vcmp.gt.s32.totalorder %v3093_v38, 0  ;;  %v3057_v50 = vshll.u32 %v3056_v29, 23 }
 0x39c   : > { %v9221_v46 = vor.u32 %v3053_v9, %v3052_v59  ;;  %v3245_v7 = vadd.s32 1, %v9205_v31  ;;  %v3095_v44 = vsel %vm3094_vm5, %v3093_v38, 0  ;;  %v2749_v56 = vcvt.s32.f32 %v9177_v27  ;;  %v9232_v9 = vld [vmem:[%s11818_s4] ss:$0 sm:$0xff] }
 0x39d   : > { %v6410_v18 = vadd.s32 4294967294, %v2943_v52  ;;  %v3097_v39 = vand.u32 31, %v3095_v44  ;;  %v3399_v61 = vshrl.u32 %v3398_v45, 23  ;;  %v3242_v22 = vmul.u32 %v9174_v1, %v3226_v49 }
 0x39e   : > { %vm3244_vm4 = vc.u32 %v9216_v24, %v9204_v51  ;;  %v2405_v29 = vadd.f32 %v9232_v9, %v2404_v33  ;;  %v9235_v23 = vmul.f32 %v2749_v56, %v2747_v40  ;;  %v11905_v41 = vand.u32 2147483647, %v9164_v63 }
 0x39f   : > { %v3246_v27 = vsel %vm3244_vm4, %v3245_v7, %v9205_v31  ;;  %v3098_v19 = vsub.s32 32, %v3097_v39  ;;  %v9239_v11 = vor.u32 4788187, %v3057_v50  ;;  %v3091_v57 = vor.u32 8388608, %v3090_v25 }
 0x3a0   : > { %v3247_v34 = vadd.s32 %v3246_v27, %v3242_v22  ;;  %vm6411_vm9 = vcmp.lt.s32.totalorder %v6410_v18, 0  ;;  %v3096_v38 = vshrl.u32 %v3095_v44, 5  ;;  %v3106_v45 = vshll.u32 %v12007_v54, %v3097_v39 }
 0x3a1   : > { %v6428_v59 = vadd.s32 4294967169, %v3399_v61  ;;  %v3101_v40 = vshrl.u32 %v12143_v16, %v3098_v19  ;;  %v3104_v52 = vshrl.u32 %v12007_v54, %v3098_v19  ;;  %v3107_v31 = vshrl.u32 %v12144_v14, %v3098_v19 }
 0x3a2   : > { %v3248_v53 = vadd.s32 536870912, %v3247_v34  ;;  %v3100_v49 = vshll.u32 %v12009_v55, %v3097_v39  ;;  %v3103_v33 = vshll.u32 %v12143_v16, %v3097_v39  ;;  %v3109_v50 = vshll.u32 %v12144_v14, %v3097_v39 }
 0x3a3   : > { %v3110_v25 = vshrl.u32 %v12010_v42, %v3098_v19  ;;  %v3059_v7 = vand.u32 2147483647, %v9239_v11  ;;  %v9251_v44 = vsel %vm6411_vm9, 0, %v6410_v18  ;;  %v3108_v61 = vor.u32 %v3107_v31, %v3106_v45 }
 0x3a4   : > { %v9253_v56 = vshrl.u32 %v3248_v53, 30  ;;  %v3102_v22 = vor.u32 %v3101_v40, %v3100_v49  ;;  %v3105_v27 = vor.u32 %v3104_v52, %v3103_v33  ;;  %v3131_v58 = vshll.u32 %v3091_v57, 8 }
 0x3a5   : > { %v3111_v36 = vor.u32 %v3110_v25, %v3109_v50  ;;  %vm2773_vm14 = vcmp.lt.s32.totalorder %v8802_v37, 0  ;;  %v3112_v1 = vshll.u32 %v12010_v42, %v3097_v39  ;;  %v3113_v0 = vshrl.u32 %v12001_v43, %v3098_v19 }
 0x3a6   : > { %12153 = vst [vmem:[#allocation16_spill] sm:$0xff] %v9253_v56  ;;  %v3250_v3 = vshll.u32 %v9253_v56, 30  ;;  %v9261_v11 = vand.u32 8388607, %v11905_v41  ;;  %v2951_v18 = vsub.s32 4294967266, %v9251_v44  ;;  %vm3118_vm10 = vcmp.lt.s32.totalorder %v3096_v38, 4 }
 0x3a7   : > { %v3405_v45 = vadd.s32 1, %v6428_v59  ;;  %v9264_v53 = vmul.f32 30.0, %v2405_v29  ;;  %v3114_v57 = vor.u32 %v3113_v0, %v3112_v1  ;;  %vm3115_vm11 = vcmp.lt.s32.totalorder %v3096_v38, 1 }
 0x3a8   : > { %v9266_v40 = vsub.s32 %v3247_v34, %v3250_v3  ;;  %v3120_v52 = vsel %vm3118_vm10, %v3108_v61, 2102212464  ;;  %v3099_v39 = vshrl.u32 %v12009_v55, %v3098_v19  ;;  %vm3117_vm7 = vcmp.lt.s32.totalorder %v3096_v38, 3 }
 0x3a9   : > { %v3123_v31 = vsel %vm3115_vm11, %v3102_v22, %v3105_v27  ;;  %v3124_v49 = vsel %vm3118_vm10, %v3111_v36, 920167782  ;;  %vm3116_vm3 = vcmp.lt.s32.totalorder %v3096_v38, 2  ;;  %v3127_v25 = vsel %vm3115_vm11, %v3105_v27, %v3108_v61 }
 0x3aa   : > { %v3253_v33 = vsub.s32 0, %v9266_v40  ;;  %v3125_v50 = vsel %vm3117_vm7, %v3108_v61, %v3124_v49  ;;  %v3119_v59 = vsel %vm3115_vm11, %v3099_v39, %v3102_v22  ;;  %v3121_v29 = vsel %vm3117_vm7, %v3105_v27, %v3120_v52 }
 0x3ab   : > { %v3126_v3 = vsel %vm3116_vm3, %v3123_v31, %v3125_v50  ;;  %v3128_v0 = vsel %vm3118_vm10, %v3114_v57, 1326507024  ;;  %v2947_v56 = vsub.s32 32, %v9251_v44  ;;  %v2952_v62 = vadd.s32 127, %v2951_v18 }
 0x3ac   : > { %v6421_v1 = vmin.u32 %v3253_v33, %v9266_v40  ;;  %v3129_v34 = vsel %vm3117_vm7, %v3111_v36, %v3128_v0  ;;  %v9275_v41 = vmul.u32.u64.low %v3131_v58, %v3126_v3  ;;  %v9276_v19 = vmul.u32.u64.high %v3131_v58, %v3126_v3, %v9275_v41 }
 0x3ad   : > { %v3130_v17 = vsel %vm3116_vm3, %v3127_v25, %v3129_v34  ;;  %vm3406_vm12 = vcmp.gt.s32.totalorder %v3405_v45, 0  ;;  %v12154_v57 = vxor.u32 2147483648, %v9158_v35  ;;  %v3122_v31 = vsel %vm3116_vm3, %v3119_v59, %v3121_v29 }
 0x3ae   : > { %v3255_v61 = vclz %v6421_v1  ;;  %v9281_v22 = vmul.u32.u64.low %v3131_v58, %v3130_v17  ;;  %v9282_v27 = vmul.u32.u64.high %v3131_v58, %v3130_v17, %v9281_v22  ;;  %v3407_v52 = vsel %vm3406_vm12, %v3405_v45, 0 }
 0x3af   : > { %v9289_v36 = vsel %vm2773_vm14, %v12154_v57, %v9158_v35  ;;  %v3409_v18 = vand.u32 31, %v3407_v52  ;;  %v12156_v49 = vcvt.s32.f32 %v9221_v46  ;;  %v2931_v17 = vadd.s32 %v9136_v48, %v9142_v5 }
 0x3b0   : > { %12155 = vst [vmem:[#allocation6_spill] sm:$0xff] %v9289_v36  ;;  %v6422_v45 = vadd.s32 4294967294, %v3255_v61  ;;  %v3141_v50 = vadd.s32 1, %v9276_v19  ;;  %v2948_v25 = vshll.u32 %v9199_v21, %v9251_v44  ;;  %v3403_v35 = vor.u32 8388608, %v9261_v11 }
 0x3b1   : > { %v9295_v33 = vmul.f32 %v12156_v49, %v3059_v7  ;;  %v3410_v3 = vsub.s32 32, %v3409_v18  ;;  %v2949_v59 = vshrl.u32 %v2931_v17, %v2947_v56  ;;  %v2953_v29 = vshll.u32 %v2952_v62, 23 }
 0x3b2   : > { %v3138_v0 = vmul.u32 %v3131_v58, %v3122_v31  ;;  %vm3140_vm1 = vc.u32 %v9282_v27, %v9275_v41  ;;  %vm6423_vm13 = vcmp.lt.s32.totalorder %v6422_v45, 0  ;;  %v3408_v5 = vshrl.u32 %v3407_v52, 5 }
 0x3b3   : > { %v3142_v48 = vsel %vm3140_vm1, %v3141_v50, %v9276_v19  ;;  %v3413_v46 = vshrl.u32 %v12143_v16, %v3410_v3  ;;  %v3412_v21 = vshll.u32 %v12009_v55, %v3409_v18  ;;  %v3415_v44 = vshll.u32 %v12143_v16, %v3409_v18 }
 0x3b4   : > { %v3143_v7 = vadd.s32 %v3142_v48, %v3138_v0  ;;  %v3418_v11 = vshll.u32 %v12007_v54, %v3409_v18  ;;  %v3416_v56 = vshrl.u32 %v12007_v54, %v3410_v3  ;;  %v3419_v58 = vshrl.u32 %v12144_v14, %v3410_v3 }
 0x3b5   : > { %v3421_v62 = vshll.u32 %v12144_v14, %v3409_v18  ;;  %v3422_v1 = vshrl.u32 %v12010_v42, %v3410_v3  ;;  %v9315_v34 = vsel %vm6423_vm13, 0, %v6422_v45  ;;  %v3414_v61 = vor.u32 %v3413_v46, %v3412_v21 }
 0x3b6   : > { %v3144_v19 = vadd.s32 536870912, %v3143_v7  ;;  %v3424_v22 = vshll.u32 %v12010_v42, %v3409_v18  ;;  %v3417_v52 = vor.u32 %v3416_v56, %v3415_v44  ;;  %v3420_v57 = vor.u32 %v3419_v58, %v3418_v11 }
 0x3b7   : > { %v3423_v31 = vor.u32 %v3422_v1, %v3421_v62  ;;  %v3425_v49 = vshrl.u32 %v12001_v43, %v3410_v3  ;;  %v9319_v17 = vor.u32 %v2949_v59, %v2948_v25  ;;  %v9321_v50 = vor.u32 4788187, %v2953_v29 }
 0x3b8   : > { %v9323_v0 = vshrl.u32 %v3144_v19, 30  ;;  %v3443_v48 = vshll.u32 %v3403_v35, 8  ;;  %v3263_v39 = vsub.s32 4294967266, %v9315_v34  ;;  %v3411_v45 = vshrl.u32 %v12009_v55, %v3410_v3 }
 0x3b9   : > { %v3426_v38 = vor.u32 %v3425_v49, %v3424_v22  ;;  %v3294_v46 = vand.u32 2139095040, %v9264_v53  ;;  %v3259_v18 = vsub.s32 32, %v9315_v34  ;;  %vm3427_vm15 = vcmp.lt.s32.totalorder %v3408_v5, 1  ;;  %v6684_v49 = vpop.f32.mrf.mxu1 }
 0x3ba   : > { %12157 = vst [vmem:[#allocation10_spill] sm:$0xff] %v9323_v0  ;;  %v3146_v21 = vshll.u32 %v9323_v0, 30  ;;  %vm3430_vm8 = vcmp.lt.s32.totalorder %v3408_v5, 4  ;;  %vm3429_vm6 = vcmp.lt.s32.totalorder %v3408_v5, 3  ;;  %v3435_v59 = vsel %vm3427_vm15, %v3414_v61, %v3417_v52 }
 0x3bb   : > { %v3432_v25 = vsel %vm3430_vm8, %v3420_v57, 2102212464  ;;  %v3436_v29 = vsel %vm3430_vm8, %v3423_v31, 920167782  ;;  %vm3428_vm5 = vcmp.lt.s32.totalorder %v3408_v5, 2  ;;  %v3439_v3 = vsel %vm3427_vm15, %v3417_v52, %v3420_v57 }
 0x3bc   : > { %v9331_v44 = vsub.s32 %v3143_v7, %v3146_v21  ;;  %v3437_v35 = vsel %vm3429_vm6, %v3420_v57, %v3436_v29  ;;  %vm2669_vm4 = vcmp.lt.s32.totalorder %v8813_v32, 0  ;;  %vm2981_vm9 = vcmp.lt.s32.totalorder %v8932_v8, 0 }
 0x3bd   : > { %v3264_v11 = vadd.s32 127, %v3263_v39  ;;  %v3438_v56 = vsel %vm3428_vm5, %v3435_v59, %v3437_v35  ;;  %v3440_v58 = vsel %vm3430_vm8, %v3426_v38, 1326507024  ;;  %v3295_v62 = vshrl.u32 %v3294_v46, 23 }
 0x3be   : > { %v3149_v1 = vsub.s32 0, %v9331_v44  ;;  %v3431_v19 = vsel %vm3427_vm15, %v3411_v45, %v3414_v61  ;;  %v3433_v7 = vsel %vm3429_vm6, %v3417_v52, %v3432_v25  ;;  %v3441_v22 = vsel %vm3429_vm6, %v3423_v31, %v3440_v58 }
 0x3bf   : > { %v3442_v57 = vsel %vm3428_vm5, %v3439_v3, %v3441_v22  ;;  %v9343_v21 = vmul.u32.u64.low %v3443_v48, %v3438_v56  ;;  %v9344_v29 = vmul.u32.u64.high %v3443_v48, %v3438_v56, %v9343_v21  ;;  %v6424_v39 = vadd.s32 4294967169, %v3295_v62 }
 0x3c0   : > { %v3063_v59 = vxor.u32 2147483648, %v9295_v33  ;;  %v6417_v38 = vmin.u32 %v3149_v1, %v9331_v44  ;;  %v9349_v46 = vmul.u32.u64.low %v3443_v48, %v3442_v57  ;;  %v9350_v35 = vmul.u32.u64.high %v3443_v48, %v3442_v57, %v9349_v46 }
 0x3c1   : > { %v3243_v61 = vadd.s32 %v9204_v51, %v9216_v24  ;;  %v3434_v52 = vsel %vm3428_vm5, %v3431_v19, %v3433_v7  ;;  %v3301_v31 = vadd.s32 1, %v6424_v39  ;;  %v2420_v45 = vadd.f32 %v9232_v9, %v6684_v49 }
 0x3c2   : > { %v2955_v25 = vand.u32 2147483647, %v9321_v50  ;;  %v2957_v3 = vcvt.s32.f32 %v9319_v17  ;;  %v3151_v56 = vclz %v6417_v38  ;;  %v12158_v58 = vand.u32 2147483647, %v9264_v53 }
 0x3c3   : > { %v3261_v1 = vshrl.u32 %v3243_v61, %v3259_v18  ;;  %v3265_v22 = vshll.u32 %v3264_v11, 23  ;;  %v3453_v57 = vadd.s32 1, %v9344_v29  ;;  %vm3302_vm10 = vcmp.gt.s32.totalorder %v3301_v31, 0 }
 0x3c4   : > { %v3298_v62 = vand.u32 8388607, %v12158_v58  ;;  %v6418_v46 = vadd.s32 4294967294, %v3151_v56  ;;  %v3450_v51 = vmul.u32 %v3443_v48, %v3434_v52  ;;  %vm3452_vm11 = vc.u32 %v9350_v35, %v9343_v21 }
 0x3c5   : > { %v3303_v24 = vsel %vm3302_vm10, %v3301_v31, 0  ;;  %v3260_v5 = vshll.u32 %v9266_v40, %v9315_v34  ;;  %v3454_v17 = vsel %vm3452_vm11, %v3453_v57, %v9344_v29  ;;  %v9366_v19 = vmul.f32 30.0, %v2420_v45 }
 0x3c6   : > { %v3305_v50 = vand.u32 31, %v3303_v24  ;;  %v12159_v18 = vxor.u32 2147483648, %v9235_v23  ;;  %v9378_v48 = vsel %vm2981_vm9, %v3063_v59, %v9295_v33  ;;  %vm6419_vm7 = vcmp.lt.s32.totalorder %v6418_v46, 0 }
 0x3c7   : > { %12160 = vst [vmem:[#allocation9_spill] sm:$0xff] %v9378_v48  ;;  %v3455_v7 = vadd.s32 %v3454_v17, %v3450_v51  ;;  %v9380_v40 = vmul.f32 %v2957_v3, %v2955_v25  ;;  %v9382_v34 = vor.u32 %v3261_v1, %v3260_v5  ;;  %v3139_v49 = vadd.s32 %v9275_v41, %v9282_v27 }
 0x3c8   : > { %v9373_v11 = vsel %vm2669_vm4, %v12159_v18, %v9235_v23  ;;  %v3306_v29 = vsub.s32 32, %v3305_v50  ;;  %v9386_v39 = vor.u32 4788187, %v3265_v22  ;;  %v9388_v38 = vsel %vm6419_vm7, 0, %v6418_v46 }
 0x3c9   : > { %v3456_v23 = vadd.s32 536870912, %v3455_v7  ;;  %v3299_v61 = vor.u32 8388608, %v3298_v62  ;;  %v3304_v52 = vshrl.u32 %v3303_v24, 5  ;;  %v3308_v25 = vshll.u32 %v12009_v55, %v3305_v50 }
 0x3ca   : > { %v3309_v33 = vshrl.u32 %v12143_v16, %v3306_v29  ;;  %v3312_v59 = vshrl.u32 %v12007_v54, %v3306_v29  ;;  %v3311_v41 = vshll.u32 %v12143_v16, %v3305_v50  ;;  %v3315_v27 = vshrl.u32 %v12144_v14, %v3306_v29 }
 0x3cb   : > { %v9393_v45 = vshrl.u32 %v3456_v23, 30  ;;  %v3159_v3 = vsub.s32 4294967266, %v9388_v38  ;;  %v3314_v56 = vshll.u32 %v12007_v54, %v3305_v50  ;;  %v3317_v58 = vshll.u32 %v12144_v14, %v3305_v50 }
 0x3cc   : > { %v3318_v62 = vshrl.u32 %v12010_v42, %v3306_v29  ;;  %v3310_v22 = vor.u32 %v3309_v33, %v3308_v25  ;;  %v3313_v57 = vor.u32 %v3312_v59, %v3311_v41  ;;  %v9403_v46 = vshll.u32 %v3299_v61, 8 }
 0x3cd   : > { %12161 = vst [vmem:[#allocation14_spill] sm:$0xff] %v9393_v45  ;;  %v3458_v1 = vshll.u32 %v9393_v45, 30  ;;  %v3316_v51 = vor.u32 %v3315_v27, %v3314_v56  ;;  %v3320_v5 = vshll.u32 %v12010_v42, %v3305_v50  ;;  %v3321_v17 = vshrl.u32 %v12001_v43, %v3306_v29 }
 0x3ce   : > { %v3319_v24 = vor.u32 %v3318_v62, %v3317_v58  ;;  %v3155_v18 = vsub.s32 32, %v9388_v38  ;;  %v3606_v31 = vand.u32 2139095040, %v9366_v19  ;;  %v12162_v0 = vand.u32 2147483647, %v9366_v19  ;;  %v2414_v58 = vpop.f32.mrf.mxu1 }
 0x3cf   : > { %v9408_v23 = vsub.s32 %v3455_v7, %v3458_v1  ;;  %v3160_v33 = vadd.s32 127, %v3159_v3  ;;  %v3307_v61 = vshrl.u32 %v12009_v55, %v3306_v29  ;;  %v3322_v59 = vor.u32 %v3321_v17, %v3320_v5 }
 0x3d0   : > { %v9413_v48 = vand.u32 8388607, %v12162_v0  ;;  %vm3323_vm3 = vcmp.lt.s32.totalorder %v3304_v52, 1  ;;  %vm3325_vm12 = vcmp.lt.s32.totalorder %v3304_v52, 3  ;;  %vm3326_vm1 = vcmp.lt.s32.totalorder %v3304_v52, 4 }
 0x3d1   : > { %v3461_v25 = vsub.s32 0, %v9408_v23  ;;  %v3331_v50 = vsel %vm3323_vm3, %v3310_v22, %v3313_v57  ;;  %v3328_v41 = vsel %vm3326_vm1, %v3316_v51, 2102212464  ;;  %v3332_v7 = vsel %vm3326_vm1, %v3319_v24, 920167782 }
 0x3d2   : > { %v3335_v27 = vsel %vm3323_vm3, %v3313_v57, %v3316_v51  ;;  %v3336_v56 = vsel %vm3326_vm1, %v3322_v59, 1326507024  ;;  %v3157_v62 = vshrl.u32 %v3139_v49, %v3155_v18  ;;  %vm3324_vm13 = vcmp.lt.s32.totalorder %v3304_v52, 2 }
 0x3d3   : > { %v6429_v0 = vmin.u32 %v3461_v25, %v9408_v23  ;;  %v3333_v29 = vsel %vm3325_vm12, %v3316_v51, %v3332_v7  ;;  %v3161_v3 = vshll.u32 %v3160_v33, 23  ;;  %v3337_v5 = vsel %vm3325_vm12, %v3319_v24, %v3336_v56  ;;  %v6687_v33 = vpop.f32.mrf.mxu1 }
 0x3d4   : > { %v3334_v1 = vsel %vm3324_vm13, %v3331_v50, %v3333_v29  ;;  %v3607_v17 = vshrl.u32 %v3606_v31, 23  ;;  %v3327_v8 = vsel %vm3323_vm3, %v3307_v61, %v3310_v22  ;;  %v3329_v20 = vsel %vm3325_vm12, %v3313_v57, %v3328_v41 }
 0x3d5   : > { %v3463_v45 = vclz %v6429_v0  ;;  %v3338_v59 = vsel %vm3324_vm13, %v3335_v27, %v3337_v5  ;;  %v9431_v25 = vmul.u32.u64.low %v9403_v46, %v3334_v1  ;;  %v9432_v51 = vmul.u32.u64.high %v9403_v46, %v3334_v1, %v9431_v25 }
 0x3d6   : > { %v9427_v49 = vmul.u32.u64.low %v9403_v46, %v3338_v59  ;;  %v9428_v18 = vmul.u32.u64.high %v9403_v46, %v3338_v59, %v9427_v49  ;;  %v3156_v31 = vshll.u32 %v9331_v44, %v9388_v38  ;;  %v6436_v50 = vadd.s32 4294967169, %v3607_v17 }
 0x3d7   : > { %v6430_v24 = vadd.s32 4294967294, %v3463_v45  ;;  %v2415_v22 = vadd.f32 %v9232_v9, %v2414_v58  ;;  %v3267_v61 = vand.u32 2147483647, %v9386_v39  ;;  %v3269_v41 = vcvt.s32.f32 %v9382_v34  ;;  %v2424_v39 = vpop.f32.mrf.mxu1 }
 0x3d8   : > { %v3330_v7 = vsel %vm3324_vm13, %v3327_v8, %v3329_v20  ;;  %v9442_v27 = vor.u32 %v3157_v62, %v3156_v31  ;;  %v9444_v56 = vor.u32 4788187, %v3161_v3  ;;  %v3613_v0 = vadd.s32 1, %v6436_v50 }
 0x3d9   : > { %vm6431_vm15 = vcmp.lt.s32.totalorder %v6430_v24, 0  ;;  %vm3348_vm8 = vc.u32 %v9428_v18, %v9431_v25  ;;  %v3349_v44 = vadd.s32 1, %v9432_v51  ;;  %v3611_v38 = vor.u32 8388608, %v9413_v48 }
 0x3da   : > { %v9446_v29 = vsel %vm6431_vm15, 0, %v6430_v24  ;;  %v3346_v34 = vmul.u32 %v9403_v46, %v3330_v7  ;;  %vm3614_vm6 = vcmp.gt.s32.totalorder %v3613_v0, 0  ;;  %v9453_v20 = vmul.f32 30.0, %v2415_v22 }
 0x3db   : > { %v2430_v8 = vadd.f32 %v9232_v9, %v6687_v33  ;;  %v3467_v52 = vsub.s32 32, %v9446_v29  ;;  %v3471_v45 = vsub.s32 4294967266, %v9446_v29  ;;  %v3350_v58 = vsel %vm3348_vm8, %v3349_v44, %v9432_v51 }
 0x3dc   : > { %12163 = vst [vmem:[#allocation22_spill] sm:$0xff] %v9453_v20  ;;  %v3615_v62 = vsel %vm3614_vm6, %v3613_v0, 0  ;;  %v9459_v3 = vmul.f32 %v3269_v41, %v3267_v61  ;;  %v3451_v48 = vadd.s32 %v9343_v21, %v9350_v35  ;;  %v3351_v1 = vadd.s32 %v3350_v58, %v3346_v34 }
 0x3dd   : > { %v9464_v46 = vadd.f32 %v9232_v9, %v2424_v39  ;;  %v3165_v17 = vcvt.s32.f32 %v9442_v27  ;;  %v3617_v59 = vand.u32 31, %v3615_v62  ;;  %v9468_v49 = vshll.u32 %v3611_v38, 8 }
 0x3de   : > { %v3352_v33 = vadd.s32 536870912, %v3351_v1  ;;  %v11923_v31 = vand.u32 2147483647, %v9453_v20  ;;  %v9473_v24 = vmul.f32 30.0, %v2430_v8  ;;  %v3469_v21 = vshrl.u32 %v3451_v48, %v3467_v52 }
 0x3df   : > { %v3472_v35 = vadd.s32 127, %v3471_v45  ;;  %v3616_v50 = vshrl.u32 %v3615_v62, 5  ;;  %v3618_v22 = vsub.s32 32, %v3617_v59  ;;  %v3620_v41 = vshll.u32 %v12009_v55, %v3617_v59 }
 0x3e0   : > { %v9475_v61 = vshrl.u32 %v3352_v33, 30  ;;  %v3623_v7 = vshll.u32 %v12143_v16, %v3617_v59  ;;  %v3502_v27 = vand.u32 2139095040, %v9453_v20  ;;  %v3626_v38 = vshll.u32 %v12007_v54, %v3617_v59 }
 0x3e1   : > { %v3621_v0 = vshrl.u32 %v12143_v16, %v3618_v22  ;;  %v3624_v44 = vshrl.u32 %v12007_v54, %v3618_v22  ;;  %v3627_v39 = vshrl.u32 %v12144_v14, %v3618_v22  ;;  %v3629_v8 = vshll.u32 %v12144_v14, %v3617_v59 }
 0x3e2   : > { %12164 = vst [vmem:[#allocation26_spill] sm:$0xff] %v9475_v61  ;;  %v3354_v34 = vshll.u32 %v9475_v61, 30  ;;  %v3630_v52 = vshrl.u32 %v12010_v42, %v3618_v22  ;;  %v3632_v45 = vshll.u32 %v12010_v42, %v3617_v59  ;;  %v3633_v33 = vshrl.u32 %v12001_v43, %v3618_v22 }
 0x3e3   : > { %v3622_v58 = vor.u32 %v3621_v0, %v3620_v41  ;;  %v3625_v62 = vor.u32 %v3624_v44, %v3623_v7  ;;  %v3628_v48 = vor.u32 %v3627_v39, %v3626_v38  ;;  %v9493_v5 = vand.u32 8388607, %v11923_v31 }
 0x3e4   : > { %v9489_v57 = vsub.s32 %v3351_v1, %v3354_v34  ;;  %v3631_v51 = vor.u32 %v3630_v52, %v3629_v8  ;;  %v3619_v36 = vshrl.u32 %v12009_v55, %v3618_v22  ;;  %v3634_v37 = vor.u32 %v3633_v33, %v3632_v45 }
 0x3e5   : > { %vm3635_vm5 = vcmp.lt.s32.totalorder %v3616_v50, 1  ;;  %vm3638_vm10 = vcmp.lt.s32.totalorder %v3616_v50, 4  ;;  %vm3636_vm11 = vcmp.lt.s32.totalorder %v3616_v50, 2  ;;  %vm2877_vm7 = vcmp.lt.s32.totalorder %v9010_v15, 0 }
 0x3e6   : > { %v3357_v59 = vsub.s32 0, %v9489_v57  ;;  %v3640_v41 = vsel %vm3638_vm10, %v3628_v48, 2102212464  ;;  %v3643_v7 = vsel %vm3635_vm5, %v3622_v58, %v3625_v62  ;;  %vm3189_vm3 = vcmp.lt.s32.totalorder %v9062_v2, 0 }
 0x3e7   : > { %vm3637_vm12 = vcmp.lt.s32.totalorder %v3616_v50, 3  ;;  %v3644_v1 = vsel %vm3638_vm10, %v3631_v51, 920167782  ;;  %v3647_v0 = vsel %vm3635_vm5, %v3625_v62, %v3628_v48  ;;  %v3648_v44 = vsel %vm3638_vm10, %v3634_v37, 1326507024  ;;  %v4126_v37 = vld [vmem:[%s11819_s5 + $0x18] sm:$0xff] }
 0x3e8   : > { %v6425_v38 = vmin.u32 %v3357_v59, %v9489_v57  ;;  %v3639_v39 = vsel %vm3635_vm5, %v3619_v36, %v3622_v58  ;;  %v3641_v22 = vsel %vm3637_vm12, %v3625_v62, %v3640_v41  ;;  %v3645_v34 = vsel %vm3637_vm12, %v3628_v48, %v3644_v1  ;;  %6691 = vmatprep.subr.mxu0 %v4126_v37  ;;  %v4125_v50 = vld [vmem:[%s11819_s5 + $0x10] sm:$0xff] }
 0x3e9   : > { %v3473_v8 = vshll.u32 %v3472_v35, 23  ;;  %v3646_v52 = vsel %vm3636_vm11, %v3643_v7, %v3645_v34  ;;  %v3649_v45 = vsel %vm3637_vm12, %v3631_v51, %v3648_v44  ;;  %v3503_v33 = vshrl.u32 %v3502_v27, 23  ;;  %6692 = vmatpush3.msra.mxu0 %v4126_v37  ;;  %v4123_v34 = vld [vmem:[%s11819_s5] sm:$0xff] }
 0x3ea   : > { %v3359_v31 = vclz %v6425_v38  ;;  %v3650_v61 = vsel %vm3636_vm11, %v3647_v0, %v3649_v45  ;;  %v9504_v30 = vmul.u32.u64.low %v9468_v49, %v3646_v52  ;;  %v9505_v20 = vmul.u32.u64.high %v9468_v49, %v3646_v52, %v9504_v30  ;;  %6693 = vmatprep.subr.mxu0 %v4125_v50 }
 0x3eb   : > { %v3642_v36 = vsel %vm3636_vm11, %v3639_v39, %v3641_v22  ;;  %v9513_v35 = vmul.u32.u64.low %v9468_v49, %v3650_v61  ;;  %v9514_v58 = vmul.u32.u64.high %v9468_v49, %v3650_v61, %v9513_v35  ;;  %v6432_v51 = vadd.s32 4294967169, %v3503_v33  ;;  %6694 = vmatpush3.msra.mxu0 %v4125_v50 }
 0x3ec   : > { %v3271_v27 = vxor.u32 2147483648, %v9459_v3  ;;  %v12165_v62 = vand.u32 2147483647, %v9444_v56  ;;  %v6426_v59 = vadd.s32 4294967294, %v3359_v31  ;;  %v3814_v41 = vand.u32 2139095040, %v9473_v24 }
 0x3ed   : > { %v12166_v61 = vshll.u32 %v9408_v23, %v9446_v29  ;;  %v9530_v1 = vor.u32 4788187, %v3473_v8  ;;  %v3509_v0 = vadd.s32 1, %v6432_v51  ;;  %v9533_v56 = vmul.f32 30.0, %v9464_v46  ;;  %v4124_v23 = vld [vmem:[%s11819_s5 + $0x8] sm:$0xff] }
 0x3ee   : > { %v9519_v48 = vmul.f32 %v3165_v17, %v12165_v62  ;;  %vm6427_vm1 = vcmp.lt.s32.totalorder %v6426_v59, 0  ;;  %v3658_v17 = vmul.u32 %v9468_v49, %v3642_v36  ;;  %v3661_v31 = vadd.s32 1, %v9505_v20  ;;  %6695 = vmatprep.subr.mxu0 %v4124_v23 }
 0x3ef   : > { %v9528_v7 = vor.u32 %v3469_v21, %v12166_v61  ;;  %v3507_v44 = vor.u32 8388608, %v9493_v5  ;;  %v9541_v29 = vsel %vm6427_vm1, 0, %v6426_v59  ;;  %vm3660_vm13 = vc.u32 %v9514_v58, %v9504_v30  ;;  %6696 = vmatpush3.msra.mxu0 %v4124_v23 }
 0x3f0   : > { %vm3510_vm15 = vcmp.gt.s32.totalorder %v3509_v0, 0  ;;  %v12167_v46 = vand.u32 2147483647, %v9473_v24  ;;  %v12168_v49 = vxor.u32 2147483648, %v9380_v40  ;;  %v9559_v38 = vsel %vm3189_vm3, %v3271_v27, %v9459_v3  ;;  %6697 = vmatprep.subr.mxu0 %v4123_v34 }
 0x3f1   : > { %12169 = vst [vmem:[#allocation8_spill] sm:$0xff] %v9559_v38  ;;  %v3662_v39 = vsel %vm3660_vm13, %v3661_v31, %v9505_v20  ;;  %v3815_v22 = vshrl.u32 %v3814_v41, 23  ;;  %v3367_v52 = vsub.s32 4294967266, %v9541_v29  ;;  %v3347_v20 = vadd.s32 %v9431_v25, %v9428_v18  ;;  %6698 = vmatpush3.msra.mxu0 %v4123_v34 }
 0x3f2   : > { %v9547_v21 = vand.u32 8388607, %v12167_v46  ;;  %v9554_v5 = vsel %vm2877_vm7, %v12168_v49, %v9380_v40  ;;  %v3663_v45 = vadd.s32 %v3662_v39, %v3658_v17  ;;  %v3511_v40 = vsel %vm3510_vm15, %v3509_v0, 0 }
 0x3f3   : > { %v3513_v37 = vand.u32 31, %v3511_v40  ;;  %v9571_v35 = vshll.u32 %v3507_v44, 8  ;;  %v3363_v62 = vsub.s32 32, %v9541_v29  ;;  %v3364_v59 = vshll.u32 %v9489_v57, %v9541_v29 }
 0x3f4   : > { %v3664_v36 = vadd.s32 536870912, %v3663_v45  ;;  %v6444_v50 = vadd.s32 4294967169, %v3815_v22  ;;  %v3368_v61 = vadd.s32 127, %v3367_v52  ;;  %v3512_v18 = vshrl.u32 %v3511_v40, 5 }
 0x3f5   : > { %v3514_v41 = vsub.s32 32, %v3513_v37  ;;  %v3516_v25 = vshll.u32 %v12009_v55, %v3513_v37  ;;  %v3519_v31 = vshll.u32 %v12143_v16, %v3513_v37  ;;  %v3522_v44 = vshll.u32 %v12007_v54, %v3513_v37 }
 0x3f6   : > { %v9578_v0 = vshrl.u32 %v3664_v36, 30  ;;  %v3525_v23 = vshll.u32 %v12144_v14, %v3513_v37  ;;  %v3365_v39 = vshrl.u32 %v3347_v20, %v3363_v62  ;;  %v3528_v34 = vshll.u32 %v12010_v42, %v3513_v37 }
 0x3f7   : > { %v3517_v17 = vshrl.u32 %v12143_v16, %v3514_v41  ;;  %v3520_v57 = vshrl.u32 %v12007_v54, %v3514_v41  ;;  %v3523_v29 = vshrl.u32 %v12144_v14, %v3514_v41  ;;  %v3526_v49 = vshrl.u32 %v12010_v42, %v3514_v41 }
 0x3f8   : > { %12170 = vst [vmem:[#allocation13_spill] sm:$0xff] %v9578_v0  ;;  %v3666_v46 = vshll.u32 %v9578_v0, 30  ;;  %v3529_v52 = vshrl.u32 %v12001_v43, %v3514_v41  ;;  %v3369_v51 = vshll.u32 %v3368_v61, 23  ;;  %v3821_v33 = vadd.s32 1, %v6444_v50 }
 0x3f9   : > { %v3518_v22 = vor.u32 %v3517_v17, %v3516_v25  ;;  %v3521_v36 = vor.u32 %v3520_v57, %v3519_v31  ;;  %v3524_v8 = vor.u32 %v3523_v29, %v3522_v44  ;;  %v3527_v27 = vor.u32 %v3526_v49, %v3525_v23  ;;  %v6690_v29 = vpop.f32.mrf.mxu1 }
 0x3fa   : > { %v9591_v40 = vsub.s32 %v3663_v45, %v3666_v46  ;;  %v3530_v3 = vor.u32 %v3529_v52, %v3528_v34  ;;  %v3710_v0 = vand.u32 2139095040, %v9533_v56  ;;  %v3515_v2 = vshrl.u32 %v12009_v55, %v3514_v41 }
 0x3fb   : > { %vm3531_vm8 = vcmp.lt.s32.totalorder %v3512_v18, 1  ;;  %vm3534_vm6 = vcmp.lt.s32.totalorder %v3512_v18, 4  ;;  %vm3533_vm5 = vcmp.lt.s32.totalorder %v3512_v18, 3  ;;  %vm3532_vm10 = vcmp.lt.s32.totalorder %v3512_v18, 2 }
 0x3fc   : > { %v3669_v38 = vsub.s32 0, %v9591_v40  ;;  %v3536_v20 = vsel %vm3534_vm6, %v3524_v8, 2102212464  ;;  %v3539_v37 = vsel %vm3531_vm8, %v3518_v22, %v3521_v36  ;;  %v3540_v62 = vsel %vm3534_vm6, %v3527_v27, 920167782 }
 0x3fd   : > { %v3541_v25 = vsel %vm3533_vm5, %v3524_v8, %v3540_v62  ;;  %v3543_v17 = vsel %vm3531_vm8, %v3521_v36, %v3524_v8  ;;  %v3535_v61 = vsel %vm3531_vm8, %v3515_v2, %v3518_v22  ;;  %v3537_v31 = vsel %vm3533_vm5, %v3521_v36, %v3536_v20 }
 0x3fe   : > { %v6437_v45 = vmin.u32 %v3669_v38, %v9591_v40  ;;  %v3542_v50 = vsel %vm3532_vm10, %v3539_v37, %v3541_v25  ;;  %v3544_v44 = vsel %vm3534_vm6, %v3530_v3, 1326507024  ;;  %v9603_v49 = vor.u32 %v3365_v39, %v3364_v59 }
 0x3ff   : > { %v3545_v46 = vsel %vm3533_vm5, %v3527_v27, %v3544_v44  ;;  %v9599_v41 = vmul.u32.u64.low %v9571_v35, %v3542_v50  ;;  %v9600_v57 = vmul.u32.u64.high %v9571_v35, %v3542_v50, %v9599_v41  ;;  %v9605_v34 = vor.u32 4788187, %v3369_v51 }
 0x400   : > { %v3671_v23 = vclz %v6437_v45  ;;  %v3546_v38 = vsel %vm3532_vm10, %v3543_v17, %v3545_v46  ;;  %vm3822_vm11 = vcmp.gt.s32.totalorder %v3821_v33, 0  ;;  %v12171_v27 = vand.u32 2147483647, %v9530_v1 }
 0x401   : > { %v9609_v8 = vmul.u32.u64.low %v9571_v35, %v3546_v38  ;;  %v9610_v22 = vmul.u32.u64.high %v9571_v35, %v3546_v38, %v9609_v8  ;;  %v3823_v3 = vsel %vm3822_vm11, %v3821_v33, 0  ;;  %v12172_v52 = vcvt.s32.f32 %v9528_v7 }
 0x402   : > { %v6438_v2 = vadd.s32 4294967294, %v3671_v23  ;;  %v3538_v59 = vsel %vm3532_vm10, %v3535_v61, %v3537_v31  ;;  %v3825_v39 = vand.u32 31, %v3823_v3  ;;  %v9620_v51 = vadd.f32 %v9232_v9, %v6690_v29 }
 0x403   : > { %v9616_v36 = vmul.f32 %v12172_v52, %v12171_v27  ;;  %v3659_v20 = vadd.s32 %v9504_v30, %v9514_v58  ;;  %v3557_v37 = vadd.s32 1, %v9600_v57  ;;  %v12173_v33 = vor.u32 8388608, %v9547_v21 }
 0x404   : > { %vm6439_vm12 = vcmp.lt.s32.totalorder %v6438_v2, 0  ;;  %v3373_v7 = vcvt.s32.f32 %v9603_v49  ;;  %v3826_v45 = vsub.s32 32, %v3825_v39  ;;  %v12174_v18 = vand.u32 2147483647, %v9533_v56 }
 0x405   : > { %v9627_v62 = vshll.u32 %v12173_v33, 8  ;;  %v3674_v1 = vsel %vm6439_vm12, 0, %v6438_v2  ;;  %v3371_v17 = vand.u32 2147483647, %v9605_v34  ;;  %v3554_v30 = vmul.u32 %v9571_v35, %v3538_v59 }
 0x406   : > { %v9632_v25 = vand.u32 8388607, %v12174_v18  ;;  %v3679_v61 = vsub.s32 4294967266, %v3674_v1  ;;  %v3711_v58 = vshrl.u32 %v3710_v0, 23  ;;  %vm3556_vm1 = vc.u32 %v9610_v22, %v9599_v41 }
 0x407   : > { %v3824_v21 = vshrl.u32 %v3823_v3, 5  ;;  %v3829_v31 = vshrl.u32 %v12143_v16, %v3826_v45  ;;  %v3832_v50 = vshrl.u32 %v12007_v54, %v3826_v45  ;;  %v3675_v44 = vsub.s32 32, %v3674_v1 }
 0x408   : > { %v3558_v23 = vsel %vm3556_vm1, %v3557_v37, %v9600_v57  ;;  %v3828_v46 = vshll.u32 %v12009_v55, %v3825_v39  ;;  %v3831_v29 = vshll.u32 %v12143_v16, %v3825_v39  ;;  %v3680_v49 = vadd.s32 127, %v3679_v61 }
 0x409   : > { %v3559_v34 = vadd.s32 %v3558_v23, %v3554_v30  ;;  %v3834_v35 = vshll.u32 %v12007_v54, %v3825_v39  ;;  %v3835_v0 = vshrl.u32 %v12144_v14, %v3826_v45  ;;  %vm3085_vm13 = vcmp.lt.s32.totalorder %v9093_v26, 0 }
 0x40a   : > { %v3830_v38 = vor.u32 %v3829_v31, %v3828_v46  ;;  %v3833_v2 = vor.u32 %v3832_v50, %v3831_v29  ;;  %v3837_v8 = vshll.u32 %v12144_v14, %v3825_v39  ;;  %v3838_v3 = vshrl.u32 %v12010_v42, %v3826_v45 }
 0x40b   : > { %v3560_v27 = vadd.s32 536870912, %v3559_v34  ;;  %v3836_v57 = vor.u32 %v3835_v0, %v3834_v35  ;;  %v3840_v52 = vshll.u32 %v12010_v42, %v3825_v39  ;;  %v3841_v59 = vshrl.u32 %v12001_v43, %v3826_v45 }
 0x40c   : > { %v3676_v37 = vshll.u32 %v9591_v40, %v3674_v1  ;;  %v3827_v33 = vshrl.u32 %v12009_v55, %v3826_v45  ;;  %v3839_v18 = vor.u32 %v3838_v3, %v3837_v8  ;;  %v6440_v61 = vadd.s32 4294967169, %v3711_v58 }
 0x40d   : > { %v3677_v30 = vshrl.u32 %v3659_v20, %v3675_v44  ;;  %v9652_v23 = vshrl.u32 %v3560_v27, 30  ;;  %v3842_v31 = vor.u32 %v3841_v59, %v3840_v52  ;;  %vm3843_vm15 = vcmp.lt.s32.totalorder %v3824_v21, 1  ;;  %v2434_v59 = vpop.f32.mrf.mxu1 }
 0x40e   : > { %v3681_v50 = vshll.u32 %v3680_v49, 23  ;;  %vm3845_vm8 = vcmp.lt.s32.totalorder %v3824_v21, 3  ;;  %vm3846_vm6 = vcmp.lt.s32.totalorder %v3824_v21, 4  ;;  %v3851_v46 = vsel %vm3843_vm15, %v3830_v38, %v3833_v2 }
 0x40f   : > { %12175 = vst [vmem:[#allocation21_spill] sm:$0xff] %v9652_v23  ;;  %v3562_v29 = vshll.u32 %v9652_v23, 30  ;;  %v3848_v39 = vsel %vm3846_vm6, %v3836_v57, 2102212464  ;;  %v3852_v35 = vsel %vm3846_vm6, %v3839_v18, 920167782  ;;  %v3855_v0 = vsel %vm3843_vm15, %v3833_v2, %v3836_v57 }
 0x410   : > { %vm3844_vm5 = vcmp.lt.s32.totalorder %v3824_v21, 2  ;;  %v3847_v40 = vsel %vm3843_vm15, %v3827_v33, %v3830_v38  ;;  %v3853_v1 = vsel %vm3845_vm8, %v3836_v57, %v3852_v35  ;;  %v3856_v45 = vsel %vm3846_vm6, %v3842_v31, 1326507024 }
 0x411   : > { %v9655_v8 = vsub.s32 %v3559_v34, %v3562_v29  ;;  %v3849_v20 = vsel %vm3845_vm8, %v3833_v2, %v3848_v39  ;;  %v3854_v58 = vsel %vm3844_vm5, %v3851_v46, %v3853_v1  ;;  %v3857_v44 = vsel %vm3845_vm8, %v3839_v18, %v3856_v45 }
 0x412   : > { %v3682_v3 = vor.u32 4788187, %v3681_v50  ;;  %v3858_v49 = vsel %vm3844_vm5, %v3855_v0, %v3857_v44  ;;  %v9660_v27 = vmul.u32.u64.low %v9627_v62, %v3854_v58  ;;  %v9661_v52 = vmul.u32.u64.high %v9627_v62, %v3854_v58, %v9660_v27 }
 0x413   : > { %v12176_v38 = vxor.u32 2147483648, %v9519_v48  ;;  %v3565_v2 = vsub.s32 0, %v9655_v8  ;;  %v9673_v57 = vmul.u32.u64.low %v9627_v62, %v3858_v49  ;;  %v9674_v33 = vmul.u32.u64.high %v9627_v62, %v3858_v49, %v9673_v57 }
 0x414   : > { %v9676_v18 = vmul.f32 %v3373_v7, %v3371_v17  ;;  %v3678_v31 = vor.u32 %v3677_v30, %v3676_v37  ;;  %v3850_v50 = vsel %vm3844_vm5, %v3847_v40, %v3849_v20  ;;  %v3717_v46 = vadd.s32 1, %v6440_v61 }
 0x415   : > { %v9669_v34 = vsel %vm3085_vm13, %v12176_v38, %v9519_v48  ;;  %v6433_v39 = vmin.u32 %v3565_v2, %v9655_v8  ;;  %v3715_v35 = vor.u32 8388608, %v9632_v25  ;;  %v2435_v48 = vadd.f32 %v9232_v9, %v2434_v59 }
 0x416   : > { %v3683_v0 = vand.u32 2147483647, %v3682_v3  ;;  %v3869_v1 = vadd.s32 1, %v9661_v52  ;;  %vm3718_vm10 = vcmp.gt.s32.totalorder %v3717_v46, 0  ;;  %v9685_v45 = vmul.f32 30.0, %v9620_v51 }
 0x417   : > { %v3567_v7 = vclz %v6433_v39  ;;  %v3866_v17 = vmul.u32 %v9627_v62, %v3850_v50  ;;  %vm3868_vm11 = vc.u32 %v9674_v33, %v9660_v27  ;;  %v3719_v21 = vsel %vm3718_vm10, %v3717_v46, 0 }
 0x418   : > { %v3685_v61 = vcvt.s32.f32 %v3678_v31  ;;  %v3870_v25 = vsel %vm3868_vm11, %v3869_v1, %v9661_v52  ;;  %v3721_v9 = vand.u32 31, %v3719_v21  ;;  %v3555_v30 = vadd.s32 %v9599_v41, %v9610_v22 }
 0x419   : > { %v6434_v40 = vadd.s32 4294967294, %v3567_v7  ;;  %v3871_v20 = vadd.s32 %v3870_v25, %v3866_v17  ;;  %v9694_v51 = vmul.f32 30.0, %v2435_v48  ;;  %v9698_v44 = vshll.u32 %v3715_v35, 8 }
 0x41a   : > { %v9696_v58 = vmul.f32 %v3685_v61, %v3683_v0  ;;  %v3722_v62 = vsub.s32 32, %v3721_v9  ;;  %v11934_v3 = vand.u32 2147483647, %v9685_v45  ;;  %v9701_v59 = vshrl.u32 %v3719_v21, 5 }
 0x41b   : > { %12177 = vst [vmem:[#allocation19_spill] sm:$0xff] %v9694_v51  ;;  %vm6435_vm12 = vcmp.lt.s32.totalorder %v6434_v40, 0  ;;  %v3872_v49 = vadd.s32 536870912, %v3871_v20  ;;  %v4022_v52 = vand.u32 2139095040, %v9685_v45  ;;  %v3724_v41 = vshll.u32 %v12009_v55, %v3721_v9 }
 0x41c   : > { %v3570_v38 = vsel %vm6435_vm12, 0, %v6434_v40  ;;  %v3725_v22 = vshrl.u32 %v12143_v16, %v3722_v62  ;;  %v3728_v2 = vshrl.u32 %v12007_v54, %v3722_v62  ;;  %v3727_v31 = vshll.u32 %v12143_v16, %v3721_v9 }
 0x41d   : > { %v9707_v57 = vshrl.u32 %v3872_v49, 30  ;;  %v3730_v50 = vshll.u32 %v12007_v54, %v3721_v9  ;;  %v3733_v46 = vshll.u32 %v12144_v14, %v3721_v9  ;;  %v3575_v39 = vsub.s32 4294967266, %v3570_v38 }
 0x41e   : > { %v3731_v35 = vshrl.u32 %v12144_v14, %v3722_v62  ;;  %v3734_v48 = vshrl.u32 %v12010_v42, %v3722_v62  ;;  %v3736_v0 = vshll.u32 %v12010_v42, %v3721_v9  ;;  %v3726_v7 = vor.u32 %v3725_v22, %v3724_v41 }
 0x41f   : > { %12178 = vst [vmem:[#allocation11_spill] sm:$0xff] %v9707_v57  ;;  %v3874_v1 = vshll.u32 %v9707_v57, 30  ;;  %v3729_v17 = vor.u32 %v3728_v2, %v3727_v31  ;;  %v3737_v21 = vshrl.u32 %v12001_v43, %v3722_v62  ;;  %vm11945_vm1 = vcmp.lt.s32.totalorder %v9164_v63, 0 }
 0x420   : > { %vm3293_vm15 = vcmp.lt.s32.totalorder %v9264_v53, 0  ;;  %v3732_v61 = vor.u32 %v3731_v35, %v3730_v50  ;;  %v3735_v25 = vor.u32 %v3734_v48, %v3733_v46  ;;  %v4023_v40 = vshrl.u32 %v4022_v52, 23 }
 0x421   : > { %v4026_v49 = vand.u32 8388607, %v11934_v3  ;;  %v3571_v37 = vsub.s32 32, %v3570_v38  ;;  %v9721_v29 = vsub.s32 %v3871_v20, %v3874_v1  ;;  %v3738_v9 = vor.u32 %v3737_v21, %v3736_v0 }
 0x422   : > { %v3918_v57 = vand.u32 2139095040, %v9694_v51  ;;  %v3572_v41 = vshll.u32 %v9655_v8, %v3570_v38  ;;  %v3576_v22 = vadd.s32 127, %v3575_v39  ;;  %v3723_v2 = vshrl.u32 %v12009_v55, %v3722_v62 }
 0x423   : > { %vm3739_vm8 = vcmp.lt.s32.totalorder %v9701_v59, 1  ;;  %v3877_v31 = vsub.s32 0, %v9721_v29  ;;  %vm3741_vm6 = vcmp.lt.s32.totalorder %v9701_v59, 3  ;;  %vm3742_vm5 = vcmp.lt.s32.totalorder %v9701_v59, 4 }
 0x424   : > { %v3747_v20 = vsel %vm3739_vm8, %v3726_v7, %v3729_v17  ;;  %v3744_v52 = vsel %vm3742_vm5, %v3732_v61, 2102212464  ;;  %v3748_v50 = vsel %vm3742_vm5, %v3735_v25, 920167782  ;;  %v3751_v46 = vsel %vm3739_vm8, %v3729_v17, %v3732_v61 }
 0x425   : > { %v3752_v8 = vsel %vm3742_vm5, %v3738_v9, 1326507024  ;;  %v3573_v38 = vshrl.u32 %v3555_v30, %v3571_v37  ;;  %v6445_v62 = vmin.u32 %v3877_v31, %v9721_v29  ;;  %vm3740_vm10 = vcmp.lt.s32.totalorder %v9701_v59, 2 }
 0x426   : > { %v3749_v39 = vsel %vm3741_vm6, %v3732_v61, %v3748_v50  ;;  %v3577_v35 = vshll.u32 %v3576_v22, 23  ;;  %v3753_v0 = vsel %vm3741_vm6, %v3735_v25, %v3752_v8  ;;  %v6452_v1 = vadd.s32 4294967169, %v4023_v40 }
 0x427   : > { %v3750_v48 = vsel %vm3740_vm10, %v3747_v20, %v3749_v39  ;;  %v3879_v21 = vclz %v6445_v62  ;;  %v3743_v9 = vsel %vm3739_vm8, %v3723_v2, %v3726_v7  ;;  %v3745_v37 = vsel %vm3741_vm6, %v3729_v17, %v3744_v52 }
 0x428   : > { %v3754_v30 = vsel %vm3740_vm10, %v3751_v46, %v3753_v0  ;;  %v9753_v31 = vmul.u32.u64.low %v9698_v44, %v3750_v48  ;;  %v9754_v20 = vmul.u32.u64.high %v9698_v44, %v3750_v48, %v9753_v31  ;;  %v12179_v25 = vxor.u32 2147483648, %v9616_v36 }
 0x429   : > { %v9749_v61 = vmul.u32.u64.low %v9698_v44, %v3754_v30  ;;  %v9750_v22 = vmul.u32.u64.high %v9698_v44, %v3754_v30, %v9749_v61  ;;  %v12181_v17 = vxor.u32 2147483648, %v9676_v18  ;;  %v6446_v2 = vadd.s32 4294967294, %v3879_v21 }
 0x42a   : > { %v9762_v7 = vsel %vm11945_vm1, %v12179_v25, %v9616_v36  ;;  %v4029_v52 = vadd.s32 1, %v6452_v1  ;;  %v9772_v46 = vor.u32 %v3573_v38, %v3572_v41  ;;  %v9774_v8 = vor.u32 4788187, %v3577_v35 }
 0x42b   : > { %12180 = vst [vmem:[#allocation18_spill] sm:$0xff] %v9762_v7  ;;  %v9769_v40 = vsel %vm3293_vm15, %v12181_v17, %v9676_v18  ;;  %v3746_v62 = vsel %vm3740_vm10, %v3743_v9, %v3745_v37  ;;  %vm6447_vm11 = vcmp.lt.s32.totalorder %v6446_v2, 0  ;;  %v4027_v36 = vor.u32 8388608, %v4026_v49 }
 0x42c   : > { %vm4030_vm12 = vcmp.gt.s32.totalorder %v4029_v52, 0  ;;  %v11935_v39 = vand.u32 2147483647, %v9694_v51  ;;  %v9779_v48 = vsel %vm6447_vm11, 0, %v6446_v2  ;;  %vm3764_vm8 = vc.u32 %v9750_v22, %v9753_v31 }
 0x42d   : > { %v3765_v18 = vadd.s32 1, %v9754_v20  ;;  %v3919_v0 = vshrl.u32 %v3918_v57, 23  ;;  %v3867_v41 = vadd.s32 %v9660_v27, %v9674_v33  ;;  %v3887_v38 = vsub.s32 4294967266, %v9779_v48 }
 0x42e   : > { %v3762_v59 = vmul.u32 %v9698_v44, %v3746_v62  ;;  %v4031_v35 = vsel %vm4030_vm12, %v4029_v52, 0  ;;  %v3581_v1 = vcvt.s32.f32 %v9772_v46  ;;  %v9791_v30 = vshll.u32 %v4027_v36, 8 }
 0x42f   : > { %v3766_v21 = vsel %vm3764_vm8, %v3765_v18, %v9754_v20  ;;  %v4033_v9 = vand.u32 31, %v4031_v35  ;;  %v9795_v57 = vand.u32 8388607, %v11935_v39  ;;  %v3883_v33 = vsub.s32 32, %v9779_v48 }
 0x430   : > { %v3767_v37 = vadd.s32 %v3766_v21, %v3762_v59  ;;  %v4032_v44 = vshrl.u32 %v4031_v35, 5  ;;  %v6448_v25 = vadd.s32 4294967169, %v3919_v0  ;;  %v3888_v17 = vadd.s32 127, %v3887_v38 }
 0x431   : > { %v4034_v61 = vsub.s32 32, %v4033_v9  ;;  %v4036_v52 = vshll.u32 %v12009_v55, %v4033_v9  ;;  %v4039_v20 = vshll.u32 %v12143_v16, %v4033_v9  ;;  %v4042_v36 = vshll.u32 %v12007_v54, %v4033_v9 }
 0x432   : > { %v3768_v2 = vadd.s32 536870912, %v3767_v37  ;;  %v3884_v59 = vshll.u32 %v9721_v29, %v9779_v48  ;;  %v4045_v0 = vshll.u32 %v12144_v14, %v4033_v9  ;;  %v3923_v50 = vor.u32 8388608, %v9795_v57 }
 0x433   : > { %v4037_v46 = vshrl.u32 %v12143_v16, %v4034_v61  ;;  %v4040_v62 = vshrl.u32 %v12007_v54, %v4034_v61  ;;  %v4043_v18 = vshrl.u32 %v12144_v14, %v4034_v61  ;;  %v4046_v38 = vshrl.u32 %v12010_v42, %v4034_v61 }
 0x434   : > { %v9807_v35 = vshrl.u32 %v3768_v2, 30  ;;  %v4048_v23 = vshll.u32 %v12010_v42, %v4033_v9  ;;  %v4049_v7 = vshrl.u32 %v12001_v43, %v4034_v61  ;;  %v12183_v29 = vand.u32 2147483647, %v8795_v12 }
 0x435   : > { %v4038_v21 = vor.u32 %v4037_v46, %v4036_v52  ;;  %v4041_v3 = vor.u32 %v4040_v62, %v4039_v20  ;;  %v4044_v39 = vor.u32 %v4043_v18, %v4042_v36  ;;  %v4047_v49 = vor.u32 %v4046_v38, %v4045_v0 }
 0x436   : > { %12182 = vst [vmem:[#allocation28_spill] sm:$0xff] %v9807_v35  ;;  %v3770_v27 = vshll.u32 %v9807_v35, 30  ;;  %vm9817_vm6 = vcmp.le.f32.partialorder %v12183_v29, 0.7853982  ;;  %v3889_v2 = vshll.u32 %v3888_v17, 23  ;;  %v4035_v52 = vshrl.u32 %v12009_v55, %v4034_v61 }
 0x437   : > { %vm4051_vm5 = vcmp.lt.s32.totalorder %v4032_v44, 1  ;;  %v3925_v20 = vadd.s32 1, %v6448_v25  ;;  %v4050_v57 = vor.u32 %v4049_v7, %v4048_v23  ;;  %vm4052_vm10 = vcmp.lt.s32.totalorder %v4032_v44, 2 }
 0x438   : > { %v9822_v46 = vsub.s32 %v3767_v37, %v3770_v27  ;;  %vm4054_vm11 = vcmp.lt.s32.totalorder %v4032_v44, 4  ;;  %vm4053_vm12 = vcmp.lt.s32.totalorder %v4032_v44, 3  ;;  %v4059_v62 = vsel %vm4051_vm5, %v4038_v21, %v4041_v3 }
 0x439   : > { %v4056_v9 = vsel %vm4054_vm11, %v4044_v39, 2102212464  ;;  %v4060_v36 = vsel %vm4054_vm11, %v4047_v49, 920167782  ;;  %v4055_v0 = vsel %vm4051_vm5, %v4035_v52, %v4038_v21  ;;  %v4063_v29 = vsel %vm4051_vm5, %v4041_v3, %v4044_v39 }
 0x43a   : > { %v3773_v18 = vsub.s32 0, %v9822_v46  ;;  %v4061_v38 = vsel %vm4053_vm12, %v4044_v39, %v4060_v36  ;;  %v4057_v35 = vsel %vm4053_vm12, %v4041_v3, %v4056_v9  ;;  %v4064_v61 = vsel %vm4054_vm11, %v4050_v57, 1326507024 }
 0x43b   : > { %v4062_v17 = vsel %vm4052_vm10, %v4059_v62, %v4061_v38  ;;  %vm3926_vm8 = vcmp.gt.s32.totalorder %v3925_v20, 0  ;;  %v3885_v25 = vshrl.u32 %v3867_v41, %v3883_v33  ;;  %v9826_v37 = vor.u32 4788187, %v3889_v2 }
 0x43c   : > { %v6441_v23 = vmin.u32 %v3773_v18, %v9822_v46  ;;  %v4065_v7 = vsel %vm4053_vm12, %v4047_v49, %v4064_v61  ;;  %v9831_v63 = vmul.u32.u64.low %v9791_v30, %v4062_v17  ;;  %v9832_v51 = vmul.u32.u64.high %v9791_v30, %v4062_v17, %v9831_v63 }
 0x43d   : > { %v4066_v27 = vsel %vm4052_vm10, %v4063_v29, %v4065_v7  ;;  %v3927_v21 = vsel %vm3926_vm8, %v3925_v20, 0  ;;  %v4058_v3 = vsel %vm4052_vm10, %v4055_v0, %v4057_v35  ;;  %v12186_v41 = vand.u32 2147483647, %v9774_v8 }
 0x43e   : > { %v3775_v39 = vclz %v6441_v23  ;;  %v9837_v52 = vmul.u32.u64.low %v9791_v30, %v4066_v27  ;;  %v9838_v57 = vmul.u32.u64.high %v9791_v30, %v4066_v27, %v9837_v52  ;;  %v9844_v49 = vshrl.u32 %v3927_v21, 5 }
 0x43f   : > { %v9842_v33 = vmul.f32 %v3581_v1, %v12186_v41  ;;  %v3929_v2 = vand.u32 31, %v3927_v21  ;;  %v2547_v9 = vsel %vm9817_vm6, %v8795_v12, %v9148_v4  ;;  %v9850_v20 = vor.u32 %v3885_v25, %v3884_v59 }
 0x440   : > { %v3891_v44 = vand.u32 2147483647, %v9826_v37  ;;  %v3763_v35 = vadd.s32 %v9753_v31, %v9750_v22  ;;  %v6442_v62 = vadd.s32 4294967294, %v3775_v39  ;;  %v4074_v8 = vmul.u32 %v9791_v30, %v4058_v3 }
 0x441   : > { %v4077_v1 = vadd.s32 1, %v9832_v51  ;;  %v3930_v36 = vsub.s32 32, %v3929_v2  ;;  %v9857_v18 = vshll.u32 %v3923_v50, 8  ;;  %vm4076_vm10 = vc.u32 %v9838_v57, %v9831_v63 }
 0x442   : > { %vm6443_vm5 = vcmp.lt.s32.totalorder %v6442_v62, 0  ;;  %v12187_v4 = vsub.s32 4, %v8900_v60  ;;  %7029 = vcosq.f32 %v2547_v9  ;;  %vm3947_vm11 = vcmp.lt.s32.totalorder %v9844_v49, 1 }
 0x443   : > { %v3778_v22 = vsel %vm6443_vm5, 0, %v6442_v62  ;;  %v4078_v31 = vsel %vm4076_vm10, %v4077_v1, %v9832_v51  ;;  %v3933_v30 = vshrl.u32 %v12143_v16, %v3930_v36  ;;  %v3932_v29 = vshll.u32 %v12009_v55, %v3929_v2 }
 0x444   : > { %v9866_v59 = vsel %vm2461_vm2, %v12187_v4, %v8900_v60  ;;  %v3779_v50 = vsub.s32 32, %v3778_v22  ;;  %v3783_v0 = vsub.s32 4294967266, %v3778_v22  ;;  %v4079_v38 = vadd.s32 %v4078_v31, %v4074_v8 }
 0x445   : > { %v3935_v17 = vshll.u32 %v12143_v16, %v3929_v2  ;;  %v3936_v61 = vshrl.u32 %v12007_v54, %v3930_v36  ;;  %v3938_v60 = vshll.u32 %v12007_v54, %v3929_v2  ;;  %v3939_v25 = vshrl.u32 %v12144_v14, %v3930_v36 }
 0x446   : > { %v4080_v23 = vadd.s32 536870912, %v4079_v38  ;;  %v3934_v7 = vor.u32 %v3933_v30, %v3932_v29  ;;  %v3941_v51 = vshll.u32 %v12144_v14, %v3929_v2  ;;  %v3942_v27 = vshrl.u32 %v12010_v42, %v3930_v36 }
 0x447   : > { %vm11944_vm2 = vcmp.lt.s32.totalorder %v9366_v19, 0  ;;  %v3937_v21 = vor.u32 %v3936_v61, %v3935_v17  ;;  %v3940_v39 = vor.u32 %v3939_v25, %v3938_v60  ;;  %v3944_v3 = vshll.u32 %v12010_v42, %v3929_v2 }
 0x448   : > { %v3945_v52 = vshrl.u32 %v12001_v43, %v3930_v36  ;;  %v3781_v41 = vshrl.u32 %v3763_v35, %v3779_v50  ;;  %v3784_v62 = vadd.s32 127, %v3783_v0  ;;  %v9881_v8 = vshrl.u32 %v4080_v23, 30 }
 0x449   : > { %v3943_v1 = vor.u32 %v3942_v27, %v3941_v51  ;;  %vm3948_vm12 = vcmp.lt.s32.totalorder %v9844_v49, 2  ;;  %vm3949_vm8 = vcmp.lt.s32.totalorder %v9844_v49, 3  ;;  %vm3950_vm5 = vcmp.lt.s32.totalorder %v9844_v49, 4 }
 0x44a   : > { %v3946_v4 = vor.u32 %v3945_v52, %v3944_v3  ;;  %v3780_v31 = vshll.u32 %v9822_v46, %v3778_v22  ;;  %v4082_v30 = vshll.u32 %v9881_v8, 30  ;;  %v3952_v29 = vsel %vm3950_vm5, %v3940_v39, 2102212464 }
 0x44b   : > { %v3955_v2 = vsel %vm3947_vm11, %v3934_v7, %v3937_v21  ;;  %v3931_v35 = vshrl.u32 %v12009_v55, %v3930_v36  ;;  %v3956_v50 = vsel %vm3950_vm5, %v3943_v1, 920167782  ;;  %v3959_v0 = vsel %vm3947_vm11, %v3937_v21, %v3940_v39 }
 0x44c   : > { %v3960_v17 = vsel %vm3950_vm5, %v3946_v4, 1326507024  ;;  %v9893_v61 = vor.u32 %v3781_v41, %v3780_v31  ;;  %v3785_v60 = vshll.u32 %v3784_v62, 23  ;;  %v9895_v25 = vsub.s32 %v4079_v38, %v4082_v30 }
 0x44d   : > { %v3957_v46 = vsel %vm3949_vm8, %v3940_v39, %v3956_v50  ;;  %v3951_v22 = vsel %vm3947_vm11, %v3931_v35, %v3934_v7  ;;  %v3953_v23 = vsel %vm3949_vm8, %v3937_v21, %v3952_v29  ;;  %v3961_v51 = vsel %vm3949_vm8, %v3943_v1, %v3960_v17 }
 0x44e   : > { %v3958_v36 = vsel %vm3948_vm12, %v3955_v2, %v3957_v46  ;;  %v4085_v27 = vsub.s32 0, %v9895_v25  ;;  %v3962_v38 = vsel %vm3948_vm12, %v3959_v0, %v3961_v51  ;;  %v2548_v39 = vsel %vm9817_vm6, 0, %v9866_v59 }
 0x44f   : > { %7031 = vsinq.f32 %v2547_v9  ;;  %v9913_v7 = vpop.eup %7029  ;;  %v9916_v21 = vmul.u32.u64.low %v9857_v18, %v3962_v38  ;;  %v9917_v3 = vmul.u32.u64.high %v9857_v18, %v3962_v38, %v9916_v21  ;;  %v12188_v62 = vxor.u32 2147483648, %v9696_v58 }
 0x450   : > { %v9920_v52 = vmul.u32.u64.low %v9857_v18, %v3958_v36  ;;  %v9921_v41 = vmul.u32.u64.high %v9857_v18, %v3958_v36, %v9920_v52  ;;  %v3893_v48 = vcvt.s32.f32 %v9850_v20  ;;  %v9932_v9 = vor.u32 4788187, %v3785_v60 }
 0x451   : > { %v9929_v1 = vsel %vm11944_vm2, %v12188_v62, %v9696_v58  ;;  %v6453_v59 = vmin.u32 %v4085_v27, %v9895_v25  ;;  %v3583_v4 = vxor.u32 2147483648, %v9842_v33  ;;  %v3954_v31 = vsel %vm3948_vm12, %v3951_v22, %v3953_v23 }
 0x452   : > { %v2552_v30 = vadd.s32 3, %v2548_v39  ;;  %v12189_v29 = vsel %vm9034_vm0, 0, %v8992_v28  ;;  %v9944_v58 = vmul.f32 %v3893_v48, %v3891_v44  ;;  %v3789_v20 = vcvt.s32.f32 %v9893_v61 }
 0x453   : > { %v2656_v2 = vadd.s32 3, %v12189_v29  ;;  %v4075_v35 = vadd.s32 %v9831_v63, %v9838_v57  ;;  %v4087_v50 = vclz %v6453_v59  ;;  %vm3972_vm6 = vc.u32 %v9917_v3, %v9920_v52 }
 0x454   : > { %v3973_v49 = vadd.s32 1, %v9921_v41  ;;  %v2660_v10 = vxor.u32 2147483648, %v9197_v6  ;;  %v3787_v28 = vand.u32 2147483647, %v9932_v9  ;;  %v3970_v37 = vmul.u32 %v9857_v18, %v3954_v31 }
 0x455   : > { %v2657_v0 = vand.u32 3, %v2656_v2  ;;  %v6454_v17 = vadd.s32 4294967294, %v4087_v50  ;;  %v2663_v44 = vxor.u32 2147483648, %v9128_v13  ;;  %v2553_v60 = vand.u32 3, %v2552_v30 }
 0x456   : > { %v3974_v61 = vsel %vm3972_vm6, %v3973_v49, %v9921_v41  ;;  %v2559_v63 = vxor.u32 2147483648, %v9913_v7  ;;  %v12190_v57 = vand.u32 2147483647, %v8813_v32  ;;  %vm2551_vm8 = vweird.f32 %v8795_v12 }
 0x457   : > { %vm6455_vm10 = vcmp.lt.s32.totalorder %v6454_v17, 0  ;;  %v3975_v22 = vadd.s32 %v3974_v61, %v3970_v37  ;;  %vm2659_vm11 = vcmp.eq.s32.totalorder %v2657_v0, 0  ;;  %vm2662_vm12 = vcmp.eq.s32.totalorder %v2657_v0, 2 }
 0x458   : > { %vm9960_vm0 = vcmp.le.f32.partialorder %v12190_v57, 0.7853982  ;;  %v4090_v23 = vsel %vm6455_vm10, 0, %v6454_v17  ;;  %v2661_v18 = vsel %vm2659_vm11, %v9128_v13, %v2660_v10  ;;  %v2753_v36 = vsub.s32 4, %v9024_v47  ;;  %v12193_v13 = vld [vmem:[#allocation22_spill] sm:$0xff]  ;;  %v12195_v10 = vld [vmem:[#allocation15_spill] sm:$0xff] }
 0x459   : > { %v2755_v51 = vsel %vm9960_vm0, %v8813_v32, %v9373_v11  ;;  %v4091_v27 = vsub.s32 32, %v4090_v23  ;;  %v4095_v38 = vsub.s32 4294967266, %v4090_v23  ;;  %v3976_v39 = vadd.s32 536870912, %v3975_v22  ;;  %v12199_v57 = vld [vmem:[#allocation6_spill] sm:$0xff] }
 0x45a   : > { %v2664_v21 = vsel %vm2662_vm12, %v2663_v44, %v9197_v6  ;;  %vm2554_vm5 = vcmp.lt.s32.totalorder %v2553_v60, 2  ;;  %vm2555_vm6 = vcmp.eq.s32.totalorder %v2553_v60, 0  ;;  %v2754_v41 = vsel %vm2669_vm4, %v2753_v36, %v9024_v47  ;;  %v12194_v6 = vld [vmem:[#allocation5_spill] sm:$0xff] }
 0x45b   : > { %7033 = vcosq.f32 %v2755_v51  ;;  %vm3501_vm10 = vcmp.lt.s32.totalorder %v12193_v13, 0  ;;  %vm3813_vm11 = vcmp.lt.s32.totalorder %v9473_v24, 0  ;;  %v4096_v62 = vadd.s32 127, %v4095_v38 }
 0x45c   : > { %v9977_v48 = vshrl.u32 %v3976_v39, 30  ;;  %vm2558_vm2 = vcmp.eq.s32.totalorder %v2553_v60, 2  ;;  %vm2658_vm1 = vcmp.lt.s32.totalorder %v2657_v0, 2  ;;  %v7032_v11 = vpop.eup %7031  ;;  %v4093_v9 = vshrl.u32 %v4075_v35, %v4091_v27  ;;  %v12200_v27 = vld [vmem:[#allocation2_spill] sm:$0xff]  ;;  %v12206_v60 = vld [vmem:[#allocation3_spill] sm:$0xff]  ;;  %v12211_v0 = vld [vmem:[#allocation4_spill] sm:$0xff] }
 0x45d   : > { %v2665_v59 = vsel %vm2658_vm1, %v2661_v18, %v2664_v21  ;;  %7035 = vsinq.f32 %v2755_v51  ;;  %v2857_v31 = vsub.s32 4, %v12194_v6  ;;  %v4097_v30 = vshll.u32 %v4096_v62, 23 }
 0x45e   : > { %v3978_v29 = vshll.u32 %v9977_v48, 30  ;;  %v2556_v47 = vxor.u32 2147483648, %v7032_v11  ;;  %v2756_v2 = vsel %vm9960_vm0, 0, %v2754_v41  ;;  %v4092_v50 = vshll.u32 %v9895_v25, %v4090_v23 }
 0x45f   : > { %v2560_v49 = vsel %vm2558_vm2, %v2559_v63, %v7032_v11  ;;  %v12196_v17 = vand.u32 2147483647, %v12195_v10  ;;  %v2858_v35 = vsel %vm2773_vm14, %v2857_v31, %v12194_v6  ;;  %v4098_v37 = vor.u32 4788187, %v4097_v30 }
 0x460   : > { %v9993_v44 = vsub.s32 %v3975_v22, %v3978_v29  ;;  %v2557_v61 = vsel %vm2555_vm6, %v9913_v7, %v2556_v47  ;;  %v3895_v63 = vxor.u32 2147483648, %v9944_v58  ;;  %v10002_v46 = vmul.f32 %v3789_v20, %v3787_v28 }
 0x461   : > { %vm9986_vm4 = vcmp.le.f32.partialorder %v12196_v17, 0.7853982  ;;  %v2561_v23 = vsel %vm2554_vm5, %v2557_v61, %v2560_v49  ;;  %v2760_v18 = vadd.s32 3, %v2756_v2  ;;  %v4094_v36 = vor.u32 %v4093_v9, %v4092_v50 }
 0x462   : > { %v2859_v25 = vsel %vm9986_vm4, %v12195_v10, %v12199_v57  ;;  %v3981_v51 = vsub.s32 0, %v9993_v44  ;;  %v2562_v22 = vsel %vm2551_vm8, nan, %v2561_v23  ;;  %vm2655_vm14 = vweird.f32 %v12200_v27 }
 0x463   : > { %v4099_v7 = vand.u32 2147483647, %v4098_v37  ;;  %vm12201_vm1 = vcmask 261120   ;;  %v2666_v38 = vsel %vm2655_vm14, nan, %v2665_v59  ;;  %v2860_v39 = vsel %vm9986_vm4, 0, %v2858_v35 }
 0x464   : > { %6699 = vmatprep.mubr.msk.f32.mxu0 %vm12201_vm1, %v2562_v22  ;;  %7037 = vcosq.f32 %v2859_v25  ;;  %v6449_v20 = vmin.u32 %v3981_v51, %v9993_v44  ;;  %vm12202_vm2 = vmmov %vm12201_vm1  ;;  %v12203_v28 = vand.u32 2147483647, %v9010_v15  ;;  %v2961_v21 = vsub.s32 4, %v12206_v60 }
 0x465   : > { %6700 = vmatmul.mubr.msk.f32.vlgmr.msra.gmra.mxu0 %vm12202_vm2, %v2666_v38  ;;  %7039 = vsinq.f32 %v2859_v25  ;;  %v10026_v41 = vsel %vm3501_vm10, %v3583_v4, %v9842_v33  ;;  %v10031_v62 = vsel %vm3813_vm11, %v3895_v63, %v9944_v58  ;;  %v2761_v11 = vand.u32 3, %v2760_v18 }
 0x466   : > { %vm10016_vm0 = vcmp.le.f32.partialorder %v12203_v28, 0.7853982  ;;  %v4101_v59 = vcvt.s32.f32 %v4094_v36  ;;  %v3983_v6 = vclz %v6449_v20  ;;  %v2962_v31 = vsel %vm2877_vm7, %v2961_v21, %v12206_v60  ;;  %v12216_v21 = vld [vmem:[#allocation10_spill] sm:$0xff] }
 0x467   : > { %v2963_v9 = vsel %vm10016_vm0, %v9010_v15, %v9554_v5  ;;  %v3791_v33 = vxor.u32 2147483648, %v10002_v46  ;;  %v3971_v4 = vadd.s32 %v9920_v52, %v9917_v3  ;;  %vm2759_vm12 = vweird.f32 %v8813_v32  ;;  %v12207_v5 = vld [vmem:[#allocation12_spill] sm:$0xff]  ;;  %v12212_v52 = vld [vmem:[#allocation9_spill] sm:$0xff] }
 0x468   : > { %7041 = vcosq.f32 %v2963_v9  ;;  %v2864_v58 = vadd.s32 3, %v2860_v39  ;;  %v7034_v30 = vpop.eup %7033  ;;  %v10044_v29 = vmul.f32 %v4101_v59, %v4099_v7  ;;  %v6450_v47 = vadd.s32 4294967294, %v3983_v6 }
 0x469   : > { %7043 = vsinq.f32 %v2963_v9  ;;  %v12208_v2 = vand.u32 2147483647, %v12207_v5  ;;  %v2767_v49 = vxor.u32 2147483648, %v7034_v30  ;;  %v2964_v17 = vsel %vm10016_vm0, 0, %v2962_v31 }
 0x46a   : > { %v3065_v3 = vsub.s32 4, %v12211_v0  ;;  %v7036_v37 = vpop.eup %7035  ;;  %vm6451_vm7 = vcmp.lt.s32.totalorder %v6450_v47, 0  ;;  %vm2762_vm5 = vcmp.lt.s32.totalorder %v2761_v11, 2  ;;  %vm2766_vm6 = vcmp.eq.s32.totalorder %v2761_v11, 2 }
 0x46b   : > { %vm10048_vm8 = vcmp.le.f32.partialorder %v12208_v2, 0.7853982  ;;  %v3986_v61 = vsel %vm6451_vm7, 0, %v6450_v47  ;;  %v2764_v57 = vxor.u32 2147483648, %v7036_v37  ;;  %v2768_v25 = vsel %vm2766_vm6, %v2767_v49, %v7036_v37 }
 0x46c   : > { %v3067_v35 = vsel %vm10048_vm8, %v12207_v5, %v12212_v52  ;;  %v3066_v63 = vsel %vm2981_vm9, %v3065_v3, %v12211_v0  ;;  %v3987_v23 = vsub.s32 32, %v3986_v61  ;;  %v3991_v18 = vsub.s32 4294967266, %v3986_v61 }
 0x46d   : > { %7045 = vcosq.f32 %v3067_v35  ;;  %vm2763_vm4 = vcmp.eq.s32.totalorder %v2761_v11, 0  ;;  %v2968_v36 = vadd.s32 3, %v2964_v17  ;;  %v4103_v51 = vxor.u32 2147483648, %v10044_v29 }
 0x46e   : > { %v2765_v22 = vsel %vm2763_vm4, %v7034_v30, %v2764_v57  ;;  %vm2863_vm14 = vweird.f32 %v12195_v10  ;;  %v2865_v27 = vand.u32 3, %v2864_v58  ;;  %v3068_v7 = vsel %vm10048_vm8, 0, %v3066_v63 }
 0x46f   : > { %v3992_v38 = vadd.s32 127, %v3991_v18  ;;  %v2769_v39 = vsel %vm2762_vm5, %v2765_v22, %v2768_v25  ;;  %7047 = vsinq.f32 %v3067_v35  ;;  %v12213_v20 = vand.u32 2147483647, %v9093_v26  ;;  %v12217_v25 = vld [vmem:[#allocation16_spill] sm:$0xff]  ;;  %v12218_v22 = vld [vmem:[#allocation7_spill] sm:$0xff]  ;;  %vm12222_vm5 = vmmov %vm12201_vm1 }
 0x470   : > { %v3989_v12 = vshrl.u32 %v3971_v4, %v3987_v23  ;;  %v2770_v60 = vsel %vm2759_vm12, nan, %v2769_v39  ;;  %v3169_v9 = vsub.s32 4, %v12216_v21  ;;  %v2969_v31 = vand.u32 3, %v2968_v36 }
 0x471   : > { %vm10069_vm9 = vcmp.le.f32.partialorder %v12213_v20, 0.7853982  ;;  %v7038_v11 = vpop.eup %7037  ;;  %v3993_v6 = vshll.u32 %v3992_v38, 23  ;;  %6702 = vmatprep.mubr.msk.f32.mxu0 %vm12201_vm1, %v2770_v60  ;;  %v3072_v58 = vadd.s32 3, %v3068_v7  ;;  %v3988_v4 = vshll.u32 %v9993_v44, %v3986_v61  ;;  %v12223_v20 = vld [vmem:[#allocation8_spill] sm:$0xff] }
 0x472   : > { %v3171_v59 = vsel %vm10069_vm9, %v9093_v26, %v9669_v34  ;;  %v7040_v30 = vpop.eup %7039  ;;  %v2871_v47 = vxor.u32 2147483648, %v7038_v11  ;;  %vm2967_vm2 = vweird.f32 %v9010_v15  ;;  %v3170_v32 = vsel %vm3085_vm13, %v3169_v9, %v12216_v21 }
 0x473   : > { %7049 = vcosq.f32 %v3171_v59  ;;  %v3994_v2 = vor.u32 4788187, %v3993_v6  ;;  %v2868_v34 = vxor.u32 2147483648, %v7040_v30  ;;  %vm2870_vm0 = vcmp.eq.s32.totalorder %v2865_v27, 2 }
 0x474   : > { %7051 = vsinq.f32 %v3171_v59  ;;  %v3172_v50 = vsel %vm10069_vm9, 0, %v3170_v32  ;;  %v3990_v17 = vor.u32 %v3989_v12, %v3988_v4  ;;  %vm2866_vm12 = vcmp.lt.s32.totalorder %v2865_v27, 2  ;;  %v12228_v4 = vld [vmem:[#allocation26_spill] sm:$0xff]  ;;  %v12229_v32 = vld [vmem:[#allocation19_spill] sm:$0xff] }
 0x475   : > { %v7042_v49 = vpop.eup %7041  ;;  %vm2867_vm8 = vcmp.eq.s32.totalorder %v2865_v27, 0  ;;  %v2872_v0 = vsel %vm2870_vm0, %v2871_v47, %v7040_v30  ;;  %vm2974_vm7 = vcmp.eq.s32.totalorder %v2969_v31, 2  ;;  %v3073_v52 = vand.u32 3, %v3072_v58  ;;  %v12251_v27 = vld [vmem:[#allocation28_spill] sm:$0xff] }
 0x476   : > { %v2869_v44 = vsel %vm2867_vm8, %v7038_v11, %v2868_v34  ;;  %v2975_v3 = vxor.u32 2147483648, %v7042_v49  ;;  %v7044_v35 = vpop.eup %7043  ;;  %v3995_v37 = vand.u32 2147483647, %v3994_v2  ;;  %v3176_v57 = vadd.s32 3, %v3172_v50  ;;  %vm12227_vm8 = vmmov %vm12222_vm5 }
 0x477   : > { %v2873_v61 = vsel %vm2866_vm12, %v2869_v44, %v2872_v0  ;;  %v3273_v63 = vsub.s32 4, %v12217_v25  ;;  %v2972_v18 = vxor.u32 2147483648, %v7044_v35  ;;  %v12219_v7 = vand.u32 2147483647, %v12218_v22  ;;  %v12230_v0 = vld [vmem:[#allocation14_spill] sm:$0xff] }
 0x478   : > { %v2874_v23 = vsel %vm2863_vm14, nan, %v2873_v61  ;;  %v2976_v36 = vsel %vm2974_vm7, %v2975_v3, %v7044_v35  ;;  %v3997_v39 = vcvt.s32.f32 %v3990_v17  ;;  %vm2971_vm6 = vcmp.eq.s32.totalorder %v2969_v31, 0 }
 0x479   : > { %vm10093_vm13 = vcmp.le.f32.partialorder %v12219_v7, 0.7853982  ;;  %6703 = vmatmul.mubr.msk.f32.gmra.mxu0 %vm12222_vm5, %v2874_v23  ;;  %vm3071_vm4 = vweird.f32 %v12207_v5  ;;  %vm2970_vm14 = vcmp.lt.s32.totalorder %v2969_v31, 2  ;;  %v2973_v28 = vsel %vm2971_vm6, %v7042_v49, %v2972_v18  ;;  %vm12235_vm6 = vmmov %vm12227_vm8 }
 0x47a   : > { %v7046_v38 = vpop.eup %7045  ;;  %v3275_v10 = vsel %vm10093_vm13, %v12218_v22, %v12223_v20  ;;  %v3274_v60 = vsel %vm3189_vm3, %v3273_v63, %v12217_v25  ;;  %v3998_v21 = vmul.f32 %v3997_v39, %v3995_v37  ;;  %v2977_v9 = vsel %vm2970_vm14, %v2973_v28, %v2976_v36  ;;  %v12231_v36 = vld [vmem:[#allocation17_spill] sm:$0xff]  ;;  %v12237_v39 = vld [vmem:[#allocation18_spill] sm:$0xff] }
 0x47b   : > { %v3079_v12 = vxor.u32 2147483648, %v7046_v38  ;;  %vm3074_vm9 = vcmp.lt.s32.totalorder %v3073_v52, 2  ;;  %vm3078_vm1 = vcmp.eq.s32.totalorder %v3073_v52, 2  ;;  %vm3709_vm0 = vcmp.lt.s32.totalorder %v9533_v56, 0 }
 0x47c   : > { %v2978_v59 = vsel %vm2967_vm2, nan, %v2977_v9  ;;  %v3177_v11 = vand.u32 3, %v3176_v57  ;;  %7053 = vcosq.f32 %v3275_v10  ;;  %v12224_v6 = vand.u32 2147483647, %v9264_v53  ;;  %v7048_v58 = vpop.eup %7047 }
 0x47d   : > { %vm4021_vm3 = vcmp.lt.s32.totalorder %v9685_v45, 0  ;;  %6705 = vmatprep.mubr.msk.f32.mxu0 %vm12227_vm8, %v2978_v59  ;;  %v3276_v30 = vsel %vm10093_vm13, 0, %v3274_v60  ;;  %7055 = vsinq.f32 %v3275_v10  ;;  %v3377_v15 = vsub.s32 4, %v12228_v4  ;;  %v12238_v60 = vld [vmem:[#allocation21_spill] sm:$0xff] }
 0x47e   : > { %vm10111_vm12 = vcmp.le.f32.partialorder %v12224_v6, 0.7853982  ;;  %vm3917_vm2 = vcmp.lt.s32.totalorder %v12229_v32, 0  ;;  %vm3075_vm7 = vcmp.eq.s32.totalorder %v3073_v52, 0  ;;  %v3076_v2 = vxor.u32 2147483648, %v7048_v58 }
 0x47f   : > { %v3379_v47 = vsel %vm10111_vm12, %v9264_v53, %v9769_v40  ;;  %v3080_v34 = vsel %vm3078_vm1, %v3079_v12, %v7048_v58  ;;  %v3999_v49 = vxor.u32 2147483648, %v3998_v21  ;;  %v3378_v17 = vsel %vm3293_vm15, %v3377_v15, %v12228_v4  ;;  %vm12239_vm1 = vmmov %vm12235_vm6  ;;  %v12246_v4 = vld [vmem:[#allocation13_spill] sm:$0xff] }
 0x480   : > { %7057 = vcosq.f32 %v3379_v47  ;;  %v7050_v50 = vpop.eup %7049  ;;  %v3481_v44 = vsub.s32 4, %v12230_v0  ;;  %v3077_v35 = vsel %vm3075_vm7, %v7046_v38, %v3076_v2  ;;  %vm3179_vm13 = vcmp.eq.s32.totalorder %v3177_v11, 0 }
 0x481   : > { %7059 = vsinq.f32 %v3379_v47  ;;  %v7052_v3 = vpop.eup %7051  ;;  %v3183_v40 = vxor.u32 2147483648, %v7050_v50  ;;  %v3280_v37 = vadd.s32 3, %v3276_v30  ;;  %v3081_v61 = vsel %vm3074_vm9, %v3077_v35, %v3080_v34 }
 0x482   : > { %v3180_v57 = vxor.u32 2147483648, %v7052_v3  ;;  %vm3182_vm5 = vcmp.eq.s32.totalorder %v3177_v11, 2  ;;  %v3380_v25 = vsel %vm10111_vm12, 0, %v3378_v17  ;;  %v3082_v63 = vsel %vm3071_vm4, nan, %v3081_v61 }
 0x483   : > { %v3184_v23 = vsel %vm3182_vm5, %v3183_v40, %v7052_v3  ;;  %v3384_v18 = vadd.s32 3, %v3380_v25  ;;  %v12232_v7 = vand.u32 2147483647, %v12231_v36  ;;  %6706 = vmatmul.mubr.msk.f32.gmra.mxu0 %vm12235_vm6, %v3082_v63  ;;  %vm3178_vm14 = vcmp.lt.s32.totalorder %v3177_v11, 2 }
 0x484   : > { %v3181_v52 = vsel %vm3179_vm13, %v7050_v50, %v3180_v57  ;;  %vm12236_vm9 = vcmp.lt.s32.totalorder %v12231_v36, 0  ;;  %vm3175_vm4 = vweird.f32 %v9093_v26  ;;  %v3281_v10 = vand.u32 3, %v3280_v37 }
 0x485   : > { %vm10137_vm15 = vcmp.le.f32.partialorder %v12232_v7, 0.7853982  ;;  %v3482_v38 = vsel %vm12236_vm9, %v3481_v44, %v12230_v0  ;;  %v3185_v20 = vsel %vm3178_vm14, %v3181_v52, %v3184_v23  ;;  %v3792_v28 = vsel %vm3709_vm0, %v3791_v33, %v10002_v46 }
 0x486   : > { %v3483_v5 = vsel %vm10137_vm15, %v12231_v36, %v12237_v39  ;;  %v3186_v12 = vsel %vm3175_vm4, nan, %v3185_v20  ;;  %v3585_v9 = vsub.s32 4, %v12238_v60  ;;  %v10161_v59 = vsel %vm4021_vm3, %v4103_v51, %v10044_v29 }
 0x487   : > { %7061 = vcosq.f32 %v3483_v5  ;;  %6708 = vmatprep.mubr.msk.f32.mxu0 %vm12239_vm1, %v3186_v12  ;;  %v3385_v26 = vand.u32 3, %v3384_v18  ;;  %v3484_v11 = vsel %vm10137_vm15, 0, %v3482_v38  ;;  %v12240_v6 = vand.u32 2147483647, %v12193_v13 }
 0x488   : > { %7063 = vsinq.f32 %v3483_v5  ;;  %v10174_v33 = vsel %vm3917_vm2, %v3999_v49, %v3998_v21  ;;  %vm3279_vm8 = vweird.f32 %v12218_v22  ;;  %v3586_v29 = vsel %vm3501_vm10, %v3585_v9, %v12238_v60 }
 0x489   : > { %vm10168_vm12 = vcmp.le.f32.partialorder %v12240_v6, 0.7853982  ;;  %vm3282_vm7 = vcmp.lt.s32.totalorder %v3281_v10, 2  ;;  %vm3283_vm13 = vcmp.eq.s32.totalorder %v3281_v10, 0  ;;  %vm3286_vm5 = vcmp.eq.s32.totalorder %v3281_v10, 2  ;;  %v7054_v21 = vpop.eup %7053 }
 0x48a   : > { %v3587_v51 = vsel %vm10168_vm12, %v12193_v13, %v10026_v41  ;;  %v12243_v31 = vand.u32 2147483647, %v9366_v19  ;;  %v3488_v30 = vadd.s32 3, %v3484_v11  ;;  %v3689_v15 = vsub.s32 4, %v12246_v4  ;;  %v7056_v41 = vpop.eup %7055  ;;  %v12256_v11 = vld [vmem:[#allocation11_spill] sm:$0xff] }
 0x48b   : > { %7065 = vcosq.f32 %v3587_v51  ;;  %v3287_v2 = vxor.u32 2147483648, %v7054_v21  ;;  %vm3386_vm10 = vcmp.lt.s32.totalorder %v3385_v26, 2  ;;  %v3588_v34 = vsel %vm10168_vm12, 0, %v3586_v29 }
 0x48c   : > { %vm10186_vm15 = vcmp.le.f32.partialorder %v12243_v31, 0.7853982  ;;  %7067 = vsinq.f32 %v3587_v51  ;;  %v3284_v49 = vxor.u32 2147483648, %v7056_v41  ;;  %vm3387_vm6 = vcmp.eq.s32.totalorder %v3385_v26, 0 }
 0x48d   : > { %v3691_v47 = vsel %vm10186_vm15, %v9366_v19, %v9929_v1  ;;  %v7058_v50 = vpop.eup %7057  ;;  %vm12247_vm14 = vcmp.lt.s32.totalorder %v9366_v19, 0  ;;  %v3288_v44 = vsel %vm3286_vm5, %v3287_v2, %v7056_v41  ;;  %vm3390_vm9 = vcmp.eq.s32.totalorder %v3385_v26, 2 }
 0x48e   : > { %v3690_v17 = vsel %vm12247_vm14, %v3689_v15, %v12246_v4  ;;  %7069 = vcosq.f32 %v3691_v47  ;;  %v7060_v0 = vpop.eup %7059  ;;  %v3391_v1 = vxor.u32 2147483648, %v7058_v50  ;;  %v3285_v3 = vsel %vm3283_vm13, %v7054_v21, %v3284_v49 }
 0x48f   : > { %7071 = vsinq.f32 %v3691_v47  ;;  %v3388_v35 = vxor.u32 2147483648, %v7060_v0  ;;  %v3489_v40 = vand.u32 3, %v3488_v30  ;;  %v3592_v37 = vadd.s32 3, %v3588_v34 }
 0x490   : > { %v3289_v61 = vsel %vm3282_vm7, %v3285_v3, %v3288_v44  ;;  %v3392_v57 = vsel %vm3390_vm9, %v3391_v1, %v7060_v0  ;;  %v3692_v25 = vsel %vm10186_vm15, 0, %v3690_v17  ;;  %v12248_v63 = vand.u32 2147483647, %v9533_v56 }
 0x491   : > { %v3290_v18 = vsel %vm3279_vm8, nan, %v3289_v61  ;;  %v3389_v7 = vsel %vm3387_vm6, %v7058_v50, %v3388_v35  ;;  %v3793_v52 = vsub.s32 4, %v12251_v27  ;;  %vm3383_vm12 = vweird.f32 %v9264_v53  ;;  %vm12252_vm8 = vmmov %vm12239_vm1 }
 0x492   : > { %vm10207_vm4 = vcmp.le.f32.partialorder %v12248_v63, 0.7853982  ;;  %6709 = vmatmul.mubr.msk.f32.gmra.mxu0 %vm12239_vm1, %v3290_v18  ;;  %v3393_v39 = vsel %vm3386_vm10, %v3389_v7, %v3392_v57  ;;  %vm3487_vm7 = vweird.f32 %v12231_v36  ;;  %v3696_v20 = vadd.s32 3, %v3692_v25 }
 0x493   : > { %v3795_v38 = vsel %vm10207_vm4, %v9533_v56, %v3792_v28  ;;  %v3394_v22 = vsel %vm3383_vm12, nan, %v3393_v39  ;;  %v3794_v10 = vsel %vm3709_vm0, %v3793_v52, %v12251_v27  ;;  %vm3490_vm13 = vcmp.lt.s32.totalorder %v3489_v40, 2 }
 0x494   : > { %7073 = vcosq.f32 %v3795_v38  ;;  %v7062_v5 = vpop.eup %7061  ;;  %6711 = vmatprep.mubr.msk.f32.mxu0 %vm12252_vm8, %v3394_v22  ;;  %v3593_v60 = vand.u32 3, %v3592_v37  ;;  %v12253_v53 = vand.u32 2147483647, %v9473_v24  ;;  %vm3494_vm15 = vcmp.eq.s32.totalorder %v3489_v40, 2 }
 0x495   : > { %7075 = vsinq.f32 %v3795_v38  ;;  %v7064_v12 = vpop.eup %7063  ;;  %v3495_v28 = vxor.u32 2147483648, %v7062_v5  ;;  %vm3591_vm10 = vweird.f32 %v12193_v13  ;;  %v3897_v6 = vsub.s32 4, %v12256_v11 }
 0x496   : > { %vm10228_vm5 = vcmp.le.f32.partialorder %v12253_v53, 0.7853982  ;;  %v3492_v26 = vxor.u32 2147483648, %v7064_v12  ;;  %vm3491_vm0 = vcmp.eq.s32.totalorder %v3489_v40, 0  ;;  %v3796_v51 = vsel %vm10207_vm4, 0, %v3794_v10 }
 0x497   : > { %v3899_v46 = vsel %vm10228_vm5, %v9473_v24, %v10031_v62  ;;  %v3496_v29 = vsel %vm3494_vm15, %v3495_v28, %v7064_v12  ;;  %v3697_v58 = vand.u32 3, %v3696_v20  ;;  %v3898_v21 = vsel %vm3813_vm11, %v3897_v6, %v12256_v11  ;;  %vm12260_vm11 = vmmov %vm12239_vm1 }
 0x498   : > { %7077 = vcosq.f32 %v3899_v46  ;;  %v3493_v31 = vsel %vm3491_vm0, %v7062_v5, %v3492_v26  ;;  %v7066_v30 = vpop.eup %7065  ;;  %vm3594_vm6 = vcmp.lt.s32.totalorder %v3593_v60, 2  ;;  %v12257_v15 = vand.u32 2147483647, %v12229_v32 }
 0x499   : > { %7079 = vsinq.f32 %v3899_v46  ;;  %v3497_v4 = vsel %vm3490_vm13, %v3493_v31, %v3496_v29  ;;  %v4001_v47 = vsub.s32 4, %v9977_v48  ;;  %v7068_v41 = vpop.eup %7067  ;;  %v3599_v34 = vxor.u32 2147483648, %v7066_v30 }
 0x49a   : > { %vm10246_vm14 = vcmp.le.f32.partialorder %v12257_v15, 0.7853982  ;;  %v3498_v2 = vsel %vm3487_vm7, nan, %v3497_v4  ;;  %v3800_v50 = vadd.s32 3, %v3796_v51  ;;  %vm3595_vm9 = vcmp.eq.s32.totalorder %v3593_v60, 0 }
 0x49b   : > { %v4003_v49 = vsel %vm10246_vm14, %v12229_v32, %v10174_v33  ;;  %v7070_v17 = vpop.eup %7069  ;;  %6712 = vmatmul.mubr.msk.f32.gmra.mxu0 %vm12260_vm11, %v3498_v2  ;;  %v3596_v0 = vxor.u32 2147483648, %v7068_v41  ;;  %vm3598_vm4 = vcmp.eq.s32.totalorder %v3593_v60, 2  ;;  %v3900_v44 = vsel %vm10228_vm5, 0, %v3898_v21  ;;  %vm12264_vm5 = vmmov %vm12252_vm8 }
 0x49c   : > { %v7072_v1 = vpop.eup %7071  ;;  %v3600_v3 = vsel %vm3598_vm4, %v3599_v34, %v7068_v41  ;;  %vm3699_vm1 = vcmp.eq.s32.totalorder %v3697_v58, 0  ;;  %vm3702_vm12 = vcmp.eq.s32.totalorder %v3697_v58, 2  ;;  %v3703_v36 = vxor.u32 2147483648, %v7070_v17  ;;  %vm12265_vm11 = vmmov %vm12264_vm5 }
 0x49d   : > { %v3597_v35 = vsel %vm3595_vm9, %v7066_v30, %v3596_v0  ;;  %v3700_v40 = vxor.u32 2147483648, %v7072_v1  ;;  %v4002_v33 = vsel %vm3917_vm2, %v4001_v47, %v9977_v48  ;;  %7081 = vcosq.f32 %v4003_v49 }
 0x49e   : > { %v3601_v37 = vsel %vm3594_vm6, %v3597_v35, %v3600_v3  ;;  %v3704_v61 = vsel %vm3702_vm12, %v3703_v36, %v7072_v1  ;;  %v3801_v57 = vand.u32 3, %v3800_v50  ;;  %v3904_v25 = vadd.s32 3, %v3900_v44 }
 0x49f   : > { %v3602_v63 = vsel %vm3591_vm10, nan, %v3601_v37  ;;  %vm3698_vm7 = vcmp.lt.s32.totalorder %v3697_v58, 2  ;;  %v3701_v23 = vsel %vm3699_vm1, %v7070_v17, %v3700_v40  ;;  %7083 = vsinq.f32 %v4003_v49  ;;  %vm12266_vm1 = vmmov %vm12264_vm5 }
 0x4a0   : > { %6714 = vmatprep.mubr.msk.f32.mxu0 %vm12252_vm8, %v3602_v63  ;;  %vm3695_vm13 = vweird.f32 %v9366_v19  ;;  %v3705_v7 = vsel %vm3698_vm7, %v3701_v23, %v3704_v61  ;;  %v4004_v48 = vsel %vm10246_vm14, 0, %v4002_v33  ;;  %v12261_v27 = vand.u32 2147483647, %v9685_v45 }
 0x4a1   : > { %v7074_v18 = vpop.eup %7073  ;;  %v3706_v38 = vsel %vm3695_vm13, nan, %v3705_v7  ;;  %v4105_v5 = vsub.s32 4, %v9881_v8  ;;  %vm3806_vm15 = vcmp.eq.s32.totalorder %v3801_v57, 2  ;;  %v3905_v20 = vand.u32 3, %v3904_v25 }
 0x4a2   : > { %vm10272_vm2 = vcmp.le.f32.partialorder %v12261_v27, 0.7853982  ;;  %v7076_v13 = vpop.eup %7075  ;;  %v3807_v39 = vxor.u32 2147483648, %v7074_v18  ;;  %6715 = vmatmul.mubr.msk.f32.gmra.mxu0 %vm12264_vm5, %v3706_v38  ;;  %vm3803_vm10 = vcmp.eq.s32.totalorder %v3801_v57, 0  ;;  %vm3802_vm0 = vcmp.lt.s32.totalorder %v3801_v57, 2  ;;  %vm12267_vm5 = vmmov %vm12266_vm1 }
 0x4a3   : > { %v4107_v19 = vsel %vm10272_vm2, %v9685_v45, %v10161_v59  ;;  %v3804_v22 = vxor.u32 2147483648, %v7076_v13  ;;  %v4106_v12 = vsel %vm4021_vm3, %v4105_v5, %v9881_v8  ;;  %v4008_v53 = vadd.s32 3, %v4004_v48 }
 0x4a4   : > { %7085 = vcosq.f32 %v4107_v19  ;;  %v3808_v10 = vsel %vm3806_vm15, %v3807_v39, %v7076_v13  ;;  %vm3799_vm6 = vweird.f32 %v9533_v56  ;;  %vm3910_vm14 = vcmp.eq.s32.totalorder %v3905_v20, 2 }
 0x4a5   : > { %7087 = vsinq.f32 %v4107_v19  ;;  %v7078_v28 = vpop.eup %7077  ;;  %v3805_v60 = vsel %vm3803_vm10, %v7074_v18, %v3804_v22  ;;  %v4108_v46 = vsel %vm10272_vm2, 0, %v4106_v12  ;;  %vm3907_vm9 = vcmp.eq.s32.totalorder %v3905_v20, 0 }
 0x4a6   : > { %v7080_v9 = vpop.eup %7079  ;;  %v3809_v59 = vsel %vm3802_vm0, %v3805_v60, %v3808_v10  ;;  %v3911_v26 = vxor.u32 2147483648, %v7078_v28  ;;  %vm3906_vm3 = vcmp.lt.s32.totalorder %v3905_v20, 2  ;;  %v4009_v51 = vand.u32 3, %v4008_v53 }
 0x4a7   : > { %v3810_v11 = vsel %vm3799_vm6, nan, %v3809_v59  ;;  %v3908_v6 = vxor.u32 2147483648, %v7080_v9  ;;  %vm3903_vm4 = vweird.f32 %v9473_v24  ;;  %v4112_v58 = vadd.s32 3, %v4108_v46  ;;  %vm12268_vm6 = vmmov %vm12266_vm1 }
 0x4a8   : > { %6717 = vmatprep.mubr.msk.f32.mxu0 %vm12265_vm11, %v3810_v11  ;;  %v3912_v8 = vsel %vm3910_vm14, %v3911_v26, %v7080_v9  ;;  %vm4014_vm12 = vcmp.eq.s32.totalorder %v4009_v51, 2  ;;  %vm4011_vm7 = vcmp.eq.s32.totalorder %v4009_v51, 0  ;;  %vm4010_vm8 = vcmp.lt.s32.totalorder %v4009_v51, 2 }
 0x4a9   : > { %v3909_v29 = vsel %vm3907_vm9, %v7078_v28, %v3908_v6  ;;  %v4113_v47 = vand.u32 3, %v4112_v58  ;;  %vm4007_vm13 = vweird.f32 %v12229_v32  ;;  %vm4111_vm0 = vweird.f32 %v9685_v45  ;;  %v10298_v32 = vld [vmem:[%s11820_s6] ss:$0 sm:$0xff] }
 0x4aa   : > { %v3913_v31 = vsel %vm3906_vm3, %v3909_v29, %v3912_v8  ;;  %v7082_v56 = vpop.eup %7081 }
 0x4ab   : > { %v3914_v21 = vsel %vm3903_vm4, nan, %v3913_v31  ;;  %v4015_v30 = vxor.u32 2147483648, %v7082_v56  ;;  %vm4118_vm2 = vcmp.eq.s32.totalorder %v4113_v47, 2  ;;  %vm4115_vm15 = vcmp.eq.s32.totalorder %v4113_v47, 0 }
 0x4ac   : > { %6718 = vmatmul.mubr.msk.f32.gmra.mxu0 %vm12266_vm1, %v3914_v21  ;;  %v7084_v4 = vpop.eup %7083  ;;  %vm4114_vm10 = vcmp.lt.s32.totalorder %v4113_v47, 2 }
 0x4ad   : > { %v4012_v15 = vxor.u32 2147483648, %v7084_v4  ;;  %v4016_v62 = vsel %vm4014_vm12, %v4015_v30, %v7084_v4 }
 0x4af   : > { %v4013_v2 = vsel %vm4011_vm7, %v7082_v56, %v4012_v15 }
 0x4b0   : > { %v4017_v24 = vsel %vm4010_vm8, %v4013_v2, %v4016_v62 }
 0x4b1   : > { %v7086_v41 = vpop.eup %7085  ;;  %v4018_v49 = vsel %vm4007_vm13, nan, %v4017_v24 }
 0x4b2   : > { %v7088_v34 = vpop.eup %7087  ;;  %v4119_v50 = vxor.u32 2147483648, %v7086_v41  ;;  %6720 = vmatprep.mubr.msk.f32.mxu0 %vm12267_vm5, %v4018_v49 }
 0x4b3   : > { %v4116_v17 = vxor.u32 2147483648, %v7088_v34 }
 0x4b4   : > { %v4120_v0 = vsel %vm4118_vm2, %v4119_v50, %v7088_v34 }
 0x4b5   : > { %v4117_v44 = vsel %vm4115_vm15, %v7086_v41, %v4116_v17 }
 0x4b6   : > { %v4121_v1 = vsel %vm4114_vm10, %v4117_v44, %v4120_v0 }
 0x4b7   : > { %v4122_v3 = vsel %vm4111_vm0, nan, %v4121_v1 }
 0x4b8   : > { %6721 = vmatmul.mubr.msk.f32.gmra.mxu0 %vm12268_vm6, %v4122_v3 }
 0x525   : > { %v6701_v36 = vpop.f32.mrf.mxu0 }
 0x526   : > { %v4254_v35 = vadd.f32 %v6701_v36, %v10298_v32 }
 0x527   : > { %v4248_v40 = vpop.f32.mrf.mxu0 }
 0x528   : > { %v10301_v33 = vmul.f32 30.0, %v4254_v35  ;;  %v4249_v37 = vadd.f32 %v10298_v32, %v4248_v40 }
 0x52a   : > { %12269 = vst [vmem:[#allocation23_spill] sm:$0xff] %v10301_v33  ;;  %v4447_v61 = vand.u32 2147483647, %v10301_v33  ;;  %v4450_v45 = vand.u32 2139095040, %v10301_v33  ;;  %v10306_v57 = vmul.f32 30.0, %v4249_v37  ;;  %vm4449_vm10 = vcmp.lt.s32.totalorder %v10301_v33, 0 }
 0x52c   : > { %v4451_v25 = vshrl.u32 %v4450_v45, 23  ;;  %v4454_v63 = vand.u32 8388607, %v4447_v61  ;;  %v11953_v23 = vand.u32 2147483647, %v10306_v57  ;;  %v4346_v18 = vand.u32 2139095040, %v10306_v57 }
 0x52e   : > { %v6477_v7 = vadd.s32 4294967169, %v4451_v25  ;;  %v4347_v48 = vshrl.u32 %v4346_v18, 23  ;;  %v4455_v52 = vor.u32 8388608, %v4454_v63  ;;  %v4350_v38 = vand.u32 8388607, %v11953_v23 }
 0x530   : > { %v4457_v27 = vadd.s32 1, %v6477_v7  ;;  %v6473_v13 = vadd.s32 4294967169, %v4347_v48  ;;  %v10314_v20 = vshll.u32 %v4455_v52, 8  ;;  %v4351_v10 = vor.u32 8388608, %v4350_v38 }
 0x532   : > { %vm4458_vm14 = vcmp.gt.s32.totalorder %v4457_v27, 0  ;;  %v4353_v5 = vadd.s32 1, %v6473_v13  ;;  %v10335_v44 = vshll.u32 %v4351_v10, 8 }
 0x533   : > { %v4459_v39 = vsel %vm4458_vm14, %v4457_v27, 0 }
 0x534   : > { %v4460_v19 = vshrl.u32 %v4459_v39, 5  ;;  %v4461_v22 = vand.u32 31, %v4459_v39  ;;  %vm4354_vm11 = vcmp.gt.s32.totalorder %v4353_v5, 0 }
 0x535   : > { %v4355_v56 = vsel %vm4354_vm11, %v4353_v5, 0 }
 0x536   : > { %v4462_v12 = vsub.s32 32, %v4461_v22  ;;  %v4464_v28 = vshll.u32 %v12009_v55, %v4461_v22  ;;  %v4467_v60 = vshll.u32 %v12143_v16, %v4461_v22  ;;  %v4470_v53 = vshll.u32 %v12007_v54, %v4461_v22 }
 0x537   : > { %v4473_v9 = vshll.u32 %v12144_v14, %v4461_v22  ;;  %v4476_v59 = vshll.u32 %v12010_v42, %v4461_v22  ;;  %vm4479_vm9 = vcmp.lt.s32.totalorder %v4460_v19, 1  ;;  %vm4480_vm3 = vcmp.lt.s32.totalorder %v4460_v19, 2 }
 0x538   : > { %v4465_v26 = vshrl.u32 %v12143_v16, %v4462_v12  ;;  %v4468_v11 = vshrl.u32 %v12007_v54, %v4462_v12  ;;  %v4471_v6 = vshrl.u32 %v12144_v14, %v4462_v12  ;;  %v4463_v46 = vshrl.u32 %v12009_v55, %v4462_v12 }
 0x539   : > { %v4474_v8 = vshrl.u32 %v12010_v42, %v4462_v12  ;;  %v4477_v29 = vshrl.u32 %v12001_v43, %v4462_v12  ;;  %vm4481_vm4 = vcmp.lt.s32.totalorder %v4460_v19, 3  ;;  %vm4482_vm1 = vcmp.lt.s32.totalorder %v4460_v19, 4 }
 0x53a   : > { %v4466_v51 = vor.u32 %v4465_v26, %v4464_v28  ;;  %v4469_v31 = vor.u32 %v4468_v11, %v4467_v60  ;;  %v4472_v58 = vor.u32 %v4471_v6, %v4470_v53  ;;  %v4357_v4 = vand.u32 31, %v4355_v56  ;;  %v6704_v53 = vpop.f32.mrf.mxu0 }
 0x53b   : > { %v4475_v21 = vor.u32 %v4474_v8, %v4473_v9  ;;  %v4478_v30 = vor.u32 %v4477_v29, %v4476_v59  ;;  %v4356_v36 = vshrl.u32 %v4355_v56, 5 }
 0x53c   : > { %v4483_v15 = vsel %vm4479_vm9, %v4463_v46, %v4466_v51  ;;  %v4484_v62 = vsel %vm4482_vm1, %v4472_v58, 2102212464  ;;  %v4487_v47 = vsel %vm4479_vm9, %v4466_v51, %v4469_v31  ;;  %v4491_v41 = vsel %vm4479_vm9, %v4469_v31, %v4472_v58 }
 0x53d   : > { %v4485_v2 = vsel %vm4481_vm4, %v4469_v31, %v4484_v62  ;;  %v4488_v34 = vsel %vm4482_vm1, %v4475_v21, 920167782  ;;  %v4492_v24 = vsel %vm4482_vm1, %v4478_v30, 1326507024  ;;  %v4358_v50 = vsub.s32 32, %v4357_v4 }
 0x53e   : > { %v4486_v49 = vsel %vm4480_vm3, %v4483_v15, %v4485_v2  ;;  %v4489_v17 = vsel %vm4481_vm4, %v4472_v58, %v4488_v34  ;;  %v4493_v0 = vsel %vm4481_vm4, %v4475_v21, %v4492_v24  ;;  %v4360_v35 = vshll.u32 %v12009_v55, %v4357_v4 }
 0x53f   : > { %v4490_v1 = vsel %vm4480_vm3, %v4487_v47, %v4489_v17  ;;  %v4494_v3 = vsel %vm4480_vm3, %v4491_v41, %v4493_v0  ;;  %v4502_v63 = vmul.u32 %v10314_v20, %v4486_v49  ;;  %v4361_v18 = vshrl.u32 %v12143_v16, %v4358_v50 }
 0x540   : > { %v10341_v40 = vmul.u32.u64.low %v10314_v20, %v4494_v3  ;;  %v10342_v37 = vmul.u32.u64.high %v10314_v20, %v4494_v3, %v10341_v40  ;;  %v10345_v45 = vmul.u32.u64.low %v10314_v20, %v4490_v1  ;;  %v10346_v25 = vmul.u32.u64.high %v10314_v20, %v4490_v1, %v10345_v45 }
 0x541   : > { %v4363_v7 = vshll.u32 %v12143_v16, %v4357_v4  ;;  %v4364_v48 = vshrl.u32 %v12007_v54, %v4358_v50  ;;  %v4366_v27 = vshll.u32 %v12007_v54, %v4357_v4  ;;  %v4367_v52 = vshrl.u32 %v12144_v14, %v4358_v50 }
 0x542   : > { %v4369_v13 = vshll.u32 %v12144_v14, %v4357_v4  ;;  %v4370_v38 = vshrl.u32 %v12010_v42, %v4358_v50  ;;  %v4362_v39 = vor.u32 %v4361_v18, %v4360_v35  ;;  %v4372_v19 = vshll.u32 %v12010_v42, %v4357_v4 }
 0x543   : > { %v4365_v5 = vor.u32 %v4364_v48, %v4363_v7  ;;  %v4373_v22 = vshrl.u32 %v12001_v43, %v4358_v50  ;;  %vm4504_vm12 = vc.u32 %v10342_v37, %v10345_v45  ;;  %v4505_v20 = vadd.s32 1, %v10346_v25 }
 0x544   : > { %v4359_v10 = vshrl.u32 %v12009_v55, %v4358_v50  ;;  %v4368_v12 = vor.u32 %v4367_v52, %v4366_v27  ;;  %v4371_v28 = vor.u32 %v4370_v38, %v4369_v13  ;;  %vm4375_vm7 = vcmp.lt.s32.totalorder %v4356_v36, 1  ;;  %v4258_v50 = vpop.f32.mrf.mxu0 }
 0x545   : > { %v4374_v60 = vor.u32 %v4373_v22, %v4372_v19  ;;  %vm4376_vm8 = vcmp.lt.s32.totalorder %v4356_v36, 2  ;;  %v4506_v9 = vsel %vm4504_vm12, %v4505_v20, %v10346_v25  ;;  %vm4377_vm13 = vcmp.lt.s32.totalorder %v4356_v36, 3 }
 0x546   : > { %vm4378_vm2 = vcmp.lt.s32.totalorder %v4356_v36, 4  ;;  %v4383_v59 = vsel %vm4375_vm7, %v4362_v39, %v4365_v5  ;;  %v4507_v26 = vadd.s32 %v4506_v9, %v4502_v63  ;;  %v4387_v46 = vsel %vm4375_vm7, %v4365_v5, %v4368_v12  ;;  %v6707_v18 = vpop.f32.mrf.mxu0 }
 0x547   : > { %v4380_v11 = vsel %vm4378_vm2, %v4368_v12, 2102212464  ;;  %v4384_v6 = vsel %vm4378_vm2, %v4371_v28, 920167782  ;;  %v4379_v8 = vsel %vm4375_vm7, %v4359_v10, %v4362_v39  ;;  %v4388_v51 = vsel %vm4378_vm2, %v4374_v60, 1326507024 }
 0x548   : > { %v4385_v29 = vsel %vm4377_vm13, %v4368_v12, %v4384_v6  ;;  %v4264_v31 = vadd.f32 %v6704_v53, %v10298_v32  ;;  %v4508_v58 = vadd.s32 536870912, %v4507_v26  ;;  %v4381_v56 = vsel %vm4377_vm13, %v4365_v5, %v4380_v11 }
 0x549   : > { %v4386_v21 = vsel %vm4376_vm8, %v4383_v59, %v4385_v29  ;;  %v4389_v30 = vsel %vm4377_vm13, %v4371_v28, %v4388_v51  ;;  %v4382_v24 = vsel %vm4376_vm8, %v4379_v8, %v4381_v56  ;;  %v4259_v35 = vadd.f32 %v10298_v32, %v4258_v50 }
 0x54a   : > { %v4390_v4 = vsel %vm4376_vm8, %v4387_v46, %v4389_v30  ;;  %v10368_v15 = vmul.u32.u64.low %v10335_v44, %v4386_v21  ;;  %v10369_v62 = vmul.u32.u64.high %v10335_v44, %v4386_v21, %v10368_v15  ;;  %v10372_v47 = vshrl.u32 %v4508_v58, 30 }
 0x54b   : > { %v10375_v41 = vmul.u32.u64.low %v10335_v44, %v4390_v4  ;;  %v10376_v2 = vmul.u32.u64.high %v10335_v44, %v4390_v4, %v10375_v41  ;;  %v10378_v34 = vmul.f32 30.0, %v4264_v31  ;;  %v4398_v3 = vmul.u32 %v10335_v44, %v4382_v24  ;;  %v4268_v24 = vpop.f32.mrf.mxu0 }
 0x54c   : > { %v4510_v49 = vshll.u32 %v10372_v47, 30  ;;  %v4401_v17 = vadd.s32 1, %v10369_v62  ;;  %v10394_v13 = vmul.f32 30.0, %v4259_v35  ;;  %v4274_v38 = vadd.f32 %v6707_v18, %v10298_v32 }
 0x54d   : > { %v4658_v0 = vand.u32 2139095040, %v10378_v34  ;;  %vm4400_vm5 = vc.u32 %v10376_v2, %v10368_v15  ;;  %v11948_v7 = vand.u32 2147483647, %v10378_v34  ;;  %v4503_v59 = vadd.s32 %v10345_v45, %v10342_v37 }
 0x54e   : > { %v10384_v1 = vsub.s32 %v4507_v26, %v4510_v49  ;;  %v4402_v40 = vsel %vm4400_vm5, %v4401_v17, %v10369_v62  ;;  %v4554_v12 = vand.u32 2139095040, %v10394_v13  ;;  %v11949_v60 = vand.u32 2147483647, %v10394_v13 }
 0x54f   : > { %v4659_v36 = vshrl.u32 %v4658_v0, 23  ;;  %v4403_v63 = vadd.s32 %v4402_v40, %v4398_v3  ;;  %v4662_v19 = vand.u32 8388607, %v11948_v7  ;;  %v10404_v53 = vmul.f32 30.0, %v4274_v38 }
 0x550   : > { %v4513_v25 = vsub.s32 0, %v10384_v1  ;;  %v4533_v26 = vsub.s32 4, %v10372_v47  ;;  %v4555_v8 = vshrl.u32 %v4554_v12, 23  ;;  %v10417_v31 = vand.u32 8388607, %v11949_v60 }
 0x551   : > { %v6485_v48 = vadd.s32 4294967169, %v4659_v36  ;;  %v4404_v52 = vadd.s32 536870912, %v4403_v63  ;;  %12270 = vst [vmem:[#allocation20_spill] sm:$0xff] %v10404_v53  ;;  %v4663_v46 = vor.u32 8388608, %v4662_v19  ;;  %v4866_v58 = vand.u32 2139095040, %v10404_v53 }
 0x552   : > { %v6478_v27 = vmin.u32 %v4513_v25, %v10384_v1  ;;  %v6481_v0 = vadd.s32 4294967169, %v4555_v8  ;;  %v11946_v38 = vand.u32 2147483647, %v10404_v53 }
 0x553   : > { %v4665_v44 = vadd.s32 1, %v6485_v48  ;;  %v10397_v5 = vshrl.u32 %v4404_v52, 30  ;;  %v4269_v48 = vadd.f32 %v10298_v32, %v4268_v24  ;;  %v4703_v52 = vshll.u32 %v4663_v46, 8 }
 0x554   : > { %v4515_v39 = vclz %v6478_v27  ;;  %v4867_v19 = vshrl.u32 %v4866_v58, 23 }
 0x555   : > { %vm4666_vm15 = vcmp.gt.s32.totalorder %v4665_v44, 0  ;;  %v4406_v20 = vshll.u32 %v10397_v5, 30 }
 0x556   : > { %v6479_v22 = vadd.s32 4294967294, %v4515_v39  ;;  %v4667_v10 = vsel %vm4666_vm15, %v4665_v44, 0  ;;  %v4559_v44 = vor.u32 8388608, %v10417_v31  ;;  %v4561_v39 = vadd.s32 1, %v6481_v0 }
 0x557   : > { %v4669_v28 = vand.u32 31, %v4667_v10  ;;  %v10406_v9 = vsub.s32 %v4403_v63, %v4406_v20  ;;  %v4668_v50 = vshrl.u32 %v4667_v10, 5  ;;  %v10432_v63 = vsel %vm4449_vm10, %v4533_v26, %v10372_v47 }
 0x558   : > { %vm6480_vm0 = vcmp.lt.s32.totalorder %v6479_v22, 0  ;;  %vm4562_vm3 = vcmp.gt.s32.totalorder %v4561_v39, 0 }
 0x559   : > { %v4670_v11 = vsub.s32 32, %v4669_v28  ;;  %v4409_v6 = vsub.s32 0, %v10406_v9  ;;  %v4672_v45 = vshll.u32 %v12009_v55, %v4669_v28  ;;  %v4675_v56 = vshll.u32 %v12143_v16, %v4669_v28 }
 0x55a   : > { %v4518_v30 = vsel %vm6480_vm0, 0, %v6479_v22  ;;  %v4678_v4 = vshll.u32 %v12007_v54, %v4669_v28  ;;  %v4681_v62 = vshll.u32 %v12144_v14, %v4669_v28  ;;  %v4684_v40 = vshll.u32 %v12010_v42, %v4669_v28 }
 0x55b   : > { %v4673_v29 = vshrl.u32 %v12143_v16, %v4670_v11  ;;  %v4676_v51 = vshrl.u32 %v12007_v54, %v4670_v11  ;;  %v6474_v37 = vmin.u32 %v4409_v6, %v10406_v9  ;;  %v4679_v21 = vshrl.u32 %v12144_v14, %v4670_v11 }
 0x55c   : > { %v4682_v41 = vshrl.u32 %v12010_v42, %v4670_v11  ;;  %v4685_v36 = vshrl.u32 %v12001_v43, %v4670_v11  ;;  %v4523_v25 = vsub.s32 4294967266, %v4518_v30  ;;  %vm4687_vm6 = vcmp.lt.s32.totalorder %v4668_v50, 1 }
 0x55d   : > { %v4674_v49 = vor.u32 %v4673_v29, %v4672_v45  ;;  %v4677_v17 = vor.u32 %v4676_v51, %v4675_v56  ;;  %v4680_v3 = vor.u32 %v4679_v21, %v4678_v4  ;;  %v4411_v18 = vclz %v6474_v37 }
 0x55e   : > { %v4683_v35 = vor.u32 %v4682_v41, %v4681_v62  ;;  %v4686_v27 = vor.u32 %v4685_v36, %v4684_v40  ;;  %vm4690_vm14 = vcmp.lt.s32.totalorder %v4668_v50, 4  ;;  %v4519_v22 = vsub.s32 32, %v4518_v30 }
 0x55f   : > { %v4692_v20 = vsel %vm4690_vm14, %v4680_v3, 2102212464  ;;  %v4695_v10 = vsel %vm4687_vm6, %v4674_v49, %v4677_v17  ;;  %v4524_v47 = vadd.s32 127, %v4523_v25  ;;  %v6475_v28 = vadd.s32 4294967294, %v4411_v18 }
 0x560   : > { %v4696_v12 = vsel %vm4690_vm14, %v4683_v35, 920167782  ;;  %v4671_v26 = vshrl.u32 %v12009_v55, %v4670_v11  ;;  %vm4689_vm11 = vcmp.lt.s32.totalorder %v4668_v50, 3  ;;  %vm4688_vm9 = vcmp.lt.s32.totalorder %v4668_v50, 2 }
 0x561   : > { %v4697_v6 = vsel %vm4689_vm11, %v4680_v3, %v4696_v12  ;;  %v4699_v46 = vsel %vm4687_vm6, %v4677_v17, %v4680_v3  ;;  %v4700_v8 = vsel %vm4690_vm14, %v4686_v27, 1326507024  ;;  %v4693_v51 = vsel %vm4689_vm11, %v4677_v17, %v4692_v20 }
 0x562   : > { %v4691_v29 = vsel %vm4687_vm6, %v4671_v26, %v4674_v49  ;;  %v4698_v31 = vsel %vm4688_vm9, %v4695_v10, %v4697_v6  ;;  %v4701_v58 = vsel %vm4689_vm11, %v4683_v35, %v4700_v8  ;;  %v6493_v56 = vadd.s32 4294967169, %v4867_v19 }
 0x563   : > { %v10441_v37 = vmul.u32.u64.low %v4703_v52, %v4698_v31  ;;  %v10442_v45 = vmul.u32.u64.high %v4703_v52, %v4698_v31, %v10441_v37  ;;  %v4521_v21 = vshrl.u32 %v4503_v59, %v4519_v22  ;;  %v4525_v4 = vshll.u32 %v4524_v47, 23 }
 0x564   : > { %vm6476_vm4 = vcmp.lt.s32.totalorder %v6475_v28, 0  ;;  %v4702_v11 = vsel %vm4688_vm9, %v4699_v46, %v4701_v58  ;;  %v4694_v62 = vsel %vm4688_vm9, %v4691_v29, %v4693_v51  ;;  %v4563_v0 = vsel %vm4562_vm3, %v4561_v39, 0 }
 0x565   : > { %v10445_v41 = vmul.u32.u64.low %v4703_v52, %v4702_v11  ;;  %v10446_v24 = vmul.u32.u64.high %v4703_v52, %v4702_v11, %v10445_v41  ;;  %v4520_v50 = vshll.u32 %v10384_v1, %v4518_v30  ;;  %v10451_v49 = vadd.s32 %v10368_v15, %v10376_v2 }
 0x566   : > { %v4564_v17 = vshrl.u32 %v4563_v0, 5  ;;  %v10455_v3 = vand.u32 8388607, %v11946_v38  ;;  %v4713_v59 = vadd.s32 1, %v10442_v45  ;;  %v4565_v35 = vand.u32 31, %v4563_v0 }
 0x567   : > { %v10458_v40 = vshll.u32 %v4559_v44, 8  ;;  %v10460_v36 = vmul.f32 30.0, %v4269_v48  ;;  %v10462_v25 = vor.u32 %v4521_v21, %v4520_v50  ;;  %v10464_v18 = vor.u32 4788187, %v4525_v4 }
 0x568   : > { %v10467_v1 = vsel %vm6476_vm4, 0, %v6475_v28  ;;  %v4710_v15 = vmul.u32 %v4703_v52, %v4694_v62  ;;  %vm4712_vm1 = vc.u32 %v10446_v24, %v10441_v37  ;;  %v4566_v2 = vsub.s32 32, %v4565_v35 }
 0x569   : > { %12271 = vst [vmem:[#allocation24_spill] sm:$0xff] %v10460_v36  ;;  %vm4583_vm12 = vcmp.lt.s32.totalorder %v4564_v17, 1  ;;  %v4873_v30 = vadd.s32 1, %v6493_v56  ;;  %v4714_v27 = vsel %vm4712_vm1, %v4713_v59, %v10442_v45  ;;  %v4568_v44 = vshll.u32 %v12009_v55, %v4565_v35 }
 0x56a   : > { %vm4584_vm7 = vcmp.lt.s32.totalorder %v4564_v17, 2  ;;  %vm4585_vm8 = vcmp.lt.s32.totalorder %v4564_v17, 3  ;;  %v4715_v48 = vadd.s32 %v4714_v27, %v4710_v15  ;;  %v4569_v39 = vshrl.u32 %v12143_v16, %v4566_v2 }
 0x56b   : > { %v4571_v19 = vshll.u32 %v12143_v16, %v4565_v35  ;;  %v4572_v22 = vshrl.u32 %v12007_v54, %v4566_v2  ;;  %v4574_v52 = vshll.u32 %v12007_v54, %v4565_v35  ;;  %v4575_v20 = vshrl.u32 %v12144_v14, %v4566_v2 }
 0x56c   : > { %v4577_v10 = vshll.u32 %v12144_v14, %v4565_v35  ;;  %v4578_v12 = vshrl.u32 %v12010_v42, %v4566_v2  ;;  %v4716_v47 = vadd.s32 536870912, %v4715_v48  ;;  %v4567_v28 = vshrl.u32 %v12009_v55, %v4566_v2 }
 0x56d   : > { %v4570_v26 = vor.u32 %v4569_v39, %v4568_v44  ;;  %v4573_v6 = vor.u32 %v4572_v22, %v4571_v19  ;;  %v4576_v46 = vor.u32 %v4575_v20, %v4574_v52  ;;  %v4580_v29 = vshll.u32 %v12010_v42, %v4565_v35 }
 0x56e   : > { %v4579_v8 = vor.u32 %v4578_v12, %v4577_v10  ;;  %v4581_v51 = vshrl.u32 %v12001_v43, %v4566_v2  ;;  %v10483_v31 = vshrl.u32 %v4716_v47, 30  ;;  %vm4586_vm13 = vcmp.lt.s32.totalorder %v4564_v17, 4 }
 0x56f   : > { %v4587_v58 = vsel %vm4583_vm12, %v4567_v28, %v4570_v26  ;;  %v4591_v45 = vsel %vm4583_vm12, %v4570_v26, %v4573_v6  ;;  %v4588_v21 = vsel %vm4586_vm13, %v4576_v46, 2102212464  ;;  %v4595_v11 = vsel %vm4583_vm12, %v4573_v6, %v4576_v46 }
 0x570   : > { %12272 = vst [vmem:[#allocation27_spill] sm:$0xff] %v10483_v31  ;;  %v4582_v56 = vor.u32 %v4581_v51, %v4580_v29  ;;  %v4592_v4 = vsel %vm4586_vm13, %v4579_v8, 920167782  ;;  %v4718_v62 = vshll.u32 %v10483_v31, 30  ;;  %v4589_v41 = vsel %vm4585_vm8, %v4573_v6, %v4588_v21 }
 0x571   : > { %v4593_v0 = vsel %vm4585_vm8, %v4576_v46, %v4592_v4  ;;  %vm4874_vm2 = vcmp.gt.s32.totalorder %v4873_v30, 0  ;;  %v4590_v50 = vsel %vm4584_vm7, %v4587_v58, %v4589_v41  ;;  %v4529_v19 = vcvt.s32.f32 %v10462_v25 }
 0x572   : > { %v4594_v59 = vsel %vm4584_vm7, %v4591_v45, %v4593_v0  ;;  %v4596_v35 = vsel %vm4586_vm13, %v4582_v56, 1326507024  ;;  %v4875_v15 = vsel %vm4874_vm2, %v4873_v30, 0  ;;  %v10493_v2 = vsub.s32 %v4715_v48, %v4718_v62 }
 0x573   : > { %v4597_v27 = vsel %vm4585_vm8, %v4579_v8, %v4596_v35  ;;  %v10497_v44 = vmul.u32.u64.low %v10458_v40, %v4594_v59  ;;  %v10498_v39 = vmul.u32.u64.high %v10458_v40, %v4594_v59, %v10497_v44  ;;  %v4871_v52 = vor.u32 8388608, %v10455_v3 }
 0x574   : > { %v4598_v22 = vsel %vm4584_vm7, %v4595_v11, %v4597_v27  ;;  %v4877_v20 = vand.u32 31, %v4875_v15  ;;  %v4527_v10 = vand.u32 2147483647, %v10464_v18  ;;  %v4721_v30 = vsub.s32 0, %v10493_v2 }
 0x575   : > { %v10507_v48 = vmul.u32.u64.low %v10458_v40, %v4598_v22  ;;  %v10508_v12 = vmul.u32.u64.high %v10458_v40, %v4598_v22, %v10507_v48  ;;  %v4419_v47 = vsub.s32 4294967266, %v10467_v1  ;;  %v4606_v28 = vmul.u32 %v10458_v40, %v4590_v50 }
 0x576   : > { %v10512_v26 = vshrl.u32 %v4875_v15, 5  ;;  %v4878_v25 = vsub.s32 32, %v4877_v20  ;;  %v6486_v17 = vmin.u32 %v4721_v30, %v10493_v2  ;;  %v4609_v3 = vadd.s32 1, %v10498_v39 }
 0x577   : > { %v4880_v6 = vshll.u32 %v12009_v55, %v4877_v20  ;;  %v4883_v18 = vshll.u32 %v12143_v16, %v4877_v20  ;;  %v4886_v29 = vshll.u32 %v12007_v54, %v4877_v20  ;;  %vm4608_vm5 = vc.u32 %v10508_v12, %v10497_v44 }
 0x578   : > { %v4881_v46 = vshrl.u32 %v12143_v16, %v4878_v25  ;;  %v4884_v8 = vshrl.u32 %v12007_v54, %v4878_v25  ;;  %v4887_v51 = vshrl.u32 %v12144_v14, %v4878_v25  ;;  %v4723_v40 = vclz %v6486_v17 }
 0x579   : > { %v4889_v58 = vshll.u32 %v12144_v14, %v4877_v20  ;;  %v4890_v45 = vshrl.u32 %v12010_v42, %v4878_v25  ;;  %v4610_v56 = vsel %vm4608_vm5, %v4609_v3, %v10498_v39  ;;  %v4892_v11 = vshll.u32 %v12010_v42, %v4877_v20 }
 0x57a   : > { %v4882_v21 = vor.u32 %v4881_v46, %v4880_v6  ;;  %v4885_v4 = vor.u32 %v4884_v8, %v4883_v18  ;;  %v6487_v62 = vadd.s32 4294967294, %v4723_v40  ;;  %v4611_v41 = vadd.s32 %v4610_v56, %v4606_v28 }
 0x57b   : > { %v4891_v0 = vor.u32 %v4890_v45, %v4889_v58  ;;  %v4893_v50 = vshrl.u32 %v12001_v43, %v4878_v25  ;;  %v10529_v59 = vmul.f32 %v4529_v19, %v4527_v10  ;;  %v4415_v35 = vsub.s32 32, %v10467_v1 }
 0x57c   : > { %v4420_v15 = vadd.s32 127, %v4419_v47  ;;  %v4888_v27 = vor.u32 %v4887_v51, %v4886_v29  ;;  %vm6488_vm15 = vcmp.lt.s32.totalorder %v6487_v62, 0  ;;  %v4612_v22 = vadd.s32 536870912, %v4611_v41 }
 0x57d   : > { %v4894_v30 = vor.u32 %v4893_v50, %v4892_v11  ;;  %vm4898_vm0 = vcmp.lt.s32.totalorder %v10512_v26, 4  ;;  %v4726_v39 = vsel %vm6488_vm15, 0, %v6487_v62  ;;  %v4879_v48 = vshrl.u32 %v12009_v55, %v4878_v25  ;;  %v6710_v62 = vpop.f32.mrf.mxu0 }
 0x57e   : > { %vm4895_vm6 = vcmp.lt.s32.totalorder %v10512_v26, 1  ;;  %v4904_v20 = vsel %vm4898_vm0, %v4891_v0, 920167782  ;;  %v4731_v28 = vsub.s32 4294967266, %v4726_v39  ;;  %v10535_v17 = vshrl.u32 %v4612_v22, 30 }
 0x57f   : > { %vm4897_vm14 = vcmp.lt.s32.totalorder %v10512_v26, 3  ;;  %v4903_v19 = vsel %vm4895_vm6, %v4882_v21, %v4885_v4  ;;  %v4900_v10 = vsel %vm4898_vm0, %v4888_v27, 2102212464  ;;  %v4907_v3 = vsel %vm4895_vm6, %v4885_v4, %v4888_v27 }
 0x580   : > { %v4905_v47 = vsel %vm4897_vm14, %v4888_v27, %v4904_v20  ;;  %v4908_v6 = vsel %vm4898_vm0, %v4894_v30, 1326507024  ;;  %v4421_v18 = vshll.u32 %v4420_v15, 23  ;;  %v4614_v46 = vshll.u32 %v10535_v17, 30 }
 0x581   : > { %vm4896_vm11 = vcmp.lt.s32.totalorder %v10512_v26, 2  ;;  %v4911_v25 = vshll.u32 %v4871_v52, 8  ;;  %v4727_v8 = vsub.s32 32, %v4726_v39  ;;  %v4899_v29 = vsel %vm4895_vm6, %v4879_v48, %v4882_v21 }
 0x582   : > { %v4906_v51 = vsel %vm4896_vm11, %v4903_v19, %v4905_v47  ;;  %v4909_v40 = vsel %vm4897_vm14, %v4891_v0, %v4908_v6  ;;  %v4732_v58 = vadd.s32 127, %v4731_v28  ;;  %v10546_v45 = vsub.s32 %v4611_v41, %v4614_v46 }
 0x583   : > { %v4901_v56 = vsel %vm4897_vm14, %v4885_v4, %v4900_v10  ;;  %v4910_v11 = vsel %vm4896_vm11, %v4907_v3, %v4909_v40  ;;  %v10555_v21 = vmul.u32.u64.low %v4911_v25, %v4906_v51  ;;  %v10556_v15 = vmul.u32.u64.high %v4911_v25, %v4906_v51, %v10555_v21  ;;  %v4278_v3 = vpop.f32.mrf.mxu0 }
 0x584   : > { %v10552_v50 = vmul.u32.u64.low %v4911_v25, %v4910_v11  ;;  %v10553_v52 = vmul.u32.u64.high %v4911_v25, %v4910_v11, %v10552_v50  ;;  %v4416_v0 = vshll.u32 %v10406_v9, %v10467_v1  ;;  %v4617_v41 = vsub.s32 0, %v10546_v45 }
 0x585   : > { %v11947_v27 = vand.u32 2147483647, %v10460_v36  ;;  %v4762_v4 = vand.u32 2139095040, %v10460_v36  ;;  %vm10566_vm9 = vcmp.le.f32.partialorder %v4447_v61, 0.7853982  ;;  %v4417_v30 = vshrl.u32 %v10451_v49, %v4415_v35 }
 0x586   : > { %v4711_v48 = vadd.s32 %v10441_v37, %v10446_v24  ;;  %v4902_v9 = vsel %vm4896_vm11, %v4899_v29, %v4901_v56  ;;  %v4284_v1 = vadd.f32 %v6710_v62, %v10298_v32  ;;  %v4531_v20 = vxor.u32 2147483648, %v10529_v59 }
 0x587   : > { %v4422_v28 = vor.u32 4788187, %v4421_v18  ;;  %v6482_v19 = vmin.u32 %v4617_v41, %v10546_v45  ;;  %v4763_v10 = vshrl.u32 %v4762_v4, 23  ;;  %v4733_v47 = vshll.u32 %v4732_v58, 23 }
 0x588   : > { %v4729_v61 = vshrl.u32 %v4711_v48, %v4727_v8  ;;  %vm4920_vm3 = vc.u32 %v10553_v52, %v10555_v21  ;;  %v4921_v49 = vadd.s32 1, %v10556_v15  ;;  %v4918_v37 = vmul.u32 %v4911_v25, %v4902_v9 }
 0x589   : > { %v4619_v35 = vclz %v6482_v19  ;;  %v6489_v24 = vadd.s32 4294967169, %v4763_v10  ;;  %v4766_v26 = vand.u32 8388607, %v11947_v27  ;;  %v4418_v6 = vor.u32 %v4417_v30, %v4416_v0 }
 0x58a   : > { %v4728_v18 = vshll.u32 %v10493_v2, %v4726_v39  ;;  %v4922_v46 = vsel %vm4920_vm3, %v4921_v49, %v10556_v15  ;;  %v10585_v29 = vmul.f32 30.0, %v4284_v1  ;;  %v4532_v8 = vsel %vm4449_vm10, %v4531_v20, %v10529_v59 }
 0x58b   : > { %v6483_v51 = vadd.s32 4294967294, %v4619_v35  ;;  %v4923_v40 = vadd.s32 %v4922_v46, %v4918_v37  ;;  %v4769_v58 = vadd.s32 1, %v6489_v24  ;;  %v4423_v25 = vand.u32 2147483647, %v4422_v28 }
 0x58c   : > { %12275 = vst [vmem:[#allocation25_spill] sm:$0xff] %v10585_v29  ;;  %v10590_v56 = vor.u32 %v4729_v61, %v4728_v18  ;;  %v10592_v11 = vor.u32 4788187, %v4733_v47  ;;  %v4279_v62 = vadd.f32 %v10298_v32, %v4278_v3  ;;  %v4767_v39 = vor.u32 8388608, %v4766_v26 }
 0x58d   : > { %vm6484_vm4 = vcmp.lt.s32.totalorder %v6483_v51, 0  ;;  %v4924_v2 = vadd.s32 536870912, %v4923_v40  ;;  %vm4770_vm1 = vcmp.gt.s32.totalorder %v4769_v58, 0  ;;  %v4425_v50 = vcvt.s32.f32 %v4418_v6 }
 0x58e   : > { %v10595_v15 = vsel %vm6484_vm4, 0, %v6483_v51  ;;  %v4771_v0 = vsel %vm4770_vm1, %v4769_v58, 0  ;;  %v5074_v59 = vand.u32 2139095040, %v10585_v29  ;;  %v10601_v41 = vsel %vm10566_vm9, %v10301_v33, %v4532_v8 }
 0x58f   : > { %v4627_v30 = vsub.s32 4294967266, %v10595_v15  ;;  %v10607_v48 = vshrl.u32 %v4924_v2, 30  ;;  %v10609_v9 = vmul.f32 %v4425_v50, %v4423_v25  ;;  %v4737_v1 = vcvt.s32.f32 %v10590_v56 }
 0x590   : > { %v4607_v20 = vadd.s32 %v10497_v44, %v10508_v12  ;;  %v4773_v28 = vand.u32 31, %v4771_v0  ;;  %v4735_v19 = vand.u32 2147483647, %v10592_v11  ;;  %v10616_v61 = vshll.u32 %v4767_v39, 8 }
 0x591   : > { %12276 = vst [vmem:[#allocation29_spill] sm:$0xff] %v10607_v48  ;;  %v4926_v10 = vshll.u32 %v10607_v48, 30  ;;  %v10618_v47 = vmul.f32 30.0, %v4279_v62  ;;  %v4623_v49 = vsub.s32 32, %v10595_v15  ;;  %v11951_v37 = vand.u32 2147483647, %v10585_v29 }
 0x592   : > { %v4774_v35 = vsub.s32 32, %v4773_v28  ;;  %v5075_v24 = vshrl.u32 %v5074_v59, 23  ;;  %v4628_v26 = vadd.s32 127, %v4627_v30  ;;  %v4776_v44 = vshll.u32 %v12009_v55, %v4773_v28 }
 0x593   : > { %v10622_v3 = vsub.s32 %v4923_v40, %v4926_v10  ;;  %v4779_v12 = vshll.u32 %v12143_v16, %v4773_v28  ;;  %v4782_v46 = vshll.u32 %v12007_v54, %v4773_v28  ;;  %v4772_v58 = vshrl.u32 %v4771_v0, 5 }
 0x594   : > { %v4777_v6 = vshrl.u32 %v12143_v16, %v4774_v35  ;;  %v4780_v18 = vshrl.u32 %v12007_v54, %v4774_v35  ;;  %v4783_v8 = vshrl.u32 %v12144_v14, %v4774_v35  ;;  %v4785_v25 = vshll.u32 %v12144_v14, %v4773_v28 }
 0x595   : > { %v4929_v51 = vsub.s32 0, %v10622_v3  ;;  %v4786_v40 = vshrl.u32 %v12010_v42, %v4774_v35  ;;  %v10635_v50 = vand.u32 8388607, %v11951_v37  ;;  %v4788_v10 = vshll.u32 %v12010_v42, %v4773_v28 }
 0x596   : > { %v4778_v62 = vor.u32 %v4777_v6, %v4776_v44  ;;  %v4781_v2 = vor.u32 %v4780_v18, %v4779_v12  ;;  %v4784_v39 = vor.u32 %v4783_v8, %v4782_v46  ;;  %v4789_v38 = vshrl.u32 %v12001_v43, %v4774_v35 }
 0x597   : > { %v6494_v59 = vmin.u32 %v4929_v51, %v10622_v3  ;;  %v4787_v30 = vor.u32 %v4786_v40, %v4785_v25  ;;  %v4625_v27 = vshrl.u32 %v4607_v20, %v4623_v49  ;;  %v4629_v0 = vshll.u32 %v4628_v26, 23 }
 0x598   : > { %v4775_v7 = vshrl.u32 %v12009_v55, %v4774_v35  ;;  %v6501_v60 = vadd.s32 4294967169, %v5075_v24  ;;  %v4790_v44 = vor.u32 %v4789_v38, %v4788_v10  ;;  %vm4791_vm10 = vcmp.lt.s32.totalorder %v4772_v58, 1 }
 0x599   : > { %v4931_v4 = vclz %v6494_v59  ;;  %vm4794_vm12 = vcmp.lt.s32.totalorder %v4772_v58, 4  ;;  %vm4793_vm7 = vcmp.lt.s32.totalorder %v4772_v58, 3  ;;  %v4799_v6 = vsel %vm4791_vm10, %v4778_v62, %v4781_v2 }
 0x59a   : > { %v4796_v12 = vsel %vm4794_vm12, %v4784_v39, 2102212464  ;;  %v4800_v18 = vsel %vm4794_vm12, %v4787_v30, 920167782  ;;  %vm4792_vm8 = vcmp.lt.s32.totalorder %v4772_v58, 2  ;;  %v4803_v51 = vsel %vm4791_vm10, %v4781_v2, %v4784_v39 }
 0x59b   : > { %v6495_v46 = vadd.s32 4294967294, %v4931_v4  ;;  %v4801_v8 = vsel %vm4793_vm7, %v4784_v39, %v4800_v18  ;;  %v4624_v28 = vshll.u32 %v10546_v45, %v10595_v15  ;;  %v4804_v49 = vsel %vm4794_vm12, %v4790_v44, 1326507024  ;;  %v6713_v39 = vpop.f32.mrf.mxu0 }
 0x59c   : > { %v4802_v20 = vsel %vm4792_vm8, %v4799_v6, %v4801_v8  ;;  %v5081_v35 = vadd.s32 1, %v6501_v60  ;;  %v4795_v24 = vsel %vm4791_vm10, %v4775_v7, %v4778_v62  ;;  %v4797_v38 = vsel %vm4793_vm7, %v4781_v2, %v4796_v12 }
 0x59d   : > { %vm6496_vm13 = vcmp.lt.s32.totalorder %v6495_v46, 0  ;;  %v4805_v26 = vsel %vm4793_vm7, %v4787_v30, %v4804_v49  ;;  %v10648_v4 = vmul.u32.u64.low %v10616_v61, %v4802_v20  ;;  %v10649_v59 = vmul.u32.u64.high %v10616_v61, %v4802_v20, %v10648_v4 }
 0x59e   : > { %v10644_v25 = vsel %vm6496_vm13, 0, %v6495_v46  ;;  %v4806_v40 = vsel %vm4792_vm8, %v4803_v51, %v4805_v26  ;;  %v10652_v10 = vor.u32 %v4625_v27, %v4624_v28  ;;  %v10654_v45 = vor.u32 4788187, %v4629_v0 }
 0x59f   : > { %v4939_v60 = vsub.s32 4294967266, %v10644_v25  ;;  %vm5082_vm2 = vcmp.gt.s32.totalorder %v5081_v35, 0  ;;  %v4798_v7 = vsel %vm4792_vm8, %v4795_v24, %v4797_v38  ;;  %v4919_v30 = vadd.s32 %v10555_v21, %v10553_v52 }
 0x5a0   : > { %v10659_v15 = vmul.u32.u64.low %v10616_v61, %v4806_v40  ;;  %v10660_v62 = vmul.u32.u64.high %v10616_v61, %v4806_v40, %v10659_v15  ;;  %v5083_v2 = vsel %vm5082_vm2, %v5081_v35, 0  ;;  %v10665_v27 = vadd.f32 %v6713_v39, %v10298_v32 }
 0x5a1   : > { %v4940_v44 = vadd.s32 127, %v4939_v60  ;;  %v5085_v12 = vand.u32 31, %v5083_v2  ;;  %v10671_v0 = vmul.f32 %v4737_v1, %v4735_v19  ;;  %v4817_v58 = vadd.s32 1, %v10649_v59 }
 0x5a2   : > { %v5079_v6 = vor.u32 8388608, %v10635_v50  ;;  %v11952_v18 = vand.u32 2147483647, %v10618_v47  ;;  %v4631_v46 = vand.u32 2147483647, %v10654_v45  ;;  %v4633_v52 = vcvt.s32.f32 %v10652_v10 }
 0x5a3   : > { %v4814_v21 = vmul.u32 %v10616_v61, %v4798_v7  ;;  %v5086_v32 = vsub.s32 32, %v5085_v12  ;;  %v4935_v8 = vsub.s32 32, %v10644_v25  ;;  %v4941_v11 = vshll.u32 %v4940_v44, 23 }
 0x5a4   : > { %vm4816_vm5 = vc.u32 %v10660_v62, %v10648_v4  ;;  %v5084_v56 = vshrl.u32 %v5083_v2, 5  ;;  %v5088_v19 = vshll.u32 %v12009_v55, %v5085_v12  ;;  %v5091_v50 = vshll.u32 %v12143_v16, %v5085_v12 }
 0x5a5   : > { %v4818_v1 = vsel %vm4816_vm5, %v4817_v58, %v10649_v59  ;;  %v5094_v51 = vshll.u32 %v12007_v54, %v5085_v12  ;;  %v5089_v20 = vshrl.u32 %v12143_v16, %v5086_v32  ;;  %v5092_v61 = vshrl.u32 %v12007_v54, %v5086_v32 }
 0x5a6   : > { %v4819_v28 = vadd.s32 %v4818_v1, %v4814_v21  ;;  %v5095_v49 = vshrl.u32 %v12144_v14, %v5086_v32  ;;  %v4936_v35 = vshll.u32 %v10622_v3, %v10644_v25  ;;  %v5097_v24 = vshll.u32 %v12144_v14, %v5085_v12 }
 0x5a7   : > { %v5098_v38 = vshrl.u32 %v12010_v42, %v5086_v32  ;;  %v10693_v26 = vshll.u32 %v5079_v6, 8  ;;  %v5090_v59 = vor.u32 %v5089_v20, %v5088_v19  ;;  %v5093_v39 = vor.u32 %v5092_v61, %v5091_v50 }
 0x5a8   : > { %v4820_v40 = vadd.s32 536870912, %v4819_v28  ;;  %v5096_v10 = vor.u32 %v5095_v49, %v5094_v51  ;;  %v4937_v45 = vshrl.u32 %v4919_v30, %v4935_v8  ;;  %v5100_v7 = vshll.u32 %v12010_v42, %v5085_v12 }
 0x5a9   : > { %v5099_v60 = vor.u32 %v5098_v38, %v5097_v24  ;;  %v5101_v15 = vshrl.u32 %v12001_v43, %v5086_v32  ;;  %v4942_v2 = vor.u32 4788187, %v4941_v11  ;;  %vm5106_vm15 = vcmp.lt.s32.totalorder %v5084_v56, 4 }
 0x5aa   : > { %v10697_v44 = vshrl.u32 %v4820_v40, 30  ;;  %v4970_v3 = vand.u32 2139095040, %v10618_v47  ;;  %v5087_v25 = vshrl.u32 %v12009_v55, %v5086_v32  ;;  %vm5103_vm0 = vcmp.lt.s32.totalorder %v5084_v56, 1 }
 0x5ab   : > { %v5102_v58 = vor.u32 %v5101_v15, %v5100_v7  ;;  %v5108_v6 = vsel %vm5106_vm15, %v5096_v10, 2102212464  ;;  %vm5105_vm6 = vcmp.lt.s32.totalorder %v5084_v56, 3  ;;  %v5111_v30 = vsel %vm5103_vm0, %v5090_v59, %v5093_v39 }
 0x5ac   : > { %12277 = vst [vmem:[#allocation22_spill] sm:$0xff] %v10697_v44  ;;  %v4822_v21 = vshll.u32 %v10697_v44, 30  ;;  %v5112_v12 = vsel %vm5106_vm15, %v5099_v60, 920167782  ;;  %vm5104_vm14 = vcmp.lt.s32.totalorder %v5084_v56, 2  ;;  %v5107_v8 = vsel %vm5103_vm0, %v5087_v25, %v5090_v59 }
 0x5ad   : > { %v5113_v11 = vsel %vm5105_vm6, %v5096_v10, %v5112_v12  ;;  %v5115_v1 = vsel %vm5103_vm0, %v5093_v39, %v5096_v10  ;;  %v5109_v50 = vsel %vm5105_vm6, %v5093_v39, %v5108_v6  ;;  %v5116_v32 = vsel %vm5106_vm15, %v5102_v58, 1326507024  ;;  %v4288_v39 = vpop.f32.mrf.mxu0 }
 0x5ae   : > { %v10704_v19 = vsub.s32 %v4819_v28, %v4822_v21  ;;  %v5114_v51 = vsel %vm5104_vm14, %v5111_v30, %v5113_v11  ;;  %vm4345_vm11 = vcmp.lt.s32.totalorder %v10306_v57, 0  ;;  %vm4657_vm3 = vcmp.lt.s32.totalorder %v10378_v34, 0 }
 0x5af   : > { %v5117_v20 = vsel %vm5105_vm6, %v5099_v60, %v5116_v32  ;;  %v10711_v61 = vmul.u32.u64.low %v10693_v26, %v5114_v51  ;;  %v10712_v49 = vmul.u32.u64.high %v10693_v26, %v5114_v51, %v10711_v61  ;;  %v4971_v24 = vshrl.u32 %v4970_v3, 23 }
 0x5b0   : > { %v4634_v38 = vmul.f32 %v4633_v52, %v4631_v46  ;;  %v4938_v40 = vor.u32 %v4937_v45, %v4936_v35  ;;  %v5118_v28 = vsel %vm5104_vm14, %v5115_v1, %v5117_v20  ;;  %v10717_v59 = vmul.f32 30.0, %v10665_v27  ;;  %v10733_v45 = vld [vmem:[%s11820_s6] ss:$0 sm:$0xff] }
 0x5b1   : > { %v4825_v10 = vsub.s32 0, %v10704_v19  ;;  %v10721_v7 = vmul.u32.u64.low %v10693_v26, %v5118_v28  ;;  %v10722_v15 = vmul.u32.u64.high %v10693_v26, %v5118_v28, %v10721_v7  ;;  %v6497_v60 = vadd.s32 4294967169, %v4971_v24 }
 0x5b2   : > { %v4427_v25 = vxor.u32 2147483648, %v10609_v9  ;;  %v4943_v58 = vand.u32 2147483647, %v4942_v2  ;;  %v5110_v3 = vsel %vm5104_vm14, %v5107_v8, %v5109_v50  ;;  %v4974_v46 = vand.u32 8388607, %v11952_v18 }
 0x5b3   : > { %v4739_v52 = vxor.u32 2147483648, %v10671_v0  ;;  %v5129_v27 = vadd.s32 1, %v10712_v49  ;;  %v4977_v35 = vadd.s32 1, %v6497_v60  ;;  %v4289_v6 = vadd.f32 %v10733_v45, %v4288_v39 }
 0x5b4   : > { %v4635_v21 = vxor.u32 2147483648, %v4634_v38  ;;  %v4945_v30 = vcvt.s32.f32 %v4938_v40  ;;  %v11950_v56 = vand.u32 2147483647, %v10717_v59  ;;  %v5282_v2 = vand.u32 2139095040, %v10717_v59  ;;  %v6716_v40 = vpop.f32.mrf.mxu0 }
 0x5b5   : > { %v6490_v12 = vmin.u32 %v4825_v10, %v10704_v19  ;;  %v5126_v8 = vmul.u32 %v10693_v26, %v5110_v3  ;;  %vm5128_vm4 = vc.u32 %v10722_v15, %v10711_v61  ;;  %vm4978_vm1 = vcmp.gt.s32.totalorder %v4977_v35, 0 }
 0x5b6   : > { %v10742_v11 = vmul.f32 %v4945_v30, %v4943_v58  ;;  %v5130_v1 = vsel %vm5128_vm4, %v5129_v27, %v10712_v49  ;;  %v4975_v50 = vor.u32 8388608, %v4974_v46  ;;  %v4979_v51 = vsel %vm4978_vm1, %v4977_v35, 0 }
 0x5b7   : > { %7089 = vcosq.f32 %v10601_v41  ;;  %vm4553_vm10 = vcmp.lt.s32.totalorder %v10394_v13, 0  ;;  %v5131_v32 = vadd.s32 %v5130_v1, %v5126_v8  ;;  %v4981_v20 = vand.u32 31, %v4979_v51 }
 0x5b8   : > { %7091 = vsinq.f32 %v10601_v41  ;;  %v10751_v26 = vsel %vm4345_vm11, %v4427_v25, %v10609_v9  ;;  %v10756_v24 = vsel %vm4657_vm3, %v4739_v52, %v10671_v0  ;;  %v5283_v49 = vshrl.u32 %v5282_v2, 23 }
 0x5b9   : > { %12278 = vst [vmem:[#allocation5_spill] sm:$0xff] %v10756_v24  ;;  %v10760_v28 = vsel %vm4553_vm10, %v4635_v21, %v4634_v38  ;;  %v4827_v39 = vclz %v6490_v12  ;;  %v5132_v10 = vadd.s32 536870912, %v5131_v32  ;;  %v4982_v7 = vsub.s32 32, %v4981_v20 }
 0x5ba   : > { %v10763_v60 = vshll.u32 %v4975_v50, 8  ;;  %v10767_v9 = vand.u32 8388607, %v11950_v56  ;;  %v10769_v25 = vmul.f32 30.0, %v4289_v6  ;;  %v10776_v3 = vadd.f32 %v10733_v45, %v6716_v40 }
 0x5bb   : > { %v10771_v0 = vshrl.u32 %v5132_v10, 30  ;;  %v4985_v58 = vshrl.u32 %v12143_v16, %v4982_v7  ;;  %v4988_v38 = vshrl.u32 %v12007_v54, %v4982_v7  ;;  %v4984_v46 = vshll.u32 %v12009_v55, %v4981_v20 }
 0x5bc   : > { %v4987_v52 = vshll.u32 %v12143_v16, %v4981_v20  ;;  %v4991_v27 = vshrl.u32 %v12144_v14, %v4982_v7  ;;  %v6509_v35 = vadd.s32 4294967169, %v5283_v49  ;;  %v6491_v21 = vadd.s32 4294967294, %v4827_v39 }
 0x5bd   : > { %12279 = vst [vmem:[#allocation15_spill] sm:$0xff] %v10771_v0  ;;  %v5134_v6 = vshll.u32 %v10771_v0, 30  ;;  %v4980_v30 = vshrl.u32 %v4979_v51, 5  ;;  %v4990_v2 = vshll.u32 %v12007_v54, %v4981_v20  ;;  %v4986_v12 = vor.u32 %v4985_v58, %v4984_v46 }
 0x5be   : > { %v4989_v8 = vor.u32 %v4988_v38, %v4987_v52  ;;  %v4993_v1 = vshll.u32 %v12144_v14, %v4981_v20  ;;  %v4994_v50 = vshrl.u32 %v12010_v42, %v4982_v7  ;;  %v4996_v56 = vshll.u32 %v12010_v42, %v4981_v20 }
 0x5bf   : > { %v10785_v40 = vsub.s32 %v5131_v32, %v5134_v6  ;;  %v4992_v10 = vor.u32 %v4991_v27, %v4990_v2  ;;  %v4997_v37 = vshrl.u32 %v12001_v43, %v4982_v7  ;;  %v5287_v39 = vor.u32 8388608, %v10767_v9 }
 0x5c0   : > { %v4995_v49 = vor.u32 %v4994_v50, %v4993_v1  ;;  %v5289_v18 = vadd.s32 1, %v6509_v35  ;;  %vm4865_vm12 = vcmp.lt.s32.totalorder %v10404_v53, 0  ;;  %vm6492_vm7 = vcmp.lt.s32.totalorder %v6491_v21, 0 }
 0x5c1   : > { %v5137_v58 = vsub.s32 0, %v10785_v40  ;;  %v4998_v38 = vor.u32 %v4997_v37, %v4996_v56  ;;  %vm4999_vm8 = vcmp.lt.s32.totalorder %v4980_v30, 1  ;;  %v4983_v32 = vshrl.u32 %v12009_v55, %v4982_v7 }
 0x5c2   : > { %vm5001_vm13 = vcmp.lt.s32.totalorder %v4980_v30, 3  ;;  %vm5002_vm2 = vcmp.lt.s32.totalorder %v4980_v30, 4  ;;  %v5007_v20 = vsel %vm4999_vm8, %v4986_v12, %v4989_v8  ;;  %v5011_v27 = vsel %vm4999_vm8, %v4989_v8, %v4992_v10 }
 0x5c3   : > { %v6502_v46 = vmin.u32 %v5137_v58, %v10785_v40  ;;  %v5004_v52 = vsel %vm5002_vm2, %v4992_v10, 2102212464  ;;  %v5008_v9 = vsel %vm5002_vm2, %v4995_v49, 920167782  ;;  %v4830_v6 = vsel %vm6492_vm7, 0, %v6491_v21 }
 0x5c4   : > { %v10797_v35 = vpop.eup %7089  ;;  %vm5000_vm5 = vcmp.lt.s32.totalorder %v4980_v30, 2  ;;  %v5009_v2 = vsel %vm5001_vm13, %v4992_v10, %v5008_v9  ;;  %v5012_v37 = vsel %vm5002_vm2, %v4998_v38, 1326507024  ;;  %v5003_v1 = vsel %vm4999_vm8, %v4983_v32, %v4986_v12 }
 0x5c5   : > { %v10800_v56 = vpop.eup %7091  ;;  %v5139_v7 = vclz %v6502_v46  ;;  %v5010_v50 = vsel %vm5000_vm5, %v5007_v20, %v5009_v2  ;;  %v5013_v58 = vsel %vm5001_vm13, %v4995_v49, %v5012_v37  ;;  %v5005_v23 = vsel %vm5001_vm13, %v4989_v8, %v5004_v52 }
 0x5c6   : > { %v5014_v51 = vsel %vm5000_vm5, %v5011_v27, %v5013_v58  ;;  %v10808_v41 = vmul.u32.u64.low %v10763_v60, %v5010_v50  ;;  %v10809_v21 = vmul.u32.u64.high %v10763_v60, %v5010_v50, %v10808_v41  ;;  %vm5290_vm15 = vcmp.gt.s32.totalorder %v5289_v18, 0 }
 0x5c7   : > { %v6503_v10 = vadd.s32 4294967294, %v5139_v7  ;;  %v10813_v38 = vmul.u32.u64.low %v10763_v60, %v5014_v51  ;;  %v10814_v9 = vmul.u32.u64.high %v10763_v60, %v5014_v51, %v10813_v38  ;;  %v4815_v12 = vadd.s32 %v10648_v4, %v10660_v62 }
 0x5c8   : > { %v4831_v32 = vsub.s32 32, %v4830_v6  ;;  %v5291_v49 = vsel %vm5290_vm15, %v5289_v18, 0  ;;  %v5178_v8 = vand.u32 2139095040, %v10769_v25  ;;  %v4835_v20 = vsub.s32 4294967266, %v4830_v6 }
 0x5c9   : > { %vm6504_vm0 = vcmp.lt.s32.totalorder %v6503_v10, 0  ;;  %v5006_v46 = vsel %vm5000_vm5, %v5003_v1, %v5005_v23  ;;  %v5293_v52 = vand.u32 31, %v5291_v49  ;;  %v12280_v27 = vxor.u32 2147483648, %v10742_v11 }
 0x5ca   : > { %v10829_v2 = vadd.s32 %v10711_v61, %v10722_v15  ;;  %v5025_v4 = vadd.s32 1, %v10809_v21  ;;  %v10832_v62 = vshll.u32 %v5287_v39, 8  ;;  %v4832_v18 = vshll.u32 %v10704_v19, %v4830_v6 }
 0x5cb   : > { %v10825_v51 = vsel %vm4865_vm12, %v12280_v27, %v10742_v11  ;;  %v10835_v30 = vsel %vm6504_vm0, 0, %v6503_v10  ;;  %v12282_v23 = vand.u32 2147483647, %v10769_v25  ;;  %v10842_v7 = vmul.f32 30.0, %v10776_v3 }
 0x5cc   : > { %12281 = vst [vmem:[#allocation6_spill] sm:$0xff] %v10825_v51  ;;  %v4833_v11 = vshrl.u32 %v4815_v12, %v4831_v32  ;;  %v5022_v1 = vmul.u32 %v10763_v60, %v5006_v46  ;;  %vm5024_vm6 = vc.u32 %v10814_v9, %v10808_v41  ;;  %v5294_v61 = vsub.s32 32, %v5293_v52 }
 0x5cd   : > { %v10839_v37 = vand.u32 8388607, %v12282_v23  ;;  %v4836_v15 = vadd.s32 127, %v4835_v20  ;;  %v5026_v39 = vsel %vm5024_vm6, %v5025_v4, %v10809_v21  ;;  %v5292_v19 = vshrl.u32 %v5291_v49, 5 }
 0x5ce   : > { %v5179_v6 = vshrl.u32 %v5178_v8, 23  ;;  %v5147_v50 = vsub.s32 4294967266, %v10835_v30  ;;  %v5027_v58 = vadd.s32 %v5026_v39, %v5022_v1  ;;  %v5297_v10 = vshrl.u32 %v12143_v16, %v5294_v61 }
 0x5cf   : > { %v5300_v3 = vshrl.u32 %v12007_v54, %v5294_v61  ;;  %v5296_v38 = vshll.u32 %v12009_v55, %v5293_v52  ;;  %v5299_v60 = vshll.u32 %v12143_v16, %v5293_v52  ;;  %v5302_v12 = vshll.u32 %v12007_v54, %v5293_v52 }
 0x5d0   : > { %v5303_v32 = vshrl.u32 %v12144_v14, %v5294_v61  ;;  %v10855_v20 = vor.u32 %v4833_v11, %v4832_v18  ;;  %v5028_v21 = vadd.s32 536870912, %v5027_v58  ;;  %v5305_v49 = vshll.u32 %v12144_v14, %v5293_v52 }
 0x5d1   : > { %v5306_v8 = vshrl.u32 %v12010_v42, %v5294_v61  ;;  %v4837_v46 = vshll.u32 %v4836_v15, 23  ;;  %v5298_v27 = vor.u32 %v5297_v10, %v5296_v38  ;;  %v5301_v4 = vor.u32 %v5300_v3, %v5299_v60 }
 0x5d2   : > { %v5304_v23 = vor.u32 %v5303_v32, %v5302_v12  ;;  %v10859_v1 = vshrl.u32 %v5028_v21, 30  ;;  %v5308_v0 = vshll.u32 %v12010_v42, %v5293_v52  ;;  %v5309_v51 = vshrl.u32 %v12001_v43, %v5294_v61 }
 0x5d3   : > { %v5307_v39 = vor.u32 %v5306_v8, %v5305_v49  ;;  %v5143_v48 = vsub.s32 32, %v10835_v30  ;;  %v5148_v18 = vadd.s32 127, %v5147_v50  ;;  %vm5314_vm14 = vcmp.lt.s32.totalorder %v5292_v19, 4 }
 0x5d4   : > { %12283 = vst [vmem:[#allocation2_spill] sm:$0xff] %v10859_v1  ;;  %v6505_v11 = vadd.s32 4294967169, %v5179_v6  ;;  %v5030_v53 = vshll.u32 %v10859_v1, 30  ;;  %v5310_v44 = vor.u32 %v5309_v51, %v5308_v0  ;;  %vm5311_vm4 = vcmp.lt.s32.totalorder %v5292_v19, 1 }
 0x5d5   : > { %v5316_v15 = vsel %vm5314_vm14, %v5304_v23, 2102212464  ;;  %v5295_v10 = vshrl.u32 %v12009_v55, %v5294_v61  ;;  %vm5313_vm1 = vcmp.lt.s32.totalorder %v5292_v19, 3  ;;  %v5319_v3 = vsel %vm5311_vm4, %v5298_v27, %v5301_v4 }
 0x5d6   : > { %v5320_v38 = vsel %vm5314_vm14, %v5307_v39, 920167782  ;;  %v10868_v52 = vsub.s32 %v5027_v58, %v5030_v53  ;;  %vm5312_vm7 = vcmp.lt.s32.totalorder %v5292_v19, 2  ;;  %v5323_v12 = vsel %vm5311_vm4, %v5301_v4, %v5304_v23 }
 0x5d7   : > { %v5321_v60 = vsel %vm5313_vm1, %v5304_v23, %v5320_v38  ;;  %v5315_v50 = vsel %vm5311_vm4, %v5295_v10, %v5298_v27  ;;  %v5317_v32 = vsel %vm5313_vm1, %v5301_v4, %v5316_v15  ;;  %v5324_v0 = vsel %vm5314_vm14, %v5310_v44, 1326507024 }
 0x5d8   : > { %v5322_v6 = vsel %vm5312_vm7, %v5319_v3, %v5321_v60  ;;  %v5033_v51 = vsub.s32 0, %v10868_v52  ;;  %v5325_v21 = vsel %vm5313_vm1, %v5307_v39, %v5324_v0  ;;  %v10878_v8 = vor.u32 4788187, %v4837_v46 }
 0x5d9   : > { %v10874_v61 = vmul.u32.u64.low %v10832_v62, %v5322_v6  ;;  %v10875_v49 = vmul.u32.u64.high %v10832_v62, %v5322_v6, %v10874_v61  ;;  %v5326_v58 = vsel %vm5312_vm7, %v5323_v12, %v5325_v21  ;;  %v5185_v27 = vadd.s32 1, %v6505_v11 }
 0x5da   : > { %v6498_v4 = vmin.u32 %v5033_v51, %v10868_v52  ;;  %v10884_v23 = vmul.u32.u64.low %v10832_v62, %v5326_v58  ;;  %v10885_v44 = vmul.u32.u64.high %v10832_v62, %v5326_v58, %v10884_v23  ;;  %v5183_v39 = vor.u32 8388608, %v10839_v37 }
 0x5db   : > { %v5145_v15 = vshrl.u32 %v10829_v2, %v5143_v48  ;;  %v5149_v10 = vshll.u32 %v5148_v18, 23  ;;  %v5318_v3 = vsel %vm5312_vm7, %v5315_v50, %v5317_v32  ;;  %vm5186_vm8 = vcmp.gt.s32.totalorder %v5185_v27, 0 }
 0x5dc   : > { %v5035_v46 = vclz %v6498_v4  ;;  %v5337_v38 = vadd.s32 1, %v10875_v49  ;;  %v5187_v60 = vsel %vm5186_vm8, %v5185_v27, 0  ;;  %v5490_v11 = vand.u32 2139095040, %v10842_v7 }
 0x5dd   : > { %v5144_v6 = vshll.u32 %v10785_v40, %v10835_v30  ;;  %v5189_v0 = vand.u32 31, %v5187_v60  ;;  %v5334_v48 = vmul.u32 %v10832_v62, %v5318_v3  ;;  %vm5336_vm13 = vc.u32 %v10885_v44, %v10874_v61 }
 0x5de   : > { %v6499_v51 = vadd.s32 4294967294, %v5035_v46  ;;  %v10899_v2 = vshll.u32 %v5183_v39, 8  ;;  %v5023_v18 = vadd.s32 %v10808_v41, %v10814_v9  ;;  %v5338_v50 = vsel %vm5336_vm13, %v5337_v38, %v10875_v49  ;;  %v4298_v46 = vpop.f32.mrf.mxu0 }
 0x5df   : > { %v10901_v19 = vor.u32 %v5145_v15, %v5144_v6  ;;  %v5190_v32 = vsub.s32 32, %v5189_v0  ;;  %v10906_v40 = vor.u32 4788187, %v5149_v10  ;;  %v5339_v30 = vadd.s32 %v5338_v50, %v5334_v48 }
 0x5e0   : > { %vm6500_vm2 = vcmp.lt.s32.totalorder %v6499_v51, 0  ;;  %v5491_v21 = vshrl.u32 %v5490_v11, 23  ;;  %v5188_v62 = vshrl.u32 %v5187_v60, 5  ;;  %v5192_v39 = vshll.u32 %v12009_v55, %v5189_v0 }
 0x5e1   : > { %v5038_v58 = vsel %vm6500_vm2, 0, %v6499_v51  ;;  %v5193_v27 = vshrl.u32 %v12143_v16, %v5190_v32  ;;  %v5196_v4 = vshrl.u32 %v12007_v54, %v5190_v32  ;;  %v5340_v23 = vadd.s32 536870912, %v5339_v30 }
 0x5e2   : > { %v5195_v15 = vshll.u32 %v12143_v16, %v5189_v0  ;;  %v5198_v41 = vshll.u32 %v12007_v54, %v5189_v0  ;;  %v5043_v9 = vsub.s32 4294967266, %v5038_v58  ;;  %v5199_v49 = vshrl.u32 %v12144_v14, %v5190_v32 }
 0x5e3   : > { %v5201_v10 = vshll.u32 %v12144_v14, %v5189_v0  ;;  %v5202_v3 = vshrl.u32 %v12010_v42, %v5190_v32  ;;  %v5039_v38 = vsub.s32 32, %v5038_v58  ;;  %v10916_v60 = vshrl.u32 %v5340_v23, 30 }
 0x5e4   : > { %v5194_v11 = vor.u32 %v5193_v27, %v5192_v39  ;;  %v5197_v6 = vor.u32 %v5196_v4, %v5195_v15  ;;  %v5200_v51 = vor.u32 %v5199_v49, %v5198_v41  ;;  %v5204_v50 = vshll.u32 %v12010_v42, %v5189_v0 }
 0x5e5   : > { %12284 = vst [vmem:[#allocation3_spill] sm:$0xff] %v10916_v60  ;;  %v5203_v48 = vor.u32 %v5202_v3, %v5201_v10  ;;  %v5205_v53 = vshrl.u32 %v12001_v43, %v5190_v32  ;;  %v5151_v12 = vand.u32 2147483647, %v10906_v40  ;;  %v5342_v37 = vshll.u32 %v10916_v60, 30 }
 0x5e6   : > { %v6517_v1 = vadd.s32 4294967169, %v5491_v21  ;;  %v4299_v33 = vadd.f32 %v10733_v45, %v4298_v46  ;;  %v5040_v24 = vshll.u32 %v10868_v52, %v5038_v58  ;;  %v5044_v31 = vadd.s32 127, %v5043_v9 }
 0x5e7   : > { %v5191_v23 = vshrl.u32 %v12009_v55, %v5190_v32  ;;  %v5206_v27 = vor.u32 %v5205_v53, %v5204_v50  ;;  %v5041_v4 = vshrl.u32 %v5023_v18, %v5039_v38  ;;  %v10925_v39 = vsub.s32 %v5339_v30, %v5342_v37 }
 0x5e8   : > { %vm5207_vm5 = vcmp.lt.s32.totalorder %v5188_v62, 1  ;;  %vm5210_vm15 = vcmp.lt.s32.totalorder %v5188_v62, 4  ;;  %vm5209_vm0 = vcmp.lt.s32.totalorder %v5188_v62, 3  ;;  %vm5208_vm6 = vcmp.lt.s32.totalorder %v5188_v62, 2 }
 0x5e9   : > { %v5212_v0 = vsel %vm5210_vm15, %v5200_v51, 2102212464  ;;  %v5215_v15 = vsel %vm5207_vm5, %v5194_v11, %v5197_v6  ;;  %v5216_v40 = vsel %vm5210_vm15, %v5203_v48, 920167782  ;;  %v5345_v41 = vsub.s32 0, %v10925_v39 }
 0x5ea   : > { %v5217_v21 = vsel %vm5209_vm0, %v5200_v51, %v5216_v40  ;;  %v5219_v49 = vsel %vm5207_vm5, %v5197_v6, %v5200_v51  ;;  %v5045_v10 = vshll.u32 %v5044_v31, 23  ;;  %v5220_v58 = vsel %vm5210_vm15, %v5206_v27, 1326507024 }
 0x5eb   : > { %v5218_v52 = vsel %vm5208_vm6, %v5215_v15, %v5217_v21  ;;  %v5497_v32 = vadd.s32 1, %v6517_v1  ;;  %v6510_v53 = vmin.u32 %v5345_v41, %v10925_v39  ;;  %v5211_v37 = vsel %vm5207_vm5, %v5191_v23, %v5194_v11  ;;  %v6719_v1 = vpop.f32.mrf.mxu0 }
 0x5ec   : > { %v5213_v18 = vsel %vm5209_vm0, %v5197_v6, %v5212_v0  ;;  %v5221_v30 = vsel %vm5209_vm0, %v5203_v48, %v5220_v58  ;;  %v10932_v3 = vmul.u32.u64.low %v10899_v2, %v5218_v52  ;;  %v10933_v46 = vmul.u32.u64.high %v10899_v2, %v5218_v52, %v10932_v3 }
 0x5ed   : > { %v5222_v9 = vsel %vm5208_vm6, %v5219_v49, %v5221_v30  ;;  %vm5498_vm14 = vcmp.gt.s32.totalorder %v5497_v32, 0  ;;  %v5153_v38 = vcvt.s32.f32 %v10901_v19  ;;  %v5347_v31 = vclz %v6510_v53 }
 0x5ee   : > { %v10938_v51 = vmul.u32.u64.low %v10899_v2, %v5222_v9  ;;  %v10939_v50 = vmul.u32.u64.high %v10899_v2, %v5222_v9, %v10938_v51  ;;  %v10941_v27 = vor.u32 %v5041_v4, %v5040_v24  ;;  %v5214_v11 = vsel %vm5208_vm6, %v5211_v37, %v5213_v18 }
 0x5ef   : > { %v12285_v6 = vand.u32 2147483647, %v10842_v7  ;;  %v5499_v23 = vsel %vm5498_vm14, %v5497_v32, 0  ;;  %v10946_v0 = vor.u32 4788187, %v5045_v10  ;;  %v6511_v15 = vadd.s32 4294967294, %v5347_v31 }
 0x5f0   : > { %v5501_v40 = vand.u32 31, %v5499_v23  ;;  %v10948_v41 = vmul.f32 30.0, %v4299_v33  ;;  %v12286_v19 = vand.u32 2147483647, %v10878_v8  ;;  %v12287_v21 = vcvt.s32.f32 %v10855_v20 }
 0x5f1   : > { %v5494_v48 = vand.u32 8388607, %v12285_v6  ;;  %v10956_v24 = vmul.f32 %v5153_v38, %v5151_v12  ;;  %v5233_v62 = vadd.s32 1, %v10933_v46  ;;  %v10960_v4 = vadd.f32 %v10733_v45, %v6719_v1 }
 0x5f2   : > { %v10954_v49 = vmul.f32 %v12287_v21, %v12286_v19  ;;  %vm6512_vm4 = vcmp.lt.s32.totalorder %v6511_v15, 0  ;;  %v5230_v10 = vmul.u32 %v10899_v2, %v5214_v11  ;;  %vm5232_vm1 = vc.u32 %v10939_v50, %v10932_v3 }
 0x5f3   : > { %v5502_v33 = vsub.s32 32, %v5501_v40  ;;  %v5335_v20 = vadd.s32 %v10874_v61, %v10885_v44  ;;  %v5234_v12 = vsel %vm5232_vm1, %v5233_v62, %v10933_v46  ;;  %v5495_v52 = vor.u32 8388608, %v5494_v48 }
 0x5f4   : > { %v10970_v32 = vsel %vm6512_vm4, 0, %v6511_v15  ;;  %v5235_v53 = vadd.s32 %v5234_v12, %v5230_v10  ;;  %v11969_v37 = vand.u32 2147483647, %v10948_v41  ;;  %v5500_v2 = vshrl.u32 %v5499_v23, 5 }
 0x5f5   : > { %v5505_v18 = vshrl.u32 %v12143_v16, %v5502_v33  ;;  %v5508_v30 = vshrl.u32 %v12007_v54, %v5502_v33  ;;  %v5386_v9 = vand.u32 2139095040, %v10948_v41  ;;  %v5504_v61 = vshll.u32 %v12009_v55, %v5501_v40 }
 0x5f6   : > { %v5236_v38 = vadd.s32 536870912, %v5235_v53  ;;  %v5507_v44 = vshll.u32 %v12143_v16, %v5501_v40  ;;  %v5511_v46 = vshrl.u32 %v12144_v14, %v5502_v33  ;;  %v5355_v31 = vsub.s32 4294967266, %v10970_v32 }
 0x5f7   : > { %v5510_v51 = vshll.u32 %v12007_v54, %v5501_v40  ;;  %v5513_v1 = vshll.u32 %v12144_v14, %v5501_v40  ;;  %v5514_v11 = vshrl.u32 %v12010_v42, %v5502_v33  ;;  %v5506_v48 = vor.u32 %v5505_v18, %v5504_v61 }
 0x5f8   : > { %v10983_v6 = vshrl.u32 %v5236_v38, 30  ;;  %v5509_v23 = vor.u32 %v5508_v30, %v5507_v44  ;;  %v10985_v15 = vshll.u32 %v5495_v52, 8  ;;  %v5516_v62 = vshll.u32 %v12010_v42, %v5501_v40 }
 0x5f9   : > { %v5512_v19 = vor.u32 %v5511_v46, %v5510_v51  ;;  %v5515_v21 = vor.u32 %v5514_v11, %v5513_v1  ;;  %v5517_v10 = vshrl.u32 %v12001_v43, %v5502_v33  ;;  %v5351_v12 = vsub.s32 32, %v10970_v32 }
 0x5fa   : > { %12288 = vst [vmem:[#allocation12_spill] sm:$0xff] %v10983_v6  ;;  %v5238_v8 = vshll.u32 %v10983_v6, 30  ;;  %v5387_v58 = vshrl.u32 %v5386_v9, 23  ;;  %v10993_v60 = vand.u32 8388607, %v11969_v37  ;;  %v5356_v38 = vadd.s32 127, %v5355_v31 }
 0x5fb   : > { %v5503_v18 = vshrl.u32 %v12009_v55, %v5502_v33  ;;  %v5518_v52 = vor.u32 %v5517_v10, %v5516_v62  ;;  %vm5519_vm7 = vcmp.lt.s32.totalorder %v5500_v2, 1  ;;  %vm5521_vm8 = vcmp.lt.s32.totalorder %v5500_v2, 3 }
 0x5fc   : > { %v10996_v30 = vsub.s32 %v5235_v53, %v5238_v8  ;;  %vm5522_vm13 = vcmp.lt.s32.totalorder %v5500_v2, 4  ;;  %v5527_v40 = vsel %vm5519_vm7, %v5506_v48, %v5509_v23  ;;  %vm4761_vm2 = vcmp.lt.s32.totalorder %v10460_v36, 0 }
 0x5fd   : > { %v5524_v61 = vsel %vm5522_vm13, %v5512_v19, 2102212464  ;;  %v5528_v44 = vsel %vm5522_vm13, %v5515_v21, 920167782  ;;  %v5531_v9 = vsel %vm5519_vm7, %v5509_v23, %v5512_v19  ;;  %v5532_v46 = vsel %vm5522_vm13, %v5518_v52, 1326507024 }
 0x5fe   : > { %vm5073_vm5 = vcmp.lt.s32.totalorder %v10585_v29, 0  ;;  %v5353_v31 = vshrl.u32 %v5335_v20, %v5351_v12  ;;  %v5241_v33 = vsub.s32 0, %v10996_v30  ;;  %vm5520_vm15 = vcmp.lt.s32.totalorder %v5500_v2, 2  ;;  %v6008_v2 = vld [vmem:[%s11821_s7 + $0x8] sm:$0xff] }
 0x5ff   : > { %v5529_v8 = vsel %vm5521_vm8, %v5512_v19, %v5528_v44  ;;  %v5357_v53 = vshll.u32 %v5356_v38, 23  ;;  %v5533_v1 = vsel %vm5521_vm8, %v5515_v21, %v5532_v46  ;;  %v6513_v11 = vadd.s32 4294967169, %v5387_v58  ;;  %v6010_v58 = vld [vmem:[%s11821_s7 + $0x18] sm:$0xff] }
 0x600   : > { %v5530_v51 = vsel %vm5520_vm15, %v5527_v40, %v5529_v8  ;;  %v6506_v62 = vmin.u32 %v5241_v33, %v10996_v30  ;;  %v5523_v10 = vsel %vm5519_vm7, %v5503_v18, %v5506_v48  ;;  %v5525_v52 = vsel %vm5521_vm8, %v5509_v23, %v5524_v61  ;;  %6723 = vmatprep.subr.mxu1 %v6010_v58 }
 0x601   : > { %v5534_v37 = vsel %vm5520_vm15, %v5531_v9, %v5533_v1  ;;  %v11015_v19 = vmul.u32.u64.low %v10985_v15, %v5530_v51  ;;  %v11016_v38 = vmul.u32.u64.high %v10985_v15, %v5530_v51, %v11015_v19  ;;  %v4843_v21 = vxor.u32 2147483648, %v10954_v49  ;;  %6724 = vmatpush3.msra.mxu1 %v6010_v58 }
 0x602   : > { %v11011_v20 = vmul.u32.u64.low %v10985_v15, %v5534_v37  ;;  %v11012_v12 = vmul.u32.u64.high %v10985_v15, %v5534_v37, %v11011_v20  ;;  %v5352_v48 = vshll.u32 %v10925_v39, %v10970_v32  ;;  %v5243_v23 = vclz %v6506_v62  ;;  %v6009_v39 = vld [vmem:[%s11821_s7 + $0x10] sm:$0xff] }
 0x603   : > { %v5393_v18 = vadd.s32 1, %v6513_v11  ;;  %v5155_v37 = vxor.u32 2147483648, %v10956_v24  ;;  %v12289_v40 = vand.u32 2147483647, %v10946_v0  ;;  %v12290_v61 = vcvt.s32.f32 %v10941_v27  ;;  %6725 = vmatprep.subr.mxu1 %v6009_v39 }
 0x604   : > { %v5526_v9 = vsel %vm5520_vm15, %v5523_v10, %v5525_v52  ;;  %v11034_v46 = vmul.f32 30.0, %v10960_v4  ;;  %v11039_v32 = vor.u32 %v5353_v31, %v5352_v48  ;;  %v11041_v33 = vor.u32 4788187, %v5357_v53  ;;  %6726 = vmatpush3.msra.mxu1 %v6009_v39 }
 0x605   : > { %v11030_v44 = vmul.f32 %v12290_v61, %v12289_v40  ;;  %v6507_v8 = vadd.s32 4294967294, %v5243_v23  ;;  %vm5394_vm0 = vcmp.gt.s32.totalorder %v5393_v18, 0  ;;  %vm5544_vm6 = vc.u32 %v11012_v12, %v11015_v19  ;;  %6727 = vmatprep.subr.mxu1 %v6008_v2 }
 0x606   : > { %v5545_v27 = vadd.s32 1, %v11016_v38  ;;  %v5391_v0 = vor.u32 8388608, %v10993_v60  ;;  %v5395_v4 = vsel %vm5394_vm0, %v5393_v18, 0  ;;  %v11053_v31 = vsel %vm4761_vm2, %v4843_v21, %v10954_v49  ;;  %6728 = vmatpush3.msra.mxu1 %v6008_v2  ;;  %v6007_v49 = vld [vmem:[%s11821_s7] sm:$0xff] }
 0x607   : > { %12291 = vst [vmem:[#allocation4_spill] sm:$0xff] %v11053_v31  ;;  %vm6508_vm14 = vcmp.lt.s32.totalorder %v6507_v8, 0  ;;  %v5542_v53 = vmul.u32 %v10985_v15, %v5526_v9  ;;  %v5397_v51 = vand.u32 31, %v5395_v4  ;;  %v11059_v60 = vsel %vm5073_vm5, %v5155_v37, %v10956_v24  ;;  %6729 = vmatprep.subr.mxu1 %v6007_v49  ;;  %v4308_v9 = vpop.f32.mrf.mxu0 }
 0x608   : > { %12292 = vst [vmem:[#allocation9_spill] sm:$0xff] %v11059_v60  ;;  %v11062_v11 = vsel %vm6508_vm14, 0, %v6507_v8  ;;  %v5546_v62 = vsel %vm5544_vm6, %v5545_v27, %v11016_v38  ;;  %v5361_v10 = vcvt.s32.f32 %v11039_v32  ;;  %v5231_v52 = vadd.s32 %v10932_v3, %v10939_v50  ;;  %6730 = vmatpush3.msra.mxu1 %v6007_v49 }
 0x609   : > { %v5547_v24 = vadd.s32 %v5546_v62, %v5542_v53  ;;  %v5247_v20 = vsub.s32 32, %v11062_v11  ;;  %v5398_v58 = vsub.s32 32, %v5397_v51  ;;  %v11073_v21 = vshll.u32 %v5391_v0, 8 }
 0x60a   : > { %v5698_v38 = vand.u32 2139095040, %v11034_v46  ;;  %v5251_v48 = vsub.s32 4294967266, %v11062_v11  ;;  %v5400_v18 = vshll.u32 %v12009_v55, %v5397_v51  ;;  %v5403_v37 = vshll.u32 %v12143_v16, %v5397_v51 }
 0x60b   : > { %v5548_v23 = vadd.s32 536870912, %v5547_v24  ;;  %v5401_v40 = vshrl.u32 %v12143_v16, %v5398_v58  ;;  %v5404_v3 = vshrl.u32 %v12007_v54, %v5398_v58  ;;  %v5406_v50 = vshll.u32 %v12007_v54, %v5397_v51 }
 0x60c   : > { %v5407_v61 = vshrl.u32 %v12144_v14, %v5398_v58  ;;  %v5396_v32 = vshrl.u32 %v5395_v4, 5  ;;  %v5409_v8 = vshll.u32 %v12144_v14, %v5397_v51  ;;  %v5410_v27 = vshrl.u32 %v12010_v42, %v5398_v58 }
 0x60d   : > { %v11083_v39 = vshrl.u32 %v5548_v23, 30  ;;  %v5402_v0 = vor.u32 %v5401_v40, %v5400_v18  ;;  %v5405_v2 = vor.u32 %v5404_v3, %v5403_v37  ;;  %v11974_v62 = vand.u32 2147483647, %v11034_v46 }
 0x60e   : > { %v5408_v53 = vor.u32 %v5407_v61, %v5406_v50  ;;  %v5411_v1 = vor.u32 %v5410_v27, %v5409_v8  ;;  %v5699_v15 = vshrl.u32 %v5698_v38, 23  ;;  %v4309_v6 = vadd.f32 %v10733_v45, %v4308_v9  ;;  %v6722_v50 = vpop.f32.mrf.mxu0 }
 0x60f   : > { %12293 = vst [vmem:[#allocation10_spill] sm:$0xff] %v11083_v39  ;;  %v5550_v49 = vshll.u32 %v11083_v39, 30  ;;  %v5249_v60 = vshrl.u32 %v5231_v52, %v5247_v20  ;;  %v5252_v29 = vadd.s32 127, %v5251_v48  ;;  %v5412_v23 = vshll.u32 %v12010_v42, %v5397_v51 }
 0x610   : > { %v5413_v4 = vshrl.u32 %v12001_v43, %v5398_v58  ;;  %vm5415_vm4 = vcmp.lt.s32.totalorder %v5396_v32, 1  ;;  %vm5417_vm1 = vcmp.lt.s32.totalorder %v5396_v32, 3  ;;  %vm5418_vm7 = vcmp.lt.s32.totalorder %v5396_v32, 4 }
 0x611   : > { %v11092_v31 = vsub.s32 %v5547_v24, %v5550_v49  ;;  %v5420_v37 = vsel %vm5418_vm7, %v5408_v53, 2102212464  ;;  %v5423_v40 = vsel %vm5415_vm4, %v5402_v0, %v5405_v2  ;;  %v5424_v3 = vsel %vm5418_vm7, %v5411_v1, 920167782 }
 0x612   : > { %v5414_v18 = vor.u32 %v5413_v4, %v5412_v23  ;;  %v5399_v52 = vshrl.u32 %v12009_v55, %v5398_v58  ;;  %vm5416_vm8 = vcmp.lt.s32.totalorder %v5396_v32, 2  ;;  %v5425_v51 = vsel %vm5417_vm1, %v5408_v53, %v5424_v3 }
 0x613   : > { %v5553_v38 = vsub.s32 0, %v11092_v31  ;;  %v5253_v20 = vshll.u32 %v5252_v29, 23  ;;  %v5426_v24 = vsel %vm5416_vm8, %v5423_v40, %v5425_v51  ;;  %v5427_v48 = vsel %vm5415_vm4, %v5405_v2, %v5408_v53  ;;  %v4318_v40 = vpop.f32.mrf.mxu0 }
 0x614   : > { %v5428_v61 = vsel %vm5418_vm7, %v5414_v18, 1326507024  ;;  %v5419_v8 = vsel %vm5415_vm4, %v5399_v52, %v5402_v0  ;;  %v5421_v27 = vsel %vm5417_vm1, %v5405_v2, %v5420_v37  ;;  %v6525_v29 = vadd.s32 4294967169, %v5699_v15 }
 0x615   : > { %v6518_v9 = vmin.u32 %v5553_v38, %v11092_v31  ;;  %v5429_v49 = vsel %vm5417_vm1, %v5411_v1, %v5428_v61  ;;  %v11106_v58 = vmul.u32.u64.low %v11073_v21, %v5426_v24  ;;  %v11107_v4 = vmul.u32.u64.high %v11073_v21, %v5426_v24, %v11106_v58 }
 0x616   : > { %v5430_v23 = vsel %vm5416_vm8, %v5427_v48, %v5429_v49  ;;  %v5248_v53 = vshll.u32 %v10996_v30, %v11062_v11  ;;  %v12294_v2 = vand.u32 2147483647, %v11041_v33  ;;  %v5422_v37 = vsel %vm5416_vm8, %v5419_v8, %v5421_v27 }
 0x617   : > { %v5555_v18 = vclz %v6518_v9  ;;  %v11113_v3 = vmul.u32.u64.low %v11073_v21, %v5430_v23  ;;  %v11114_v0 = vmul.u32.u64.high %v11073_v21, %v5430_v23, %v11113_v3  ;;  %v5705_v38 = vadd.s32 1, %v6525_v29 }
 0x618   : > { %v11118_v1 = vmul.f32 %v5361_v10, %v12294_v2  ;;  %v4324_v52 = vadd.f32 %v10733_v45, %v6722_v50  ;;  %v11122_v51 = vor.u32 %v5249_v60, %v5248_v53  ;;  %v11124_v15 = vor.u32 4788187, %v5253_v20 }
 0x619   : > { %v6519_v24 = vadd.s32 4294967294, %v5555_v18  ;;  %v11127_v30 = vadd.f32 %v10733_v45, %v4318_v40  ;;  %v5441_v11 = vadd.s32 1, %v11107_v4  ;;  %v5702_v33 = vand.u32 8388607, %v11974_v62 }
 0x61a   : > { %vm5706_vm13 = vcmp.gt.s32.totalorder %v5705_v38, 0  ;;  %v11132_v10 = vmul.f32 30.0, %v4309_v6  ;;  %v5438_v32 = vmul.u32 %v11073_v21, %v5422_v37  ;;  %vm5440_vm0 = vc.u32 %v11114_v0, %v11106_v58 }
 0x61b   : > { %vm6520_vm15 = vcmp.lt.s32.totalorder %v6519_v24, 0  ;;  %v5707_v60 = vsel %vm5706_vm13, %v5705_v38, 0  ;;  %v5543_v50 = vadd.s32 %v11015_v19, %v11012_v12  ;;  %v5442_v20 = vsel %vm5440_vm0, %v5441_v11, %v11107_v4 }
 0x61c   : > { %v11139_v45 = vsel %vm6520_vm15, 0, %v6519_v24  ;;  %v5709_v48 = vand.u32 31, %v5707_v60  ;;  %v5255_v61 = vand.u32 2147483647, %v11124_v15  ;;  %v5257_v6 = vcvt.s32.f32 %v11122_v51 }
 0x61d   : > { %v5563_v9 = vsub.s32 4294967266, %v11139_v45  ;;  %v5443_v8 = vadd.s32 %v5442_v20, %v5438_v32  ;;  %v5559_v21 = vsub.s32 32, %v11139_v45  ;;  %v5703_v27 = vor.u32 8388608, %v5702_v33 }
 0x61e   : > { %v5710_v49 = vsub.s32 32, %v5709_v48  ;;  %v5712_v12 = vshll.u32 %v12009_v55, %v5709_v48  ;;  %v5715_v19 = vshll.u32 %v12143_v16, %v5709_v48  ;;  %v5718_v4 = vshll.u32 %v12007_v54, %v5709_v48 }
 0x61f   : > { %v5444_v29 = vadd.s32 536870912, %v5443_v8  ;;  %v5564_v40 = vadd.s32 127, %v5563_v9  ;;  %v5708_v37 = vshrl.u32 %v5707_v60, 5  ;;  %v5721_v38 = vshll.u32 %v12144_v14, %v5709_v48 }
 0x620   : > { %v5713_v53 = vshrl.u32 %v12143_v16, %v5710_v49  ;;  %v5716_v18 = vshrl.u32 %v12007_v54, %v5710_v49  ;;  %v5719_v3 = vshrl.u32 %v12144_v14, %v5710_v49  ;;  %v5722_v51 = vshrl.u32 %v12010_v42, %v5710_v49 }
 0x621   : > { %v11153_v2 = vshrl.u32 %v5444_v29, 30  ;;  %v5594_v33 = vand.u32 2139095040, %v11132_v10  ;;  %v5743_v9 = vshll.u32 %v5703_v27, 8  ;;  %v11159_v62 = vmul.f32 30.0, %v4324_v52 }
 0x622   : > { %v5714_v15 = vor.u32 %v5713_v53, %v5712_v12  ;;  %v5717_v24 = vor.u32 %v5716_v18, %v5715_v19  ;;  %v5720_v11 = vor.u32 %v5719_v3, %v5718_v4  ;;  %v5723_v20 = vor.u32 %v5722_v51, %v5721_v38 }
 0x623   : > { %12295 = vst [vmem:[#allocation16_spill] sm:$0xff] %v11153_v2  ;;  %v5446_v32 = vshll.u32 %v11153_v2, 30  ;;  %12296 = vst [vmem:[#allocation7_spill] sm:$0xff] %v11159_v62  ;;  %v5561_v23 = vshrl.u32 %v5543_v50, %v5559_v21  ;;  %v5565_v39 = vshll.u32 %v5564_v40, 23  ;;  %v5724_v29 = vshll.u32 %v12010_v42, %v5709_v48 }
 0x624   : > { %v5725_v60 = vshrl.u32 %v12001_v43, %v5710_v49  ;;  %vm5727_vm6 = vcmp.lt.s32.totalorder %v5708_v37, 1  ;;  %vm5729_vm14 = vcmp.lt.s32.totalorder %v5708_v37, 3  ;;  %vm5730_vm4 = vcmp.lt.s32.totalorder %v5708_v37, 4 }
 0x625   : > { %v11163_v36 = vsub.s32 %v5443_v8, %v5446_v32  ;;  %v5732_v19 = vsel %vm5730_vm4, %v5720_v11, 2102212464  ;;  %v5735_v4 = vsel %vm5727_vm6, %v5714_v15, %v5717_v24  ;;  %v5736_v53 = vsel %vm5730_vm4, %v5723_v20, 920167782 }
 0x626   : > { %v5726_v12 = vor.u32 %v5725_v60, %v5724_v29  ;;  %v5711_v52 = vshrl.u32 %v12009_v55, %v5710_v49  ;;  %vm5728_vm1 = vcmp.lt.s32.totalorder %v5708_v37, 2  ;;  %v5737_v50 = vsel %vm5729_vm14, %v5720_v11, %v5736_v53 }
 0x627   : > { %v5449_v27 = vsub.s32 0, %v11163_v36  ;;  %v5566_v48 = vor.u32 4788187, %v5565_v39  ;;  %v5738_v21 = vsel %vm5728_vm1, %v5735_v4, %v5737_v50  ;;  %v5739_v8 = vsel %vm5727_vm6, %v5717_v24, %v5720_v11 }
 0x628   : > { %v5740_v40 = vsel %vm5730_vm4, %v5726_v12, 1326507024  ;;  %v5731_v3 = vsel %vm5727_vm6, %v5711_v52, %v5714_v15  ;;  %v5733_v38 = vsel %vm5729_vm14, %v5717_v24, %v5732_v19  ;;  %v5595_v39 = vshrl.u32 %v5594_v33, 23 }
 0x629   : > { %v6514_v18 = vmin.u32 %v5449_v27, %v11163_v36  ;;  %v5741_v51 = vsel %vm5729_vm14, %v5723_v20, %v5740_v40  ;;  %v11176_v49 = vmul.u32.u64.low %v5743_v9, %v5738_v21  ;;  %v11177_v29 = vmul.u32.u64.high %v5743_v9, %v5738_v21, %v11176_v49 }
 0x62a   : > { %v5742_v32 = vsel %vm5728_vm1, %v5739_v8, %v5741_v51  ;;  %v11180_v60 = vmul.f32 %v5257_v6, %v5255_v61  ;;  %v5560_v15 = vshll.u32 %v11092_v31, %v11139_v45  ;;  %v5734_v24 = vsel %vm5728_vm1, %v5731_v3, %v5733_v38 }
 0x62b   : > { %v5451_v4 = vclz %v6514_v18  ;;  %v11182_v11 = vmul.u32.u64.low %v5743_v9, %v5742_v32  ;;  %v11183_v12 = vmul.u32.u64.high %v5743_v9, %v5742_v32, %v11182_v11  ;;  %v6521_v19 = vadd.s32 4294967169, %v5595_v39 }
 0x62c   : > { %v12297_v20 = vand.u32 2147483647, %v11132_v10  ;;  %v11979_v52 = vand.u32 2147483647, %v11159_v62  ;;  %v5906_v33 = vand.u32 2139095040, %v11159_v62  ;;  %v11193_v61 = vmul.f32 30.0, %v11127_v30 }
 0x62d   : > { %v6515_v27 = vadd.s32 4294967294, %v5451_v4  ;;  %v5562_v6 = vor.u32 %v5561_v23, %v5560_v15  ;;  %v5567_v50 = vand.u32 2147483647, %v5566_v48  ;;  %v5753_v21 = vadd.s32 1, %v11177_v29 }
 0x62e   : > { %v5598_v53 = vand.u32 8388607, %v12297_v20  ;;  %12298 = vst [vmem:[#allocation8_spill] sm:$0xff] %v11193_v61  ;;  %v5601_v8 = vadd.s32 1, %v6521_v19  ;;  %v5750_v31 = vmul.u32 %v5743_v9, %v5734_v24  ;;  %vm5752_vm8 = vc.u32 %v11183_v12, %v11176_v49 }
 0x62f   : > { %vm6516_vm7 = vcmp.lt.s32.totalorder %v6515_v27, 0  ;;  %v5907_v45 = vshrl.u32 %v5906_v33, 23  ;;  %v5754_v40 = vsel %vm5752_vm8, %v5753_v21, %v11177_v29  ;;  %v11202_v23 = vand.u32 8388607, %v11979_v52 }
 0x630   : > { %v5454_v37 = vsel %vm6516_vm7, 0, %v6515_v27  ;;  %v5599_v18 = vor.u32 8388608, %v5598_v53  ;;  %vm5602_vm13 = vcmp.gt.s32.totalorder %v5601_v8, 0  ;;  %v5755_v38 = vadd.s32 %v5754_v40, %v5750_v31 }
 0x631   : > { %v5459_v30 = vsub.s32 4294967266, %v5454_v37  ;;  %v5569_v48 = vcvt.s32.f32 %v5562_v6  ;;  %v5455_v51 = vsub.s32 32, %v5454_v37  ;;  %v5603_v9 = vsel %vm5602_vm13, %v5601_v8, 0 }
 0x632   : > { %v6533_v32 = vadd.s32 4294967169, %v5907_v45  ;;  %v5439_v4 = vadd.s32 %v11106_v58, %v11114_v0  ;;  %v5756_v11 = vadd.s32 536870912, %v5755_v38  ;;  %v5605_v24 = vand.u32 31, %v5603_v9 }
 0x633   : > { %v5460_v29 = vadd.s32 127, %v5459_v30  ;;  %v11207_v15 = vmul.f32 %v5569_v48, %v5567_v50  ;;  %v11209_v19 = vshll.u32 %v5599_v18, 8  ;;  %v5456_v53 = vshll.u32 %v11163_v36, %v5454_v37 }
 0x634   : > { %v11213_v27 = vshrl.u32 %v5756_v11, 30  ;;  %v5911_v33 = vor.u32 8388608, %v11202_v23  ;;  %v5802_v6 = vand.u32 2139095040, %v11193_v61  ;;  %v5457_v21 = vshrl.u32 %v5439_v4, %v5455_v51 }
 0x635   : > { %v5604_v8 = vshrl.u32 %v5603_v9, 5  ;;  %v5606_v58 = vsub.s32 32, %v5605_v24  ;;  %v5913_v0 = vadd.s32 1, %v6533_v32  ;;  %v5461_v31 = vshll.u32 %v5460_v29, 23 }
 0x636   : > { %12299 = vst [vmem:[#allocation26_spill] sm:$0xff] %v11213_v27  ;;  %v5758_v50 = vshll.u32 %v11213_v27, 30  ;;  %v5608_v45 = vshll.u32 %v12009_v55, %v5605_v24  ;;  %v5611_v40 = vshll.u32 %v12143_v16, %v5605_v24  ;;  %v5614_v37 = vshll.u32 %v12007_v54, %v5605_v24 }
 0x637   : > { %v5609_v18 = vshrl.u32 %v12143_v16, %v5606_v58  ;;  %v5612_v36 = vshrl.u32 %v12007_v54, %v5606_v58  ;;  %v5615_v30 = vshrl.u32 %v12144_v14, %v5606_v58  ;;  %v5617_v48 = vshll.u32 %v12144_v14, %v5605_v24 }
 0x638   : > { %v11224_v23 = vsub.s32 %v5755_v38, %v5758_v50  ;;  %v5618_v51 = vshrl.u32 %v12010_v42, %v5606_v58  ;;  %v5620_v9 = vshll.u32 %v12010_v42, %v5605_v24  ;;  %v5621_v11 = vshrl.u32 %v12001_v43, %v5606_v58 }
 0x639   : > { %v5610_v32 = vor.u32 %v5609_v18, %v5608_v45  ;;  %v5613_v4 = vor.u32 %v5612_v36, %v5611_v40  ;;  %v5616_v29 = vor.u32 %v5615_v30, %v5614_v37  ;;  %v11230_v52 = vor.u32 %v5457_v21, %v5456_v53 }
 0x63a   : > { %v5761_v39 = vsub.s32 0, %v11224_v23  ;;  %v5619_v3 = vor.u32 %v5618_v51, %v5617_v48  ;;  %v5803_v20 = vshrl.u32 %v5802_v6, 23  ;;  %v11233_v27 = vor.u32 4788187, %v5461_v31 }
 0x63b   : > { %v5622_v38 = vor.u32 %v5621_v11, %v5620_v9  ;;  %vm5623_vm15 = vcmp.lt.s32.totalorder %v5604_v8, 1  ;;  %vm5626_vm0 = vcmp.lt.s32.totalorder %v5604_v8, 4  ;;  %v5607_v24 = vshrl.u32 %v12009_v55, %v5606_v58 }
 0x63c   : > { %v6526_v50 = vmin.u32 %v5761_v39, %v11224_v23  ;;  %v5628_v45 = vsel %vm5626_vm0, %v5616_v29, 2102212464  ;;  %v5631_v40 = vsel %vm5623_vm15, %v5610_v32, %v5613_v4  ;;  %vm5625_vm6 = vcmp.lt.s32.totalorder %v5604_v8, 3 }
 0x63d   : > { %v5632_v18 = vsel %vm5626_vm0, %v5619_v3, 920167782  ;;  %v5635_v36 = vsel %vm5623_vm15, %v5613_v4, %v5616_v29  ;;  %v5636_v53 = vsel %vm5626_vm0, %v5622_v38, 1326507024  ;;  %vm5624_vm14 = vcmp.lt.s32.totalorder %v5604_v8, 2 }
 0x63e   : > { %v5763_v21 = vclz %v6526_v50  ;;  %v5627_v37 = vsel %vm5623_vm15, %v5607_v24, %v5610_v32  ;;  %v5633_v30 = vsel %vm5625_vm6, %v5616_v29, %v5632_v18  ;;  %v5629_v6 = vsel %vm5625_vm6, %v5613_v4, %v5628_v45 }
 0x63f   : > { %v5634_v31 = vsel %vm5624_vm14, %v5631_v40, %v5633_v30  ;;  %v5637_v48 = vsel %vm5625_vm6, %v5619_v3, %v5636_v53  ;;  %vm5914_vm4 = vcmp.gt.s32.totalorder %v5913_v0, 0  ;;  %v12300_v8 = vand.u32 2147483647, %v11193_v61 }
 0x640   : > { %v6527_v51 = vadd.s32 4294967294, %v5763_v21  ;;  %v5638_v9 = vsel %vm5624_vm14, %v5635_v36, %v5637_v48  ;;  %v11238_v39 = vmul.u32.u64.low %v11209_v19, %v5634_v31  ;;  %v11239_v11 = vmul.u32.u64.high %v11209_v19, %v5634_v31, %v11238_v39 }
 0x641   : > { %v11243_v58 = vmul.u32.u64.low %v11209_v19, %v5638_v9  ;;  %v11244_v2 = vmul.u32.u64.high %v11209_v19, %v5638_v9, %v11243_v58  ;;  %v5915_v38 = vsel %vm5914_vm4, %v5913_v0, 0  ;;  %v11248_v32 = vand.u32 8388607, %v12300_v8 }
 0x642   : > { %vm6528_vm1 = vcmp.lt.s32.totalorder %v6527_v51, 0  ;;  %v5630_v4 = vsel %vm5624_vm14, %v5627_v37, %v5629_v6  ;;  %v5917_v3 = vand.u32 31, %v5915_v38  ;;  %v6529_v29 = vadd.s32 4294967169, %v5803_v20 }
 0x643   : > { %v5751_v24 = vadd.s32 %v11176_v49, %v11183_v12  ;;  %v5766_v45 = vsel %vm6528_vm1, 0, %v6527_v51  ;;  %v11253_v40 = vshll.u32 %v5911_v33, 8  ;;  %v5465_v0 = vcvt.s32.f32 %v11230_v52 }
 0x644   : > { %v5771_v36 = vsub.s32 4294967266, %v5766_v45  ;;  %v5649_v53 = vadd.s32 1, %v11239_v11  ;;  %v5767_v21 = vsub.s32 32, %v5766_v45  ;;  %v5646_v37 = vmul.u32 %v11209_v19, %v5630_v4 }
 0x645   : > { %vm5648_vm7 = vc.u32 %v11244_v2, %v11238_v39  ;;  %v5918_v20 = vsub.s32 32, %v5917_v3  ;;  %v5916_v49 = vshrl.u32 %v5915_v38, 5  ;;  %v5809_v33 = vadd.s32 1, %v6529_v29 }
 0x646   : > { %v5650_v30 = vsel %vm5648_vm7, %v5649_v53, %v11239_v11  ;;  %v5920_v31 = vshll.u32 %v12009_v55, %v5917_v3  ;;  %v5772_v51 = vadd.s32 127, %v5771_v36  ;;  %v5923_v19 = vshll.u32 %v12143_v16, %v5917_v3 }
 0x647   : > { %v5651_v6 = vadd.s32 %v5650_v30, %v5646_v37  ;;  %v5921_v52 = vshrl.u32 %v12143_v16, %v5918_v20  ;;  %v5924_v48 = vshrl.u32 %v12007_v54, %v5918_v20  ;;  %v5926_v9 = vshll.u32 %v12007_v54, %v5917_v3 }
 0x648   : > { %v5927_v58 = vshrl.u32 %v12144_v14, %v5918_v20  ;;  %v5768_v11 = vshll.u32 %v11224_v23, %v5766_v45  ;;  %v5769_v38 = vshrl.u32 %v5751_v24, %v5767_v21  ;;  %v5929_v37 = vshll.u32 %v12144_v14, %v5917_v3 }
 0x649   : > { %v5652_v8 = vadd.s32 536870912, %v5651_v6  ;;  %v5922_v4 = vor.u32 %v5921_v52, %v5920_v31  ;;  %v5925_v29 = vor.u32 %v5924_v48, %v5923_v19  ;;  %v5930_v30 = vshrl.u32 %v12010_v42, %v5918_v20 }
 0x64a   : > { %v5928_v53 = vor.u32 %v5927_v58, %v5926_v9  ;;  %v5919_v36 = vshrl.u32 %v12009_v55, %v5918_v20  ;;  %v5932_v12 = vshll.u32 %v12010_v42, %v5917_v3  ;;  %v5933_v18 = vshrl.u32 %v12001_v43, %v5918_v20 }
 0x64b   : > { %v11272_v50 = vshrl.u32 %v5652_v8, 30  ;;  %v5773_v61 = vshll.u32 %v5772_v51, 23  ;;  %v5931_v62 = vor.u32 %v5930_v30, %v5929_v37  ;;  %vm5935_vm8 = vcmp.lt.s32.totalorder %v5916_v49, 1 }
 0x64c   : > { %vm5936_vm13 = vcmp.lt.s32.totalorder %v5916_v49, 2  ;;  %v5934_v24 = vor.u32 %v5933_v18, %v5932_v12  ;;  %vm5937_vm15 = vcmp.lt.s32.totalorder %v5916_v49, 3  ;;  %vm5938_vm0 = vcmp.lt.s32.totalorder %v5916_v49, 4 }
 0x64d   : > { %v5654_v23 = vshll.u32 %v11272_v50, 30  ;;  %v5939_v45 = vsel %vm5935_vm8, %v5919_v36, %v5922_v4  ;;  %v5940_v21 = vsel %vm5938_vm0, %v5928_v53, 2102212464  ;;  %v5943_v31 = vsel %vm5935_vm8, %v5922_v4, %v5925_v29 }
 0x64e   : > { %v5944_v52 = vsel %vm5938_vm0, %v5931_v62, 920167782  ;;  %v5941_v19 = vsel %vm5937_vm15, %v5925_v29, %v5940_v21  ;;  %v5947_v3 = vsel %vm5935_vm8, %v5925_v29, %v5928_v53  ;;  %v11280_v58 = vor.u32 %v5769_v38, %v5768_v11 }
 0x64f   : > { %v11278_v48 = vsub.s32 %v5651_v6, %v5654_v23  ;;  %v5945_v9 = vsel %vm5937_vm15, %v5928_v53, %v5944_v52  ;;  %v11282_v20 = vor.u32 4788187, %v5773_v61  ;;  %v5948_v8 = vsel %vm5938_vm0, %v5934_v24, 1326507024 }
 0x650   : > { %v5946_v51 = vsel %vm5936_vm13, %v5943_v31, %v5945_v9  ;;  %v5949_v12 = vsel %vm5937_vm15, %v5931_v62, %v5948_v8  ;;  %v5942_v6 = vsel %vm5936_vm13, %v5939_v45, %v5941_v19  ;;  %vm5810_vm6 = vcmp.gt.s32.totalorder %v5809_v33, 0 }
 0x651   : > { %v5657_v18 = vsub.s32 0, %v11278_v48  ;;  %v11287_v37 = vmul.u32.u64.low %v11253_v40, %v5946_v51  ;;  %v11288_v30 = vmul.u32.u64.high %v11253_v40, %v5946_v51, %v11287_v37  ;;  %v5950_v4 = vsel %vm5936_vm13, %v5947_v3, %v5949_v12 }
 0x652   : > { %v4429_v11 = vsub.s32 4, %v10397_v5  ;;  %v11296_v38 = vmul.u32.u64.low %v11253_v40, %v5950_v4  ;;  %v11297_v29 = vmul.u32.u64.high %v11253_v40, %v5950_v4, %v11296_v38  ;;  %v5811_v53 = vsel %vm5810_vm6, %v5809_v33, 0 }
 0x653   : > { %v6522_v61 = vmin.u32 %v5657_v18, %v11278_v48  ;;  %v12301_v62 = vand.u32 2147483647, %v11233_v27  ;;  %v5647_v23 = vadd.s32 %v11238_v39, %v11244_v2  ;;  %v5813_v24 = vand.u32 31, %v5811_v53 }
 0x654   : > { %v12302_v49 = vand.u32 2147483647, %v10306_v57  ;;  %v5775_v21 = vand.u32 2147483647, %v11282_v20  ;;  %v5777_v31 = vcvt.s32.f32 %v11280_v58  ;;  %v5961_v33 = vadd.s32 1, %v11288_v30 }
 0x655   : > { %v11301_v36 = vmul.f32 %v5465_v0, %v12301_v62  ;;  %v5659_v52 = vclz %v6522_v61  ;;  %v5958_v27 = vmul.u32 %v11253_v40, %v5942_v6  ;;  %v11315_v0 = vshrl.u32 %v5811_v53, 5 }
 0x656   : > { %vm11307_vm14 = vcmp.le.f32.partialorder %v12302_v49, 0.7853982  ;;  %v5814_v19 = vsub.s32 32, %v5813_v24  ;;  %v12305_v2 = vor.u32 8388608, %v11248_v32  ;;  %vm5960_vm4 = vc.u32 %v11297_v29, %v11287_v37 }
 0x657   : > { %v6523_v9 = vadd.s32 4294967294, %v5659_v52  ;;  %v5816_v3 = vshll.u32 %v12009_v55, %v5813_v24  ;;  %v11327_v51 = vsel %vm4345_vm11, %v4429_v11, %v10397_v5  ;;  %v5962_v40 = vsel %vm5960_vm4, %v5961_v33, %v11288_v30 }
 0x658   : > { %v11319_v39 = vshll.u32 %v12305_v2, 8  ;;  %v5817_v8 = vshrl.u32 %v12143_v16, %v5814_v19  ;;  %v5819_v18 = vshll.u32 %v12143_v16, %v5813_v24  ;;  %v5820_v32 = vshrl.u32 %v12007_v54, %v5814_v19 }
 0x659   : > { %vm6524_vm1 = vcmp.lt.s32.totalorder %v6523_v9, 0  ;;  %v5963_v12 = vadd.s32 %v5962_v40, %v5958_v27  ;;  %v5823_v6 = vshrl.u32 %v12144_v14, %v5814_v19  ;;  %v5826_v4 = vshrl.u32 %v12010_v42, %v5814_v19 }
 0x65a   : > { %v5662_v61 = vsel %vm6524_vm1, 0, %v6523_v9  ;;  %v5818_v38 = vor.u32 %v5817_v8, %v5816_v3  ;;  %v5822_v53 = vshll.u32 %v12007_v54, %v5813_v24  ;;  %v5825_v5 = vshll.u32 %v12144_v14, %v5813_v24 }
 0x65b   : > { %v5667_v11 = vsub.s32 4294967266, %v5662_v61  ;;  %v5964_v30 = vadd.s32 536870912, %v5963_v12  ;;  %v5821_v62 = vor.u32 %v5820_v32, %v5819_v18  ;;  %v5828_v49 = vshll.u32 %v12010_v42, %v5813_v24 }
 0x65c   : > { %v5663_v16 = vsub.s32 32, %v5662_v61  ;;  %v5824_v52 = vor.u32 %v5823_v6, %v5822_v53  ;;  %v5827_v33 = vor.u32 %v5826_v4, %v5825_v5  ;;  %v5829_v27 = vshrl.u32 %v12001_v43, %v5814_v19 }
 0x65d   : > { %v5668_v2 = vadd.s32 127, %v5667_v11  ;;  %v11339_v40 = vshrl.u32 %v5964_v30, 30  ;;  %v4431_v54 = vsel %vm11307_vm14, %v10306_v57, %v10751_v26  ;;  %v4432_v14 = vsel %vm11307_vm14, 0, %v11327_v51 }
 0x65e   : > { %vm4969_vm11 = vcmp.lt.s32.totalorder %v10618_v47, 0  ;;  %vm11989_vm7 = vcmp.lt.s32.totalorder %v10717_v59, 0  ;;  %vm11990_vm8 = vcmp.lt.s32.totalorder %v10769_v25, 0  ;;  %v5664_v43 = vshll.u32 %v11278_v48, %v5662_v61 }
 0x65f   : > { %v5815_v42 = vshrl.u32 %v12009_v55, %v5814_v19  ;;  %v5830_v24 = vor.u32 %v5829_v27, %v5828_v49  ;;  %vm5834_vm13 = vcmp.lt.s32.totalorder %v11315_v0, 4  ;;  %vm11988_vm15 = vcmp.lt.s32.totalorder %v10842_v7, 0 }
 0x660   : > { %v5669_v26 = vshll.u32 %v5668_v2, 23  ;;  %v5966_v9 = vshll.u32 %v11339_v40, 30  ;;  %vm5831_vm0 = vcmp.lt.s32.totalorder %v11315_v0, 1  ;;  %v5836_v45 = vsel %vm5834_vm13, %v5824_v52, 2102212464 }
 0x661   : > { %v5665_v3 = vshrl.u32 %v5647_v23, %v5663_v16  ;;  %vm5832_vm6 = vcmp.lt.s32.totalorder %v11315_v0, 2  ;;  %v5839_v51 = vsel %vm5831_vm0, %v5818_v38, %v5821_v62  ;;  %v5840_v55 = vsel %vm5834_vm13, %v5827_v33, 920167782 }
 0x662   : > { %v11362_v48 = vsub.s32 %v5963_v12, %v5966_v9  ;;  %vm5833_vm14 = vcmp.lt.s32.totalorder %v11315_v0, 3  ;;  %v5835_v19 = vsel %vm5831_vm0, %v5815_v42, %v5818_v38  ;;  %v5843_v8 = vsel %vm5831_vm0, %v5821_v62, %v5824_v52 }
 0x663   : > { %v5837_v18 = vsel %vm5833_vm14, %v5821_v62, %v5836_v45  ;;  %v5841_v32 = vsel %vm5833_vm14, %v5824_v52, %v5840_v55  ;;  %v5844_v6 = vsel %vm5834_vm13, %v5830_v24, 1326507024  ;;  %7093 = vcosq.f32 %v4431_v54 }
 0x664   : > { %v5670_v4 = vor.u32 4788187, %v5669_v26  ;;  %v5969_v23 = vsub.s32 0, %v11362_v48  ;;  %v5842_v61 = vsel %vm5832_vm6, %v5839_v51, %v5841_v32  ;;  %v5845_v53 = vsel %vm5833_vm14, %v5827_v33, %v5844_v6 }
 0x665   : > { %v5846_v12 = vsel %vm5832_vm6, %v5843_v8, %v5845_v53  ;;  %v11373_v5 = vmul.u32.u64.low %v11319_v39, %v5842_v61  ;;  %v11374_v38 = vmul.u32.u64.high %v11319_v39, %v5842_v61, %v11373_v5  ;;  %7095 = vsinq.f32 %v4431_v54 }
 0x666   : > { %v11381_v11 = vmul.f32 %v5777_v31, %v5775_v21  ;;  %v6534_v30 = vmin.u32 %v5969_v23, %v11362_v48  ;;  %v11385_v62 = vmul.u32.u64.low %v11319_v39, %v5846_v12  ;;  %v11386_v49 = vmul.u32.u64.high %v11319_v39, %v5846_v12, %v11385_v62 }
 0x667   : > { %v5666_v16 = vor.u32 %v5665_v3, %v5664_v43  ;;  %v5838_v52 = vsel %vm5832_vm6, %v5835_v19, %v5837_v18  ;;  %v4436_v33 = vadd.s32 3, %v4432_v14  ;;  %v12306_v27 = vsel %vm10566_vm9, 0, %v10432_v63 }
 0x668   : > { %v4540_v20 = vadd.s32 3, %v12306_v27  ;;  %v12307_v58 = vxor.u32 2147483648, %v11030_v44  ;;  %v12308_v31 = vxor.u32 2147483648, %v11118_v1  ;;  %v12309_v22 = vxor.u32 2147483648, %v11180_v60 }
 0x669   : > { %v5971_v2 = vclz %v6534_v30  ;;  %v12310_v54 = vxor.u32 2147483648, %v11207_v15  ;;  %v5467_v14 = vxor.u32 2147483648, %v11301_v36  ;;  %v5671_v43 = vand.u32 2147483647, %v5670_v4 }
 0x66a   : > { %v11399_v21 = vsel %vm4969_vm11, %v12307_v58, %v11030_v44  ;;  %v11406_v0 = vsel %vm11989_vm7, %v12308_v31, %v11118_v1  ;;  %v11413_v63 = vsel %vm11990_vm8, %v12309_v22, %v11180_v60  ;;  %v5857_v1 = vadd.s32 1, %v11374_v38 }
 0x66b   : > { %v11420_v44 = vsel %vm11988_vm15, %v12310_v54, %v11207_v15  ;;  %v6535_v42 = vadd.s32 4294967294, %v5971_v2  ;;  %v5854_v24 = vmul.u32 %v11319_v39, %v5838_v52  ;;  %vm5856_vm9 = vc.u32 %v11386_v49, %v11373_v5  ;;  %v12317_v2 = vld [vmem:[#allocation27_spill] sm:$0xff] }
 0x66c   : > { %v4437_v60 = vand.u32 3, %v4436_v33  ;;  %v5779_v26 = vxor.u32 2147483648, %v11381_v11  ;;  %v5673_v9 = vcvt.s32.f32 %v5666_v16  ;;  %v5858_v45 = vsel %vm5856_vm9, %v5857_v1, %v11374_v38  ;;  %v12318_v1 = vld [vmem:[#allocation5_spill] sm:$0xff] }
 0x66d   : > { %v4541_v3 = vand.u32 3, %v4540_v20  ;;  %v5959_v15 = vadd.s32 %v11287_v37, %v11297_v29  ;;  %vm6536_vm4 = vcmp.lt.s32.totalorder %v6535_v42, 0  ;;  %v5859_v51 = vadd.s32 %v5858_v45, %v5854_v24  ;;  %v12319_v45 = vld [vmem:[#allocation23_spill] sm:$0xff] }
 0x66e   : > { %v4544_v55 = vxor.u32 2147483648, %v10800_v56  ;;  %v11432_v19 = vmul.f32 %v5673_v9, %v5671_v43  ;;  %v5974_v39 = vsel %vm6536_vm4, 0, %v6535_v42  ;;  %v4547_v8 = vxor.u32 2147483648, %v10797_v35 }
 0x66f   : > { %v12311_v18 = vand.u32 2147483647, %v10394_v13  ;;  %vm5385_vm13 = vcmp.lt.s32.totalorder %v10948_v41, 0  ;;  %v5979_v6 = vsub.s32 4294967266, %v5974_v39  ;;  %v5860_v4 = vadd.s32 536870912, %v5859_v51 }
 0x670   : > { %vm4435_vm0 = vweird.f32 %v10306_v57  ;;  %vm4438_vm6 = vcmp.lt.s32.totalorder %v4437_v60, 2  ;;  %v4637_v37 = vsub.s32 4, %v10535_v17  ;;  %v5975_v29 = vsub.s32 32, %v5974_v39  ;;  %v7094_v61 = vpop.eup %7093  ;;  %v12326_v57 = vld [vmem:[#allocation22_spill] sm:$0xff] }
 0x671   : > { %vm11437_vm1 = vcmp.le.f32.partialorder %v12311_v18, 0.7853982  ;;  %vm4439_vm14 = vcmp.eq.s32.totalorder %v4437_v60, 0  ;;  %vm4543_vm9 = vcmp.eq.s32.totalorder %v4541_v3, 0  ;;  %v11448_v53 = vshrl.u32 %v5860_v4, 30 }
 0x672   : > { %v4639_v23 = vsel %vm11437_vm1, %v10394_v13, %v10760_v28  ;;  %vm4442_vm4 = vcmp.eq.s32.totalorder %v4437_v60, 2  ;;  %v4545_v12 = vsel %vm4543_vm9, %v10797_v35, %v4544_v55  ;;  %vm4546_vm15 = vcmp.eq.s32.totalorder %v4541_v3, 2  ;;  %v7096_v16 = vpop.eup %7095 }
 0x673   : > { %vm5697_vm7 = vcmp.lt.s32.totalorder %v11034_v46, 0  ;;  %v5980_v38 = vadd.s32 127, %v5979_v6  ;;  %v4443_v30 = vxor.u32 2147483648, %v7094_v61  ;;  %v4548_v62 = vsel %vm4546_vm15, %v4547_v8, %v10800_v56 }
 0x674   : > { %7097 = vcosq.f32 %v4639_v23  ;;  %v5862_v52 = vshll.u32 %v11448_v53, 30  ;;  %vm4542_vm8 = vcmp.lt.s32.totalorder %v4541_v3, 2  ;;  %v4638_v28 = vsel %vm4553_vm10, %v4637_v37, %v10535_v17 }
 0x675   : > { %7099 = vsinq.f32 %v4639_v23  ;;  %v5976_v33 = vshll.u32 %v11362_v48, %v5974_v39  ;;  %v5977_v35 = vshrl.u32 %v5959_v15, %v5975_v29  ;;  %v4440_v27 = vxor.u32 2147483648, %v7096_v16 }
 0x676   : > { %v4444_v20 = vsel %vm4442_vm4, %v4443_v30, %v7096_v16  ;;  %v11459_v58 = vsub.s32 %v5859_v51, %v5862_v52  ;;  %v4549_v31 = vsel %vm4542_vm8, %v4545_v12, %v4548_v62  ;;  %v12314_v56 = vand.u32 2147483647, %v10378_v34 }
 0x677   : > { %v4741_v54 = vsub.s32 4, %v12317_v2  ;;  %v5981_v43 = vshll.u32 %v5980_v38, 23  ;;  %v4441_v17 = vsel %vm4439_vm14, %v7094_v61, %v4440_v27  ;;  %v4640_v48 = vsel %vm11437_vm1, 0, %v4638_v28  ;;  %v12327_v61 = vld [vmem:[#allocation4_spill] sm:$0xff] }
 0x678   : > { %vm11463_vm15 = vcmp.le.f32.partialorder %v12314_v56, 0.7853982  ;;  %v5865_v24 = vsub.s32 0, %v11459_v58  ;;  %v4445_v9 = vsel %vm4438_vm6, %v4441_v17, %v4444_v20  ;;  %vm4539_vm10 = vweird.f32 %v12319_v45  ;;  %v12332_v20 = vld [vmem:[#allocation29_spill] sm:$0xff]  ;;  %v12333_v56 = vld [vmem:[#allocation6_spill] sm:$0xff] }
 0x679   : > { %v4743_v42 = vsel %vm11463_vm15, %v10378_v34, %v12318_v1  ;;  %v4742_v3 = vsel %vm4657_vm3, %v4741_v54, %v12317_v2  ;;  %v11484_v15 = vsel %vm5385_vm13, %v5467_v14, %v11301_v36  ;;  %v5978_v51 = vor.u32 %v5977_v35, %v5976_v33  ;;  %v12322_v36 = vld [vmem:[#allocation24_spill] sm:$0xff] }
 0x67a   : > { %v4446_v55 = vsel %vm4435_vm0, nan, %v4445_v9  ;;  %v4550_v39 = vsel %vm4539_vm10, nan, %v4549_v31  ;;  %v6530_v8 = vmin.u32 %v5865_v24, %v11459_v58  ;;  %vm12320_vm8 = vcmask 261120   ;;  %v12328_v33 = vld [vmem:[#allocation20_spill] sm:$0xff] }
 0x67b   : > { %6731 = vmatprep.mubr.msk.f32.mxu1 %vm12320_vm8, %v4446_v55  ;;  %v4644_v60 = vadd.s32 3, %v4640_v48  ;;  %v4744_v18 = vsel %vm11463_vm15, 0, %v4742_v3  ;;  %7101 = vcosq.f32 %v4743_v42  ;;  %v5982_v32 = vor.u32 4788187, %v5981_v43  ;;  %vm12321_vm3 = vmmov %vm12320_vm8 }
 0x67c   : > { %6732 = vmatmul.mubr.msk.f32.vlgmr.msra.gmra.mxu1 %vm12321_vm3, %v4550_v39  ;;  %7103 = vsinq.f32 %v4743_v42  ;;  %v12323_v14 = vand.u32 2147483647, %v12322_v36  ;;  %v4845_v4 = vsub.s32 4, %v12326_v57  ;;  %v11505_v37 = vsel %vm5697_vm7, %v5779_v26, %v11381_v11 }
 0x67d   : > { %v5675_v29 = vxor.u32 2147483648, %v11432_v19  ;;  %v5867_v23 = vclz %v6530_v8  ;;  %v5855_v38 = vadd.s32 %v11373_v5, %v11386_v49  ;;  %v4748_v30 = vadd.s32 3, %v4744_v18 }
 0x67e   : > { %vm11495_vm1 = vcmp.le.f32.partialorder %v12323_v14, 0.7853982  ;;  %v4846_v62 = vsel %vm4761_vm2, %v4845_v4, %v12326_v57  ;;  %v4645_v11 = vand.u32 3, %v4644_v60  ;;  %v5983_v52 = vand.u32 2147483647, %v5982_v32  ;;  %v12338_v4 = vld [vmem:[#allocation2_spill] sm:$0xff] }
 0x67f   : > { %v4847_v12 = vsel %vm11495_vm1, %v12322_v36, %v12327_v61  ;;  %v6531_v16 = vadd.s32 4294967294, %v5867_v23  ;;  %v4848_v26 = vsel %vm11495_vm1, 0, %v4846_v62  ;;  %v5985_v28 = vcvt.s32.f32 %v5978_v51 }
 0x680   : > { %7105 = vcosq.f32 %v4847_v12  ;;  %vm4643_vm0 = vweird.f32 %v10394_v13  ;;  %v12329_v35 = vand.u32 2147483647, %v12328_v33  ;;  %v4852_v27 = vadd.s32 3, %v4848_v26 }
 0x681   : > { %7107 = vsinq.f32 %v4847_v12  ;;  %v7098_v49 = vpop.eup %7097  ;;  %vm6532_vm14 = vcmp.lt.s32.totalorder %v6531_v16, 0  ;;  %v4949_v31 = vsub.s32 4, %v12332_v20  ;;  %v4749_v17 = vand.u32 3, %v4748_v30 }
 0x682   : > { %vm11522_vm6 = vcmp.le.f32.partialorder %v12329_v35, 0.7853982  ;;  %v7100_v2 = vpop.eup %7099  ;;  %v5870_v54 = vsel %vm6532_vm14, 0, %v6531_v16  ;;  %v4651_v43 = vxor.u32 2147483648, %v7098_v49  ;;  %vm4646_vm2 = vcmp.lt.s32.totalorder %v4645_v11, 2 }
 0x683   : > { %v4951_v22 = vsel %vm11522_vm6, %v12328_v33, %v12333_v56  ;;  %v5875_v48 = vsub.s32 4294967266, %v5870_v54  ;;  %v4648_v1 = vxor.u32 2147483648, %v7100_v2  ;;  %vm4650_vm9 = vcmp.eq.s32.totalorder %v4645_v11, 2 }
 0x684   : > { %7109 = vcosq.f32 %v4951_v22  ;;  %v11531_v42 = vmul.f32 %v5985_v28, %v5983_v52  ;;  %v5871_v24 = vsub.s32 32, %v5870_v54  ;;  %vm4647_vm4 = vcmp.eq.s32.totalorder %v4645_v11, 0  ;;  %v12339_v11 = vld [vmem:[#allocation15_spill] sm:$0xff] }
 0x685   : > { %v4652_v9 = vsel %vm4650_vm9, %v4651_v43, %v7100_v2  ;;  %v5876_v45 = vadd.s32 127, %v5875_v48  ;;  %v4649_v3 = vsel %vm4647_vm4, %v7098_v49, %v4648_v1  ;;  %vm4747_vm15 = vweird.f32 %v10378_v34 }
 0x686   : > { %v4853_v51 = vand.u32 3, %v4852_v27  ;;  %v4950_v55 = vsel %vm4865_vm12, %v4949_v31, %v12332_v20  ;;  %v4653_v39 = vsel %vm4646_vm2, %v4649_v3, %v4652_v9  ;;  %vm4750_vm10 = vcmp.lt.s32.totalorder %v4749_v17, 2  ;;  %v12340_v20 = vld [vmem:[#allocation7_spill] sm:$0xff] }
 0x687   : > { %v4952_v8 = vsel %vm11522_vm6, 0, %v4950_v55  ;;  %7111 = vsinq.f32 %v4951_v22  ;;  %v5877_v60 = vshll.u32 %v5876_v45, 23  ;;  %v4654_v18 = vsel %vm4643_vm0, nan, %v4653_v39  ;;  %v12341_v22 = vld [vmem:[#allocation25_spill] sm:$0xff] }
 0x688   : > { %vm4751_vm8 = vcmp.eq.s32.totalorder %v4749_v17, 0  ;;  %v12334_v32 = vand.u32 2147483647, %v10618_v47  ;;  %v7102_v6 = vpop.eup %7101  ;;  %v5873_v57 = vshrl.u32 %v5855_v38, %v5871_v24  ;;  %vm12337_vm12 = vcmask 261120   ;;  %v12346_v55 = vld [vmem:[#allocation9_spill] sm:$0xff] }
 0x689   : > { %6734 = vmatprep.mubr.msk.f32.mxu1 %vm12337_vm12, %v4654_v18  ;;  %vm4754_vm1 = vcmp.eq.s32.totalorder %v4749_v17, 2  ;;  %v5053_v23 = vsub.s32 4, %v12338_v4  ;;  %v7104_v61 = vpop.eup %7103  ;;  %vm5593_vm0 = vcmp.lt.s32.totalorder %v11132_v10, 0  ;;  %v5872_v12 = vshll.u32 %v11459_v58, %v5870_v54  ;;  %vm12345_vm4 = vmmov %vm12337_vm12 }
 0x68a   : > { %vm11543_vm3 = vcmp.le.f32.partialorder %v12334_v32, 0.7853982  ;;  %v4755_v30 = vxor.u32 2147483648, %v7102_v6  ;;  %vm4854_vm6 = vcmp.lt.s32.totalorder %v4853_v51, 2  ;;  %v4956_v62 = vadd.s32 3, %v4952_v8 }
 0x68b   : > { %v5055_v13 = vsel %vm11543_vm3, %v10618_v47, %v11399_v21  ;;  %v4752_v16 = vxor.u32 2147483648, %v7104_v61  ;;  %v5054_v38 = vsel %vm4969_vm11, %v5053_v23, %v12338_v4  ;;  %v5157_v26 = vsub.s32 4, %v12339_v11 }
 0x68c   : > { %7113 = vcosq.f32 %v5055_v13  ;;  %v5878_v28 = vor.u32 4788187, %v5877_v60  ;;  %v4756_v35 = vsel %vm4754_vm1, %v4755_v30, %v7104_v61  ;;  %vm4855_vm14 = vcmp.eq.s32.totalorder %v4853_v51, 0  ;;  %v12352_v61 = vld [vmem:[#allocation12_spill] sm:$0xff] }
 0x68d   : > { %v7106_v52 = vpop.eup %7105  ;;  %vm4858_vm2 = vcmp.eq.s32.totalorder %v4853_v51, 2  ;;  %v5874_v5 = vor.u32 %v5873_v57, %v5872_v12  ;;  %v4753_v58 = vsel %vm4751_vm8, %v7102_v6, %v4752_v16  ;;  %v5056_v27 = vsel %vm11543_vm3, 0, %v5054_v38  ;;  %v12348_v51 = vld [vmem:[#allocation8_spill] sm:$0xff] }
 0x68e   : > { %v7108_v21 = vpop.eup %7107  ;;  %v4859_v49 = vxor.u32 2147483648, %v7106_v52  ;;  %vm5905_vm9 = vcmp.lt.s32.totalorder %v12340_v20, 0  ;;  %v4757_v31 = vsel %vm4750_vm10, %v4753_v58, %v4756_v35  ;;  %7115 = vsinq.f32 %v5055_v13 }
 0x68f   : > { %v4856_v56 = vxor.u32 2147483648, %v7108_v21  ;;  %v12342_v2 = vand.u32 2147483647, %v12341_v22  ;;  %v4758_v43 = vsel %vm4747_vm15, nan, %v4757_v31  ;;  %v4957_v1 = vand.u32 3, %v4956_v62 }
 0x690   : > { %v4860_v48 = vsel %vm4858_vm2, %v4859_v49, %v7108_v21  ;;  %v5158_v24 = vsel %vm5073_vm5, %v5157_v26, %v12339_v11  ;;  %v5879_v17 = vand.u32 2147483647, %v5878_v28  ;;  %6735 = vmatmul.mubr.msk.f32.gmra.mxu1 %vm12345_vm4, %v4758_v43  ;;  %v5060_v3 = vadd.s32 3, %v5056_v27  ;;  %vm12347_vm5 = vmmov %vm12345_vm4  ;;  %v12357_v26 = vld [vmem:[#allocation3_spill] sm:$0xff]  ;;  %v12362_v43 = vld [vmem:[#allocation16_spill] sm:$0xff] }
 0x691   : > { %vm11566_vm11 = vcmp.le.f32.partialorder %v12342_v2, 0.7853982  ;;  %v7110_v9 = vpop.eup %7109  ;;  %v4857_v45 = vsel %vm4855_vm14, %v7106_v52, %v4856_v56  ;;  %vm4851_vm15 = vweird.f32 %v12322_v36  ;;  %v5881_v60 = vcvt.s32.f32 %v5874_v5 }
 0x692   : > { %v5159_v39 = vsel %vm11566_vm11, %v12341_v22, %v12346_v55  ;;  %v4861_v34 = vsel %vm4854_vm6, %v4857_v45, %v4860_v48  ;;  %v4963_v8 = vxor.u32 2147483648, %v7110_v9  ;;  %v5160_v32 = vsel %vm11566_vm11, 0, %v5158_v24 }
 0x693   : > { %7117 = vcosq.f32 %v5159_v39  ;;  %v4862_v18 = vsel %vm4851_vm15, nan, %v4861_v34  ;;  %v11590_v14 = vsel %vm5593_vm0, %v5675_v29, %v11432_v19  ;;  %v5987_v6 = vxor.u32 2147483648, %v11531_v42 }
 0x694   : > { %7119 = vsinq.f32 %v5159_v39  ;;  %6737 = vmatprep.mubr.msk.f32.mxu1 %vm12347_vm5, %v4862_v18  ;;  %vm4959_vm10 = vcmp.eq.s32.totalorder %v4957_v1, 0  ;;  %vm4962_vm8 = vcmp.eq.s32.totalorder %v4957_v1, 2  ;;  %v7112_v36 = vpop.eup %7111  ;;  %vm5801_vm3 = vcmp.lt.s32.totalorder %v12348_v51, 0 }
 0x695   : > { %v5882_v57 = vmul.f32 %v5881_v60, %v5879_v17  ;;  %v5061_v4 = vand.u32 3, %v5060_v3  ;;  %v12349_v23 = vand.u32 2147483647, %v10769_v25  ;;  %v5261_v19 = vsub.s32 4, %v12352_v61 }
 0x696   : > { %v4960_v29 = vxor.u32 2147483648, %v7112_v36  ;;  %v4964_v12 = vsel %vm4962_vm8, %v4963_v8, %v7112_v36  ;;  %v5164_v30 = vadd.s32 3, %v5160_v32  ;;  %vm12353_vm1 = vcmp.lt.s32.totalorder %v10769_v25, 0 }
 0x697   : > { %vm11597_vm12 = vcmp.le.f32.partialorder %v12349_v23, 0.7853982  ;;  %v5262_v16 = vsel %vm12353_vm1, %v5261_v19, %v12352_v61  ;;  %v12354_v38 = vand.u32 2147483647, %v10717_v59  ;;  %v5365_v52 = vsub.s32 4, %v12357_v26  ;;  %v12367_v23 = vld [vmem:[#allocation10_spill] sm:$0xff] }
 0x698   : > { %v5263_v62 = vsel %vm11597_vm12, %v10769_v25, %v11413_v63  ;;  %v11619_v28 = vsel %vm5905_vm9, %v5987_v6, %v11531_v42  ;;  %vm4958_vm14 = vcmp.lt.s32.totalorder %v4957_v1, 2  ;;  %v4961_v63 = vsel %vm4959_vm10, %v7110_v9, %v4960_v29 }
 0x699   : > { %7121 = vcosq.f32 %v5263_v62  ;;  %vm11611_vm6 = vcmp.le.f32.partialorder %v12354_v38, 0.7853982  ;;  %v7114_v21 = vpop.eup %7113  ;;  %vm4955_vm2 = vweird.f32 %v12328_v33  ;;  %v4965_v5 = vsel %vm4958_vm14, %v4961_v63, %v4964_v12 }
 0x69a   : > { %v5367_v35 = vsel %vm11611_vm6, %v10717_v59, %v11406_v0  ;;  %v5264_v58 = vsel %vm11597_vm12, 0, %v5262_v16  ;;  %7123 = vsinq.f32 %v5263_v62  ;;  %v5883_v49 = vxor.u32 2147483648, %v5882_v57 }
 0x69b   : > { %v4966_v27 = vsel %vm4955_vm2, nan, %v4965_v5  ;;  %v5067_v42 = vxor.u32 2147483648, %v7114_v21  ;;  %vm12358_vm11 = vcmp.lt.s32.totalorder %v10717_v59, 0  ;;  %vm5066_vm15 = vcmp.eq.s32.totalorder %v5061_v4, 2  ;;  %v7116_v2 = vpop.eup %7115  ;;  %vm12363_vm2 = vmmov %vm12345_vm4 }
 0x69c   : > { %v5366_v31 = vsel %vm12358_vm11, %v5365_v52, %v12357_v26  ;;  %6738 = vmatmul.mubr.msk.f32.gmra.mxu1 %vm12345_vm4, %v4966_v27  ;;  %v5165_v56 = vand.u32 3, %v5164_v30  ;;  %7125 = vcosq.f32 %v5367_v35  ;;  %v12359_v0 = vand.u32 2147483647, %v10948_v41 }
 0x69d   : > { %v5268_v54 = vadd.s32 3, %v5264_v58  ;;  %7127 = vsinq.f32 %v5367_v35  ;;  %v5469_v48 = vsub.s32 4, %v12362_v43  ;;  %v5064_v24 = vxor.u32 2147483648, %v7116_v2 }
 0x69e   : > { %vm11635_vm5 = vcmp.le.f32.partialorder %v12359_v0, 0.7853982  ;;  %v5068_v9 = vsel %vm5066_vm15, %v5067_v42, %v7116_v2  ;;  %v5368_v17 = vsel %vm11611_vm6, 0, %v5366_v31  ;;  %v11648_v45 = vsel %vm5801_vm3, %v5883_v49, %v5882_v57 }
 0x69f   : > { %v5471_v1 = vsel %vm11635_vm5, %v10948_v41, %v11484_v15  ;;  %vm5059_vm10 = vweird.f32 %v10618_v47  ;;  %vm5063_vm8 = vcmp.eq.s32.totalorder %v5061_v4, 0  ;;  %vm5163_vm12 = vweird.f32 %v12341_v22 }
 0x6a0   : > { %7129 = vcosq.f32 %v5471_v1  ;;  %v7118_v3 = vpop.eup %7117  ;;  %vm5062_vm1 = vcmp.lt.s32.totalorder %v5061_v4, 2  ;;  %v5065_v55 = vsel %vm5063_vm8, %v7114_v21, %v5064_v24  ;;  %vm5167_vm14 = vcmp.eq.s32.totalorder %v5165_v56, 0 }
 0x6a1   : > { %v5470_v15 = vsel %vm5385_vm13, %v5469_v48, %v12362_v43  ;;  %v7120_v39 = vpop.eup %7119  ;;  %v5069_v34 = vsel %vm5062_vm1, %v5065_v55, %v5068_v9  ;;  %v5171_v8 = vxor.u32 2147483648, %v7118_v3  ;;  %v5372_v60 = vadd.s32 3, %v5368_v17  ;;  %v12376_v17 = vld [vmem:[#allocation26_spill] sm:$0xff] }
 0x6a2   : > { %7131 = vsinq.f32 %v5471_v1  ;;  %v5070_v18 = vsel %vm5059_vm10, nan, %v5069_v34  ;;  %v5168_v32 = vxor.u32 2147483648, %v7120_v39  ;;  %vm5170_vm6 = vcmp.eq.s32.totalorder %v5165_v56, 2  ;;  %vm12369_vm10 = vmmov %vm12363_vm2 }
 0x6a3   : > { %v5269_v47 = vand.u32 3, %v5268_v54  ;;  %6740 = vmatprep.mubr.msk.f32.mxu1 %vm12363_vm2, %v5070_v18  ;;  %v5172_v6 = vsel %vm5170_vm6, %v5171_v8, %v7120_v39  ;;  %v5472_v36 = vsel %vm11635_vm5, 0, %v5470_v15  ;;  %v12364_v57 = vand.u32 2147483647, %v10842_v7 }
 0x6a4   : > { %v5573_v13 = vsub.s32 4, %v12367_v23  ;;  %vm5166_vm13 = vcmp.lt.s32.totalorder %v5165_v56, 2  ;;  %v5169_v61 = vsel %vm5167_vm14, %v7118_v3, %v5168_v32  ;;  %vm5267_vm4 = vweird.f32 %v10769_v25 }
 0x6a5   : > { %vm11660_vm11 = vcmp.le.f32.partialorder %v12364_v57, 0.7853982  ;;  %v5173_v12 = vsel %vm5166_vm13, %v5169_v61, %v5172_v6  ;;  %v5373_v30 = vand.u32 3, %v5372_v60  ;;  %v5677_v62 = vsub.s32 4, %v11272_v50 }
 0x6a6   : > { %v5575_v19 = vsel %vm11660_vm11, %v10842_v7, %v11420_v44  ;;  %v7122_v29 = vpop.eup %7121  ;;  %v5174_v16 = vsel %vm5163_vm12, nan, %v5173_v12  ;;  %vm5371_vm15 = vweird.f32 %v10717_v59  ;;  %v5476_v11 = vadd.s32 3, %v5472_v36 }
 0x6a7   : > { %7133 = vcosq.f32 %v5575_v19  ;;  %v5275_v38 = vxor.u32 2147483648, %v7122_v29  ;;  %vm12368_vm5 = vcmp.lt.s32.totalorder %v10842_v7, 0  ;;  %v7124_v52 = vpop.eup %7123  ;;  %6741 = vmatmul.mubr.msk.f32.gmra.mxu1 %vm12369_vm10, %v5174_v16  ;;  %vm5270_vm8 = vcmp.lt.s32.totalorder %v5269_v47, 2  ;;  %vm12377_vm10 = vmmov %vm12363_vm2 }
 0x6a8   : > { %v5574_v26 = vsel %vm12368_vm5, %v5573_v13, %v12367_v23  ;;  %vm5274_vm1 = vcmp.eq.s32.totalorder %v5269_v47, 2  ;;  %7135 = vsinq.f32 %v5575_v19  ;;  %v12370_v44 = vand.u32 2147483647, %v11132_v10 }
 0x6a9   : > { %v5272_v22 = vxor.u32 2147483648, %v7124_v52  ;;  %v5276_v35 = vsel %vm5274_vm1, %v5275_v38, %v7124_v52  ;;  %v5678_v21 = vsel %vm5593_vm0, %v5677_v62, %v11272_v50  ;;  %v7126_v58 = vpop.eup %7125  ;;  %vm5271_vm12 = vcmp.eq.s32.totalorder %v5269_v47, 0 }
 0x6aa   : > { %vm11681_vm14 = vcmp.le.f32.partialorder %v12370_v44, 0.7853982  ;;  %vm5375_vm6 = vcmp.eq.s32.totalorder %v5373_v30, 0  ;;  %v5576_v49 = vsel %vm11660_vm11, 0, %v5574_v26  ;;  %v7128_v27 = vpop.eup %7127  ;;  %v5379_v31 = vxor.u32 2147483648, %v7126_v58 }
 0x6ab   : > { %v5679_v5 = vsel %vm11681_vm14, %v11132_v10, %v11590_v14  ;;  %v5273_v42 = vsel %vm5271_vm12, %v7122_v29, %v5272_v22  ;;  %v5477_v56 = vand.u32 3, %v5476_v11  ;;  %v5376_v33 = vxor.u32 2147483648, %v7128_v27 }
 0x6ac   : > { %7137 = vcosq.f32 %v5679_v5  ;;  %v5277_v50 = vsel %vm5270_vm8, %v5273_v42, %v5276_v35  ;;  %vm5378_vm0 = vcmp.eq.s32.totalorder %v5373_v30, 2  ;;  %v5680_v14 = vsel %vm11681_vm14, 0, %v5678_v21 }
 0x6ad   : > { %7139 = vsinq.f32 %v5679_v5  ;;  %v7130_v0 = vpop.eup %7129  ;;  %v5278_v2 = vsel %vm5267_vm4, nan, %v5277_v50  ;;  %v5380_v54 = vsel %vm5378_vm0, %v5379_v31, %v7128_v27  ;;  %v5580_v48 = vadd.s32 3, %v5576_v49 }
 0x6ae   : > { %v5483_v43 = vxor.u32 2147483648, %v7130_v0  ;;  %6743 = vmatprep.mubr.msk.f32.mxu1 %vm12363_vm2, %v5278_v2  ;;  %vm5374_vm11 = vcmp.lt.s32.totalorder %v5373_v30, 2  ;;  %v5377_v1 = vsel %vm5375_vm6, %v7126_v58, %v5376_v33  ;;  %v12373_v24 = vand.u32 2147483647, %v11034_v46 }
 0x6af   : > { %v5781_v3 = vsub.s32 4, %v12376_v17  ;;  %v7132_v55 = vpop.eup %7131  ;;  %v5381_v15 = vsel %vm5374_vm11, %v5377_v1, %v5380_v54  ;;  %vm5482_vm5 = vcmp.eq.s32.totalorder %v5477_v56, 2  ;;  %v5684_v25 = vadd.s32 3, %v5680_v14 }
 0x6b0   : > { %vm11703_vm13 = vcmp.le.f32.partialorder %v12373_v24, 0.7853982  ;;  %v5382_v34 = vsel %vm5371_vm15, nan, %v5381_v15  ;;  %vm5475_vm4 = vweird.f32 %v10948_v41  ;;  %v5480_v8 = vxor.u32 2147483648, %v7132_v55  ;;  %vm12381_vm15 = vmmov %vm12363_vm2 }
 0x6b1   : > { %v5783_v39 = vsel %vm11703_vm13, %v11034_v46, %v11505_v37  ;;  %v5484_v60 = vsel %vm5482_vm5, %v5483_v43, %v7132_v55  ;;  %6744 = vmatmul.mubr.msk.f32.gmra.mxu1 %vm12377_vm10, %v5382_v34  ;;  %vm5478_vm8 = vcmp.lt.s32.totalorder %v5477_v56, 2  ;;  %vm5479_vm1 = vcmp.eq.s32.totalorder %v5477_v56, 0 }
 0x6b2   : > { %v5581_v18 = vand.u32 3, %v5580_v48  ;;  %7141 = vcosq.f32 %v5783_v39  ;;  %v5481_v32 = vsel %vm5479_vm1, %v7130_v0, %v5480_v8  ;;  %v5782_v47 = vsel %vm5697_vm7, %v5781_v3, %v12376_v17 }
 0x6b3   : > { %7143 = vsinq.f32 %v5783_v39  ;;  %v12378_v37 = vand.u32 2147483647, %v12348_v51  ;;  %v5485_v36 = vsel %vm5478_vm8, %v5481_v32, %v5484_v60  ;;  %v5685_v57 = vand.u32 3, %v5684_v25 }
 0x6b4   : > { %v7134_v6 = vpop.eup %7133  ;;  %v5885_v4 = vsub.s32 4, %v11448_v53  ;;  %v5486_v13 = vsel %vm5475_vm4, nan, %v5485_v36  ;;  %vm5579_vm7 = vweird.f32 %v10842_v7  ;;  %vm5586_vm12 = vcmp.eq.s32.totalorder %v5581_v18, 2 }
 0x6b5   : > { %vm11721_vm14 = vcmp.le.f32.partialorder %v12378_v37, 0.7853982  ;;  %v5587_v61 = vxor.u32 2147483648, %v7134_v6  ;;  %v7136_v19 = vpop.eup %7135  ;;  %6746 = vmatprep.mubr.msk.f32.mxu1 %vm12381_vm15, %v5486_v13  ;;  %v5784_v29 = vsel %vm11703_vm13, 0, %v5782_v47  ;;  %v12382_v41 = vand.u32 2147483647, %v12340_v20  ;;  %vm12385_vm13 = vmmov %vm12377_vm10 }
 0x6b6   : > { %v5887_v23 = vsel %vm11721_vm14, %v12348_v51, %v11648_v45  ;;  %v5886_v12 = vsel %vm5801_vm3, %v5885_v4, %v11448_v53  ;;  %v5584_v45 = vxor.u32 2147483648, %v7136_v19  ;;  %v5989_v16 = vsub.s32 4, %v11339_v40 }
 0x6b7   : > { %7145 = vcosq.f32 %v5887_v23  ;;  %v5588_v30 = vsel %vm5586_vm12, %v5587_v61, %v7136_v19  ;;  %vm11741_vm6 = vcmp.le.f32.partialorder %v12382_v41, 0.7853982  ;;  %vm5582_vm0 = vcmp.lt.s32.totalorder %v5581_v18, 2  ;;  %vm12386_vm12 = vmmov %vm12377_vm10 }
 0x6b8   : > { %7147 = vsinq.f32 %v5887_v23  ;;  %vm5583_vm2 = vcmp.eq.s32.totalorder %v5581_v18, 0  ;;  %vm5687_vm11 = vcmp.eq.s32.totalorder %v5685_v57, 0  ;;  %v5991_v53 = vsel %vm11741_vm6, %v12340_v20, %v11619_v28 }
 0x6b9   : > { %v7138_v38 = vpop.eup %7137  ;;  %v5585_v26 = vsel %vm5583_vm2, %v7134_v6, %v5584_v45  ;;  %v5788_v44 = vadd.s32 3, %v5784_v29  ;;  %v5888_v63 = vsel %vm11721_vm14, 0, %v5886_v12  ;;  %vm5690_vm3 = vcmp.eq.s32.totalorder %v5685_v57, 2  ;;  %vm12387_vm2 = vmmov %vm12377_vm10 }
 0x6ba   : > { %v7140_v11 = vpop.eup %7139  ;;  %v5691_v52 = vxor.u32 2147483648, %v7138_v38  ;;  %v5589_v22 = vsel %vm5582_vm0, %v5585_v26, %v5588_v30  ;;  %7149 = vcosq.f32 %v5991_v53  ;;  %v5990_v58 = vsel %vm5905_vm9, %v5989_v16, %v11339_v40 }
 0x6bb   : > { %v5688_v35 = vxor.u32 2147483648, %v7140_v11  ;;  %v5590_v21 = vsel %vm5579_vm7, nan, %v5589_v22  ;;  %7151 = vsinq.f32 %v5991_v53  ;;  %vm5686_vm5 = vcmp.lt.s32.totalorder %v5685_v57, 2 }
 0x6bc   : > { %v5692_v5 = vsel %vm5690_vm3, %v5691_v52, %v7140_v11  ;;  %6747 = vmatmul.mubr.msk.f32.gmra.mxu1 %vm12385_vm13, %v5590_v21  ;;  %v5892_v49 = vadd.s32 3, %v5888_v63  ;;  %vm5683_vm4 = vweird.f32 %v11132_v10  ;;  %v5789_v42 = vand.u32 3, %v5788_v44 }
 0x6bd   : > { %v5689_v28 = vsel %vm5687_vm11, %v7138_v38, %v5688_v35  ;;  %v5992_v7 = vsel %vm11741_vm6, 0, %v5990_v58  ;;  %vm5787_vm14 = vweird.f32 %v11034_v46  ;;  %vm5891_vm0 = vweird.f32 %v12348_v51  ;;  %v6537_v51 = vld [vmem:[%s11822_s8] ss:$0 sm:$0xff] }
 0x6be   : > { %v5693_v27 = vsel %vm5686_vm5, %v5689_v28, %v5692_v5  ;;  %v5893_v50 = vand.u32 3, %v5892_v49  ;;  %vm5794_vm9 = vcmp.eq.s32.totalorder %v5789_v42, 2  ;;  %v5996_v14 = vadd.s32 3, %v5992_v7 }
 0x6bf   : > { %v5694_v31 = vsel %vm5683_vm4, nan, %v5693_v27  ;;  %v7142_v56 = vpop.eup %7141  ;;  %vm5791_vm8 = vcmp.eq.s32.totalorder %v5789_v42, 0  ;;  %vm5790_vm1 = vcmp.lt.s32.totalorder %v5789_v42, 2  ;;  %vm5995_vm5 = vweird.f32 %v12340_v20  ;;  %vm12388_vm4 = vmmov %vm12387_vm2 }
 0x6c0   : > { %6749 = vmatprep.mubr.msk.f32.mxu1 %vm12377_vm10, %v5694_v31  ;;  %v7144_v0 = vpop.eup %7143  ;;  %v5795_v40 = vxor.u32 2147483648, %v7142_v56  ;;  %vm5898_vm7 = vcmp.eq.s32.totalorder %v5893_v50, 2  ;;  %vm5895_vm15 = vcmp.eq.s32.totalorder %v5893_v50, 0  ;;  %v5997_v3 = vand.u32 3, %v5996_v14 }
 0x6c1   : > { %v5792_v33 = vxor.u32 2147483648, %v7144_v0  ;;  %vm5894_vm6 = vcmp.lt.s32.totalorder %v5893_v50, 2  ;;  %vm6211_vm10 = vcmask 23552  }
 0x6c2   : > { %v5796_v54 = vsel %vm5794_vm9, %v5795_v40, %v7144_v0  ;;  %vm6002_vm11 = vcmp.eq.s32.totalorder %v5997_v3, 2  ;;  %vm5999_vm3 = vcmp.eq.s32.totalorder %v5997_v3, 0  ;;  %vm5998_vm13 = vcmp.lt.s32.totalorder %v5997_v3, 2 }
 0x6c3   : > { %v5793_v10 = vsel %vm5791_vm8, %v7142_v56, %v5792_v33 }
 0x6c4   : > { %v7146_v2 = vpop.eup %7145  ;;  %v5797_v1 = vsel %vm5790_vm1, %v5793_v10, %v5796_v54 }
 0x6c5   : > { %v7148_v43 = vpop.eup %7147  ;;  %v5899_v48 = vxor.u32 2147483648, %v7146_v2  ;;  %v5798_v9 = vsel %vm5787_vm14, nan, %v5797_v1 }
 0x6c6   : > { %v5896_v24 = vxor.u32 2147483648, %v7148_v43  ;;  %6750 = vmatmul.mubr.msk.f32.gmra.mxu1 %vm12386_vm12, %v5798_v9 }
 0x6c7   : > { %v5900_v17 = vsel %vm5898_vm7, %v5899_v48, %v7148_v43  ;;  %v7150_v15 = vpop.eup %7149 }
 0x6c8   : > { %v5897_v55 = vsel %vm5895_vm15, %v7146_v2, %v5896_v24  ;;  %v7152_v39 = vpop.eup %7151  ;;  %v6003_v8 = vxor.u32 2147483648, %v7150_v15 }
 0x6c9   : > { %v5901_v25 = vsel %vm5894_vm6, %v5897_v55, %v5900_v17  ;;  %v6000_v46 = vxor.u32 2147483648, %v7152_v39 }
 0x6ca   : > { %v5902_v34 = vsel %vm5891_vm0, nan, %v5901_v25  ;;  %v6004_v60 = vsel %vm6002_vm11, %v6003_v8, %v7152_v39 }
 0x6cb   : > { %6752 = vmatprep.mubr.msk.f32.mxu1 %vm12387_vm2, %v5902_v34  ;;  %v6001_v18 = vsel %vm5999_vm3, %v7150_v15, %v6000_v46 }
 0x6cc   : > { %v6005_v32 = vsel %vm5998_vm13, %v6001_v18, %v6004_v60 }
 0x6cd   : > { %v6006_v47 = vsel %vm5995_vm5, nan, %v6005_v32 }
 0x6ce   : > { %6753 = vmatmul.mubr.msk.f32.gmra.mxu1 %vm12388_vm4, %v6006_v47 }
 0x73c   : > { %v6733_v37 = vpop.f32.mrf.mxu1 }
 0x73d   : > { %v6138_v20 = vadd.f32 %v6733_v37, %v6537_v51 }
 0x73e   : > { %v6132_v59 = vpop.f32.mrf.mxu1 }
 0x73f   : > { %6213 = vst.msk [vmem:[%s11777_s22 + $0x8] sm:$0xff] %vm6211_vm10, %v6138_v20  ;;  %v6133_v6 = vadd.f32 %v6537_v51, %v6132_v59 }
 0x741   : > { %6212 = vst.msk [vmem:[%s11777_s22] sm:$0xff] %vm6211_vm10, %v6133_v6 }
 0x750   : > { %v6736_v36 = vpop.f32.mrf.mxu1 }
 0x751   : > { %v6148_v57 = vadd.f32 %v6736_v36, %v6537_v51 }
 0x752   : > { %v6142_v4 = vpop.f32.mrf.mxu1 }
 0x753   : > { %6215 = vst.msk [vmem:[%s11777_s22 + $0x18] sm:$0xff] %vm6211_vm10, %v6148_v57  ;;  %v6143_v23 = vadd.f32 %v6537_v51, %v6142_v4 }
 0x755   : > { %6214 = vst.msk [vmem:[%s11777_s22 + $0x10] sm:$0xff] %vm6211_vm10, %v6143_v23 }
 0x75c   : > { %v6739_v13 = vpop.f32.mrf.mxu1 }
 0x75d   : > { %v6158_v61 = vadd.f32 %v6739_v13, %v6537_v51 }
 0x75e   : > { %v6152_v19 = vpop.f32.mrf.mxu1 }
 0x75f   : > { %6217 = vst.msk [vmem:[%s11777_s22 + $0x28] sm:$0xff] %vm6211_vm10, %v6158_v61  ;;  %v6153_v29 = vadd.f32 %v6537_v51, %v6152_v19 }
 0x761   : > { %6216 = vst.msk [vmem:[%s11777_s22 + $0x20] sm:$0xff] %vm6211_vm10, %v6153_v29 }
 0x767   : > { %v6742_v12 = vpop.f32.mrf.mxu1 }
 0x768   : > { %v6168_v45 = vadd.f32 %v6742_v12, %v6537_v51 }
 0x769   : > { %v6162_v30 = vpop.f32.mrf.mxu1 }
 0x76a   : > { %6219 = vst.msk [vmem:[%s11777_s22 + $0x38] sm:$0xff] %vm6211_vm10, %v6168_v45  ;;  %v6163_v41 = vadd.f32 %v6537_v51, %v6162_v30 }
 0x76c   : > { %6218 = vst.msk [vmem:[%s11777_s22 + $0x30] sm:$0xff] %vm6211_vm10, %v6163_v41 }
 0x771   : > { %v6745_v62 = vpop.f32.mrf.mxu1 }
 0x772   : > { %v6178_v16 = vadd.f32 %v6745_v62, %v6537_v51 }
 0x773   : > { %v6172_v38 = vpop.f32.mrf.mxu1 }
 0x774   : > { %6221 = vst.msk [vmem:[%s11777_s22 + $0x48] sm:$0xff] %vm6211_vm10, %v6178_v16  ;;  %v6173_v53 = vadd.f32 %v6537_v51, %v6172_v38 }
 0x776   : > { %6220 = vst.msk [vmem:[%s11777_s22 + $0x40] sm:$0xff] %vm6211_vm10, %v6173_v53 }
 0x77c   : > { %v6748_v11 = vpop.f32.mrf.mxu1 }
 0x77d   : > { %v6188_v26 = vadd.f32 %v6748_v11, %v6537_v51 }
 0x77e   : > { %v6182_v52 = vpop.f32.mrf.mxu1 }
 0x77f   : > { %6223 = vst.msk [vmem:[%s11777_s22 + $0x58] sm:$0xff] %vm6211_vm10, %v6188_v26  ;;  %v6183_v44 = vadd.f32 %v6537_v51, %v6182_v52 }
 0x781   : > { %6222 = vst.msk [vmem:[%s11777_s22 + $0x50] sm:$0xff] %vm6211_vm10, %v6183_v44 }
 0x786   : > { %v6751_v63 = vpop.f32.mrf.mxu1 }
 0x787   : > { %v6198_v22 = vadd.f32 %v6751_v63, %v6537_v51 }
 0x788   : > { %v6192_v35 = vpop.f32.mrf.mxu1 }
 0x789   : > { %6225 = vst.msk [vmem:[%s11777_s22 + $0x68] sm:$0xff] %vm6211_vm10, %v6198_v22  ;;  %v6193_v21 = vadd.f32 %v6537_v51, %v6192_v35 }
 0x78b   : > { %6224 = vst.msk [vmem:[%s11777_s22 + $0x60] sm:$0xff] %vm6211_vm10, %v6193_v21 }
 0x78e   : > { %v6754_v5 = vpop.f32.mrf.mxu1 }
 0x78f   : > { %v6208_v58 = vadd.f32 %v6754_v5, %v6537_v51 }
 0x790   : > { %v6202_v28 = vpop.f32.mrf.mxu1 }
 0x791   : > { %6227 = vst.msk [vmem:[%s11777_s22 + $0x78] sm:$0xff] %vm6211_vm10, %v6208_v58  ;;  %v6203_v49 = vadd.f32 %v6537_v51, %v6202_v28 }
 0x793   : > { %6226 = vst.msk [vmem:[%s11777_s22 + $0x70] sm:$0xff] %vm6211_vm10, %v6203_v49 }
 0x794 PF: > { %s19_s30 = sadd.s32 1, %s7162_s30  }
 0x795   : > { %p16_p4 = scmp.ge.s32.totalorder %s19_s30, 4  }
 0x797   :  { %18 = sbr.rel (!%p16_p4) target bundleno = 1 (0x1), region = 86 }

</bundles_post_ra>
